<compile_context>
chip_gen: v5e
topology: v5e:2x2
jax: 0.10.0
libtpu: 0.0.40
codegen_flags: <defaults>
</compile_context>

<pallas_src>
import functools

import jax
import jax.numpy as jnp
from jax.experimental import pallas as pl
from jax.experimental.pallas import tpu as pltpu


N_PAD = 128       # lane-dense fused-head output width (>= 1 + actions_n)
C_TRUNK = 32      # conv trunk channel count (fixed by the module)


def _round_up(x, m):
    return (x + m - 1) // m * m


def _slab_strides(length):
    """Per-stage row stride of the 2-D slab activation layout.

    s0 is the (padded) input length; each MaxPool1d(3,2) stage halves it, so
    s0 must be divisible by 16 (4 pool stages).  strides[i] is the stride of
    the activation entering conv i+1; strides[4] also covers conv5/conv6 and
    the FC-head row gather.
    """
    s0 = _round_up(max(length, 16), 16)
    return (s0, s0 // 2, s0 // 4, s0 // 8, s0 // 16)


def conv_out_len(length):
    l = length
    for _ in range(4):
        l = l - 2                  # Conv1d(k=3, valid)
        l = (l - 3) // 2 + 1       # MaxPool1d(3, 2)
    l = l - 2                      # conv5
    l = l - 2                      # conv6
    return l


# ----------------------------------------------------------------------------
# Kernel: one TILE_B batch block per grid step; whole model resident in VMEM.
# ----------------------------------------------------------------------------
def dqn_large_kernel(x_ref, *refs, strides, actions_n):
    conv_refs = refs[0:12]                        # w1,b1, ..., w6,b6
    wfc1_ref, bfc1_ref, wfc2_ref, bfc2_ref = refs[12:16]
    out_ref = refs[16]                            # (TILE_B, N_PAD) f32
    scratch = refs[17]                            # (TILE_B*s0 + 8, 32) f32

    tile_b = out_ref.shape[0]
    l6 = wfc1_ref.shape[0]
    s4 = strides[4]

    h = x_ref[...]                                # (TILE_B*s0, Cin) f32

    # conv trunk: 4x (conv -> maxpool(3,2) -> relu), then 2x (conv -> relu)
    for i in range(6):
        w_ref = conv_refs[2 * i]                  # (Cin_i, 3*Cout) bf16
        b_ref = conv_refs[2 * i + 1]              # (1, Cout) f32
        cout = b_ref.shape[1]
        n = h.shape[0]
        # fused K=3 taps: one MXU dot, then row-shifted slab adds (VPU/XLU)
        y = jnp.dot(h.astype(jnp.bfloat16), w_ref[...],
                    preferred_element_type=jnp.float32)           # (n, 3*Cout)
        h = (y[0:n - 2, 0:cout] + y[1:n - 1, cout:2 * cout]
             + y[2:n, 2 * cout:3 * cout]) + b_ref[...]            # (n-2, Cout)

        if i < 4:
            # MaxPool1d(3, 2): write the conv output to scratch, read the
            # three pool taps back with stride-2 sublane loads (no selection
            # matmul), exact f32 max.  Valid pooled rows only ever read valid
            # conv rows; the couple of stale rows touched at the tail land in
            # slab-garbage positions of the last sample.
            s_out = strides[i] // 2
            n_out = tile_b * s_out
            scratch[0:n - 2, :] = h
            a0 = scratch[pl.ds(0, n_out, stride=2), :]
            a1 = scratch[pl.ds(1, n_out, stride=2), :]
            a2 = scratch[pl.ds(2, n_out, stride=2), :]
            h = jnp.maximum(jnp.maximum(a0, a1), a2)              # (n_out, C)

        h = jnp.maximum(h, 0.0)                   # ReLU (f32)

    # fused dueling FC1: gather the l6 time taps (rows at stride s4) and do
    # per-tap (TILE_B, 32) x (32, 2H) dots.
    scratch[0:h.shape[0], :] = h
    acc = None
    for t in range(l6):
        xt = scratch[pl.ds(t, tile_b, stride=s4), :]              # (TILE_B, 32)
        d = jnp.dot(xt.astype(jnp.bfloat16), wfc1_ref[t],
                    preferred_element_type=jnp.float32)
        acc = d if acc is None else acc + d
    hid = jnp.maximum(acc + bfc1_ref[...], 0.0)                   # (TILE_B, 2H)

    # fused FC2 (block-diagonal): lane 0 = val, lanes 1..A = adv, rest = 0
    y2 = jnp.dot(hid.astype(jnp.bfloat16), wfc2_ref[...],
                 preferred_element_type=jnp.float32) + bfc2_ref[...]

    lanes = jax.lax.broadcasted_iota(jnp.int32, y2.shape, 1)
    adv_mask = jnp.logical_and(lanes >= 1, lanes < 1 + actions_n)
    adv_mean = jnp.sum(jnp.where(adv_mask, y2, 0.0), axis=1,
                       keepdims=True) * (1.0 / actions_n)
    out_ref[...] = y2[:, 0:1] + y2 - adv_mean     # lanes 1..A hold the Q-values


# ----------------------------------------------------------------------------
# One-time PyTorch-layout -> kernel-layout weight preparation (+ bf16 cast).
# ----------------------------------------------------------------------------
def prepare_params(p):
    def conv_w(w):
        # torch (Cout, Cin, K) -> fused-tap (Cin, K*Cout) bf16, [ci, k*Cout+co]
        cout, cin, k = w.shape
        wt = jnp.transpose(jnp.asarray(w, jnp.float32), (1, 2, 0))
        return wt.reshape(cin, k * cout).astype(jnp.bfloat16)

    def row(b):                          # (N,) -> (1, N) f32
        return jnp.asarray(b, jnp.float32).reshape(1, -1)

    c_out = p['w6'].shape[0]             # trunk channel count (32)
    hidden, out_size = p['wv1'].shape    # torch flat index = c * L6 + t
    l6 = out_size // c_out
    actions_n = p['wa2'].shape[0]
    assert 1 + actions_n <= N_PAD

    def fc1_w(w):                        # (H, C*L6) -> (L6, C, H)
        wr = jnp.asarray(w, jnp.float32).reshape(hidden, c_out, l6)
        return jnp.transpose(wr, (2, 1, 0))

    wfc1 = jnp.concatenate([fc1_w(p['wv1']), fc1_w(p['wa1'])],
                           axis=-1).astype(jnp.bfloat16)            # (L6, C, 2H)
    bfc1 = jnp.concatenate([p['bv1'], p['ba1']]).reshape(1, 2 * hidden)
    bfc1 = bfc1.astype(jnp.float32)

    wfc2 = jnp.zeros((2 * hidden, N_PAD), jnp.float32)
    wfc2 = wfc2.at[:hidden, 0].set(p['wv2'][0])                     # val column
    wfc2 = wfc2.at[hidden:, 1:1 + actions_n].set(p['wa2'].T)        # adv columns
    wfc2 = wfc2.astype(jnp.bfloat16)
    bfc2 = jnp.zeros((1, N_PAD), jnp.float32)
    bfc2 = bfc2.at[0, 0].set(p['bv2'][0])
    bfc2 = bfc2.at[0, 1:1 + actions_n].set(p['ba2'])

    kparams = (conv_w(p['w1']), row(p['b1']),
               conv_w(p['w2']), row(p['b2']),
               conv_w(p['w3']), row(p['b3']),
               conv_w(p['w4']), row(p['b4']),
               conv_w(p['w5']), row(p['b5']),
               conv_w(p['w6']), row(p['b6']),
               wfc1, bfc1, wfc2, bfc2)
    return kparams, actions_n


def _const_index_map(ndim):
    zeros = (0,) * ndim
    return lambda i: zeros


@functools.partial(jax.jit, static_argnames=("actions_n", "tile_b"))
def dqn_forward(x_ncl, kparams, *, actions_n, tile_b=64):
    """x_ncl: (B, Cin, L) float32, PyTorch NCL layout; returns (B, actions_n)."""
    b, c_in, length = x_ncl.shape
    assert tile_b % 8 == 0
    strides = _slab_strides(length)
    s0 = strides[0]
    l6 = conv_out_len(length)
    assert l6 >= 1, "input length too short for DQNConv1DLarge"
    assert kparams[12].shape[0] == l6, "weights were prepared for another length"

    # batch padding; keep the grid even when >1 step so v7x uses both cores
    b_pad = _round_up(b, tile_b)
    steps = b_pad // tile_b
    if steps > 1 and steps % 2 == 1:
        b_pad += tile_b
        steps += 1

    # NCL -> 2-D slab layout (B_pad * s0, Cin): sample i occupies rows
    # [i*s0, i*s0 + length); padded rows are garbage and never reach outputs.
    x = jnp.transpose(x_ncl, (0, 2, 1)).astype(jnp.float32)          # (B, L, Cin)
    x = jnp.pad(x, ((0, b_pad - b), (0, s0 - length), (0, 0)))
    x2d = x.reshape(b_pad * s0, c_in)

    in_specs = [pl.BlockSpec((tile_b * s0, c_in), lambda i: (i, 0))]
    in_specs += [pl.BlockSpec(a.shape, _const_index_map(a.ndim)) for a in kparams]

    out = pl.pallas_call(
        functools.partial(dqn_large_kernel, strides=strides,
                          actions_n=actions_n),
        out_shape=jax.ShapeDtypeStruct((b_pad, N_PAD), jnp.float32),
        grid=(steps,),
        in_specs=in_specs,
        out_specs=pl.BlockSpec((tile_b, N_PAD), lambda i: (i, 0)),
        scratch_shapes=[pltpu.VMEM((tile_b * s0 + 8, C_TRUNK), jnp.float32)],
        compiler_params=pltpu.CompilerParams(
            dimension_semantics=("parallel",),
            vmem_limit_bytes=32 * 1024 * 1024),
    )(x2d, *kparams)
    return out[:b, 1:1 + actions_n]


# ----------------------------------------------------------------------------
# Pure-JAX reference in PyTorch layout (correctness check only).
# ----------------------------------------------------------------------------
def ref_forward(x_ncl, p):
    dn = ('NCH', 'OIH', 'NCH')
    y = x_ncl
    for i in range(1, 7):
        y = jax.lax.conv_general_dilated(y, p[f'w{i}'], (1,), 'VALID',
                                         dimension_numbers=dn)
        y = y + p[f'b{i}'][None, :, None]
        if i <= 4:
            y = jax.lax.reduce_window(y, -jnp.inf, jax.lax.max,
                                      (1, 1, 3), (1, 1, 2), 'VALID')
        y = jax.nn.relu(y)
    flat = y.reshape(y.shape[0], -1)                  # torch .view(B, -1)
    hv = jax.nn.relu(flat @ p['wv1'].T + p['bv1'])
    val = hv @ p['wv2'].T + p['bv2']
    ha = jax.nn.relu(flat @ p['wa1'].T + p['ba1'])
    adv = ha @ p['wa2'].T + p['ba2']
    return val + adv - adv.mean(axis=1, keepdims=True)


def init_params(key, c_in, length, actions_n, c_hidden=32, k=3, fc_hidden=512):
    l6 = conv_out_len(length)
    assert l6 >= 1, "input length too short for DQNConv1DLarge"
    out_size = c_hidden * l6
    keys = jax.random.split(key, 20)

    def norm(kk, shape, fan_in):
        return jax.random.normal(kk, shape, jnp.float32) / jnp.sqrt(fan_in)

    params = {}
    cin = c_in
    for i in range(1, 7):
        params[f'w{i}'] = norm(keys[2 * i - 2], (c_hidden, cin, k), cin * k)
        params[f'b{i}'] = norm(keys[2 * i - 1], (c_hidden,), cin * k)
        cin = c_hidden
    params['wv1'] = norm(keys[12], (fc_hidden, out_size), out_size)
    params['bv1'] = norm(keys[13], (fc_hidden,), out_size)
    params['wv2'] = norm(keys[14], (1, fc_hidden), fc_hidden)
    params['bv2'] = norm(keys[15], (1,), fc_hidden)
    params['wa1'] = norm(keys[16], (fc_hidden, out_size), out_size)
    params['ba1'] = norm(keys[17], (fc_hidden,), out_size)
    params['wa2'] = norm(keys[18], (actions_n, fc_hidden), fc_hidden)
    params['ba2'] = norm(keys[19], (actions_n,), fc_hidden)
    return params


if __name__ == "__main__":
    # Smallest-ish length that survives the 4 maxpool stages: L=160 -> L6=3.
    # B=16 with TILE_B=8 gives a 2-step "parallel" grid (both v7x cores busy).
    B, C_IN, L, ACTIONS = 16, 4, 160, 3   # DQNConv1DLarge(shape=(4,160), actions_n=3)
    TILE_B = 8

    key = jax.random.PRNGKey(0)
    kx, kp = jax.random.split(key)
    x = jax.random.normal(kx, (B, C_IN, L), jnp.float32)   # PyTorch NCL input
    params = init_params(kp, C_IN, L, ACTIONS)

    kparams, actions_n = prepare_params(params)            # one-time weight prep
    out = dqn_forward(x, kparams, actions_n=actions_n, tile_b=TILE_B)
    out = jax.block_until_ready(out)

    assert out.shape == (B, ACTIONS), out.shape
    ref = ref_forward(x, params)
    err = float(jnp.max(jnp.abs(out - ref)))
    # bf16 matmul operands with f32 accumulation -> expect ~1e-2 relative error.
    tol = 5e-2 * (1.0 + float(jnp.max(jnp.abs(ref))))
    if err > tol:
        raise AssertionError(f"kernel mismatch vs reference: max abs err {err} > {tol}")

    print("KERNEL_OK")
</pallas_src>

<mosaic_0001>
module attributes {stable_mosaic.version = 11 : i64} {
  func.func @dqn_large_kernel(%arg0: i32, %arg1: memref<1280x4xf32, #tpu.memory_space<vmem>>, %arg2: memref<4x96xbf16, #tpu.memory_space<vmem>>, %arg3: memref<1x32xf32, #tpu.memory_space<vmem>>, %arg4: memref<32x96xbf16, #tpu.memory_space<vmem>>, %arg5: memref<1x32xf32, #tpu.memory_space<vmem>>, %arg6: memref<32x96xbf16, #tpu.memory_space<vmem>>, %arg7: memref<1x32xf32, #tpu.memory_space<vmem>>, %arg8: memref<32x96xbf16, #tpu.memory_space<vmem>>, %arg9: memref<1x32xf32, #tpu.memory_space<vmem>>, %arg10: memref<32x96xbf16, #tpu.memory_space<vmem>>, %arg11: memref<1x32xf32, #tpu.memory_space<vmem>>, %arg12: memref<32x96xbf16, #tpu.memory_space<vmem>>, %arg13: memref<1x32xf32, #tpu.memory_space<vmem>>, %arg14: memref<3x32x1024xbf16, #tpu.memory_space<vmem>>, %arg15: memref<1x1024xf32, #tpu.memory_space<vmem>>, %arg16: memref<1024x128xbf16, #tpu.memory_space<vmem>>, %arg17: memref<1x128xf32, #tpu.memory_space<vmem>>, %arg18: memref<8x128xf32, #tpu.memory_space<vmem>>, %arg19: memref<1288x32xf32, #tpu.memory_space<vmem>>) attributes {dimension_semantics = [#tpu.dimension_semantics<parallel>], iteration_bounds = array<i64: 2>, scalar_prefetch = 0 : i64, scratch_operands = 1 : i64, tpu.core_type = #tpu.core_type<tc>, window_params = [{transform_indices = @transform_0, window_bounds = array<i64: 1280, 4>}, {pipeline_mode = #tpu.pipeline_mode<synchronous>, transform_indices = @transform_1, window_bounds = array<i64: 4, 96>}, {pipeline_mode = #tpu.pipeline_mode<synchronous>, transform_indices = @transform_2, window_bounds = array<i64: 1, 32>}, {pipeline_mode = #tpu.pipeline_mode<synchronous>, transform_indices = @transform_3, window_bounds = array<i64: 32, 96>}, {pipeline_mode = #tpu.pipeline_mode<synchronous>, transform_indices = @transform_4, window_bounds = array<i64: 1, 32>}, {pipeline_mode = #tpu.pipeline_mode<synchronous>, transform_indices = @transform_5, window_bounds = array<i64: 32, 96>}, {pipeline_mode = #tpu.pipeline_mode<synchronous>, transform_indices = @transform_6, window_bounds = array<i64: 1, 32>}, {pipeline_mode = #tpu.pipeline_mode<synchronous>, transform_indices = @transform_7, window_bounds = array<i64: 32, 96>}, {pipeline_mode = #tpu.pipeline_mode<synchronous>, transform_indices = @transform_8, window_bounds = array<i64: 1, 32>}, {pipeline_mode = #tpu.pipeline_mode<synchronous>, transform_indices = @transform_9, window_bounds = array<i64: 32, 96>}, {pipeline_mode = #tpu.pipeline_mode<synchronous>, transform_indices = @transform_10, window_bounds = array<i64: 1, 32>}, {pipeline_mode = #tpu.pipeline_mode<synchronous>, transform_indices = @transform_11, window_bounds = array<i64: 32, 96>}, {pipeline_mode = #tpu.pipeline_mode<synchronous>, transform_indices = @transform_12, window_bounds = array<i64: 1, 32>}, {pipeline_mode = #tpu.pipeline_mode<synchronous>, transform_indices = @transform_13, window_bounds = array<i64: 3, 32, 1024>}, {pipeline_mode = #tpu.pipeline_mode<synchronous>, transform_indices = @transform_14, window_bounds = array<i64: 1, 1024>}, {pipeline_mode = #tpu.pipeline_mode<synchronous>, transform_indices = @transform_15, window_bounds = array<i64: 1024, 128>}, {pipeline_mode = #tpu.pipeline_mode<synchronous>, transform_indices = @transform_16, window_bounds = array<i64: 1, 128>}, {transform_indices = @transform_17, window_bounds = array<i64: 8, 128>}]} {
    %c0 = arith.constant 0 : index
    %c0_0 = arith.constant 0 : index
    %0 = vector.load %arg1[%c0, %c0_0] : memref<1280x4xf32, #tpu.memory_space<vmem>>, vector<1280x4xf32>
    %1 = arith.truncf %0 : vector<1280x4xf32> to vector<1280x4xbf16>
    %c0_1 = arith.constant 0 : index
    %c0_2 = arith.constant 0 : index
    %2 = vector.load %arg2[%c0_1, %c0_2] : memref<4x96xbf16, #tpu.memory_space<vmem>>, vector<4x96xbf16>
    %cst = arith.constant dense<0.000000e+00> : vector<1280x96xf32>
    %3 = tpu.matmul %1, %2, %cst {dimension_numbers = #tpu.dot_dimension_numbers<[1], [0], [0], [1], [0, 0, 1, 1], [], []>} : vector<1280x4xbf16>, vector<4x96xbf16>, vector<1280x96xf32> -> vector<1280x96xf32>
    %4 = vector.extract_strided_slice %3 {offsets = [0, 0], sizes = [1278, 32], strides = [1, 1]} : vector<1280x96xf32> to vector<1278x32xf32>
    %5 = vector.extract_strided_slice %3 {offsets = [1, 32], sizes = [1278, 32], strides = [1, 1]} : vector<1280x96xf32> to vector<1278x32xf32>
    %6 = arith.addf %4, %5 : vector<1278x32xf32>
    %7 = vector.extract_strided_slice %3 {offsets = [2, 64], sizes = [1278, 32], strides = [1, 1]} : vector<1280x96xf32> to vector<1278x32xf32>
    %8 = arith.addf %6, %7 : vector<1278x32xf32>
    %c0_3 = arith.constant 0 : index
    %c0_4 = arith.constant 0 : index
    %9 = vector.load %arg3[%c0_3, %c0_4] : memref<1x32xf32, #tpu.memory_space<vmem>>, vector<1x32xf32>
    %10 = vector.broadcast %9 : vector<1x32xf32> to vector<1278x32xf32>
    %11 = arith.addf %8, %10 : vector<1278x32xf32>
    %c0_5 = arith.constant 0 : index
    %c0_6 = arith.constant 0 : index
    %12 = vector.load %arg19[%c0_5, %c0_6] : memref<1288x32xf32, #tpu.memory_space<vmem>>, vector<1278x32xf32>
    tpu.vector_store %arg19[%c0_5, %c0_6], %11 {strides = array<i32>} : memref<1288x32xf32, #tpu.memory_space<vmem>>, vector<1278x32xf32>,
    %c0_7 = arith.constant 0 : index
    %c0_8 = arith.constant 0 : index
    %13 = tpu.strided_load %arg19[%c0_7, %c0_8] {strides = array<i32: 2, 1>} : memref<1288x32xf32, #tpu.memory_space<vmem>>, vector<640x32xf32>
    %c1 = arith.constant 1 : index
    %c0_9 = arith.constant 0 : index
    %14 = tpu.strided_load %arg19[%c1, %c0_9] {strides = array<i32: 2, 1>} : memref<1288x32xf32, #tpu.memory_space<vmem>>, vector<640x32xf32>
    %c2 = arith.constant 2 : index
    %c0_10 = arith.constant 0 : index
    %15 = tpu.strided_load %arg19[%c2, %c0_10] {strides = array<i32: 2, 1>} : memref<1288x32xf32, #tpu.memory_space<vmem>>, vector<640x32xf32>
    %16 = arith.maximumf %13, %14 : vector<640x32xf32>
    %17 = arith.maximumf %16, %15 : vector<640x32xf32>
    %cst_11 = arith.constant 0.000000e+00 : f32
    %18 = vector.broadcast %cst_11 : f32 to vector<640x32xf32>
    %19 = arith.maximumf %17, %18 : vector<640x32xf32>
    %20 = arith.truncf %19 : vector<640x32xf32> to vector<640x32xbf16>
    %c0_12 = arith.constant 0 : index
    %c0_13 = arith.constant 0 : index
    %21 = vector.load %arg4[%c0_12, %c0_13] : memref<32x96xbf16, #tpu.memory_space<vmem>>, vector<32x96xbf16>
    %cst_14 = arith.constant dense<0.000000e+00> : vector<640x96xf32>
    %22 = tpu.matmul %20, %21, %cst_14 {dimension_numbers = #tpu.dot_dimension_numbers<[1], [0], [0], [1], [0, 0, 1, 1], [], []>} : vector<640x32xbf16>, vector<32x96xbf16>, vector<640x96xf32> -> vector<640x96xf32>
    %23 = vector.extract_strided_slice %22 {offsets = [0, 0], sizes = [638, 32], strides = [1, 1]} : vector<640x96xf32> to vector<638x32xf32>
    %24 = vector.extract_strided_slice %22 {offsets = [1, 32], sizes = [638, 32], strides = [1, 1]} : vector<640x96xf32> to vector<638x32xf32>
    %25 = arith.addf %23, %24 : vector<638x32xf32>
    %26 = vector.extract_strided_slice %22 {offsets = [2, 64], sizes = [638, 32], strides = [1, 1]} : vector<640x96xf32> to vector<638x32xf32>
    %27 = arith.addf %25, %26 : vector<638x32xf32>
    %c0_15 = arith.constant 0 : index
    %c0_16 = arith.constant 0 : index
    %28 = vector.load %arg5[%c0_15, %c0_16] : memref<1x32xf32, #tpu.memory_space<vmem>>, vector<1x32xf32>
    %29 = vector.broadcast %28 : vector<1x32xf32> to vector<638x32xf32>
    %30 = arith.addf %27, %29 : vector<638x32xf32>
    %c0_17 = arith.constant 0 : index
    %c0_18 = arith.constant 0 : index
    %31 = vector.load %arg19[%c0_17, %c0_18] : memref<1288x32xf32, #tpu.memory_space<vmem>>, vector<638x32xf32>
    tpu.vector_store %arg19[%c0_17, %c0_18], %30 {strides = array<i32>} : memref<1288x32xf32, #tpu.memory_space<vmem>>, vector<638x32xf32>,
    %c0_19 = arith.constant 0 : index
    %c0_20 = arith.constant 0 : index
    %32 = tpu.strided_load %arg19[%c0_19, %c0_20] {strides = array<i32: 2, 1>} : memref<1288x32xf32, #tpu.memory_space<vmem>>, vector<320x32xf32>
    %c1_21 = arith.constant 1 : index
    %c0_22 = arith.constant 0 : index
    %33 = tpu.strided_load %arg19[%c1_21, %c0_22] {strides = array<i32: 2, 1>} : memref<1288x32xf32, #tpu.memory_space<vmem>>, vector<320x32xf32>
    %c2_23 = arith.constant 2 : index
    %c0_24 = arith.constant 0 : index
    %34 = tpu.strided_load %arg19[%c2_23, %c0_24] {strides = array<i32: 2, 1>} : memref<1288x32xf32, #tpu.memory_space<vmem>>, vector<320x32xf32>
    %35 = arith.maximumf %32, %33 : vector<320x32xf32>
    %36 = arith.maximumf %35, %34 : vector<320x32xf32>
    %cst_25 = arith.constant 0.000000e+00 : f32
    %37 = vector.broadcast %cst_25 : f32 to vector<320x32xf32>
    %38 = arith.maximumf %36, %37 : vector<320x32xf32>
    %39 = arith.truncf %38 : vector<320x32xf32> to vector<320x32xbf16>
    %c0_26 = arith.constant 0 : index
    %c0_27 = arith.constant 0 : index
    %40 = vector.load %arg6[%c0_26, %c0_27] : memref<32x96xbf16, #tpu.memory_space<vmem>>, vector<32x96xbf16>
    %cst_28 = arith.constant dense<0.000000e+00> : vector<320x96xf32>
    %41 = tpu.matmul %39, %40, %cst_28 {dimension_numbers = #tpu.dot_dimension_numbers<[1], [0], [0], [1], [0, 0, 1, 1], [], []>} : vector<320x32xbf16>, vector<32x96xbf16>, vector<320x96xf32> -> vector<320x96xf32>
    %42 = vector.extract_strided_slice %41 {offsets = [0, 0], sizes = [318, 32], strides = [1, 1]} : vector<320x96xf32> to vector<318x32xf32>
    %43 = vector.extract_strided_slice %41 {offsets = [1, 32], sizes = [318, 32], strides = [1, 1]} : vector<320x96xf32> to vector<318x32xf32>
    %44 = arith.addf %42, %43 : vector<318x32xf32>
    %45 = vector.extract_strided_slice %41 {offsets = [2, 64], sizes = [318, 32], strides = [1, 1]} : vector<320x96xf32> to vector<318x32xf32>
    %46 = arith.addf %44, %45 : vector<318x32xf32>
    %c0_29 = arith.constant 0 : index
    %c0_30 = arith.constant 0 : index
    %47 = vector.load %arg7[%c0_29, %c0_30] : memref<1x32xf32, #tpu.memory_space<vmem>>, vector<1x32xf32>
    %48 = vector.broadcast %47 : vector<1x32xf32> to vector<318x32xf32>
    %49 = arith.addf %46, %48 : vector<318x32xf32>
    %c0_31 = arith.constant 0 : index
    %c0_32 = arith.constant 0 : index
    %50 = vector.load %arg19[%c0_31, %c0_32] : memref<1288x32xf32, #tpu.memory_space<vmem>>, vector<318x32xf32>
    tpu.vector_store %arg19[%c0_31, %c0_32], %49 {strides = array<i32>} : memref<1288x32xf32, #tpu.memory_space<vmem>>, vector<318x32xf32>,
    %c0_33 = arith.constant 0 : index
    %c0_34 = arith.constant 0 : index
    %51 = tpu.strided_load %arg19[%c0_33, %c0_34] {strides = array<i32: 2, 1>} : memref<1288x32xf32, #tpu.memory_space<vmem>>, vector<160x32xf32>
    %c1_35 = arith.constant 1 : index
    %c0_36 = arith.constant 0 : index
    %52 = tpu.strided_load %arg19[%c1_35, %c0_36] {strides = array<i32: 2, 1>} : memref<1288x32xf32, #tpu.memory_space<vmem>>, vector<160x32xf32>
    %c2_37 = arith.constant 2 : index
    %c0_38 = arith.constant 0 : index
    %53 = tpu.strided_load %arg19[%c2_37, %c0_38] {strides = array<i32: 2, 1>} : memref<1288x32xf32, #tpu.memory_space<vmem>>, vector<160x32xf32>
    %54 = arith.maximumf %51, %52 : vector<160x32xf32>
    %55 = arith.maximumf %54, %53 : vector<160x32xf32>
    %cst_39 = arith.constant 0.000000e+00 : f32
    %56 = vector.broadcast %cst_39 : f32 to vector<160x32xf32>
    %57 = arith.maximumf %55, %56 : vector<160x32xf32>
    %58 = arith.truncf %57 : vector<160x32xf32> to vector<160x32xbf16>
    %c0_40 = arith.constant 0 : index
    %c0_41 = arith.constant 0 : index
    %59 = vector.load %arg8[%c0_40, %c0_41] : memref<32x96xbf16, #tpu.memory_space<vmem>>, vector<32x96xbf16>
    %cst_42 = arith.constant dense<0.000000e+00> : vector<160x96xf32>
    %60 = tpu.matmul %58, %59, %cst_42 {dimension_numbers = #tpu.dot_dimension_numbers<[1], [0], [0], [1], [0, 0, 1, 1], [], []>} : vector<160x32xbf16>, vector<32x96xbf16>, vector<160x96xf32> -> vector<160x96xf32>
    %61 = vector.extract_strided_slice %60 {offsets = [0, 0], sizes = [158, 32], strides = [1, 1]} : vector<160x96xf32> to vector<158x32xf32>
    %62 = vector.extract_strided_slice %60 {offsets = [1, 32], sizes = [158, 32], strides = [1, 1]} : vector<160x96xf32> to vector<158x32xf32>
    %63 = arith.addf %61, %62 : vector<158x32xf32>
    %64 = vector.extract_strided_slice %60 {offsets = [2, 64], sizes = [158, 32], strides = [1, 1]} : vector<160x96xf32> to vector<158x32xf32>
    %65 = arith.addf %63, %64 : vector<158x32xf32>
    %c0_43 = arith.constant 0 : index
    %c0_44 = arith.constant 0 : index
    %66 = vector.load %arg9[%c0_43, %c0_44] : memref<1x32xf32, #tpu.memory_space<vmem>>, vector<1x32xf32>
    %67 = vector.broadcast %66 : vector<1x32xf32> to vector<158x32xf32>
    %68 = arith.addf %65, %67 : vector<158x32xf32>
    %c0_45 = arith.constant 0 : index
    %c0_46 = arith.constant 0 : index
    %69 = vector.load %arg19[%c0_45, %c0_46] : memref<1288x32xf32, #tpu.memory_space<vmem>>, vector<158x32xf32>
    tpu.vector_store %arg19[%c0_45, %c0_46], %68 {strides = array<i32>} : memref<1288x32xf32, #tpu.memory_space<vmem>>, vector<158x32xf32>,
    %c0_47 = arith.constant 0 : index
    %c0_48 = arith.constant 0 : index
    %70 = tpu.strided_load %arg19[%c0_47, %c0_48] {strides = array<i32: 2, 1>} : memref<1288x32xf32, #tpu.memory_space<vmem>>, vector<80x32xf32>
    %c1_49 = arith.constant 1 : index
    %c0_50 = arith.constant 0 : index
    %71 = tpu.strided_load %arg19[%c1_49, %c0_50] {strides = array<i32: 2, 1>} : memref<1288x32xf32, #tpu.memory_space<vmem>>, vector<80x32xf32>
    %c2_51 = arith.constant 2 : index
    %c0_52 = arith.constant 0 : index
    %72 = tpu.strided_load %arg19[%c2_51, %c0_52] {strides = array<i32: 2, 1>} : memref<1288x32xf32, #tpu.memory_space<vmem>>, vector<80x32xf32>
    %73 = arith.maximumf %70, %71 : vector<80x32xf32>
    %74 = arith.maximumf %73, %72 : vector<80x32xf32>
    %cst_53 = arith.constant 0.000000e+00 : f32
    %75 = vector.broadcast %cst_53 : f32 to vector<80x32xf32>
    %76 = arith.maximumf %74, %75 : vector<80x32xf32>
    %77 = arith.truncf %76 : vector<80x32xf32> to vector<80x32xbf16>
    %c0_54 = arith.constant 0 : index
    %c0_55 = arith.constant 0 : index
    %78 = vector.load %arg10[%c0_54, %c0_55] : memref<32x96xbf16, #tpu.memory_space<vmem>>, vector<32x96xbf16>
    %cst_56 = arith.constant dense<0.000000e+00> : vector<80x96xf32>
    %79 = tpu.matmul %77, %78, %cst_56 {dimension_numbers = #tpu.dot_dimension_numbers<[1], [0], [0], [1], [0, 0, 1, 1], [], []>} : vector<80x32xbf16>, vector<32x96xbf16>, vector<80x96xf32> -> vector<80x96xf32>
    %80 = vector.extract_strided_slice %79 {offsets = [0, 0], sizes = [78, 32], strides = [1, 1]} : vector<80x96xf32> to vector<78x32xf32>
    %81 = vector.extract_strided_slice %79 {offsets = [1, 32], sizes = [78, 32], strides = [1, 1]} : vector<80x96xf32> to vector<78x32xf32>
    %82 = arith.addf %80, %81 : vector<78x32xf32>
    %83 = vector.extract_strided_slice %79 {offsets = [2, 64], sizes = [78, 32], strides = [1, 1]} : vector<80x96xf32> to vector<78x32xf32>
    %84 = arith.addf %82, %83 : vector<78x32xf32>
    %c0_57 = arith.constant 0 : index
    %c0_58 = arith.constant 0 : index
    %85 = vector.load %arg11[%c0_57, %c0_58] : memref<1x32xf32, #tpu.memory_space<vmem>>, vector<1x32xf32>
    %86 = vector.broadcast %85 : vector<1x32xf32> to vector<78x32xf32>
    %87 = arith.addf %84, %86 : vector<78x32xf32>
    %cst_59 = arith.constant 0.000000e+00 : f32
    %88 = vector.broadcast %cst_59 : f32 to vector<78x32xf32>
    %89 = arith.maximumf %87, %88 : vector<78x32xf32>
    %90 = arith.truncf %89 : vector<78x32xf32> to vector<78x32xbf16>
    %c0_60 = arith.constant 0 : index
    %c0_61 = arith.constant 0 : index
    %91 = vector.load %arg12[%c0_60, %c0_61] : memref<32x96xbf16, #tpu.memory_space<vmem>>, vector<32x96xbf16>
    %cst_62 = arith.constant dense<0.000000e+00> : vector<78x96xf32>
    %92 = tpu.matmul %90, %91, %cst_62 {dimension_numbers = #tpu.dot_dimension_numbers<[1], [0], [0], [1], [0, 0, 1, 1], [], []>} : vector<78x32xbf16>, vector<32x96xbf16>, vector<78x96xf32> -> vector<78x96xf32>
    %93 = vector.extract_strided_slice %92 {offsets = [0, 0], sizes = [76, 32], strides = [1, 1]} : vector<78x96xf32> to vector<76x32xf32>
    %94 = vector.extract_strided_slice %92 {offsets = [1, 32], sizes = [76, 32], strides = [1, 1]} : vector<78x96xf32> to vector<76x32xf32>
    %95 = arith.addf %93, %94 : vector<76x32xf32>
    %96 = vector.extract_strided_slice %92 {offsets = [2, 64], sizes = [76, 32], strides = [1, 1]} : vector<78x96xf32> to vector<76x32xf32>
    %97 = arith.addf %95, %96 : vector<76x32xf32>
    %c0_63 = arith.constant 0 : index
    %c0_64 = arith.constant 0 : index
    %98 = vector.load %arg13[%c0_63, %c0_64] : memref<1x32xf32, #tpu.memory_space<vmem>>, vector<1x32xf32>
    %99 = vector.broadcast %98 : vector<1x32xf32> to vector<76x32xf32>
    %100 = arith.addf %97, %99 : vector<76x32xf32>
    %cst_65 = arith.constant 0.000000e+00 : f32
    %101 = vector.broadcast %cst_65 : f32 to vector<76x32xf32>
    %102 = arith.maximumf %100, %101 : vector<76x32xf32>
    %c0_66 = arith.constant 0 : index
    %c0_67 = arith.constant 0 : index
    %103 = vector.load %arg19[%c0_66, %c0_67] : memref<1288x32xf32, #tpu.memory_space<vmem>>, vector<76x32xf32>
    tpu.vector_store %arg19[%c0_66, %c0_67], %102 {strides = array<i32>} : memref<1288x32xf32, #tpu.memory_space<vmem>>, vector<76x32xf32>,
    %c0_68 = arith.constant 0 : index
    %c0_69 = arith.constant 0 : index
    %104 = tpu.strided_load %arg19[%c0_68, %c0_69] {strides = array<i32: 10, 1>} : memref<1288x32xf32, #tpu.memory_space<vmem>>, vector<8x32xf32>
    %105 = arith.truncf %104 : vector<8x32xf32> to vector<8x32xbf16>
    %c0_70 = arith.constant 0 : index
    %c0_71 = arith.constant 0 : index
    %c0_72 = arith.constant 0 : index
    %106 = vector.load %arg14[%c0_70, %c0_71, %c0_72] : memref<3x32x1024xbf16, #tpu.memory_space<vmem>>, vector<1x32x1024xbf16>
    %107 = vector.shape_cast %106 : vector<1x32x1024xbf16> to vector<32x1024xbf16>
    %cst_73 = arith.constant dense<0.000000e+00> : vector<8x1024xf32>
    %108 = tpu.matmul %105, %107, %cst_73 {dimension_numbers = #tpu.dot_dimension_numbers<[1], [0], [0], [1], [0, 0, 1, 1], [], []>} : vector<8x32xbf16>, vector<32x1024xbf16>, vector<8x1024xf32> -> vector<8x1024xf32>
    %c1_74 = arith.constant 1 : index
    %c0_75 = arith.constant 0 : index
    %109 = tpu.strided_load %arg19[%c1_74, %c0_75] {strides = array<i32: 10, 1>} : memref<1288x32xf32, #tpu.memory_space<vmem>>, vector<8x32xf32>
    %110 = arith.truncf %109 : vector<8x32xf32> to vector<8x32xbf16>
    %c1_76 = arith.constant 1 : index
    %c0_77 = arith.constant 0 : index
    %c0_78 = arith.constant 0 : index
    %111 = vector.load %arg14[%c1_76, %c0_77, %c0_78] : memref<3x32x1024xbf16, #tpu.memory_space<vmem>>, vector<1x32x1024xbf16>
    %112 = vector.shape_cast %111 : vector<1x32x1024xbf16> to vector<32x1024xbf16>
    %cst_79 = arith.constant dense<0.000000e+00> : vector<8x1024xf32>
    %113 = tpu.matmul %110, %112, %cst_79 {dimension_numbers = #tpu.dot_dimension_numbers<[1], [0], [0], [1], [0, 0, 1, 1], [], []>} : vector<8x32xbf16>, vector<32x1024xbf16>, vector<8x1024xf32> -> vector<8x1024xf32>
    %114 = arith.addf %108, %113 : vector<8x1024xf32>
    %c2_80 = arith.constant 2 : index
    %c0_81 = arith.constant 0 : index
    %115 = tpu.strided_load %arg19[%c2_80, %c0_81] {strides = array<i32: 10, 1>} : memref<1288x32xf32, #tpu.memory_space<vmem>>, vector<8x32xf32>
    %116 = arith.truncf %115 : vector<8x32xf32> to vector<8x32xbf16>
    %c2_82 = arith.constant 2 : index
    %c0_83 = arith.constant 0 : index
    %c0_84 = arith.constant 0 : index
    %117 = vector.load %arg14[%c2_82, %c0_83, %c0_84] : memref<3x32x1024xbf16, #tpu.memory_space<vmem>>, vector<1x32x1024xbf16>
    %118 = vector.shape_cast %117 : vector<1x32x1024xbf16> to vector<32x1024xbf16>
    %cst_85 = arith.constant dense<0.000000e+00> : vector<8x1024xf32>
    %119 = tpu.matmul %116, %118, %cst_85 {dimension_numbers = #tpu.dot_dimension_numbers<[1], [0], [0], [1], [0, 0, 1, 1], [], []>} : vector<8x32xbf16>, vector<32x1024xbf16>, vector<8x1024xf32> -> vector<8x1024xf32>
    %120 = arith.addf %114, %119 : vector<8x1024xf32>
    %c0_86 = arith.constant 0 : index
    %c0_87 = arith.constant 0 : index
    %121 = vector.load %arg15[%c0_86, %c0_87] : memref<1x1024xf32, #tpu.memory_space<vmem>>, vector<1x1024xf32>
    %122 = vector.broadcast %121 : vector<1x1024xf32> to vector<8x1024xf32>
    %123 = arith.addf %120, %122 : vector<8x1024xf32>
    %cst_88 = arith.constant 0.000000e+00 : f32
    %124 = vector.broadcast %cst_88 : f32 to vector<8x1024xf32>
    %125 = arith.maximumf %123, %124 : vector<8x1024xf32>
    %126 = arith.truncf %125 : vector<8x1024xf32> to vector<8x1024xbf16>
    %c0_89 = arith.constant 0 : index
    %c0_90 = arith.constant 0 : index
    %127 = vector.load %arg16[%c0_89, %c0_90] : memref<1024x128xbf16, #tpu.memory_space<vmem>>, vector<1024x128xbf16>
    %cst_91 = arith.constant dense<0.000000e+00> : vector<8x128xf32>
    %128 = tpu.matmul %126, %127, %cst_91 {dimension_numbers = #tpu.dot_dimension_numbers<[1], [0], [0], [1], [0, 0, 1, 1], [], []>} : vector<8x1024xbf16>, vector<1024x128xbf16>, vector<8x128xf32> -> vector<8x128xf32>
    %c0_92 = arith.constant 0 : index
    %c0_93 = arith.constant 0 : index
    %129 = vector.load %arg17[%c0_92, %c0_93] : memref<1x128xf32, #tpu.memory_space<vmem>>, vector<1x128xf32>
    %130 = vector.broadcast %129 : vector<1x128xf32> to vector<8x128xf32>
    %131 = arith.addf %128, %130 : vector<8x128xf32>
    %132 = tpu.iota {dimensions = array<i32: 1>} : vector<8x128xi32>
    %c1_i32 = arith.constant 1 : i32
    %133 = vector.broadcast %c1_i32 : i32 to vector<8x128xi32>
    %134 = arith.cmpi sge, %132, %133 : vector<8x128xi32>
    %c4_i32 = arith.constant 4 : i32
    %135 = vector.broadcast %c4_i32 : i32 to vector<8x128xi32>
    %136 = arith.cmpi slt, %132, %135 : vector<8x128xi32>
    %137 = arith.andi %134, %136 : vector<8x128xi1>
    %cst_94 = arith.constant 0.000000e+00 : f32
    %138 = vector.broadcast %cst_94 : f32 to vector<8x128xf32>
    %139 = arith.select %137, %131, %138 : vector<8x128xi1>, vector<8x128xf32>
    %cst_95 = arith.constant dense<0.000000e+00> : vector<8xf32>
    %140 = vector.multi_reduction <add>, %139, %cst_95 [1] : vector<8x128xf32> to vector<8xf32>
    %141 = vector.shape_cast %140 : vector<8xf32> to vector<8x1xf32>
    %cst_96 = arith.constant 0.333333343 : f32
    %142 = vector.broadcast %cst_96 : f32 to vector<8x1xf32>
    %143 = arith.mulf %141, %142 : vector<8x1xf32>
    %144 = vector.extract_strided_slice %131 {offsets = [0, 0], sizes = [8, 1], strides = [1, 1]} : vector<8x128xf32> to vector<8x1xf32>
    %145 = vector.broadcast %144 : vector<8x1xf32> to vector<8x128xf32>
    %146 = arith.addf %145, %131 : vector<8x128xf32>
    %147 = vector.broadcast %143 : vector<8x1xf32> to vector<8x128xf32>
    %148 = arith.subf %146, %147 : vector<8x128xf32>
    %c0_97 = arith.constant 0 : index
    %c0_98 = arith.constant 0 : index
    %149 = vector.load %arg18[%c0_97, %c0_98] : memref<8x128xf32, #tpu.memory_space<vmem>>, vector<8x128xf32>
    tpu.vector_store %arg18[%c0_97, %c0_98], %148 {strides = array<i32>} : memref<8x128xf32, #tpu.memory_space<vmem>>, vector<8x128xf32>,
    return
  }
  func.func @transform_0(%arg0: i32) -> (i32, i32) {
    %c0_i32 = arith.constant 0 : i32
    %c0_i32_0 = arith.constant 0 : i32
    return %arg0, %c0_i32 : i32, i32
  }
  func.func @transform_1(%arg0: i32) -> (i32, i32) {
    %c0_i32 = arith.constant 0 : i32
    %c0_i32_0 = arith.constant 0 : i32
    %c0_i32_1 = arith.constant 0 : i32
    return %c0_i32, %c0_i32_0 : i32, i32
  }
  func.func @transform_2(%arg0: i32) -> (i32, i32) {
    %c0_i32 = arith.constant 0 : i32
    %c0_i32_0 = arith.constant 0 : i32
    %c0_i32_1 = arith.constant 0 : i32
    return %c0_i32, %c0_i32_0 : i32, i32
  }
  func.func @transform_3(%arg0: i32) -> (i32, i32) {
    %c0_i32 = arith.constant 0 : i32
    %c0_i32_0 = arith.constant 0 : i32
    %c0_i32_1 = arith.constant 0 : i32
    return %c0_i32, %c0_i32_0 : i32, i32
  }
  func.func @transform_4(%arg0: i32) -> (i32, i32) {
    %c0_i32 = arith.constant 0 : i32
    %c0_i32_0 = arith.constant 0 : i32
    %c0_i32_1 = arith.constant 0 : i32
    return %c0_i32, %c0_i32_0 : i32, i32
  }
  func.func @transform_5(%arg0: i32) -> (i32, i32) {
    %c0_i32 = arith.constant 0 : i32
    %c0_i32_0 = arith.constant 0 : i32
    %c0_i32_1 = arith.constant 0 : i32
    return %c0_i32, %c0_i32_0 : i32, i32
  }
  func.func @transform_6(%arg0: i32) -> (i32, i32) {
    %c0_i32 = arith.constant 0 : i32
    %c0_i32_0 = arith.constant 0 : i32
    %c0_i32_1 = arith.constant 0 : i32
    return %c0_i32, %c0_i32_0 : i32, i32
  }
  func.func @transform_7(%arg0: i32) -> (i32, i32) {
    %c0_i32 = arith.constant 0 : i32
    %c0_i32_0 = arith.constant 0 : i32
    %c0_i32_1 = arith.constant 0 : i32
    return %c0_i32, %c0_i32_0 : i32, i32
  }
  func.func @transform_8(%arg0: i32) -> (i32, i32) {
    %c0_i32 = arith.constant 0 : i32
    %c0_i32_0 = arith.constant 0 : i32
    %c0_i32_1 = arith.constant 0 : i32
    return %c0_i32, %c0_i32_0 : i32, i32
  }
  func.func @transform_9(%arg0: i32) -> (i32, i32) {
    %c0_i32 = arith.constant 0 : i32
    %c0_i32_0 = arith.constant 0 : i32
    %c0_i32_1 = arith.constant 0 : i32
    return %c0_i32, %c0_i32_0 : i32, i32
  }
  func.func @transform_10(%arg0: i32) -> (i32, i32) {
    %c0_i32 = arith.constant 0 : i32
    %c0_i32_0 = arith.constant 0 : i32
    %c0_i32_1 = arith.constant 0 : i32
    return %c0_i32, %c0_i32_0 : i32, i32
  }
  func.func @transform_11(%arg0: i32) -> (i32, i32) {
    %c0_i32 = arith.constant 0 : i32
    %c0_i32_0 = arith.constant 0 : i32
    %c0_i32_1 = arith.constant 0 : i32
    return %c0_i32, %c0_i32_0 : i32, i32
  }
  func.func @transform_12(%arg0: i32) -> (i32, i32) {
    %c0_i32 = arith.constant 0 : i32
    %c0_i32_0 = arith.constant 0 : i32
    %c0_i32_1 = arith.constant 0 : i32
    return %c0_i32, %c0_i32_0 : i32, i32
  }
  func.func @transform_13(%arg0: i32) -> (i32, i32, i32) {
    %c0_i32 = arith.constant 0 : i32
    %c0_i32_0 = arith.constant 0 : i32
    %c0_i32_1 = arith.constant 0 : i32
    %c0_i32_2 = arith.constant 0 : i32
    return %c0_i32, %c0_i32_0, %c0_i32_1 : i32, i32, i32
  }
  func.func @transform_14(%arg0: i32) -> (i32, i32) {
    %c0_i32 = arith.constant 0 : i32
    %c0_i32_0 = arith.constant 0 : i32
    %c0_i32_1 = arith.constant 0 : i32
    return %c0_i32, %c0_i32_0 : i32, i32
  }
  func.func @transform_15(%arg0: i32) -> (i32, i32) {
    %c0_i32 = arith.constant 0 : i32
    %c0_i32_0 = arith.constant 0 : i32
    %c0_i32_1 = arith.constant 0 : i32
    return %c0_i32, %c0_i32_0 : i32, i32
  }
  func.func @transform_16(%arg0: i32) -> (i32, i32) {
    %c0_i32 = arith.constant 0 : i32
    %c0_i32_0 = arith.constant 0 : i32
    %c0_i32_1 = arith.constant 0 : i32
    return %c0_i32, %c0_i32_0 : i32, i32
  }
  func.func @transform_17(%arg0: i32) -> (i32, i32) {
    %c0_i32 = arith.constant 0 : i32
    %c0_i32_0 = arith.constant 0 : i32
    return %arg0, %c0_i32 : i32, i32
  }
}

</mosaic_0001>

<bundles_post_ra>
// kernel: dqn_forward.1
= control target key start
LH: loop header
LB: loop body
LE: loop exit
PB: predicated region body
PF: predicated region fallthrough
CT: control target
= control target key end

     0   :  { %s10584_s24 = smov 0   ;;  %s15976_s0 = inlined_call_operand.vmem [shape: f32[2560,4], index: 0, kind: input, shape index: {}]   ;;  %s15977_s1 = inlined_call_operand.vmem [shape: bf16[4,96], index: 1, kind: input, shape index: {}]   ;;  %s15978_s2 = inlined_call_operand.vmem [shape: f32[1,32], index: 2, kind: input, shape index: {}]   ;;  %s15979_s3 = inlined_call_operand.vmem [shape: bf16[32,96], index: 3, kind: input, shape index: {}]   ;;  %s15980_s4 = inlined_call_operand.vmem [shape: f32[1,32], index: 4, kind: input, shape index: {}]   ;;  %s15981_s5 = inlined_call_operand.vmem [shape: bf16[32,96], index: 5, kind: input, shape index: {}]   ;;  %s15982_s6 = inlined_call_operand.vmem [shape: f32[1,32], index: 6, kind: input, shape index: {}]   ;;  %s15983_s7 = inlined_call_operand.vmem [shape: bf16[32,96], index: 7, kind: input, shape index: {}]   ;;  %s15984_s8 = inlined_call_operand.vmem [shape: f32[1,32], index: 8, kind: input, shape index: {}]   ;;  %s15985_s9 = inlined_call_operand.vmem [shape: bf16[32,96], index: 9, kind: input, shape index: {}]   ;;  %s15986_s10 = inlined_call_operand.vmem [shape: f32[1,32], index: 10, kind: input, shape index: {}]   ;;  %s15987_s11 = inlined_call_operand.vmem [shape: bf16[32,96], index: 11, kind: input, shape index: {}]   ;;  %s15988_s12 = inlined_call_operand.vmem [shape: f32[1,32], index: 12, kind: input, shape index: {}]   ;;  %s15989_s13 = inlined_call_operand.vmem [shape: bf16[3,32,1024], index: 13, kind: input, shape index: {}]   ;;  %s15990_s14 = inlined_call_operand.vmem [shape: f32[1,1024], index: 14, kind: input, shape index: {}]   ;;  %s15991_s15 = inlined_call_operand.vmem [shape: bf16[1024,128], index: 15, kind: input, shape index: {}]   ;;  %s15992_s16 = inlined_call_operand.vmem [shape: f32[1,128], index: 16, kind: input, shape index: {}]   ;;  %s15993_s17 = inlined_call_operand.vmem [shape: f32[16,128], index: 17, kind: output, shape index: {}]  }
   0x1   :  { %16094 = sst [smem:[#allocation18_spill]] %s15976_s0 }
   0x2   :  { %16095 = sst [smem:[#allocation19_spill]] %s15977_s1 }
   0x3 LB: > { %s10590_s25 = sadd.s32 4294967295, %s10489_s24   ;;  %p9617_p0 = scmp.ge.s32.totalorder %s10489_s24, 1  ;;  %s10489_s24 = sphi %s10584_s24, %s27_s24  }
   0x4   : > { %p488_p1 = scmp.lt.s32.totalorder %s10489_s24, 3 }
   0x6   : > { %p489_p2 = pnand %p9617_p0, %p488_p1 }
   0x8   : > { %492 = sbr.rel (%p489_p2) target bundleno = 3396 (0xd44), region = 88 }
   0xd   : > { %s16096_s28 = sld [smem:[#allocation19_spill]]  ;;  %vm1032_vm0 = vcmask 1041408   ;;  %s539_s29 = smul.u32 160, %s10590_s25  ;;  %vm791_vm1 = vcmask 31744   ;;  %vm2565_vm2 = vcmask 1045504   ;;  %vm1605_vm3 = vcmask 1046528  }
   0xe   : > { %s16097_s19 = sld [smem:[#allocation18_spill]]  ;;  %s10491_s20 = smov 64   ;;  %vm3689_vm4 = vcmask 261120   ;;  %vm3849_vm5 = vcmask 259072   ;;  %vm8254_vm6 = vcmask 257024  }
   0xf   : > { %p540_p3 = scmp.lt.s32.totalorder %s539_s29, 319  ;;  %s10492_s21 = smov 96  }
  0x10   : > { %p545_p4 = scmp.lt.s32.totalorder %s10590_s25, 1 }
  0x11   : > { %s16229_s29 = smov (!%p540_p3, %s539_s29), 319 }
  0x12   : > { %s9618_s0 = sshll.u32 %s16229_s29, 3  ;;  %s16231_s25 = smov (!%p545_p4, %s10590_s25), 1 }
  0x13   : > { %v790_v0 = vld [vmem:[%s16096_s28] sm:$0x3] }
  0x14   : > { %v1034_v1 = vsel %vm1032_vm0, %v790_v0, 0  ;;  %s10601_s1 = scalar_lea.vmem %s16097_s19, %s9618_s0 }
  0x15   : > { %1043 = vmatpush.bf16.msra.mxu0 %v1034_v1  ;;  %10448 = vmatpush.bf16.msra.mxu1 %v1034_v1  ;;  %v550_v2 = vld [vmem:[%s10601_s1] sm:$0xff]  ;;  %v551_v3 = vld [vmem:[%s10601_s1 + $0x8] sm:$0xff]  ;;  %v552_v11 = vld [vmem:[%s10601_s1 + $0x10] sm:$0xff] }
  0x16   : > { %10449 = vmatpush.bf16.msra.mxu2 %v1034_v1  ;;  %10450 = vmatpush.bf16.msra.mxu3 %v1034_v1  ;;  %v650_v4 = vld [vmem:[%s10601_s1 + $0x320] sm:$0xff]  ;;  %v710_v5 = vpack.c.bf16 %v551_v3, %v550_v2  ;;  %v651_v6 = vld [vmem:[%s10601_s1 + $0x328] sm:$0xff]  ;;  %v553_v12 = vld [vmem:[%s10601_s1 + $0x18] sm:$0xff] }
  0x17   : > { %v670_v7 = vld [vmem:[%s10601_s1 + $0x3c0] sm:$0xff]  ;;  %v671_v8 = vld [vmem:[%s10601_s1 + $0x3c8] sm:$0xff]  ;;  %v760_v9 = vpack.c.bf16 %v651_v6, %v650_v4  ;;  %v652_v13 = vld [vmem:[%s10601_s1 + $0x330] sm:$0xff]  ;;  %v711_v17 = vpack.c.bf16 %v553_v12, %v552_v11 }
  0x18   : > { %v770_v10 = vpack.c.bf16 %v671_v8, %v670_v7  ;;  %9620 = vmatmul.msk.bf16.vlgmr.msra.gmra.mxu0 %vm791_vm1, %v710_v5  ;;  %v653_v14 = vld [vmem:[%s10601_s1 + $0x338] sm:$0xff]  ;;  %v672_v15 = vld [vmem:[%s10601_s1 + $0x3d0] sm:$0xff]  ;;  %v554_v20 = vld [vmem:[%s10601_s1 + $0x20] sm:$0xff] }
  0x19   : > { %9670 = vmatmul.msk.bf16.vlgmr.msra.gmra.mxu1 %vm791_vm1, %v760_v9  ;;  %v673_v16 = vld [vmem:[%s10601_s1 + $0x3d8] sm:$0xff]  ;;  %v761_v18 = vpack.c.bf16 %v653_v14, %v652_v13  ;;  %v555_v21 = vld [vmem:[%s10601_s1 + $0x28] sm:$0xff]  ;;  %v654_v22 = vld [vmem:[%s10601_s1 + $0x340] sm:$0xff] }
  0x1a   : > { %9680 = vmatmul.msk.bf16.vlgmr.msra.gmra.mxu2 %vm791_vm1, %v770_v10  ;;  %v771_v19 = vpack.c.bf16 %v673_v16, %v672_v15  ;;  %v655_v23 = vld [vmem:[%s10601_s1 + $0x348] sm:$0xff]  ;;  %v674_v24 = vld [vmem:[%s10601_s1 + $0x3e0] sm:$0xff]  ;;  %v712_v26 = vpack.c.bf16 %v555_v21, %v554_v20  ;;  %v556_v29 = vld [vmem:[%s10601_s1 + $0x30] sm:$0xff] }
  0x1b   : > { %v675_v25 = vld [vmem:[%s10601_s1 + $0x3e8] sm:$0xff]  ;;  %v762_v27 = vpack.c.bf16 %v655_v23, %v654_v22  ;;  %v557_v30 = vld [vmem:[%s10601_s1 + $0x38] sm:$0xff]  ;;  %v656_v31 = vld [vmem:[%s10601_s1 + $0x350] sm:$0xff] }
  0x1c   : > { %v772_v28 = vpack.c.bf16 %v675_v25, %v674_v24  ;;  %v657_v32 = vld [vmem:[%s10601_s1 + $0x358] sm:$0xff]  ;;  %v676_v33 = vld [vmem:[%s10601_s1 + $0x3f0] sm:$0xff]  ;;  %v713_v35 = vpack.c.bf16 %v557_v30, %v556_v29  ;;  %v558_v38 = vld [vmem:[%s10601_s1 + $0x40] sm:$0xff] }
  0x1d   : > { %v677_v34 = vld [vmem:[%s10601_s1 + $0x3f8] sm:$0xff]  ;;  %v763_v36 = vpack.c.bf16 %v657_v32, %v656_v31  ;;  %v559_v39 = vld [vmem:[%s10601_s1 + $0x48] sm:$0xff]  ;;  %v658_v40 = vld [vmem:[%s10601_s1 + $0x360] sm:$0xff] }
  0x1e   : > { %v773_v37 = vpack.c.bf16 %v677_v34, %v676_v33  ;;  %v659_v41 = vld [vmem:[%s10601_s1 + $0x368] sm:$0xff]  ;;  %v714_v42 = vpack.c.bf16 %v559_v39, %v558_v38  ;;  %v678_v44 = vld [vmem:[%s10601_s1 + $0x400] sm:$0xff]  ;;  %v560_v47 = vld [vmem:[%s10601_s1 + $0x50] sm:$0xff] }
  0x1f   : > { %v764_v43 = vpack.c.bf16 %v659_v41, %v658_v40  ;;  %v679_v45 = vld [vmem:[%s10601_s1 + $0x408] sm:$0xff]  ;;  %v561_v48 = vld [vmem:[%s10601_s1 + $0x58] sm:$0xff]  ;;  %v660_v49 = vld [vmem:[%s10601_s1 + $0x370] sm:$0xff] }
  0x20   : > { %v774_v46 = vpack.c.bf16 %v679_v45, %v678_v44  ;;  %v661_v50 = vld [vmem:[%s10601_s1 + $0x378] sm:$0xff]  ;;  %v715_v51 = vpack.c.bf16 %v561_v48, %v560_v47  ;;  %v680_v53 = vld [vmem:[%s10601_s1 + $0x410] sm:$0xff]  ;;  %v562_v56 = vld [vmem:[%s10601_s1 + $0x60] sm:$0xff] }
  0x21   : > { %v765_v52 = vpack.c.bf16 %v661_v50, %v660_v49  ;;  %v681_v54 = vld [vmem:[%s10601_s1 + $0x418] sm:$0xff]  ;;  %v563_v57 = vld [vmem:[%s10601_s1 + $0x68] sm:$0xff]  ;;  %v662_v58 = vld [vmem:[%s10601_s1 + $0x380] sm:$0xff] }
  0x22   : > { %v775_v55 = vpack.c.bf16 %v681_v54, %v680_v53  ;;  %v663_v59 = vld [vmem:[%s10601_s1 + $0x388] sm:$0xff]  ;;  %v716_v60 = vpack.c.bf16 %v563_v57, %v562_v56  ;;  %v564_v62 = vld [vmem:[%s10601_s1 + $0x70] sm:$0xff]  ;;  %v565_v63 = vld [vmem:[%s10601_s1 + $0x78] sm:$0xff] }
  0x23   : > { %v766_v61 = vpack.c.bf16 %v663_v59, %v662_v58  ;;  %v664_v0 = vld [vmem:[%s10601_s1 + $0x390] sm:$0xff]  ;;  %v665_v1 = vld [vmem:[%s10601_s1 + $0x398] sm:$0xff]  ;;  %v717_v2 = vpack.c.bf16 %v565_v63, %v564_v62  ;;  %v566_v4 = vld [vmem:[%s10601_s1 + $0x80] sm:$0xff] }
  0x24   : > { %v767_v3 = vpack.c.bf16 %v665_v1, %v664_v0  ;;  %v567_v5 = vld [vmem:[%s10601_s1 + $0x88] sm:$0xff]  ;;  %v666_v6 = vld [vmem:[%s10601_s1 + $0x3a0] sm:$0xff]  ;;  %v568_v24 = vld [vmem:[%s10601_s1 + $0x90] sm:$0xff] }
  0x25   : > { %v667_v7 = vld [vmem:[%s10601_s1 + $0x3a8] sm:$0xff]  ;;  %v718_v8 = vpack.c.bf16 %v567_v5, %v566_v4  ;;  %v682_v12 = vld [vmem:[%s10601_s1 + $0x420] sm:$0xff]  ;;  %v569_v25 = vld [vmem:[%s10601_s1 + $0x98] sm:$0xff] }
  0x26   : > { %v768_v10 = vpack.c.bf16 %v667_v7, %v666_v6  ;;  %v683_v13 = vld [vmem:[%s10601_s1 + $0x428] sm:$0xff]  ;;  %v719_v30 = vpack.c.bf16 %v569_v25, %v568_v24  ;;  %v684_v58 = vld [vmem:[%s10601_s1 + $0x430] sm:$0xff] }
  0x27   : > { %v776_v14 = vpack.c.bf16 %v683_v13, %v682_v12  ;;  %v573_v12 = vld [vmem:[%s10601_s1 + $0xb8] sm:$0xff] }
  0x28   : > { %9621 = vmatmul.msk.bf16.gmra.mxu0 %vm791_vm1, %v711_v17 }
  0x29   : > { %9671 = vmatmul.msk.bf16.gmra.mxu1 %vm791_vm1, %v761_v18 }
  0x2a   : > { %9681 = vmatmul.msk.bf16.gmra.mxu2 %vm791_vm1, %v771_v19 }
  0x38   : > { %9622 = vmatmul.msk.bf16.gmra.mxu0 %vm791_vm1, %v712_v26  ;;  %v668_v26 = vld [vmem:[%s10601_s1 + $0x3b0] sm:$0xff] }
  0x39   : > { %9672 = vmatmul.msk.bf16.gmra.mxu1 %vm791_vm1, %v762_v27  ;;  %v669_v27 = vld [vmem:[%s10601_s1 + $0x3b8] sm:$0xff] }
  0x3a   : > { %9682 = vmatmul.msk.bf16.gmra.mxu2 %vm791_vm1, %v772_v28 }
  0x48   : > { %9623 = vmatmul.msk.bf16.gmra.mxu0 %vm791_vm1, %v713_v35  ;;  %v769_v35 = vpack.c.bf16 %v669_v27, %v668_v26 }
  0x49   : > { %9673 = vmatmul.msk.bf16.gmra.mxu1 %vm791_vm1, %v763_v36 }
  0x4a   : > { %9683 = vmatmul.msk.bf16.gmra.mxu2 %vm791_vm1, %v773_v37 }
  0x58   : > { %9624 = vmatmul.msk.bf16.gmra.mxu0 %vm791_vm1, %v714_v42 }
  0x59   : > { %9674 = vmatmul.msk.bf16.gmra.mxu1 %vm791_vm1, %v764_v43 }
  0x5a   : > { %9684 = vmatmul.msk.bf16.gmra.mxu2 %vm791_vm1, %v774_v46 }
  0x68   : > { %9625 = vmatmul.msk.bf16.gmra.mxu0 %vm791_vm1, %v715_v51  ;;  %v570_v51 = vld [vmem:[%s10601_s1 + $0xa0] sm:$0xff] }
  0x69   : > { %9675 = vmatmul.msk.bf16.gmra.mxu1 %vm791_vm1, %v765_v52  ;;  %v571_v52 = vld [vmem:[%s10601_s1 + $0xa8] sm:$0xff] }
  0x6a   : > { %9685 = vmatmul.msk.bf16.gmra.mxu2 %vm791_vm1, %v775_v55  ;;  %v720_v55 = vpack.c.bf16 %v571_v52, %v570_v51  ;;  %v687_v52 = vld [vmem:[%s10601_s1 + $0x448] sm:$0xff] }
  0x78   : > { %9626 = vmatmul.msk.bf16.gmra.mxu0 %vm791_vm1, %v716_v60  ;;  %v685_v60 = vld [vmem:[%s10601_s1 + $0x438] sm:$0xff] }
  0x79   : > { %9676 = vmatmul.msk.bf16.gmra.mxu1 %vm791_vm1, %v766_v61  ;;  %v777_v62 = vpack.c.bf16 %v685_v60, %v684_v58 }
  0x7a   : > { %9686 = vmatmul.msk.bf16.gmra.mxu2 %vm791_vm1, %v776_v14 }
  0x88   : > { %9627 = vmatmul.msk.bf16.gmra.mxu0 %vm791_vm1, %v717_v2 }
  0x89   : > { %9677 = vmatmul.msk.bf16.gmra.mxu1 %vm791_vm1, %v767_v3 }
  0x8a   : > { %9687 = vmatmul.msk.bf16.gmra.mxu2 %vm791_vm1, %v777_v62 }
  0x95   : > { %v10673_v9 = vpop.f32.mrf.mxu0 }
  0x96   : > { %v10675_v11 = vpop.f32.mrf.mxu1  ;;  %v1606_v17 = vrot.slane %v10673_v9, 1  ;;  %v2566_v18 = vrot.slane %v10673_v9, 2 }
  0x97   : > { %16098 = vst [vmem:[#allocation3_spill] sm:$0xff] %v10675_v11  ;;  %v15994_v36 = vrot.slane %v10675_v11, 1  ;;  %v15995_v37 = vrot.slane %v10675_v11, 2 }
  0x98   : > { %9628 = vmatmul.msk.bf16.gmra.mxu0 %vm791_vm1, %v718_v8 }
  0x99   : > { %9678 = vmatmul.msk.bf16.gmra.mxu1 %vm791_vm1, %v768_v10  ;;  %v572_v10 = vld [vmem:[%s10601_s1 + $0xb0] sm:$0xff] }
  0x9d   : > { %v10682_v15 = vpop.f32.mrf.mxu2  ;;  %v10684_v16 = vpop.f32.mrf.mxu0 }
  0x9e   : > { %v10688_v19 = vpop.f32.mrf.mxu1  ;;  %v2567_v20 = vrot.slane %v10684_v16, 2  ;;  %v1607_v21 = vrot.slane %v10684_v16, 1  ;;  %v15996_v31 = vrot.slane %v10682_v15, 2  ;;  %v15997_v46 = vrot.slane %v10682_v15, 1 }
  0x9f   : > { %v1807_v28 = vrot.slane %v10688_v19, 1  ;;  %v2767_v32 = vrot.slane %v10688_v19, 2 }
  0xa0   : > { %v2568_v22 = vsel %vm2565_vm2, %v2566_v18, %v2567_v20  ;;  %v1608_v23 = vsel %vm1605_vm3, %v1606_v17, %v1607_v21  ;;  %v721_v17 = vpack.c.bf16 %v573_v12, %v572_v10 }
  0xa1   : > { %2885 = vrot.lane.b32.xlu2 %v2568_v22, %s10491_s20  ;;  %1925 = vrot.lane.b32.xlu0 %v1608_v23, %s10492_s21  ;;  %v1808_v40 = vsel %vm1605_vm3, %v15994_v36, %v1807_v28  ;;  %v2768_v41 = vsel %vm2565_vm2, %v15995_v37, %v2767_v32 }
  0xa5   : > { %v10703_v29 = vpop.f32.mrf.mxu2  ;;  %v10707_v33 = vpop.f32.mrf.mxu0 }
  0xa6   : > { %v2807_v34 = vrot.slane %v10703_v29, 2  ;;  %v10717_v39 = vpop.f32.mrf.mxu1  ;;  %v1847_v44 = vrot.slane %v10703_v29, 1  ;;  %v1609_v56 = vrot.slane %v10707_v33, 1  ;;  %v2569_v3 = vrot.slane %v10707_v33, 2 }
  0xa7   : > { %v1809_v42 = vrot.slane %v10717_v39, 1  ;;  %v2769_v43 = vrot.slane %v10717_v39, 2 }
  0xa8   : > { %v2808_v38 = vsel %vm2565_vm2, %v15996_v31, %v2807_v34  ;;  %9629 = vmatmul.msk.bf16.gmra.mxu0 %vm791_vm1, %v719_v30  ;;  %v1848_v50 = vsel %vm1605_vm3, %v15997_v46, %v1847_v44  ;;  %v1610_v0 = vsel %vm1605_vm3, %v1607_v21, %v1609_v56  ;;  %v2570_v8 = vsel %vm2565_vm2, %v2567_v20, %v2569_v3  ;;  %v587_v46 = vld [vmem:[%s10601_s1 + $0x128] sm:$0xff] }
  0xa9   : > { %3125 = vrot.lane.b32.xlu1 %v2808_v38, %s10491_s20  ;;  %9679 = vmatmul.msk.bf16.gmra.mxu1 %vm791_vm1, %v769_v35  ;;  %v1810_v47 = vsel %vm1605_vm3, %v1807_v28, %v1809_v42  ;;  %v2770_v48 = vsel %vm2565_vm2, %v2767_v32, %v2769_v43  ;;  %v574_v38 = vld [vmem:[%s10601_s1 + $0xc0] sm:$0xff] }
  0xaa   : > { %2125 = vrot.lane.b32.xlu2 %v1808_v40, %s10492_s21  ;;  %3085 = vrot.lane.b32.xlu0 %v2768_v41, %s10491_s20  ;;  %v575_v40 = vld [vmem:[%s10601_s1 + $0xc8] sm:$0xff] }
  0xad   : > { %v10733_v45 = vpop.f32.mrf.mxu0  ;;  %v10741_v49 = vpop.f32.mrf.mxu2 }
  0xae   : > { %v1611_v53 = vrot.slane %v10733_v45, 1  ;;  %v1849_v54 = vrot.slane %v10741_v49, 1  ;;  %v10763_v63 = vpop.f32.mrf.mxu1  ;;  %v2571_v1 = vrot.slane %v10733_v45, 2  ;;  %v2809_v18 = vrot.slane %v10741_v49, 2 }
  0xaf   : > { %v1811_v2 = vrot.slane %v10763_v63, 1  ;;  %v2771_v27 = vrot.slane %v10763_v63, 2 }
  0xb0   : > { %v1612_v59 = vsel %vm1605_vm3, %v1609_v56, %v1611_v53  ;;  %v1850_v61 = vsel %vm1605_vm3, %v1847_v44, %v1849_v54  ;;  %v2572_v6 = vsel %vm2565_vm2, %v2569_v3, %v2571_v1  ;;  %v2810_v24 = vsel %vm2565_vm2, %v2807_v34, %v2809_v18  ;;  %v577_v3 = vld [vmem:[%s10601_s1 + $0xd8] sm:$0xff] }
  0xb1   : > { %2127 = vrot.lane.b32.xlu1 %v1810_v47, %s10492_s21  ;;  %v1812_v7 = vsel %vm1605_vm3, %v1809_v42, %v1811_v2  ;;  %v2772_v35 = vsel %vm2565_vm2, %v2769_v43, %v2771_v27  ;;  %v722_v44 = vpack.c.bf16 %v575_v40, %v574_v38  ;;  %v579_v38 = vld [vmem:[%s10601_s1 + $0xe8] sm:$0xff] }
  0xb2   : > { %3087 = vrot.lane.b32.xlu2 %v2770_v48, %s10491_s20  ;;  %2165 = vrot.lane.b32.xlu0 %v1848_v50, %s10492_s21  ;;  %v686_v50 = vld [vmem:[%s10601_s1 + $0x440] sm:$0xff] }
  0xb5   : > { %v10753_v57 = vpop.f32.mrf.mxu0  ;;  %v10774_v5 = vpop.f32.mrf.mxu2 }
  0xb6   : > { %v2811_v13 = vrot.slane %v10774_v5, 2  ;;  %v2573_v14 = vrot.slane %v10753_v57, 2  ;;  %v1613_v25 = vrot.slane %v10753_v57, 1  ;;  %v10812_v32 = vpop.f32.mrf.mxu1  ;;  %v1851_v47 = vrot.slane %v10774_v5, 1 }
  0xb7   : > { %v2773_v41 = vrot.slane %v10812_v32, 2  ;;  %v1813_v60 = vrot.slane %v10812_v32, 1 }
  0xb8   : > { %9630 = vmatmul.msk.bf16.gmra.mxu0 %vm791_vm1, %v720_v55  ;;  %v2812_v22 = vsel %vm2565_vm2, %v2809_v18, %v2811_v13  ;;  %v2574_v20 = vsel %vm2565_vm2, %v2571_v1, %v2573_v14  ;;  %v1614_v30 = vsel %vm1605_vm3, %v1611_v53, %v1613_v25  ;;  %v778_v53 = vpack.c.bf16 %v687_v52, %v686_v50  ;;  %v576_v1 = vld [vmem:[%s10601_s1 + $0xd0] sm:$0xff] }
  0xb9   : > { %1929 = vrot.lane.b32.xlu1 %v1612_v59, %s10492_s21  ;;  %v2774_v51 = vsel %vm2565_vm2, %v2771_v27, %v2773_v41  ;;  %v1852_v55 = vsel %vm1605_vm3, %v1849_v54, %v1851_v47  ;;  %v723_v10 = vpack.c.bf16 %v577_v3, %v576_v1 }
  0xba   : > { %2167 = vrot.lane.b32.xlu2 %v1850_v61, %s10492_s21  ;;  %1927 = vrot.lane.b32.xlu0 %v1610_v0, %s10492_s21  ;;  %v1814_v0 = vsel %vm1605_vm3, %v1811_v2, %v1813_v60 }
  0xbb   : > { %9688 = vmatmul.msk.bf16.gmra.mxu2 %vm791_vm1, %v778_v53 }
  0xbd   : > { %v10772_v4 = vpop.f32.mrf.mxu0  ;;  %v10799_v23 = vpop.f32.mrf.mxu2 }
  0xbe   : > { %v2813_v26 = vrot.slane %v10799_v23, 2  ;;  %v1615_v42 = vrot.slane %v10772_v4, 1  ;;  %v1853_v56 = vrot.slane %v10799_v23, 1  ;;  %v10843_v58 = vpop.f32.mrf.mxu1  ;;  %v2575_v12 = vrot.slane %v10772_v4, 2 }
  0xbf   : > { %v2775_v59 = vrot.slane %v10843_v58, 2 }
  0xc0   : > { %v2814_v34 = vsel %vm2565_vm2, %v2811_v13, %v2813_v26  ;;  %v1616_v43 = vsel %vm1605_vm3, %v1613_v25, %v1615_v42  ;;  %v1854_v62 = vsel %vm1605_vm3, %v1851_v47, %v1853_v56  ;;  %v2576_v18 = vsel %vm2565_vm2, %v2573_v14, %v2575_v12 }
  0xc1   : > { %2889 = vrot.lane.b32.xlu1 %v2572_v6, %s10491_s20  ;;  %v2776_v54 = vsel %vm2565_vm2, %v2773_v41, %v2775_v59  ;;  %v1815_v6 = vrot.slane %v10843_v58, 1 }
  0xc2   : > { %2129 = vrot.lane.b32.xlu2 %v1812_v7, %s10492_s21  ;;  %2887 = vrot.lane.b32.xlu0 %v2570_v8, %s10491_s20 }
  0xc5   : > { %v10791_v21 = vpop.f32.mrf.mxu0  ;;  %v10860_v7 = vpop.f32.mrf.mxu2 }
  0xc6   : > { %v1855_v8 = vrot.slane %v10860_v7, 1  ;;  %v10891_v40 = vpop.f32.mrf.mxu1 }
  0xc7   : > { %v2777_v41 = vrot.slane %v10891_v40, 2  ;;  %v1817_v47 = vrot.slane %v10891_v40, 1 }
  0xc8   : > { %9631 = vmatmul.msk.bf16.gmra.mxu0 %vm791_vm1, %v721_v17  ;;  %v1816_v17 = vsel %vm1605_vm3, %v1813_v60, %v1815_v6  ;;  %v1856_v2 = vsel %vm1605_vm3, %v1853_v56, %v1855_v8  ;;  %v688_v60 = vld [vmem:[%s10601_s1 + $0x450] sm:$0xff] }
  0xc9   : > { %3129 = vrot.lane.b32.xlu1 %v2812_v22, %s10491_s20  ;;  %v1617_v22 = vrot.slane %v10791_v21, 1  ;;  %v1818_v52 = vsel %vm1605_vm3, %v1815_v6, %v1817_v47  ;;  %v580_v6 = vld [vmem:[%s10601_s1 + $0xf0] sm:$0xff] }
  0xca   : > { %2891 = vrot.lane.b32.xlu2 %v2574_v20, %s10491_s20  ;;  %3127 = vrot.lane.b32.xlu0 %v2810_v24, %s10491_s20  ;;  %v2577_v20 = vrot.slane %v10791_v21, 2  ;;  %v2815_v24 = vrot.slane %v10860_v7, 2 }
  0xcb   : > { %v1618_v27 = vsel %vm1605_vm3, %v1615_v42, %v1617_v22 }
  0xcc   : > { %v2816_v14 = vsel %vm2565_vm2, %v2813_v26, %v2815_v24  ;;  %v2778_v26 = vsel %vm2565_vm2, %v2775_v59, %v2777_v41 }
  0xcd   : > { %v10809_v28 = vpop.f32.mrf.mxu0 }
  0xce   : > { %v2579_v56 = vrot.slane %v10809_v28, 2 }
  0xd0   : > { %v2580_v3 = vsel %vm2565_vm2, %v2577_v20, %v2579_v56 }
  0xd1   : > { %1931 = vrot.lane.b32.xlu1 %v1614_v30, %s10492_s21  ;;  %v2578_v30 = vsel %vm2565_vm2, %v2575_v12, %v2577_v20  ;;  %v10921_v12 = vpop.f32.mrf.mxu1 }
  0xd2   : > { %3131 = vrot.lane.b32.xlu2 %v2814_v34, %s10491_s20  ;;  %3089 = vrot.lane.b32.xlu0 %v2772_v35, %s10491_s20  ;;  %v10883_v34 = vpop.f32.mrf.mxu2  ;;  %v578_v35 = vld [vmem:[%s10601_s1 + $0xe0] sm:$0xff] }
  0xd3   : > { %v2817_v42 = vrot.slane %v10883_v34, 2 }
  0xd5   : > { %v10828_v48 = vpop.f32.mrf.mxu0 }
  0xd8   : > { %9632 = vmatmul.msk.bf16.gmra.mxu0 %vm791_vm1, %v722_v44  ;;  %v724_v44 = vpack.c.bf16 %v579_v38, %v578_v35  ;;  %v2581_v35 = vrot.slane %v10828_v48, 2 }
  0xd9   : > { %3091 = vrot.lane.b32.xlu1 %v2774_v51, %s10491_s20  ;;  %v2818_v51 = vsel %vm2565_vm2, %v2815_v24, %v2817_v42 }
  0xda   : > { %1933 = vrot.lane.b32.xlu2 %v1616_v43, %s10492_s21  ;;  %2169 = vrot.lane.b32.xlu0 %v1852_v55, %s10492_s21  ;;  %v1857_v43 = vrot.slane %v10883_v34, 1  ;;  %v1619_v55 = vrot.slane %v10809_v28, 1 }
  0xdc   : > { %v1620_v1 = vsel %vm1605_vm3, %v1617_v22, %v1619_v55 }
  0xdd   : > { %v10847_v61 = vpop.f32.mrf.mxu0 }
  0xe1   : > { %2171 = vrot.lane.b32.xlu1 %v1854_v62, %s10492_s21  ;;  %v689_v62 = vld [vmem:[%s10601_s1 + $0x458] sm:$0xff] }
  0xe2   : > { %3093 = vrot.lane.b32.xlu2 %v2776_v54, %s10491_s20  ;;  %2131 = vrot.lane.b32.xlu0 %v1814_v0, %s10492_s21  ;;  %v1858_v54 = vsel %vm1605_vm3, %v1855_v8, %v1857_v43  ;;  %v779_v0 = vpack.c.bf16 %v689_v62, %v688_v60  ;;  %v582_v60 = vld [vmem:[%s10601_s1 + $0x100] sm:$0xff]  ;;  %v583_v62 = vld [vmem:[%s10601_s1 + $0x108] sm:$0xff] }
  0xe4   : > { %9689 = vmatmul.msk.bf16.gmra.mxu2 %vm791_vm1, %v779_v0 }
  0xe5   : > { %v10864_v13 = vpop.f32.mrf.mxu0 }
  0xe8   : > { %9633 = vmatmul.msk.bf16.gmra.mxu0 %vm791_vm1, %v723_v10  ;;  %v581_v10 = vld [vmem:[%s10601_s1 + $0xf8] sm:$0xff] }
  0xe9   : > { %2133 = vrot.lane.b32.xlu1 %v1816_v17, %s10492_s21  ;;  %v1819_v17 = vrot.slane %v10921_v12, 1  ;;  %v725_v22 = vpack.c.bf16 %v581_v10, %v580_v6  ;;  %v726_v6 = vpack.c.bf16 %v583_v62, %v582_v60  ;;  %v2583_v60 = vrot.slane %v10847_v61, 2 }
  0xea   : > { %2173 = vrot.lane.b32.xlu2 %v1856_v2, %s10492_s21  ;;  %2893 = vrot.lane.b32.xlu0 %v2576_v18, %s10491_s20  ;;  %v2779_v2 = vrot.slane %v10921_v12, 2  ;;  %v10926_v18 = vpop.f32.mrf.mxu2 }
  0xeb   : > { %v2819_v20 = vrot.slane %v10926_v18, 2 }
  0xed   : > { %v10878_v25 = vpop.f32.mrf.mxu0 }
  0xf1   : > { %1935 = vrot.lane.b32.xlu1 %v1618_v27, %s10492_s21  ;;  %v1820_v27 = vsel %vm1605_vm3, %v1817_v47, %v1819_v17  ;;  %v1621_v47 = vrot.slane %v10828_v48, 1 }
  0xf2   : > { %2895 = vrot.lane.b32.xlu2 %v2578_v30, %s10491_s20  ;;  %3133 = vrot.lane.b32.xlu0 %v2816_v14, %s10491_s20  ;;  %v2780_v30 = vsel %vm2565_vm2, %v2777_v41, %v2779_v2  ;;  %v2820_v14 = vsel %vm2565_vm2, %v2817_v42, %v2819_v20  ;;  %v10946_v41 = vpop.f32.mrf.mxu2 }
  0xf3   : > { %v2821_v0 = vrot.slane %v10946_v41, 2  ;;  %v1861_v62 = vrot.slane %v10946_v41, 1 }
  0xf5   : > { %v10897_v50 = vpop.f32.mrf.mxu0 }
  0xf8   : > { %9634 = vmatmul.msk.bf16.gmra.mxu0 %vm791_vm1, %v724_v44  ;;  %v1859_v44 = vrot.slane %v10926_v18, 1 }
  0xf9   : > { %3095 = vrot.lane.b32.xlu1 %v2778_v26, %s10491_s20 }
  0xfa   : > { %3135 = vrot.lane.b32.xlu2 %v2818_v51, %s10491_s20  ;;  %2135 = vrot.lane.b32.xlu0 %v1818_v52, %s10492_s21  ;;  %v2582_v51 = vsel %vm2565_vm2, %v2579_v56, %v2581_v35  ;;  %v1860_v42 = vsel %vm1605_vm3, %v1857_v43, %v1859_v44  ;;  %v1622_v52 = vsel %vm1605_vm3, %v1619_v55, %v1621_v47  ;;  %v10964_v43 = vld [vmem:[%s15978_s2] ss:$0 sm:$0xff] }
  0xfb   : > { %v2886_v53 = vpop.permute.xlu2 %2885 }
  0xfd   : > { %v10909_v59 = vpop.f32.mrf.mxu0 }
 0x101   : > { %2175 = vrot.lane.b32.xlu1 %v1858_v54, %s10492_s21  ;;  %v10954_v54 = vpop.f32.mrf.mxu1 }
 0x102   : > { %1937 = vrot.lane.b32.xlu2 %v1620_v1, %s10492_s21  ;;  %2897 = vrot.lane.b32.xlu0 %v2580_v3, %s10491_s20  ;;  %v1821_v3 = vrot.slane %v10954_v54, 1  ;;  %v2781_v10 = vrot.slane %v10954_v54, 2 }
 0x104   : > { %v2126_v8 = vpop.permute.xlu2 %2125 }
 0x105   : > { %v10929_v24 = vpop.f32.mrf.mxu0 }
 0x108   : > { %9635 = vmatmul.msk.bf16.gmra.mxu0 %vm791_vm1, %v725_v22 }
 0x109   : > { %2137 = vrot.lane.b32.xlu1 %v1820_v27, %s10492_s21 }
 0x10a   : > { %3097 = vrot.lane.b32.xlu2 %v2780_v30, %s10491_s20  ;;  %3137 = vrot.lane.b32.xlu0 %v2820_v14, %s10491_s20  ;;  %v2822_v30 = vsel %vm2565_vm2, %v2819_v20, %v2821_v0  ;;  %v2505_v20 = vadd.f32 %v2126_v8, %v10675_v11  ;;  %v2584_v8 = vsel %vm2565_vm2, %v2581_v35, %v2583_v60 }
 0x10c   : > { %v10939_v38 = vpop.permute.xlu2 %3087 }
 0x10d   : > { %v10943_v26 = vpop.f32.mrf.mxu0 }
 0x10e   : > { %16099 = vst [vmem:[#allocation4_spill] sm:$0xff] %v10943_v26 }
 0x111   : > { %2899 = vrot.lane.b32.xlu1 %v2582_v51, %s10491_s20  ;;  %v1822_v51 = vsel %vm1605_vm3, %v1819_v17, %v1821_v3 }
 0x112   : > { %2177 = vrot.lane.b32.xlu2 %v1860_v42, %s10492_s21  ;;  %1939 = vrot.lane.b32.xlu0 %v1622_v52, %s10492_s21 }
 0x113   : > { %v1926_v56 = vpop.permute.xlu0 %1925 }
 0x114   : > { %v10958_v1 = vpop.permute.xlu2 %2167  ;;  %v2405_v55 = vadd.f32 %v1926_v56, %v10673_v9  ;;  %v2782_v9 = vsel %vm2565_vm2, %v2779_v2, %v2781_v10 }
 0x115   : > { %v10968_v22 = vpop.f32.mrf.mxu0 }
 0x116   : > { %v3365_v27 = vadd.f32 %v2886_v53, %v2405_v55  ;;  %v1623_v53 = vrot.slane %v10847_v61, 1 }
 0x118   : > { %v3529_v14 = vadd.f32 %v10964_v43, %v3365_v27  ;;  %9636 = vmatmul.msk.bf16.gmra.mxu0 %vm791_vm1, %v726_v6  ;;  %v1624_v6 = vsel %vm1605_vm3, %v1621_v47, %v1623_v53  ;;  %v10993_v27 = vpop.f32.mrf.mxu1 }
 0x119   : > { %3139 = vrot.lane.b32.xlu1 %v2822_v30, %s10491_s20  ;;  %v1862_v30 = vsel %vm1605_vm3, %v1859_v44, %v1861_v62  ;;  %v2783_v47 = vrot.slane %v10993_v27, 2  ;;  %v1823_v44 = vrot.slane %v10993_v27, 1 }
 0x11a   : > { %2139 = vrot.lane.b32.xlu2 %v1822_v51, %s10492_s21  ;;  %3690 = vst.msk [vmem:[#allocation2] sm:$0xff] %vm3689_vm4, %v3529_v14  ;;  %3099 = vrot.lane.b32.xlu0 %v2782_v9, %s10491_s20  ;;  %v584_v14 = vld [vmem:[%s10601_s1 + $0x110] sm:$0xff]  ;;  %v585_v51 = vld [vmem:[%s10601_s1 + $0x118] sm:$0xff] }
 0x11b   : > { %v3126_v42 = vpop.permute.xlu1 %3125 }
 0x11c   : > { %v10981_v52 = vpop.permute.xlu2 %2129  ;;  %v3086_v17 = vpop.permute.xlu0 %3085 }
 0x11d   : > { %v3465_v56 = vadd.f32 %v3086_v17, %v2505_v20  ;;  %v10985_v2 = vpop.f32.mrf.mxu0  ;;  %v11002_v20 = vpop.f32.mrf.mxu2 }
 0x11f   : > { %v3629_v55 = vadd.f32 %v10964_v43, %v3465_v56  ;;  %v2823_v56 = vrot.slane %v11002_v20, 2 }
 0x121   : > { %1941 = vrot.lane.b32.xlu1 %v1624_v6, %s10492_s21  ;;  %3790 = vst.msk [vmem:[#allocation2 + $0x320] sm:$0xff] %vm3689_vm4, %v3629_v55  ;;  %v727_v6 = vpack.c.bf16 %v585_v51, %v584_v14  ;;  %v2824_v14 = vsel %vm2565_vm2, %v2821_v0, %v2823_v56  ;;  %v15998_v51 = vrot.slane %v11002_v20, 1 }
 0x122   : > { %2901 = vrot.lane.b32.xlu2 %v2584_v8, %s10491_s20  ;;  %2179 = vrot.lane.b32.xlu0 %v1862_v30, %s10492_s21 }
 0x123   : > { %v2128_v9 = vpop.permute.xlu1 %2127 }
 0x124   : > { %v2506_v17 = vadd.f32 %v2128_v9, %v10688_v19  ;;  %v11005_v35 = vpop.permute.xlu2 %2891  ;;  %v2166_v55 = vpop.permute.xlu0 %2165  ;;  %v2784_v19 = vsel %vm2565_vm2, %v2781_v10, %v2783_v47 }
 0x125   : > { %v2525_v36 = vadd.f32 %v2166_v55, %v10682_v15  ;;  %v11011_v37 = vpop.f32.mrf.mxu0  ;;  %v11027_v10 = vpop.f32.mrf.mxu1  ;;  %v1864_v55 = vsel %vm1605_vm3, %v1861_v62, %v15998_v51 }
 0x126   : > { %v3466_v8 = vadd.f32 %v10939_v38, %v2506_v17  ;;  %v15999_v9 = vrot.slane %v11027_v10, 1  ;;  %v11056_v51 = vpop.f32.mrf.mxu2 }
 0x127   : > { %v3485_v31 = vadd.f32 %v3126_v42, %v2525_v36  ;;  %v1824_v36 = vsel %vm1605_vm3, %v1821_v3, %v1823_v44  ;;  %v16000_v3 = vrot.slane %v10864_v13, 1 }
 0x128   : > { %v3630_v30 = vadd.f32 %v10964_v43, %v3466_v8  ;;  %9637 = vmatmul.msk.bf16.gmra.mxu0 %vm791_vm1, %v727_v6  ;;  %v690_v6 = vld [vmem:[%s10601_s1 + $0x460] sm:$0xff]  ;;  %v691_v8 = vld [vmem:[%s10601_s1 + $0x468] sm:$0xff] }
 0x129   : > { %3101 = vrot.lane.b32.xlu1 %v2784_v19, %s10491_s20  ;;  %v3649_v38 = vadd.f32 %v10964_v43, %v3485_v31  ;;  %v780_v19 = vpack.c.bf16 %v691_v8, %v690_v6  ;;  %v16003_v6 = vrot.slane %v10878_v25, 2 }
 0x12a   : > { %3791 = vst.msk [vmem:[#allocation2 + $0x328] sm:$0xff] %vm3689_vm4, %v3630_v30  ;;  %3141 = vrot.lane.b32.xlu2 %v2824_v14, %s10491_s20  ;;  %2141 = vrot.lane.b32.xlu0 %v1824_v36, %s10492_s21  ;;  %v1826_v30 = vsel %vm1605_vm3, %v1823_v44, %v15999_v9  ;;  %v586_v36 = vld [vmem:[%s10601_s1 + $0x120] sm:$0xff] }
 0x12b   : > { %v1930_v42 = vpop.permute.xlu1 %1929  ;;  %3810 = vst.msk [vmem:[#allocation2 + $0x3c0] sm:$0xff] %vm3689_vm4, %v3649_v38  ;;  %v1626_v38 = vsel %vm1605_vm3, %v1623_v53, %v16000_v3  ;;  %9690 = vmatmul.msk.bf16.vlgmr.msra.gmra.mxu3 %vm791_vm1, %v780_v19  ;;  %v728_v53 = vpack.c.bf16 %v587_v46, %v586_v36  ;;  %v2526_v36 = vadd.f32 %v10958_v1, %v10703_v29  ;;  %v692_v1 = vld [vmem:[%s10601_s1 + $0x470] sm:$0xff] }
 0x12c   : > { %v11031_v0 = vpop.permute.xlu2 %3131  ;;  %v1928_v31 = vpop.permute.xlu0 %1927  ;;  %v2407_v14 = vadd.f32 %v1930_v42, %v10707_v33 }
 0x12d   : > { %v11035_v17 = vpop.f32.mrf.mxu0  ;;  %v2406_v44 = vadd.f32 %v1928_v31, %v10684_v16 }
 0x131   : > { %2181 = vrot.lane.b32.xlu1 %v1864_v55, %s10492_s21  ;;  %v2585_v55 = vrot.slane %v10864_v13, 2 }
 0x132   : > { %2143 = vrot.lane.b32.xlu2 %v1826_v30, %s10492_s21  ;;  %1943 = vrot.lane.b32.xlu0 %v1626_v38, %s10492_s21  ;;  %v16004_v30 = vrot.slane %v11027_v10, 2 }
 0x133   : > { %v2890_v62 = vpop.permute.xlu1 %2889  ;;  %v2586_v16 = vsel %vm2565_vm2, %v2583_v60, %v2585_v55  ;;  %v2588_v46 = vsel %vm2565_vm2, %v2585_v55, %v16003_v6  ;;  %v10327_v60 = vld [vmem:[%s15979_s3 + $0x8] sm:$0xff] }
 0x134   : > { %v3367_v33 = vadd.f32 %v2890_v62, %v2407_v14  ;;  %v11059_v42 = vpop.permute.xlu2 %1933  ;;  %v2888_v8 = vpop.permute.xlu0 %2887  ;;  %v2825_v14 = vrot.slane %v11056_v51, 2  ;;  %4752 = vmatpush.bf16.msrb.mxu1 %v10327_v60  ;;  %v16100_v60 = vrot.slane %v11002_v20, 1 }
 0x135   : > { %v3366_v38 = vadd.f32 %v2888_v8, %v2406_v44  ;;  %v11064_v3 = vpop.f32.mrf.mxu0  ;;  %v11090_v62 = vpop.f32.mrf.mxu2 }
 0x136   : > { %v3531_v9 = vadd.f32 %v10964_v43, %v3367_v33  ;;  %v16002_v33 = vrot.slane %v11056_v51, 1  ;;  %v2826_v29 = vsel %vm2565_vm2, %v2823_v56, %v2825_v14  ;;  %v588_v56 = vld [vmem:[%s10601_s1 + $0x130] sm:$0xff] }
 0x137   : > { %v3530_v19 = vadd.f32 %v10964_v43, %v3366_v38 }
 0x138   : > { %3692 = vst.msk [vmem:[#allocation2 + $0x10] sm:$0xff] %vm3689_vm4, %v3531_v9  ;;  %9638 = vmatmul.msk.bf16.gmra.mxu0 %vm791_vm1, %v728_v53  ;;  %v2786_v9 = vsel %vm2565_vm2, %v2783_v47, %v16004_v30  ;;  %v16001_v47 = vrot.slane %v11090_v62, 2 }
 0x139   : > { %2903 = vrot.lane.b32.xlu1 %v2586_v16, %s10491_s20  ;;  %3691 = vst.msk [vmem:[#allocation2 + $0x8] sm:$0xff] %vm3689_vm4, %v3530_v19  ;;  %v693_v19 = vld [vmem:[%s10601_s1 + $0x478] sm:$0xff] }
 0x13a   : > { %2905 = vrot.lane.b32.xlu2 %v2588_v46, %s10491_s20  ;;  %3103 = vrot.lane.b32.xlu0 %v2786_v9, %s10491_s20  ;;  %v2828_v16 = vsel %vm2565_vm2, %v2825_v14, %v16001_v47  ;;  %v781_v46 = vpack.c.bf16 %v693_v19, %v692_v1  ;;  %v11108_v9 = vpop.f32.mrf.mxu1  ;;  %v1627_v14 = vrot.slane %v10878_v25, 1  ;;  %v16006_v19 = vrot.slane %v10897_v50, 1 }
 0x13b   : > { %v3130_v31 = vpop.permute.xlu1 %3129  ;;  %v16008_v47 = vrot.slane %v11108_v9, 1 }
 0x13c   : > { %v11092_v55 = vpop.permute.xlu2 %3093  ;;  %v3128_v44 = vpop.permute.xlu0 %3127  ;;  %9691 = vmatmul.msk.bf16.gmra.mxu3 %vm791_vm1, %v781_v46 }
 0x13d   : > { %v3486_v8 = vadd.f32 %v3128_v44, %v2526_v36  ;;  %v11096_v53 = vpop.f32.mrf.mxu0  ;;  %v1866_v36 = vsel %vm1605_vm3, %v16100_v60, %v16002_v33  ;;  %v589_v44 = vld [vmem:[%s10601_s1 + $0x138] sm:$0xff] }
 0x13f   : > { %v3650_v38 = vadd.f32 %v10964_v43, %v3486_v8 }
 0x141   : > { %3143 = vrot.lane.b32.xlu1 %v2826_v29, %s10491_s20  ;;  %3811 = vst.msk [vmem:[#allocation2 + $0x3c8] sm:$0xff] %vm3689_vm4, %v3650_v38  ;;  %v2507_v38 = vadd.f32 %v10981_v52, %v10717_v39  ;;  %v16102_v39 = vrot.slane %v10864_v13, 1  ;;  %v1630_v52 = vsel %vm1605_vm3, %v1627_v14, %v16006_v19 }
 0x142   : > { %3145 = vrot.lane.b32.xlu2 %v2828_v16, %s10491_s20  ;;  %2183 = vrot.lane.b32.xlu0 %v1866_v36, %s10492_s21  ;;  %v729_v16 = vpack.c.bf16 %v589_v44, %v588_v56  ;;  %v10326_v44 = vld [vmem:[%s15979_s3] sm:$0xff] }
 0x143   : > { %v1932_v8 = vpop.permute.xlu1 %1931  ;;  %4753 = vmatpush.bf16.msrb.mxu1 %v10326_v44  ;;  %v590_v44 = vld [vmem:[%s10601_s1 + $0x140] sm:$0xff] }
 0x144   : > { %v2408_v29 = vadd.f32 %v1932_v8, %v10733_v45  ;;  %v11125_v1 = vpop.permute.xlu2 %2173  ;;  %v3090_v60 = vpop.permute.xlu0 %3089  ;;  %v1628_v45 = vsel %vm1605_vm3, %v16102_v39, %v1627_v14  ;;  %v2787_v8 = vrot.slane %v11108_v9, 2  ;;  %v16104_v39 = vrot.slane %v11027_v10, 2 }
 0x145   : > { %v3467_v36 = vadd.f32 %v3090_v60, %v2507_v38  ;;  %v11130_v6 = vpop.f32.mrf.mxu0  ;;  %v11155_v14 = vpop.f32.mrf.mxu1 }
 0x146   : > { %v3368_v33 = vadd.f32 %v11005_v35, %v2408_v29  ;;  %16101 = vst [vmem:[#allocation5_spill] sm:$0xff] %v11130_v6  ;;  %v16103_v35 = vrot.slane %v11027_v10, 1  ;;  %v16005_v29 = vrot.slane %v11155_v14, 2 }
 0x147   : > { %v3631_v30 = vadd.f32 %v10964_v43, %v3467_v36 }
 0x148   : > { %v3532_v46 = vadd.f32 %v10964_v43, %v3368_v33  ;;  %9639 = vmatmul.msk.bf16.gmra.mxu0 %vm791_vm1, %v729_v16  ;;  %v1828_v33 = vsel %vm1605_vm3, %v16103_v35, %v16008_v47  ;;  %v11171_v35 = vpop.f32.mrf.mxu2 }
 0x149   : > { %1945 = vrot.lane.b32.xlu1 %v1628_v45, %s10492_s21  ;;  %3792 = vst.msk [vmem:[#allocation2 + $0x330] sm:$0xff] %vm3689_vm4, %v3631_v30  ;;  %v16007_v30 = vrot.slane %v10897_v50, 2  ;;  %v2788_v45 = vsel %vm2565_vm2, %v16104_v39, %v2787_v8  ;;  %v1867_v39 = vrot.slane %v11090_v62, 1 }
 0x14a   : > { %3693 = vst.msk [vmem:[#allocation2 + $0x18] sm:$0xff] %vm3689_vm4, %v3532_v46  ;;  %1947 = vrot.lane.b32.xlu2 %v1630_v52, %s10492_s21  ;;  %2145 = vrot.lane.b32.xlu0 %v1828_v33, %s10492_s21  ;;  %v2790_v52 = vsel %vm2565_vm2, %v2787_v8, %v16005_v29 }
 0x14b   : > { %v3092_v56 = vpop.permute.xlu1 %3091 }
 0x14c   : > { %v11157_v38 = vpop.permute.xlu2 %2895  ;;  %v2170_v60 = vpop.permute.xlu0 %2169 }
 0x14d   : > { %v2527_v16 = vadd.f32 %v2170_v60, %v10741_v49  ;;  %v11162_v36 = vpop.f32.mrf.mxu0  ;;  %v16105_v49 = vrot.slane %v10878_v25, 2  ;;  %v591_v60 = vld [vmem:[%s10601_s1 + $0x148] sm:$0xff] }
 0x14e   : > { %v730_v19 = vpack.c.bf16 %v591_v60, %v590_v44  ;;  %v2409_v60 = vadd.f32 %v11059_v42, %v10753_v57 }
 0x14f   : > { %v3487_v46 = vadd.f32 %v3130_v31, %v2527_v16  ;;  %v2590_v31 = vsel %vm2565_vm2, %v16105_v49, %v16007_v30  ;;  %v16013_v49 = vrot.slane %v11171_v35, 2 }
 0x151   : > { %3105 = vrot.lane.b32.xlu1 %v2788_v45, %s10491_s20  ;;  %v3651_v33 = vadd.f32 %v10964_v43, %v3487_v46  ;;  %v16012_v45 = vrot.slane %v11171_v35, 1 }
 0x152   : > { %3107 = vrot.lane.b32.xlu2 %v2790_v52, %s10491_s20  ;;  %2907 = vrot.lane.b32.xlu0 %v2590_v31, %s10491_s20 }
 0x153   : > { %v2172_v16 = vpop.permute.xlu1 %2171  ;;  %3812 = vst.msk [vmem:[#allocation2 + $0x3d0] sm:$0xff] %vm3689_vm4, %v3651_v33  ;;  %v16106_v33 = vrot.slane %v11056_v51, 1  ;;  %v1870_v44 = vsel %vm1605_vm3, %v1867_v39, %v16012_v45 }
 0x154   : > { %v2528_v8 = vadd.f32 %v2172_v16, %v10774_v5  ;;  %v11186_v46 = vpop.permute.xlu2 %3135  ;;  %v2132_v29 = vpop.permute.xlu0 %2131 }
 0x155   : > { %v2508_v30 = vadd.f32 %v2132_v29, %v10763_v63  ;;  %v11192_v47 = vpop.f32.mrf.mxu0  ;;  %v1868_v5 = vsel %vm1605_vm3, %v16106_v33, %v1867_v39 }
 0x156   : > { %v3488_v52 = vadd.f32 %v11031_v0, %v2528_v8  ;;  %v16107_v0 = vrot.slane %v11090_v62, 2 }
 0x157   : > { %v3468_v11 = vadd.f32 %v3092_v56, %v2508_v30  ;;  %v11213_v30 = vpop.f32.mrf.mxu1 }
 0x158   : > { %v3652_v31 = vadd.f32 %v10964_v43, %v3488_v52  ;;  %9640 = vmatmul.msk.bf16.gmra.mxu0 %vm791_vm1, %v730_v19  ;;  %v2830_v56 = vsel %vm2565_vm2, %v16107_v0, %v16013_v49  ;;  %v1829_v19 = vrot.slane %v11155_v14, 1  ;;  %v16011_v39 = vrot.slane %v11213_v30, 1  ;;  %v3851_v0 = vld [vmem:[#allocation2] ss:$2 sm:$0xff]  ;;  %v3853_v49 = vld [vmem:[#allocation2 + $0x10] ss:$2 sm:$0xff] }
 0x159   : > { %2185 = vrot.lane.b32.xlu1 %v1868_v5, %s10492_s21  ;;  %v3632_v63 = vadd.f32 %v10964_v43, %v3468_v11  ;;  %v1631_v52 = vrot.slane %v10909_v59, 1 }
 0x15a   : > { %3813 = vst.msk [vmem:[#allocation2 + $0x3d8] sm:$0xff] %vm3689_vm4, %v3652_v31  ;;  %2187 = vrot.lane.b32.xlu2 %v1870_v44, %s10492_s21  ;;  %3147 = vrot.lane.b32.xlu0 %v2830_v56, %s10491_s20 }
 0x15b   : > { %v2134_v29 = vpop.permute.xlu1 %2133  ;;  %3793 = vst.msk [vmem:[#allocation2 + $0x338] sm:$0xff] %vm3689_vm4, %v3632_v63  ;;  %v1832_v63 = vsel %vm1605_vm3, %v1829_v19, %v16011_v39  ;;  %v2791_v39 = vrot.slane %v11213_v30, 2 }
 0x15c   : > { %v2509_v11 = vadd.f32 %v2134_v29, %v10812_v32  ;;  %v11219_v16 = vpop.permute.xlu2 %1937  ;;  %v2894_v8 = vpop.permute.xlu0 %2893  ;;  %v16108_v32 = vrot.slane %v11108_v9, 1  ;;  %v592_v29 = vld [vmem:[%s10601_s1 + $0x150] sm:$0xff] }
 0x15d   : > { %v3369_v33 = vadd.f32 %v2894_v8, %v2409_v60  ;;  %v11224_v5 = vpop.f32.mrf.mxu0  ;;  %v593_v60 = vld [vmem:[%s10601_s1 + $0x158] sm:$0xff] }
 0x15e   : > { %v3469_v31 = vadd.f32 %v11092_v55, %v2509_v11  ;;  %v1830_v44 = vsel %vm1605_vm3, %v16108_v32, %v1829_v19  ;;  %v16109_v55 = vrot.slane %v10897_v50, 1  ;;  %v4011_v11 = vld [vmem:[#allocation2 + $0x1] ss:$2 sm:$0xff]  ;;  %v2529_v19 = vadd.f32 %v11125_v1, %v10799_v23 }
 0x15f   : > { %v3533_v42 = vadd.f32 %v10964_v43, %v3369_v33  ;;  %v16015_v32 = vrot.slane %v10929_v24, 1  ;;  %v16110_v1 = vrot.slane %v10909_v59, 2 }
 0x160   : > { %v3633_v57 = vadd.f32 %v10964_v43, %v3469_v31  ;;  %v1632_v56 = vsel %vm1605_vm3, %v16109_v55, %v1631_v52  ;;  %v4330_v55 = vmax.f32 %v3851_v0, %v4011_v11  ;;  %v4013_v31 = vld [vmem:[#allocation2 + $0x11] ss:$2 sm:$0xff]  ;;  %v4171_v0 = vld [vmem:[#allocation2 + $0x2] ss:$2 sm:$0xff] }
 0x161   : > { %2147 = vrot.lane.b32.xlu1 %v1830_v44, %s10492_s21  ;;  %3694 = vst.msk [vmem:[#allocation2 + $0x20] sm:$0xff] %vm3689_vm4, %v3533_v42  ;;  %v4331_v11 = vmax.f32 %v3853_v49, %v4013_v31 }
 0x162   : > { %3794 = vst.msk [vmem:[#allocation2 + $0x340] sm:$0xff] %vm3689_vm4, %v3633_v57  ;;  %2149 = vrot.lane.b32.xlu2 %v1832_v63, %s10492_s21  ;;  %1949 = vrot.lane.b32.xlu0 %v1632_v56, %s10492_s21  ;;  %v731_v63 = vpack.c.bf16 %v593_v60, %v592_v29  ;;  %v11262_v60 = vpop.f32.mrf.mxu1 }
 0x163   : > { %v1936_v8 = vpop.permute.xlu1 %1935  ;;  %v16014_v31 = vrot.slane %v11262_v60, 2 }
 0x164   : > { %v2410_v33 = vadd.f32 %v1936_v8, %v10772_v4  ;;  %v11248_v57 = vpop.permute.xlu2 %3097  ;;  %v3134_v44 = vpop.permute.xlu0 %3133  ;;  %v16111_v8 = vrot.slane %v10897_v50, 2 }
 0x165   : > { %v3489_v45 = vadd.f32 %v3134_v44, %v2529_v19  ;;  %v11253_v56 = vpop.f32.mrf.mxu0  ;;  %v4410_v19 = vmax.f32 %v4330_v55, %v4171_v0 }
 0x166   : > { %v3370_v42 = vadd.f32 %v11157_v38, %v2410_v33  ;;  %v2592_v29 = vsel %vm2565_vm2, %v16111_v8, %v16110_v1  ;;  %v1634_v38 = vsel %vm1605_vm3, %v1631_v52, %v16015_v32  ;;  %v16112_v33 = vrot.slane %v11155_v14, 2 }
 0x167   : > { %v3653_v4 = vadd.f32 %v10964_v43, %v3489_v45  ;;  %v11269_v45 = vpop.f32.mrf.mxu2 }
 0x168   : > { %v3534_v23 = vadd.f32 %v10964_v43, %v3370_v42  ;;  %9641 = vmatmul.msk.bf16.gmra.mxu0 %vm791_vm1, %v731_v63  ;;  %v2792_v44 = vsel %vm2565_vm2, %v16112_v33, %v2791_v39  ;;  %v4173_v42 = vld [vmem:[#allocation2 + $0x12] ss:$2 sm:$0xff]  ;;  %v16017_v49 = vrot.slane %v11269_v45, 2  ;;  %v16113_v33 = vrot.slane %v11171_v35, 2 }
 0x169   : > { %2909 = vrot.lane.b32.xlu1 %v2592_v29, %s10491_s20  ;;  %3814 = vst.msk [vmem:[#allocation2 + $0x3e0] sm:$0xff] %vm3689_vm4, %v3653_v4  ;;  %v4411_v1 = vmax.f32 %v4331_v11, %v4173_v42  ;;  %v16016_v29 = vrot.slane %v11269_v45, 1  ;;  %v594_v42 = vld [vmem:[%s10601_s1 + $0x160] sm:$0xff] }
 0x16a   : > { %3695 = vst.msk [vmem:[#allocation2 + $0x28] sm:$0xff] %vm3689_vm4, %v3534_v23  ;;  %1951 = vrot.lane.b32.xlu2 %v1634_v38, %s10492_s21  ;;  %3109 = vrot.lane.b32.xlu0 %v2792_v44, %s10491_s20  ;;  %v4490_v23 = vmax.f32 %v4410_v19, 0.0  ;;  %v2832_v44 = vsel %vm2565_vm2, %v16113_v33, %v16017_v49  ;;  %v2794_v19 = vsel %vm2565_vm2, %v2791_v39, %v16014_v31  ;;  %v1833_v33 = vrot.slane %v11262_v60, 1 }
 0x16b   : > { %v3096_v63 = vpop.permute.xlu1 %3095  ;;  %v4491_v8 = vmax.f32 %v4411_v1, 0.0 }
 0x16c   : > { %v2178_v52 = vpop.permute.xlu2 %2177  ;;  %v2136_v55 = vpop.permute.xlu0 %2135 }
 0x16d   : > { %v2510_v4 = vadd.f32 %v2136_v55, %v10843_v58  ;;  %v11282_v0 = vpop.f32.mrf.mxu0  ;;  %v4570_v38 = vpack.c.bf16 %v4491_v8, %v4490_v23  ;;  %v595_v55 = vld [vmem:[%s10601_s1 + $0x168] sm:$0xff]  ;;  %v694_v23 = vld [vmem:[%s10601_s1 + $0x480] sm:$0xff] }
 0x16e   : > { %v695_v8 = vld [vmem:[%s10601_s1 + $0x488] sm:$0xff] }
 0x16f   : > { %v3470_v11 = vadd.f32 %v3096_v63, %v2510_v4  ;;  %9708 = vmatmul.msk.bf16.vlgmr.msrb.gmra.mxu1 %vm3689_vm4, %v4570_v38  ;;  %v16114_v63 = vrot.slane %v11171_v35, 1  ;;  %v11305_v4 = vpop.f32.mrf.mxu1  ;;  %v782_v39 = vpack.c.bf16 %v695_v8, %v694_v23 }
 0x170   : > { %16115 = vst [vmem:[#allocation6_spill] sm:$0xff] %v11305_v4  ;;  %v16021_v31 = vrot.slane %v11305_v4, 1 }
 0x171   : > { %3149 = vrot.lane.b32.xlu1 %v2832_v44, %s10491_s20  ;;  %v3634_v58 = vadd.f32 %v10964_v43, %v3470_v11  ;;  %v1872_v1 = vsel %vm1605_vm3, %v16114_v63, %v16016_v29  ;;  %v11309_v11 = vpop.f32.mrf.mxu2  ;;  %v2411_v44 = vadd.f32 %v11219_v16, %v10791_v21  ;;  %v732_v29 = vpack.c.bf16 %v595_v55, %v594_v42 }
 0x172   : > { %3111 = vrot.lane.b32.xlu2 %v2794_v19, %s10491_s20  ;;  %2189 = vrot.lane.b32.xlu0 %v1872_v1, %s10492_s21  ;;  %v2593_v1 = vrot.slane %v10929_v24, 2  ;;  %v1836_v42 = vsel %vm1605_vm3, %v1833_v33, %v16021_v31 }
 0x173   : > { %v2176_v38 = vpop.permute.xlu1 %2175  ;;  %3795 = vst.msk [vmem:[#allocation2 + $0x348] sm:$0xff] %vm3689_vm4, %v3634_v58  ;;  %9692 = vmatmul.msk.bf16.gmra.mxu3 %vm791_vm1, %v782_v39 }
 0x174   : > { %v2530_v19 = vadd.f32 %v2176_v38, %v10860_v7  ;;  %v11315_v63 = vpop.permute.xlu2 %2139  ;;  %v2898_v32 = vpop.permute.xlu0 %2897  ;;  %v16117_v7 = vrot.slane %v11213_v30, 1  ;;  %v2833_v38 = vrot.slane %v11309_v11, 2 }
 0x175   : > { %v3371_v8 = vadd.f32 %v2898_v32, %v2411_v44  ;;  %v11321_v49 = vpop.f32.mrf.mxu0 }
 0x176   : > { %v3490_v23 = vadd.f32 %v11186_v46, %v2530_v19  ;;  %16116 = vst [vmem:[#allocation7_spill] sm:$0xff] %v11321_v49  ;;  %v1834_v58 = vsel %vm1605_vm3, %v16117_v7, %v1833_v33  ;;  %v16118_v46 = vrot.slane %v10909_v59, 2  ;;  %v16128_v49 = vrot.slane %v10968_v22, 2 }
 0x177   : > { %v3535_v16 = vadd.f32 %v10964_v43, %v3371_v8  ;;  %v1873_v8 = vrot.slane %v11309_v11, 1 }
 0x178   : > { %v3654_v21 = vadd.f32 %v10964_v43, %v3490_v23  ;;  %9642 = vmatmul.msk.bf16.gmra.mxu0 %vm791_vm1, %v732_v29  ;;  %v2594_v32 = vsel %vm2565_vm2, %v16118_v46, %v2593_v1  ;;  %v2531_v29 = vadd.f32 %v2178_v52, %v10883_v34  ;;  %v596_v46 = vld [vmem:[%s10601_s1 + $0x170] sm:$0xff] }
 0x179   : > { %2151 = vrot.lane.b32.xlu1 %v1834_v58, %s10492_s21  ;;  %3696 = vst.msk [vmem:[#allocation2 + $0x30] sm:$0xff] %vm3689_vm4, %v3535_v16  ;;  %v11342_v39 = vpop.f32.mrf.mxu2 }
 0x17a   : > { %3815 = vst.msk [vmem:[#allocation2 + $0x3e8] sm:$0xff] %vm3689_vm4, %v3654_v21  ;;  %2153 = vrot.lane.b32.xlu2 %v1836_v42, %s10492_s21  ;;  %2911 = vrot.lane.b32.xlu0 %v2594_v32, %s10491_s20  ;;  %v16018_v19 = vrot.slane %v11342_v39, 2 }
 0x17b   : > { %v2138_v55 = vpop.permute.xlu1 %2137 }
 0x17c   : > { %v2511_v33 = vadd.f32 %v2138_v55, %v10891_v40  ;;  %v11345_v44 = vpop.permute.xlu2 %2901  ;;  %v3138_v23 = vpop.permute.xlu0 %3137  ;;  %v16120_v40 = vrot.slane %v11269_v45, 2  ;;  %v2836_v42 = vsel %vm2565_vm2, %v2833_v38, %v16018_v19  ;;  %v597_v55 = vld [vmem:[%s10601_s1 + $0x178] sm:$0xff] }
 0x17d   : > { %v3491_v16 = vadd.f32 %v3138_v23, %v2531_v29  ;;  %v11350_v7 = vpop.f32.mrf.mxu0  ;;  %v696_v29 = vld [vmem:[%s10601_s1 + $0x490] sm:$0xff] }
 0x17e   : > { %v3471_v21 = vadd.f32 %v11248_v57, %v2511_v33  ;;  %16119 = vst [vmem:[#allocation8_spill] sm:$0xff] %v11350_v7  ;;  %v2834_v58 = vsel %vm2565_vm2, %v16120_v40, %v2833_v38  ;;  %v16121_v57 = vrot.slane %v11269_v45, 1  ;;  %v697_v33 = vld [vmem:[%s10601_s1 + $0x498] sm:$0xff]  ;;  %v2595_v38 = vrot.slane %v10943_v26, 2 }
 0x17f   : > { %v3655_v52 = vadd.f32 %v10964_v43, %v3491_v16 }
 0x180   : > { %v3635_v34 = vadd.f32 %v10964_v43, %v3471_v21  ;;  %v1874_v32 = vsel %vm1605_vm3, %v16121_v57, %v1873_v8  ;;  %v783_v21 = vpack.c.bf16 %v697_v33, %v696_v29  ;;  %v16123_v33 = vrot.slane %v10929_v24, 1 }
 0x181   : > { %3151 = vrot.lane.b32.xlu1 %v2834_v58, %s10491_s20  ;;  %3816 = vst.msk [vmem:[#allocation2 + $0x3f0] sm:$0xff] %vm3689_vm4, %v3655_v52  ;;  %v733_v58 = vpack.c.bf16 %v597_v55, %v596_v46  ;;  %v11387_v46 = vpop.f32.mrf.mxu2 }
 0x182   : > { %3796 = vst.msk [vmem:[#allocation2 + $0x350] sm:$0xff] %vm3689_vm4, %v3635_v34  ;;  %3153 = vrot.lane.b32.xlu2 %v2836_v42, %s10491_s20  ;;  %2191 = vrot.lane.b32.xlu0 %v1874_v32, %s10492_s21  ;;  %v16019_v34 = vrot.slane %v10968_v22, 2  ;;  %v1635_v42 = vrot.slane %v10943_v26, 1  ;;  %v2596_v32 = vsel %vm2565_vm2, %v2593_v1, %v2595_v38  ;;  %v1875_v1 = vrot.slane %v11342_v39, 1 }
 0x183   : > { %v2900_v23 = vpop.permute.xlu1 %2899  ;;  %9693 = vmatmul.msk.bf16.gmra.mxu3 %vm791_vm1, %v783_v21  ;;  %v2512_v21 = vadd.f32 %v11315_v63, %v10921_v12  ;;  %v16125_v63 = vrot.slane %v11262_v60, 2 }
 0x184   : > { %v11373_v16 = vpop.permute.xlu2 %3141  ;;  %v1940_v40 = vpop.permute.xlu0 %1939  ;;  %v2598_v29 = vsel %vm2565_vm2, %v2595_v38, %v16019_v34 }
 0x185   : > { %v2412_v57 = vadd.f32 %v1940_v40, %v10809_v28  ;;  %v11379_v19 = vpop.f32.mrf.mxu0  ;;  %v1636_v28 = vsel %vm1605_vm3, %v16123_v33, %v1635_v42  ;;  %v16020_v40 = vrot.slane %v11387_v46, 1  ;;  %v1876_v33 = vsel %vm1605_vm3, %v1873_v8, %v1875_v1 }
 0x186   : > { %16122 = vst [vmem:[#allocation9_spill] sm:$0xff] %v11379_v19  ;;  %v1637_v8 = vrot.slane %v10968_v22, 1 }
 0x187   : > { %v3372_v52 = vadd.f32 %v2900_v23, %v2412_v57  ;;  %v2795_v57 = vrot.slane %v11305_v4, 2  ;;  %v1878_v12 = vsel %vm1605_vm3, %v1875_v1, %v16020_v40  ;;  %v16025_v1 = vrot.slane %v10985_v2, 1 }
 0x188   : > { %9643 = vmatmul.msk.bf16.gmra.mxu0 %vm791_vm1, %v733_v58  ;;  %v1638_v7 = vsel %vm1605_vm3, %v1635_v42, %v1637_v8 }
 0x189   : > { %2913 = vrot.lane.b32.xlu1 %v2596_v32, %s10491_s20  ;;  %v3536_v55 = vadd.f32 %v10964_v43, %v3372_v52 }
 0x18a   : > { %2915 = vrot.lane.b32.xlu2 %v2598_v29, %s10491_s20  ;;  %1953 = vrot.lane.b32.xlu0 %v1636_v28, %s10492_s21  ;;  %v11407_v28 = vpop.f32.mrf.mxu1 }
 0x18b   : > { %v3140_v23 = vpop.permute.xlu1 %3139  ;;  %3697 = vst.msk [vmem:[#allocation2 + $0x38] sm:$0xff] %vm3689_vm4, %v3536_v55  ;;  %v2796_v55 = vsel %vm2565_vm2, %v16125_v63, %v2795_v57  ;;  %v16026_v31 = vrot.slane %v11407_v28, 1 }
 0x18c   : > { %v11399_v38 = vpop.permute.xlu2 %2143  ;;  %v3100_v58 = vpop.permute.xlu0 %3099 }
 0x18d   : > { %v3472_v52 = vadd.f32 %v3100_v58, %v2512_v21  ;;  %v11403_v32 = vpop.f32.mrf.mxu0  ;;  %v598_v21 = vld [vmem:[%s10601_s1 + $0x180] sm:$0xff]  ;;  %v599_v58 = vld [vmem:[%s10601_s1 + $0x188] sm:$0xff] }
 0x18e   : > { %16124 = vst [vmem:[#allocation10_spill] sm:$0xff] %v11403_v32  ;;  %v734_v40 = vpack.c.bf16 %v599_v58, %v598_v21  ;;  %v4015_v21 = vld [vmem:[#allocation2 + $0x21] ss:$2 sm:$0xff]  ;;  %v2797_v58 = vrot.slane %v11407_v28, 2 }
 0x18f   : > { %v3636_v29 = vadd.f32 %v10964_v43, %v3472_v52 }
 0x191   : > { %2193 = vrot.lane.b32.xlu1 %v1876_v33, %s10492_s21  ;;  %3797 = vst.msk [vmem:[#allocation2 + $0x358] sm:$0xff] %vm3689_vm4, %v3636_v29 }
 0x192   : > { %2195 = vrot.lane.b32.xlu2 %v1878_v12, %s10492_s21  ;;  %3113 = vrot.lane.b32.xlu0 %v2796_v55, %s10491_s20  ;;  %v11446_v42 = vpop.f32.mrf.mxu1 }
 0x193   : > { %v1942_v52 = vpop.permute.xlu1 %1941 }
 0x194   : > { %v2413_v33 = vadd.f32 %v1942_v52, %v10828_v48  ;;  %v11423_v34 = vpop.permute.xlu2 %2905  ;;  %v2180_v29 = vpop.permute.xlu0 %2179  ;;  %v1640_v48 = vsel %vm1605_vm3, %v1637_v8, %v16025_v1  ;;  %v2799_v52 = vrot.slane %v11446_v42, 2  ;;  %v2798_v1 = vsel %vm2565_vm2, %v2795_v57, %v2797_v58  ;;  %v601_v57 = vld [vmem:[%s10601_s1 + $0x198] sm:$0xff] }
 0x195   : > { %v2532_v12 = vadd.f32 %v2180_v29, %v10926_v18  ;;  %v11429_v32 = vpop.f32.mrf.mxu0  ;;  %v16127_v18 = vrot.slane %v11305_v4, 1  ;;  %v4017_v29 = vld [vmem:[#allocation2 + $0x31] ss:$2 sm:$0xff] }
 0x196   : > { %v3373_v63 = vadd.f32 %v11345_v44, %v2413_v33  ;;  %16126 = vst [vmem:[#allocation11_spill] sm:$0xff] %v11429_v32  ;;  %v3857_v33 = vld [vmem:[#allocation2 + $0x30] ss:$2 sm:$0xff]  ;;  %v2800_v32 = vsel %vm2565_vm2, %v2797_v58, %v2799_v52 }
 0x197   : > { %v3492_v19 = vadd.f32 %v3140_v23, %v2532_v12  ;;  %v1838_v23 = vsel %vm1605_vm3, %v16127_v18, %v16026_v31  ;;  %v2599_v12 = vrot.slane %v10985_v2, 2  ;;  %v4333_v31 = vmax.f32 %v3857_v33, %v4017_v29 }
 0x198   : > { %v3537_v55 = vadd.f32 %v10964_v43, %v3373_v63  ;;  %9644 = vmatmul.msk.bf16.gmra.mxu0 %vm791_vm1, %v734_v40  ;;  %v3855_v40 = vld [vmem:[#allocation2 + $0x20] ss:$2 sm:$0xff] }
 0x199   : > { %1955 = vrot.lane.b32.xlu1 %v1638_v7, %s10492_s21  ;;  %v3656_v44 = vadd.f32 %v10964_v43, %v3492_v19  ;;  %v4175_v63 = vld [vmem:[#allocation2 + $0x22] ss:$2 sm:$0xff]  ;;  %v4332_v18 = vmax.f32 %v3855_v40, %v4015_v21 }
 0x19a   : > { %3698 = vst.msk [vmem:[#allocation2 + $0x40] sm:$0xff] %vm3689_vm4, %v3537_v55  ;;  %1957 = vrot.lane.b32.xlu2 %v1640_v48, %s10492_s21  ;;  %2155 = vrot.lane.b32.xlu0 %v1838_v23, %s10492_s21  ;;  %v600_v40 = vld [vmem:[%s10601_s1 + $0x190] sm:$0xff] }
 0x19b   : > { %v3102_v7 = vpop.permute.xlu1 %3101  ;;  %3817 = vst.msk [vmem:[#allocation2 + $0x3f8] sm:$0xff] %vm3689_vm4, %v3656_v44  ;;  %v4412_v44 = vmax.f32 %v4332_v18, %v4175_v63  ;;  %v11477_v63 = vpop.f32.mrf.mxu2 }
 0x19c   : > { %v11452_v19 = vpop.permute.xlu2 %3145  ;;  %v2142_v8 = vpop.permute.xlu0 %2141 }
 0x19d   : > { %v2513_v55 = vadd.f32 %v2142_v8, %v10954_v54  ;;  %v11456_v48 = vpop.f32.mrf.mxu0  ;;  %v2600_v54 = vsel %vm2565_vm2, %v16128_v49, %v2599_v12  ;;  %v4492_v33 = vmax.f32 %v4412_v44, 0.0  ;;  %v2601_v49 = vrot.slane %v11011_v37, 2 }
 0x19e   : > { %v16129_v44 = vrot.slane %v11407_v28, 1 }
 0x19f   : > { %v3473_v23 = vadd.f32 %v3102_v7, %v2513_v55 }
 0x1a1   : > { %3115 = vrot.lane.b32.xlu1 %v2798_v1, %s10491_s20  ;;  %v4177_v4 = vld [vmem:[#allocation2 + $0x32] ss:$2 sm:$0xff]  ;;  %v3637_v26 = vadd.f32 %v10964_v43, %v3473_v23  ;;  %v1839_v1 = vrot.slane %v11446_v42, 1 }
 0x1a2   : > { %3117 = vrot.lane.b32.xlu2 %v2800_v32, %s10491_s20  ;;  %v4413_v7 = vmax.f32 %v4333_v31, %v4177_v4  ;;  %2917 = vrot.lane.b32.xlu0 %v2600_v54, %s10491_s20  ;;  %v735_v4 = vpack.c.bf16 %v601_v57, %v600_v40  ;;  %v16032_v32 = vrot.slane %v11477_v63, 1  ;;  %v16130_v40 = vrot.slane %v11387_v46, 1 }
 0x1a3   : > { %v2182_v21 = vpop.permute.xlu1 %2181  ;;  %3798 = vst.msk [vmem:[#allocation2 + $0x360] sm:$0xff] %vm3689_vm4, %v3637_v26  ;;  %v11483_v26 = vpop.f32.mrf.mxu1  ;;  %v1840_v54 = vsel %vm1605_vm3, %v16129_v44, %v1839_v1 }
 0x1a4   : > { %v2533_v58 = vadd.f32 %v2182_v21, %v10946_v41  ;;  %v11474_v8 = vpop.permute.xlu2 %1947  ;;  %v4493_v29 = vmax.f32 %v4413_v7, 0.0  ;;  %v1944_v31 = vpop.permute.xlu0 %1943  ;;  %v2602_v7 = vsel %vm2565_vm2, %v2599_v12, %v2601_v49  ;;  %v1880_v57 = vsel %vm1605_vm3, %v16130_v40, %v16032_v32  ;;  %v602_v40 = vld [vmem:[%s10601_s1 + $0x1a0] sm:$0xff] }
 0x1a5   : > { %v11481_v18 = vpop.f32.mrf.mxu0  ;;  %v2514_v12 = vadd.f32 %v11399_v38, %v10993_v27  ;;  %v16131_v27 = vrot.slane %v10985_v2, 1 }
 0x1a6   : > { %v3493_v55 = vadd.f32 %v11373_v16, %v2533_v58  ;;  %v4571_v23 = vpack.c.bf16 %v4493_v29, %v4492_v33  ;;  %v2414_v16 = vadd.f32 %v1944_v31, %v10847_v61  ;;  %v1641_v58 = vrot.slane %v11011_v37, 1 }
 0x1a7   : > { %v1643_v61 = vrot.slane %v11035_v17, 1 }
 0x1a8   : > { %v3657_v41 = vadd.f32 %v10964_v43, %v3493_v55  ;;  %9709 = vmatmul.msk.bf16.gmra.mxu1 %vm3689_vm4, %v4571_v23  ;;  %9645 = vmatmul.msk.bf16.gmra.mxu0 %vm791_vm1, %v735_v4  ;;  %v1841_v4 = vrot.slane %v11483_v26, 1  ;;  %v1642_v38 = vsel %vm1605_vm3, %v16131_v27, %v1641_v58 }
 0x1a9   : > { %2157 = vrot.lane.b32.xlu1 %v1840_v54, %s10492_s21  ;;  %v1644_v54 = vsel %vm1605_vm3, %v1641_v58, %v1643_v61 }
 0x1aa   : > { %3818 = vst.msk [vmem:[#allocation2 + $0x400] sm:$0xff] %vm3689_vm4, %v3657_v41  ;;  %2919 = vrot.lane.b32.xlu2 %v2602_v7, %s10491_s20  ;;  %2197 = vrot.lane.b32.xlu0 %v1880_v57, %s10492_s21  ;;  %v603_v57 = vld [vmem:[%s10601_s1 + $0x1a8] sm:$0xff] }
 0x1ab   : > { %v2904_v21 = vpop.permute.xlu1 %2903  ;;  %v11521_v7 = vpop.f32.mrf.mxu1 }
 0x1ac   : > { %v3374_v33 = vadd.f32 %v2904_v21, %v2414_v16  ;;  %v11505_v29 = vpop.permute.xlu2 %3107  ;;  %v3104_v31 = vpop.permute.xlu0 %3103  ;;  %v1842_v16 = vsel %vm1605_vm3, %v1839_v1, %v1841_v4 }
 0x1ad   : > { %v3474_v23 = vadd.f32 %v3104_v31, %v2514_v12  ;;  %v11510_v41 = vpop.f32.mrf.mxu0  ;;  %v2801_v12 = vrot.slane %v11483_v26, 2  ;;  %v1843_v31 = vrot.slane %v11521_v7, 1 }
 0x1ae   : > { %v3538_v55 = vadd.f32 %v10964_v43, %v3374_v33 }
 0x1af   : > { %v3638_v44 = vadd.f32 %v10964_v43, %v3474_v23  ;;  %v2603_v23 = vrot.slane %v11035_v17, 2 }
 0x1b0   : > { %3699 = vst.msk [vmem:[#allocation2 + $0x48] sm:$0xff] %vm3689_vm4, %v3538_v55  ;;  %v736_v55 = vpack.c.bf16 %v603_v57, %v602_v40 }
 0x1b1   : > { %1959 = vrot.lane.b32.xlu1 %v1642_v38, %s10492_s21  ;;  %3799 = vst.msk [vmem:[#allocation2 + $0x368] sm:$0xff] %vm3689_vm4, %v3638_v44  ;;  %v2802_v38 = vsel %vm2565_vm2, %v2799_v52, %v2801_v12 }
 0x1b2   : > { %1961 = vrot.lane.b32.xlu2 %v1644_v54, %s10492_s21  ;;  %2159 = vrot.lane.b32.xlu0 %v1842_v16, %s10492_s21  ;;  %v16132_v54 = vrot.slane %v10682_v15, 1 }
 0x1b3   : > { %v3144_v21 = vpop.permute.xlu1 %3143 }
 0x1b4   : > { %v11530_v33 = vpop.permute.xlu2 %2187  ;;  %v2184_v58 = vpop.permute.xlu0 %2183  ;;  %v1846_v16 = vsel %vm1605_vm3, %v1843_v31, %v16132_v54  ;;  %v1844_v54 = vsel %vm1605_vm3, %v1841_v4, %v1843_v31  ;;  %v2416_v4 = vadd.f32 %v11474_v8, %v10878_v25  ;;  %v2605_v8 = vrot.slane %v11064_v3, 2 }
 0x1b5   : > { %v2534_v44 = vadd.f32 %v2184_v58, %v11002_v20  ;;  %v11535_v1 = vpop.f32.mrf.mxu0  ;;  %v2604_v20 = vsel %vm2565_vm2, %v2601_v49, %v2603_v23  ;;  %v11559_v49 = vpop.f32.mrf.mxu2 }
 0x1b7   : > { %v3494_v27 = vadd.f32 %v3144_v21, %v2534_v44 }
 0x1b8   : > { %9646 = vmatmul.msk.bf16.gmra.mxu0 %vm791_vm1, %v736_v55  ;;  %v2803_v55 = vrot.slane %v11521_v7, 2 }
 0x1b9   : > { %3119 = vrot.lane.b32.xlu1 %v2802_v38, %s10491_s20  ;;  %v3658_v40 = vadd.f32 %v10964_v43, %v3494_v27 }
 0x1ba   : > { %2163 = vrot.lane.b32.xlu2 %v1846_v16, %s10492_s21  ;;  %2921 = vrot.lane.b32.xlu0 %v2604_v20, %s10491_s20  ;;  %v604_v20 = vld [vmem:[%s10601_s1 + $0x1b0] sm:$0xff] }
 0x1bb   : > { %v1946_v57 = vpop.permute.xlu1 %1945  ;;  %3819 = vst.msk [vmem:[#allocation2 + $0x408] sm:$0xff] %vm3689_vm4, %v3658_v40  ;;  %v16133_v40 = vrot.slane %v10682_v15, 2 }
 0x1bc   : > { %v2415_v52 = vadd.f32 %v1946_v57, %v10864_v13  ;;  %v11553_v21 = vpop.permute.xlu2 %2149  ;;  %v2146_v58 = vpop.permute.xlu0 %2145  ;;  %v2804_v13 = vsel %vm2565_vm2, %v2801_v12, %v2803_v55  ;;  %v605_v57 = vld [vmem:[%s10601_s1 + $0x1b8] sm:$0xff] }
 0x1bd   : > { %v11557_v27 = vpop.f32.mrf.mxu0  ;;  %v2515_v16 = vadd.f32 %v2146_v58, %v11027_v10  ;;  %v2607_v10 = vrot.slane %v11096_v53, 2  ;;  %v737_v58 = vpack.c.bf16 %v605_v57, %v604_v20 }
 0x1be   : > { %v3375_v44 = vadd.f32 %v11423_v34, %v2415_v52  ;;  %v2806_v34 = vsel %vm2565_vm2, %v2803_v55, %v16133_v40  ;;  %v1645_v55 = vrot.slane %v11064_v3, 1 }
 0x1bf   : > { %v2608_v20 = vsel %vm2565_vm2, %v2605_v8, %v2607_v10 }
 0x1c0   : > { %v3539_v38 = vadd.f32 %v10964_v43, %v3375_v44  ;;  %v16036_v43 = vrot.slane %v11477_v63, 2  ;;  %v2837_v44 = vrot.slane %v11387_v46, 2  ;;  %v1646_v57 = vsel %vm1605_vm3, %v1643_v61, %v1645_v55 }
 0x1c1   : > { %2161 = vrot.lane.b32.xlu1 %v1844_v54, %s10492_s21 }
 0x1c2   : > { %3700 = vst.msk [vmem:[#allocation2 + $0x50] sm:$0xff] %vm3689_vm4, %v3539_v38  ;;  %3121 = vrot.lane.b32.xlu2 %v2804_v13, %s10491_s20  ;;  %3123 = vrot.lane.b32.xlu0 %v2806_v34, %s10491_s20  ;;  %v11585_v38 = vld [vmem:[%s15978_s2] ss:$0 sm:$0xff]  ;;  %v2840_v40 = vsel %vm2565_vm2, %v2837_v44, %v16036_v43  ;;  %v11596_v34 = vpop.f32.mrf.mxu2 }
 0x1c3   : > { %v3106_v52 = vpop.permute.xlu1 %3105  ;;  %16134 = vst [vmem:[#allocation12_spill] sm:$0xff] %v11596_v34 }
 0x1c4   : > { %v3475_v12 = vadd.f32 %v3106_v52, %v2515_v16  ;;  %v11577_v31 = vpop.permute.xlu2 %1951  ;;  %v2908_v15 = vpop.permute.xlu0 %2907 }
 0x1c5   : > { %v3376_v13 = vadd.f32 %v2908_v15, %v2416_v4  ;;  %v11588_v25 = vpop.f32.mrf.mxu0  ;;  %v1883_v4 = vrot.slane %v11596_v34, 1 }
 0x1c6   : > { %v3639_v54 = vadd.f32 %v11585_v38, %v3475_v12  ;;  %v2536_v12 = vadd.f32 %v11530_v33, %v11090_v62 }
 0x1c7   : > { %v3540_v16 = vadd.f32 %v11585_v38, %v3376_v13 }
 0x1c8   : > { %3800 = vst.msk [vmem:[#allocation2 + $0x370] sm:$0xff] %vm3689_vm4, %v3639_v54  ;;  %9647 = vmatmul.msk.bf16.gmra.mxu0 %vm791_vm1, %v737_v58  ;;  %v16033_v54 = vrot.slane %v11559_v49, 1 }
 0x1c9   : > { %3157 = vrot.lane.b32.xlu1 %v2840_v40, %s10491_s20  ;;  %3701 = vst.msk [vmem:[#allocation2 + $0x58] sm:$0xff] %vm3689_vm4, %v3540_v16 }
 0x1ca   : > { %2925 = vrot.lane.b32.xlu2 %v2608_v20, %s10491_s20  ;;  %1963 = vrot.lane.b32.xlu0 %v1646_v57, %s10492_s21  ;;  %v1884_v62 = vsel %vm1605_vm3, %v16033_v54, %v1883_v4  ;;  %v2606_v20 = vsel %vm2565_vm2, %v2603_v23, %v2605_v8 }
 0x1cb   : > { %v2186_v52 = vpop.permute.xlu1 %2185 }
 0x1cc   : > { %v2535_v15 = vadd.f32 %v2186_v52, %v11056_v51  ;;  %v11613_v58 = vpop.permute.xlu2 %3111  ;;  %v3148_v13 = vpop.permute.xlu0 %3147  ;;  %v606_v52 = vld [vmem:[%s10601_s1 + $0x1c0] sm:$0xff] }
 0x1cd   : > { %v3496_v16 = vadd.f32 %v3148_v13, %v2536_v12  ;;  %v11617_v40 = vpop.f32.mrf.mxu0  ;;  %v607_v12 = vld [vmem:[%s10601_s1 + $0x1c8] sm:$0xff]  ;;  %v1647_v13 = vrot.slane %v11096_v53, 1 }
 0x1ce   : > { %v3495_v61 = vadd.f32 %v11452_v19, %v2535_v15  ;;  %v16135_v19 = vrot.slane %v11342_v39, 2 }
 0x1cf   : > { %v3660_v51 = vadd.f32 %v11585_v38, %v3496_v16 }
 0x1d0   : > { %v3659_v33 = vadd.f32 %v11585_v38, %v3495_v61  ;;  %v2838_v57 = vsel %vm2565_vm2, %v16135_v19, %v2837_v44  ;;  %v16034_v61 = vrot.slane %v11162_v36, 2  ;;  %v1649_v44 = vrot.slane %v11130_v6, 1 }
 0x1d1   : > { %2923 = vrot.lane.b32.xlu1 %v2606_v20, %s10491_s20  ;;  %3821 = vst.msk [vmem:[#allocation2 + $0x418] sm:$0xff] %vm3689_vm4, %v3660_v51  ;;  %v2609_v51 = vrot.slane %v11130_v6, 2 }
 0x1d2   : > { %3820 = vst.msk [vmem:[#allocation2 + $0x410] sm:$0xff] %vm3689_vm4, %v3659_v33  ;;  %2201 = vrot.lane.b32.xlu2 %v1884_v62, %s10492_s21  ;;  %3155 = vrot.lane.b32.xlu0 %v2838_v57, %s10491_s20  ;;  %v738_v33 = vpack.c.bf16 %v607_v12, %v606_v52  ;;  %v1648_v57 = vsel %vm1605_vm3, %v1645_v55, %v1647_v13 }
 0x1d3   : > { %v2148_v15 = vpop.permute.xlu1 %2147  ;;  %v1650_v52 = vsel %vm1605_vm3, %v1647_v13, %v1649_v44  ;;  %v2517_v55 = vadd.f32 %v11553_v21, %v11155_v14  ;;  %v2610_v21 = vsel %vm2565_vm2, %v2607_v10, %v2609_v51  ;;  %v609_v10 = vld [vmem:[%s10601_s1 + $0x1d8] sm:$0xff] }
 0x1d4   : > { %v2516_v23 = vadd.f32 %v2148_v15, %v11108_v9  ;;  %v11641_v8 = vpop.permute.xlu2 %2153  ;;  %v1950_v16 = vpop.permute.xlu0 %1949  ;;  %v2612_v9 = vsel %vm2565_vm2, %v2609_v51, %v16034_v61  ;;  %v2613_v61 = vrot.slane %v11192_v47, 2 }
 0x1d5   : > { %v11646_v20 = vpop.f32.mrf.mxu0 }
 0x1d6   : > { %v3476_v62 = vadd.f32 %v11505_v29, %v2516_v23  ;;  %16136 = vst [vmem:[#allocation13_spill] sm:$0xff] %v11646_v20  ;;  %v2417_v29 = vadd.f32 %v1950_v16, %v10897_v50 }
 0x1d8   : > { %v3640_v19 = vadd.f32 %v11585_v38, %v3476_v62  ;;  %9648 = vmatmul.msk.bf16.gmra.mxu0 %vm791_vm1, %v738_v33  ;;  %v1651_v33 = vrot.slane %v11162_v36, 1  ;;  %v16031_v62 = vrot.slane %v11192_v47, 1 }
 0x1d9   : > { %1965 = vrot.lane.b32.xlu1 %v1648_v57, %s10492_s21 }
 0x1da   : > { %3801 = vst.msk [vmem:[#allocation2 + $0x378] sm:$0xff] %vm3689_vm4, %v3640_v19  ;;  %2929 = vrot.lane.b32.xlu2 %v2612_v9, %s10491_s20  ;;  %1967 = vrot.lane.b32.xlu0 %v1650_v52, %s10492_s21  ;;  %v11667_v19 = vpop.f32.mrf.mxu3  ;;  %v3859_v52 = vld [vmem:[#allocation2 + $0x40] ss:$2 sm:$0xff]  ;;  %v1652_v6 = vsel %vm1605_vm3, %v1649_v44, %v1651_v33 }
 0x1db   : > { %v2910_v12 = vpop.permute.xlu1 %2909  ;;  %v16035_v13 = vrot.slane %v11667_v19, 1 }
 0x1dc   : > { %v3377_v15 = vadd.f32 %v2910_v12, %v2417_v29  ;;  %v11663_v23 = vpop.permute.xlu2 %3153  ;;  %v3110_v50 = vpop.permute.xlu0 %3109  ;;  %v1654_v29 = vsel %vm1605_vm3, %v1651_v33, %v16031_v62  ;;  %v4019_v12 = vld [vmem:[#allocation2 + $0x41] ss:$2 sm:$0xff] }
 0x1dd   : > { %v3477_v57 = vadd.f32 %v3110_v50, %v2517_v55  ;;  %v11671_v9 = vpop.f32.mrf.mxu0  ;;  %v1886_v55 = vsel %vm1605_vm3, %v1883_v4, %v16035_v13  ;;  %v3861_v50 = vld [vmem:[#allocation2 + $0x50] ss:$2 sm:$0xff]  ;;  %v4334_v62 = vmax.f32 %v3859_v52, %v4019_v12  ;;  %v16138_v52 = vrot.slane %v11477_v63, 2 }
 0x1de   : > { %v3541_v16 = vadd.f32 %v11585_v38, %v3377_v15  ;;  %16137 = vst [vmem:[#allocation14_spill] sm:$0xff] %v11671_v9  ;;  %v608_v15 = vld [vmem:[%s10601_s1 + $0x1d0] sm:$0xff] }
 0x1df   : > { %v3641_v14 = vadd.f32 %v11585_v38, %v3477_v57  ;;  %v4179_v57 = vld [vmem:[#allocation2 + $0x42] ss:$2 sm:$0xff]  ;;  %v739_v54 = vpack.c.bf16 %v609_v10, %v608_v15  ;;  %v1655_v10 = vrot.slane %v11224_v5, 1 }
 0x1e0   : > { %3702 = vst.msk [vmem:[#allocation2 + $0x60] sm:$0xff] %vm3689_vm4, %v3541_v16  ;;  %v4021_v16 = vld [vmem:[#allocation2 + $0x51] ss:$2 sm:$0xff]  ;;  %v4414_v43 = vmax.f32 %v4334_v62, %v4179_v57  ;;  %v16140_v57 = vrot.slane %v11559_v49, 1 }
 0x1e1   : > { %2927 = vrot.lane.b32.xlu1 %v2610_v21, %s10491_s20  ;;  %3802 = vst.msk [vmem:[#allocation2 + $0x380] sm:$0xff] %vm3689_vm4, %v3641_v14  ;;  %v2841_v14 = vrot.slane %v11559_v49, 2  ;;  %v4335_v13 = vmax.f32 %v3861_v50, %v4021_v16 }
 0x1e2   : > { %1971 = vrot.lane.b32.xlu2 %v1654_v29, %s10492_s21  ;;  %2203 = vrot.lane.b32.xlu0 %v1886_v55, %s10492_s21  ;;  %v4494_v44 = vmax.f32 %v4414_v43, 0.0 }
 0x1e3   : > { %v3150_v51 = vpop.permute.xlu1 %3149  ;;  %v2842_v12 = vsel %vm2565_vm2, %v16138_v52, %v2841_v14  ;;  %v16142_v52 = vrot.slane %v11192_v47, 1 }
 0x1e4   : > { %v11692_v21 = vpop.permute.xlu2 %2915  ;;  %v2190_v32 = vpop.permute.xlu0 %2189 }
 0x1e5   : > { %v2537_v4 = vadd.f32 %v2190_v32, %v11171_v35  ;;  %v11697_v29 = vpop.f32.mrf.mxu0  ;;  %v16139_v32 = vrot.slane %v11162_v36, 2 }
 0x1e7   : > { %v4181_v9 = vld [vmem:[#allocation2 + $0x52] ss:$2 sm:$0xff]  ;;  %v3497_v55 = vadd.f32 %v3150_v51, %v2537_v4  ;;  %v2614_v62 = vsel %vm2565_vm2, %v16139_v32, %v2613_v61  ;;  %v1657_v51 = vrot.slane %v11253_v56, 1  ;;  %v16141_v4 = vrot.slane %v11477_v63, 1  ;;  %v611_v32 = vld [vmem:[%s10601_s1 + $0x1e8] sm:$0xff] }
 0x1e8   : > { %v4415_v20 = vmax.f32 %v4335_v13, %v4181_v9  ;;  %9649 = vmatmul.msk.bf16.gmra.mxu0 %vm791_vm1, %v739_v54 }
 0x1e9   : > { %1969 = vrot.lane.b32.xlu1 %v1652_v6, %s10492_s21  ;;  %v3661_v35 = vadd.f32 %v11585_v38, %v3497_v55  ;;  %v2418_v6 = vadd.f32 %v11577_v31, %v10909_v59  ;;  %v11725_v31 = vpop.f32.mrf.mxu3  ;;  %v1882_v55 = vsel %vm1605_vm3, %v16141_v4, %v16140_v57 }
 0x1ea   : > { %3159 = vrot.lane.b32.xlu2 %v2842_v12, %s10491_s20  ;;  %v4495_v33 = vmax.f32 %v4415_v20, 0.0  ;;  %2931 = vrot.lane.b32.xlu0 %v2614_v62, %s10491_s20  ;;  %v1656_v12 = vsel %vm1605_vm3, %v16142_v52, %v1655_v10 }
 0x1eb   : > { %v2152_v13 = vpop.permute.xlu1 %2151  ;;  %3822 = vst.msk [vmem:[#allocation2 + $0x420] sm:$0xff] %vm3689_vm4, %v3661_v35  ;;  %v610_v35 = vld [vmem:[%s10601_s1 + $0x1e0] sm:$0xff] }
 0x1ec   : > { %v2518_v54 = vadd.f32 %v2152_v13, %v11213_v30  ;;  %v11717_v9 = vpop.permute.xlu2 %2195  ;;  %v4572_v15 = vpack.c.bf16 %v4495_v33, %v4494_v44  ;;  %v2912_v43 = vpop.permute.xlu0 %2911  ;;  %v2615_v44 = vrot.slane %v11224_v5, 2  ;;  %v16040_v13 = vrot.slane %v11725_v31, 2 }
 0x1ed   : > { %v3378_v50 = vadd.f32 %v2912_v43, %v2418_v6  ;;  %v11723_v59 = vpop.f32.mrf.mxu0 }
 0x1ee   : > { %v3478_v20 = vadd.f32 %v11613_v58, %v2518_v54  ;;  %9710 = vmatmul.msk.bf16.gmra.mxu1 %vm3689_vm4, %v4572_v15  ;;  %v1658_v58 = vsel %vm1605_vm3, %v1655_v10, %v1657_v51  ;;  %v740_v54 = vpack.c.bf16 %v611_v32, %v610_v35  ;;  %v2617_v15 = vrot.slane %v11253_v56, 2 }
 0x1ef   : > { %v3542_v16 = vadd.f32 %v11585_v38, %v3378_v50  ;;  %v1659_v35 = vrot.slane %v11282_v0, 1 }
 0x1f0   : > { %v3642_v30 = vadd.f32 %v11585_v38, %v3478_v20  ;;  %v16042_v20 = vrot.slane %v11667_v19, 2  ;;  %v2618_v4 = vsel %vm2565_vm2, %v2615_v44, %v2617_v15 }
 0x1f1   : > { %2199 = vrot.lane.b32.xlu1 %v1882_v55, %s10492_s21  ;;  %3703 = vst.msk [vmem:[#allocation2 + $0x68] sm:$0xff] %vm3689_vm4, %v3542_v16  ;;  %v11762_v57 = vpop.f32.mrf.mxu3 }
 0x1f2   : > { %3803 = vst.msk [vmem:[#allocation2 + $0x388] sm:$0xff] %vm3689_vm4, %v3642_v30  ;;  %1975 = vrot.lane.b32.xlu2 %v1658_v58, %s10492_s21  ;;  %1973 = vrot.lane.b32.xlu0 %v1656_v12, %s10492_s21  ;;  %v2616_v30 = vsel %vm2565_vm2, %v2613_v61, %v2615_v44  ;;  %v2848_v16 = vsel %vm2565_vm2, %v16042_v20, %v16040_v13  ;;  %v1887_v61 = vrot.slane %v11725_v31, 1  ;;  %v16041_v52 = vrot.slane %v11762_v57, 1 }
 0x1f3   : > { %v3152_v62 = vpop.permute.xlu1 %3151 }
 0x1f4   : > { %v11746_v33 = vpop.permute.xlu2 %1957  ;;  %v2192_v6 = vpop.permute.xlu0 %2191 }
 0x1f5   : > { %v2538_v10 = vadd.f32 %v2192_v6, %v11269_v45  ;;  %v11751_v43 = vpop.f32.mrf.mxu0  ;;  %v16143_v6 = vrot.slane %v11667_v19, 1 }
 0x1f7   : > { %v3498_v50 = vadd.f32 %v3152_v62, %v2538_v10  ;;  %v1890_v10 = vsel %vm1605_vm3, %v1887_v61, %v16041_v52 }
 0x1f8   : > { %9650 = vmatmul.msk.bf16.gmra.mxu0 %vm791_vm1, %v740_v54  ;;  %v1888_v54 = vsel %vm1605_vm3, %v16143_v6, %v1887_v61 }
 0x1f9   : > { %2933 = vrot.lane.b32.xlu1 %v2616_v30, %s10491_s20  ;;  %v3662_v45 = vadd.f32 %v11585_v38, %v3498_v50  ;;  %v1660_v30 = vsel %vm1605_vm3, %v1657_v51, %v1659_v35 }
 0x1fa   : > { %3165 = vrot.lane.b32.xlu2 %v2848_v16, %s10491_s20  ;;  %2935 = vrot.lane.b32.xlu0 %v2618_v4, %s10491_s20  ;;  %v613_v16 = vld [vmem:[%s10601_s1 + $0x1f8] sm:$0xff]  ;;  %v2619_v4 = vrot.slane %v11282_v0, 2 }
 0x1fb   : > { %v2914_v55 = vpop.permute.xlu1 %2913  ;;  %3823 = vst.msk [vmem:[#allocation2 + $0x428] sm:$0xff] %vm3689_vm4, %v3662_v45 }
 0x1fc   : > { %v11770_v58 = vpop.permute.xlu2 %3117  ;;  %v1954_v12 = vpop.permute.xlu0 %1953 }
 0x1fd   : > { %v2419_v32 = vadd.f32 %v1954_v12, %v10929_v24  ;;  %v11775_v62 = vpop.f32.mrf.mxu0  ;;  %v612_v24 = vld [vmem:[%s10601_s1 + $0x1f0] sm:$0xff] }
 0x1fe   : > { %v741_v51 = vpack.c.bf16 %v613_v16, %v612_v24  ;;  %v16145_v24 = vld [vmem:[#allocation4_spill] sm:$0xff] }
 0x1ff   : > { %v3379_v44 = vadd.f32 %v2914_v55, %v2419_v32  ;;  %v2519_v55 = vadd.f32 %v11641_v8, %v11262_v60  ;;  %v16144_v32 = vld [vmem:[#allocation7_spill] sm:$0xff]  ;;  %v2620_v8 = vsel %vm2565_vm2, %v2617_v15, %v2619_v4 }
 0x200   : > { %v1661_v15 = vrot.slane %v16144_v32, 1 }
 0x201   : > { %2205 = vrot.lane.b32.xlu1 %v1888_v54, %s10492_s21  ;;  %v3543_v50 = vadd.f32 %v11585_v38, %v3379_v44  ;;  %v2621_v44 = vrot.slane %v16144_v32, 2  ;;  %v2843_v54 = vrot.slane %v11596_v34, 2 }
 0x202   : > { %2207 = vrot.lane.b32.xlu2 %v1890_v10, %s10492_s21  ;;  %1977 = vrot.lane.b32.xlu0 %v1660_v30, %s10492_s21 }
 0x203   : > { %v2194_v45 = vpop.permute.xlu1 %2193  ;;  %3704 = vst.msk [vmem:[#allocation2 + $0x70] sm:$0xff] %vm3689_vm4, %v3543_v50 }
 0x204   : > { %v2539_v61 = vadd.f32 %v2194_v45, %v11309_v11  ;;  %v11795_v12 = vpop.permute.xlu2 %2919  ;;  %v3114_v6 = vpop.permute.xlu0 %3113  ;;  %v2622_v11 = vsel %vm2565_vm2, %v2619_v4, %v2621_v44  ;;  %v16146_v4 = vld [vmem:[#allocation8_spill] sm:$0xff] }
 0x205   : > { %v3479_v30 = vadd.f32 %v3114_v6, %v2519_v55  ;;  %v11800_v13 = vpop.f32.mrf.mxu0 }
 0x206   : > { %v3499_v10 = vadd.f32 %v11663_v23, %v2539_v61  ;;  %v2844_v23 = vsel %vm2565_vm2, %v2841_v14, %v2843_v54  ;;  %v2623_v14 = vrot.slane %v16146_v4, 2 }
 0x207   : > { %v3643_v60 = vadd.f32 %v11585_v38, %v3479_v30  ;;  %v1662_v30 = vsel %vm1605_vm3, %v1659_v35, %v1661_v15  ;;  %v2421_v35 = vadd.f32 %v11746_v33, %v10968_v22  ;;  %v16153_v22 = vrot.slane %v11667_v19, 2 }
 0x208   : > { %v3663_v52 = vadd.f32 %v11585_v38, %v3499_v10  ;;  %9651 = vmatmul.msk.bf16.gmra.mxu0 %vm791_vm1, %v741_v51  ;;  %v11824_v51 = vpop.f32.mrf.mxu3 }
 0x209   : > { %2937 = vrot.lane.b32.xlu1 %v2620_v8, %s10491_s20  ;;  %3804 = vst.msk [vmem:[#allocation2 + $0x390] sm:$0xff] %vm3689_vm4, %v3643_v60  ;;  %v16149_v8 = vld [vmem:[#allocation6_spill] sm:$0xff]  ;;  %v2846_v33 = vsel %vm2565_vm2, %v2843_v54, %v16153_v22 }
 0x20a   : > { %3824 = vst.msk [vmem:[#allocation2 + $0x430] sm:$0xff] %vm3689_vm4, %v3663_v52  ;;  %2939 = vrot.lane.b32.xlu2 %v2622_v11, %s10491_s20  ;;  %3161 = vrot.lane.b32.xlu0 %v2844_v23, %s10491_s20  ;;  %v1663_v52 = vrot.slane %v16146_v4, 1  ;;  %v2624_v23 = vsel %vm2565_vm2, %v2621_v44, %v2623_v14 }
 0x20b   : > { %v1956_v50 = vpop.permute.xlu1 %1955  ;;  %16148 = vst [vmem:[#allocation4_spill] sm:$0xff] %v11824_v51 }
 0x20c   : > { %v2420_v16 = vadd.f32 %v1956_v50, %v16145_v24  ;;  %v11817_v45 = vpop.permute.xlu2 %1961  ;;  %v2156_v55 = vpop.permute.xlu0 %2155  ;;  %v1664_v60 = vsel %vm1605_vm3, %v1661_v15, %v1663_v52  ;;  %v615_v50 = vld [vmem:[%s10601_s1 + $0x208] sm:$0xff] }
 0x20d   : > { %v11822_v6 = vpop.f32.mrf.mxu0  ;;  %v2520_v11 = vadd.f32 %v2156_v55, %v16149_v8 }
 0x20e   : > { %v3380_v61 = vadd.f32 %v11692_v21, %v2420_v16  ;;  %16147 = vst [vmem:[#allocation7_spill] sm:$0xff] %v11822_v6  ;;  %v614_v21 = vld [vmem:[%s10601_s1 + $0x200] sm:$0xff]  ;;  %v16044_v16 = vrot.slane %v11824_v51, 1 }
 0x20f   : > { %v742_v8 = vpack.c.bf16 %v615_v50, %v614_v21 }
 0x210   : > { %v3544_v10 = vadd.f32 %v11585_v38, %v3380_v61  ;;  %v11848_v4 = vpop.f32.mrf.mxu3 }
 0x211   : > { %1979 = vrot.lane.b32.xlu1 %v1662_v30, %s10492_s21  ;;  %16152 = vst [vmem:[#allocation15_spill] sm:$0xff] %v11848_v4 }
 0x212   : > { %3705 = vst.msk [vmem:[#allocation2 + $0x78] sm:$0xff] %vm3689_vm4, %v3544_v10  ;;  %1981 = vrot.lane.b32.xlu2 %v1664_v60, %s10492_s21  ;;  %2941 = vrot.lane.b32.xlu0 %v2624_v23, %s10491_s20  ;;  %v16150_v10 = vld [vmem:[#allocation9_spill] sm:$0xff] }
 0x213   : > { %v3116_v24 = vpop.permute.xlu1 %3115  ;;  %v2625_v30 = vrot.slane %v16150_v10, 2  ;;  %v1665_v54 = vrot.slane %v16150_v10, 1 }
 0x214   : > { %v3480_v61 = vadd.f32 %v3116_v24, %v2520_v11  ;;  %v11840_v15 = vpop.permute.xlu2 %2163  ;;  %v2918_v55 = vpop.permute.xlu0 %2917  ;;  %v16154_v11 = vrot.slane %v11762_v57, 1 }
 0x215   : > { %v3381_v60 = vadd.f32 %v2918_v55, %v2421_v35  ;;  %v11844_v20 = vpop.f32.mrf.mxu0  ;;  %v2626_v50 = vsel %vm2565_vm2, %v2623_v14, %v2625_v30  ;;  %v3863_v55 = vld [vmem:[#allocation2 + $0x60] ss:$2 sm:$0xff] }
 0x216   : > { %v3644_v44 = vadd.f32 %v11585_v38, %v3480_v61  ;;  %16151 = vst [vmem:[#allocation6_spill] sm:$0xff] %v11844_v20  ;;  %v1892_v21 = vsel %vm1605_vm3, %v16154_v11, %v16044_v16 }
 0x217   : > { %v3545_v23 = vadd.f32 %v11585_v38, %v3381_v60  ;;  %v16155_v60 = vld [vmem:[#allocation10_spill] sm:$0xff] }
 0x218   : > { %3805 = vst.msk [vmem:[#allocation2 + $0x398] sm:$0xff] %vm3689_vm4, %v3644_v44  ;;  %9652 = vmatmul.msk.bf16.gmra.mxu0 %vm791_vm1, %v742_v8  ;;  %v4023_v44 = vld [vmem:[#allocation2 + $0x61] ss:$2 sm:$0xff]  ;;  %v1667_v22 = vrot.slane %v16155_v60, 1 }
 0x219   : > { %3163 = vrot.lane.b32.xlu1 %v2846_v33, %s10491_s20  ;;  %3706 = vst.msk [vmem:[#allocation2 + $0x80] sm:$0xff] %vm3689_vm4, %v3545_v23  ;;  %v3865_v14 = vld [vmem:[#allocation2 + $0x70] ss:$2 sm:$0xff]  ;;  %v4025_v33 = vld [vmem:[#allocation2 + $0x71] ss:$2 sm:$0xff]  ;;  %v2627_v23 = vrot.slane %v16155_v60, 2  ;;  %v4336_v16 = vmax.f32 %v3863_v55, %v4023_v44 }
 0x21a   : > { %2943 = vrot.lane.b32.xlu2 %v2626_v50, %s10491_s20  ;;  %2209 = vrot.lane.b32.xlu0 %v1892_v21, %s10492_s21  ;;  %v4183_v21 = vld [vmem:[#allocation2 + $0x62] ss:$2 sm:$0xff]  ;;  %v4337_v20 = vmax.f32 %v3865_v14, %v4025_v33  ;;  %v1668_v10 = vsel %vm1605_vm3, %v1665_v54, %v1667_v22  ;;  %v617_v14 = vld [vmem:[%s10601_s1 + $0x218] sm:$0xff] }
 0x21b   : > { %v2158_v24 = vpop.permute.xlu1 %2157  ;;  %v4416_v34 = vmax.f32 %v4336_v16, %v4183_v21 }
 0x21c   : > { %v2521_v35 = vadd.f32 %v2158_v24, %v11407_v28  ;;  %v11866_v61 = vpop.permute.xlu2 %3121  ;;  %v11869_v8 = vpop.permute.xlu0 %2197  ;;  %v1666_v24 = vsel %vm1605_vm3, %v1663_v52, %v1665_v54  ;;  %v616_v52 = vld [vmem:[%s10601_s1 + $0x210] sm:$0xff]  ;;  %v1893_v54 = vrot.slane %v11848_v4, 1 }
 0x21d   : > { %v11873_v50 = vpop.f32.mrf.mxu0 }
 0x21e   : > { %v3481_v11 = vadd.f32 %v11770_v58, %v2521_v35  ;;  %16156 = vst [vmem:[#allocation16_spill] sm:$0xff] %v11873_v50  ;;  %v11880_v58 = vpop.f32.mrf.mxu3  ;;  %v2628_v35 = vsel %vm2565_vm2, %v2625_v30, %v2627_v23  ;;  %v16158_v30 = vld [vmem:[#allocation11_spill] sm:$0xff] }
 0x21f   : > { %16157 = vst [vmem:[#allocation17_spill] sm:$0xff] %v11880_v58  ;;  %v1669_v60 = vrot.slane %v16158_v30, 1 }
 0x220   : > { %v3645_v28 = vadd.f32 %v11585_v38, %v3481_v11  ;;  %v4185_v6 = vld [vmem:[#allocation2 + $0x72] ss:$2 sm:$0xff] }
 0x221   : > { %1983 = vrot.lane.b32.xlu1 %v1666_v24, %s10492_s21  ;;  %v4417_v55 = vmax.f32 %v4337_v20, %v4185_v6  ;;  %v4496_v24 = vmax.f32 %v4416_v34, 0.0 }
 0x222   : > { %3806 = vst.msk [vmem:[#allocation2 + $0x3a0] sm:$0xff] %vm3689_vm4, %v3645_v28  ;;  %1985 = vrot.lane.b32.xlu2 %v1668_v10, %s10492_s21  ;;  %2945 = vrot.lane.b32.xlu0 %v2628_v35, %s10491_s20  ;;  %v743_v10 = vpack.c.bf16 %v617_v14, %v616_v52  ;;  %v16159_v35 = vrot.slane %v11880_v58, 1  ;;  %v2629_v52 = vrot.slane %v16158_v30, 2 }
 0x223   : > { %v1960_v11 = vpop.permute.xlu1 %1959  ;;  %v4497_v21 = vmax.f32 %v4417_v55, 0.0 }
 0x224   : > { %v2422_v16 = vadd.f32 %v1960_v11, %v10985_v2  ;;  %v11890_v33 = vpop.permute.xlu2 %2925  ;;  %v2160_v28 = vpop.permute.xlu0 %2159  ;;  %v1896_v50 = vsel %vm1605_vm3, %v1893_v54, %v16159_v35  ;;  %v16160_v2 = vrot.slane %v11824_v51, 1  ;;  %v618_v35 = vld [vmem:[%s10601_s1 + $0x220] sm:$0xff] }
 0x225   : > { %v11894_v6 = vpop.f32.mrf.mxu0  ;;  %v4573_v44 = vpack.c.bf16 %v4497_v21, %v4496_v24  ;;  %v2522_v34 = vadd.f32 %v2160_v28, %v11446_v42  ;;  %v16161_v24 = vrot.slane %v11725_v31, 2 }
 0x226   : > { %v3382_v20 = vadd.f32 %v11795_v12, %v2422_v16  ;;  %v1894_v55 = vsel %vm1605_vm3, %v16160_v2, %v1893_v54  ;;  %v1670_v12 = vsel %vm1605_vm3, %v1667_v22, %v1669_v60  ;;  %v619_v2 = vld [vmem:[%s10601_s1 + $0x228] sm:$0xff] }
 0x227   : > { %9711 = vmatmul.msk.bf16.gmra.mxu1 %vm3689_vm4, %v4573_v44  ;;  %v2423_v44 = vadd.f32 %v11817_v45, %v11011_v37  ;;  %v2630_v37 = vsel %vm2565_vm2, %v2627_v23, %v2629_v52  ;;  %v1671_v23 = vrot.slane %v11456_v48, 1 }
 0x228   : > { %v3546_v4 = vadd.f32 %v11585_v38, %v3382_v20  ;;  %9653 = vmatmul.msk.bf16.gmra.mxu0 %vm791_vm1, %v743_v10 }
 0x229   : > { %2211 = vrot.lane.b32.xlu1 %v1894_v55, %s10492_s21  ;;  %v2524_v55 = vadd.f32 %v11840_v15, %v11521_v7 }
 0x22a   : > { %3707 = vst.msk [vmem:[#allocation2 + $0x88] sm:$0xff] %vm3689_vm4, %v3546_v4  ;;  %2213 = vrot.lane.b32.xlu2 %v1896_v50, %s10492_s21  ;;  %1987 = vrot.lane.b32.xlu0 %v1670_v12, %s10492_s21  ;;  %v2631_v4 = vrot.slane %v11456_v48, 2  ;;  %v2849_v50 = vrot.slane %v11762_v57, 2 }
 0x22b   : > { %v3120_v11 = vpop.permute.xlu1 %3119 }
 0x22c   : > { %v3482_v14 = vadd.f32 %v3120_v11, %v2522_v34  ;;  %v11914_v54 = vpop.permute.xlu2 %2201  ;;  %v2922_v42 = vpop.permute.xlu0 %2921  ;;  %v2632_v45 = vsel %vm2565_vm2, %v2629_v52, %v2631_v4  ;;  %v2850_v20 = vsel %vm2565_vm2, %v16161_v24, %v2849_v50  ;;  %v2635_v11 = vrot.slane %v11510_v41, 2 }
 0x22d   : > { %v3383_v16 = vadd.f32 %v2922_v42, %v2423_v44  ;;  %v11919_v21 = vpop.f32.mrf.mxu0  ;;  %v1673_v44 = vrot.slane %v11481_v18, 1 }
 0x22e   : > { %v3646_v22 = vadd.f32 %v11585_v38, %v3482_v14 }
 0x22f   : > { %v3547_v28 = vadd.f32 %v11585_v38, %v3383_v16  ;;  %v744_v16 = vpack.c.bf16 %v619_v2, %v618_v35  ;;  %v2637_v35 = vrot.slane %v11535_v1, 2 }
 0x230   : > { %3807 = vst.msk [vmem:[#allocation2 + $0x3a8] sm:$0xff] %vm3689_vm4, %v3646_v22 }
 0x231   : > { %2947 = vrot.lane.b32.xlu1 %v2630_v37, %s10491_s20  ;;  %3708 = vst.msk [vmem:[#allocation2 + $0x90] sm:$0xff] %vm3689_vm4, %v3547_v28  ;;  %v2633_v28 = vrot.slane %v11481_v18, 2 }
 0x232   : > { %2949 = vrot.lane.b32.xlu2 %v2632_v45, %s10491_s20  ;;  %3167 = vrot.lane.b32.xlu0 %v2850_v20, %s10491_s20  ;;  %v2541_v45 = vadd.f32 %v11869_v8, %v11387_v46  ;;  %v1677_v46 = vrot.slane %v11535_v1, 1 }
 0x233   : > { %v2162_v10 = vpop.permute.xlu1 %2161  ;;  %v2636_v15 = vsel %vm2565_vm2, %v2633_v28, %v2635_v11 }
 0x234   : > { %v2523_v34 = vadd.f32 %v2162_v10, %v11483_v26  ;;  %v11940_v12 = vpop.permute.xlu2 %2929  ;;  %v3124_v52 = vpop.permute.xlu0 %3123  ;;  %v1672_v26 = vsel %vm1605_vm3, %v1669_v60, %v1671_v23  ;;  %v1675_v10 = vrot.slane %v11510_v41, 1 }
 0x235   : > { %v3484_v42 = vadd.f32 %v3124_v52, %v2524_v55  ;;  %v11945_v22 = vpop.f32.mrf.mxu0  ;;  %v11969_v55 = vpop.f32.mrf.mxu1 }
 0x236   : > { %v3483_v14 = vadd.f32 %v11866_v61, %v2523_v34  ;;  %v1674_v61 = vsel %vm1605_vm3, %v1671_v23, %v1673_v44  ;;  %v2634_v34 = vsel %vm2565_vm2, %v2631_v4, %v2633_v28  ;;  %v1678_v52 = vsel %vm1605_vm3, %v1675_v10, %v1677_v46 }
 0x237   : > { %v3648_v7 = vadd.f32 %v11585_v38, %v3484_v42  ;;  %v2638_v42 = vsel %vm2565_vm2, %v2635_v11, %v2637_v35  ;;  %v2540_v4 = vadd.f32 %v11717_v9, %v11342_v39  ;;  %v1676_v39 = vsel %vm1605_vm3, %v1673_v44, %v1675_v10 }
 0x238   : > { %v3647_v37 = vadd.f32 %v11585_v38, %v3483_v14  ;;  %9654 = vmatmul.msk.bf16.gmra.mxu0 %vm791_vm1, %v744_v16  ;;  %v16053_v44 = vrot.slane %v11824_v51, 2 }
 0x239   : > { %1989 = vrot.lane.b32.xlu1 %v1672_v26, %s10492_s21  ;;  %3809 = vst.msk [vmem:[#allocation2 + $0x3b8] sm:$0xff] %vm3689_vm4, %v3648_v7  ;;  %v621_v7 = vld [vmem:[%s10601_s1 + $0x238] sm:$0xff] }
 0x23a   : > { %3808 = vst.msk [vmem:[#allocation2 + $0x3b0] sm:$0xff] %vm3689_vm4, %v3647_v37  ;;  %2953 = vrot.lane.b32.xlu2 %v2636_v15, %s10491_s20  ;;  %1991 = vrot.lane.b32.xlu0 %v1674_v61, %s10492_s21  ;;  %v620_v37 = vld [vmem:[%s10601_s1 + $0x230] sm:$0xff]  ;;  %v1679_v15 = vrot.slane %v11557_v27, 1 }
 0x23b   : > { %v3158_v24 = vpop.permute.xlu1 %3157 }
 0x23c   : > { %v3501_v60 = vadd.f32 %v3158_v24, %v2541_v45  ;;  %v11961_v20 = vpop.permute.xlu2 %1971  ;;  %v1964_v8 = vpop.permute.xlu0 %1963 }
 0x23d   : > { %v11967_v23 = vpop.f32.mrf.mxu0  ;;  %v2424_v14 = vadd.f32 %v1964_v8, %v11035_v17  ;;  %v16055_v17 = vrot.slane %v11588_v25, 1 }
 0x23e   : > { %v3665_v2 = vadd.f32 %v11585_v38, %v3501_v60  ;;  %v745_v60 = vpack.c.bf16 %v621_v7, %v620_v37  ;;  %v2639_v37 = vrot.slane %v11557_v27, 2  ;;  %v2641_v7 = vrot.slane %v11588_v25, 2 }
 0x23f   : > { %v1682_v9 = vsel %vm1605_vm3, %v1679_v15, %v16055_v17 }
 0x240   : > { %3826 = vst.msk [vmem:[#allocation2 + $0x440] sm:$0xff] %vm3689_vm4, %v3665_v2  ;;  %v11999_v2 = vpop.f32.mrf.mxu1 }
 0x241   : > { %2951 = vrot.lane.b32.xlu1 %v2634_v34, %s10491_s20  ;;  %v1680_v34 = vsel %vm1605_vm3, %v1677_v46, %v1679_v15 }
 0x242   : > { %1995 = vrot.lane.b32.xlu2 %v1678_v52, %s10492_s21  ;;  %2955 = vrot.lane.b32.xlu0 %v2638_v42, %s10491_s20  ;;  %v16054_v42 = vrot.slane %v11999_v2, 1 }
 0x243   : > { %v2924_v16 = vpop.permute.xlu1 %2923 }
 0x244   : > { %v3384_v28 = vadd.f32 %v2924_v16, %v2424_v14  ;;  %v11985_v26 = vpop.permute.xlu2 %3159  ;;  %v3156_v45 = vpop.permute.xlu0 %3155 }
 0x245   : > { %v3500_v61 = vadd.f32 %v3156_v45, %v2540_v4  ;;  %v11990_v24 = vpop.f32.mrf.mxu0 }
 0x246   : > { %v3548_v11 = vadd.f32 %v11585_v38, %v3384_v28  ;;  %v5035_v28 = vrot.slane %v11969_v55, 1 }
 0x247   : > { %v3664_v8 = vadd.f32 %v11585_v38, %v3500_v61  ;;  %v3867_v61 = vld [vmem:[#allocation2 + $0x80] ss:$2 sm:$0xff] }
 0x248   : > { %3709 = vst.msk [vmem:[#allocation2 + $0x98] sm:$0xff] %vm3689_vm4, %v3548_v11  ;;  %9655 = vmatmul.msk.bf16.gmra.mxu0 %vm791_vm1, %v745_v60  ;;  %v5037_v45 = vsel %vm1605_vm3, %v5035_v28, %v16054_v42  ;;  %v2642_v11 = vsel %vm2565_vm2, %v2639_v37, %v2641_v7 }
 0x249   : > { %1993 = vrot.lane.b32.xlu1 %v1676_v39, %s10492_s21  ;;  %3825 = vst.msk [vmem:[#allocation2 + $0x438] sm:$0xff] %vm3689_vm4, %v3664_v8  ;;  %v622_v8 = vld [vmem:[%s10601_s1 + $0x240] sm:$0xff] }
 0x24a   : > { %1999 = vrot.lane.b32.xlu2 %v1682_v9, %s10492_s21  ;;  %1997 = vrot.lane.b32.xlu0 %v1680_v34, %s10492_s21  ;;  %v4027_v39 = vld [vmem:[#allocation2 + $0x81] ss:$2 sm:$0xff]  ;;  %v2643_v9 = vrot.slane %v11617_v40, 2  ;;  %v16162_v34 = vld [vmem:[#allocation13_spill] sm:$0xff] }
 0x24b   : > { %v1966_v52 = vpop.permute.xlu1 %1965  ;;  %v4338_v42 = vmax.f32 %v3867_v61, %v4027_v39 }
 0x24c   : > { %v2425_v10 = vadd.f32 %v1966_v52, %v11064_v3  ;;  %v12008_v14 = vpop.permute.xlu2 %1975  ;;  %v1968_v16 = vpop.permute.xlu0 %1967  ;;  %v2852_v3 = vsel %vm2565_vm2, %v2849_v50, %v16053_v44  ;;  %v623_v50 = vld [vmem:[%s10601_s1 + $0x248] sm:$0xff]  ;;  %v2645_v52 = vrot.slane %v16162_v34, 2 }
 0x24d   : > { %v12014_v4 = vpop.f32.mrf.mxu0  ;;  %v746_v44 = vpack.c.bf16 %v623_v50, %v622_v8  ;;  %v16163_v8 = vrot.slane %v11588_v25, 1 }
 0x24e   : > { %v3385_v46 = vadd.f32 %v11890_v33, %v2425_v10  ;;  %v2426_v33 = vadd.f32 %v1968_v16, %v11096_v53  ;;  %v2646_v58 = vsel %vm2565_vm2, %v2643_v9, %v2645_v52 }
 0x24f   : > { %v3869_v53 = vld [vmem:[#allocation2 + $0x90] ss:$2 sm:$0xff]  ;;  %v4029_v16 = vld [vmem:[#allocation2 + $0x91] ss:$2 sm:$0xff] }
 0x250   : > { %v3549_v15 = vadd.f32 %v11585_v38, %v3385_v46 }
 0x251   : > { %3169 = vrot.lane.b32.xlu1 %v2852_v3, %s10491_s20  ;;  %v1683_v3 = vrot.slane %v11617_v40, 1 }
 0x252   : > { %3710 = vst.msk [vmem:[#allocation2 + $0xa0] sm:$0xff] %vm3689_vm4, %v3549_v15  ;;  %5194 = vrot.lane.b32.xlu2 %v5037_v45, %s10492_s21  ;;  %2959 = vrot.lane.b32.xlu0 %v2642_v11, %s10491_s20  ;;  %v4187_v15 = vld [vmem:[#allocation2 + $0x82] ss:$2 sm:$0xff] }
 0x253   : > { %v2928_v60 = vpop.permute.xlu1 %2927  ;;  %v4418_v17 = vmax.f32 %v4338_v42, %v4187_v15  ;;  %v1684_v61 = vsel %vm1605_vm3, %v16163_v8, %v1683_v3  ;;  %v16164_v42 = vld [vmem:[#allocation5_spill] sm:$0xff] }
 0x254   : > { %v3386_v10 = vadd.f32 %v2928_v60, %v2426_v33  ;;  %v12036_v46 = vpop.permute.xlu2 %3165  ;;  %v12038_v28 = vpop.permute.xlu0 %2203  ;;  %v2640_v33 = vsel %vm2565_vm2, %v2637_v35, %v2639_v37  ;;  %v4339_v60 = vmax.f32 %v3869_v53, %v4029_v16  ;;  %v2428_v35 = vadd.f32 %v11961_v20, %v11162_v36  ;;  %v16165_v16 = vld [vmem:[#allocation14_spill] sm:$0xff] }
 0x255   : > { %v12042_v11 = vpop.f32.mrf.mxu0  ;;  %v16062_v15 = vrot.slane %v16165_v16, 1  ;;  %v1685_v36 = vrot.slane %v16162_v34, 1 }
 0x256   : > { %v3550_v45 = vadd.f32 %v11585_v38, %v3386_v10 }
 0x258   : > { %3711 = vst.msk [vmem:[#allocation2 + $0xa8] sm:$0xff] %vm3689_vm4, %v3550_v45  ;;  %9656 = vmatmul.msk.bf16.gmra.mxu0 %vm791_vm1, %v746_v44  ;;  %v4498_v44 = vmax.f32 %v4418_v17, 0.0 }
 0x259   : > { %2957 = vrot.lane.b32.xlu1 %v2640_v33, %s10491_s20  ;;  %v4189_v51 = vld [vmem:[#allocation2 + $0x92] ss:$2 sm:$0xff]  ;;  %v2647_v33 = vrot.slane %v16165_v16, 2 }
 0x25a   : > { %2963 = vrot.lane.b32.xlu2 %v2646_v58, %s10491_s20  ;;  %v4419_v50 = vmax.f32 %v4339_v60, %v4189_v51  ;;  %2001 = vrot.lane.b32.xlu0 %v1684_v61, %s10492_s21  ;;  %v2644_v61 = vsel %vm2565_vm2, %v2641_v7, %v2643_v9  ;;  %v624_v7 = vld [vmem:[%s10601_s1 + $0x250] sm:$0xff]  ;;  %v625_v9 = vld [vmem:[%s10601_s1 + $0x258] sm:$0xff] }
 0x25b   : > { %v1970_v39 = vpop.permute.xlu1 %1969 }
 0x25c   : > { %v2427_v37 = vadd.f32 %v1970_v39, %v16164_v42  ;;  %v12061_v10 = vpop.permute.xlu2 %2207  ;;  %v4499_v53 = vmax.f32 %v4419_v50, 0.0  ;;  %v2932_v45 = vpop.permute.xlu0 %2931  ;;  %v2648_v50 = vsel %vm2565_vm2, %v2645_v52, %v2647_v33  ;;  %v5515_v42 = vrot.slane %v11999_v2, 2 }
 0x25d   : > { %v3388_v51 = vadd.f32 %v2932_v45, %v2428_v35  ;;  %v12066_v60 = vpop.f32.mrf.mxu0  ;;  %v12080_v39 = vpop.f32.mrf.mxu1  ;;  %v5514_v45 = vrot.slane %v11969_v55, 2 }
 0x25e   : > { %v3387_v58 = vadd.f32 %v11940_v12, %v2427_v37  ;;  %v4574_v8 = vpack.c.bf16 %v4499_v53, %v4498_v44  ;;  %v1688_v12 = vsel %vm1605_vm3, %v1685_v36, %v16062_v15  ;;  %v2649_v53 = vrot.slane %v11697_v29, 2 }
 0x25f   : > { %v3552_v17 = vadd.f32 %v11585_v38, %v3388_v51 }
 0x260   : > { %v3551_v20 = vadd.f32 %v11585_v38, %v3387_v58  ;;  %9712 = vmatmul.msk.bf16.gmra.mxu1 %vm3689_vm4, %v4574_v8  ;;  %v16061_v58 = vrot.slane %v12080_v39, 1 }
 0x261   : > { %2961 = vrot.lane.b32.xlu1 %v2644_v61, %s10491_s20  ;;  %3713 = vst.msk [vmem:[#allocation2 + $0xb8] sm:$0xff] %vm3689_vm4, %v3552_v17  ;;  %v5516_v61 = vsel %vm2565_vm2, %v5514_v45, %v5515_v42 }
 0x262   : > { %3712 = vst.msk [vmem:[#allocation2 + $0xb0] sm:$0xff] %vm3689_vm4, %v3551_v20  ;;  %2005 = vrot.lane.b32.xlu2 %v1688_v12, %s10492_s21  ;;  %2965 = vrot.lane.b32.xlu0 %v2648_v50, %s10491_s20  ;;  %v747_v20 = vpack.c.bf16 %v625_v9, %v624_v7 }
 0x263   : > { %v2200_v35 = vpop.permute.xlu1 %2199 }
 0x264   : > { %v2542_v37 = vadd.f32 %v2200_v35, %v11477_v63  ;;  %v12088_v44 = vpop.permute.xlu2 %2939  ;;  %v1974_v52 = vpop.permute.xlu0 %1973  ;;  %v2650_v63 = vsel %vm2565_vm2, %v2647_v33, %v2649_v53  ;;  %v2430_v33 = vadd.f32 %v12008_v14, %v11224_v5  ;;  %v1686_v5 = vsel %vm1605_vm3, %v1683_v3, %v1685_v36 }
 0x265   : > { %v12094_v8 = vpop.f32.mrf.mxu0  ;;  %v2429_v12 = vadd.f32 %v1974_v52, %v11192_v47  ;;  %v5517_v47 = vrot.slane %v12080_v39, 2  ;;  %v16060_v52 = vrot.slane %v11723_v59, 2 }
 0x266   : > { %v3502_v51 = vadd.f32 %v11985_v26, %v2542_v37  ;;  %v16166_v26 = vrot.slane %v11999_v2, 1 }
 0x267   : > { %v5518_v14 = vsel %vm2565_vm2, %v5515_v42, %v5517_v47 }
 0x268   : > { %v3666_v17 = vadd.f32 %v11585_v38, %v3502_v51  ;;  %9657 = vmatmul.msk.bf16.gmra.mxu0 %vm791_vm1, %v747_v20  ;;  %v5039_v50 = vsel %vm1605_vm3, %v16166_v26, %v16061_v58  ;;  %v626_v26 = vld [vmem:[%s10601_s1 + $0x260] sm:$0xff] }
 0x269   : > { %5673 = vrot.lane.b32.xlu1 %v5516_v61, %s10491_s20  ;;  %v3871_v61 = vld [vmem:[#allocation2 + $0xa0] ss:$2 sm:$0xff]  ;;  %v3873_v3 = vld [vmem:[#allocation2 + $0xb0] ss:$2 sm:$0xff]  ;;  %v4033_v36 = vld [vmem:[#allocation2 + $0xb1] ss:$2 sm:$0xff] }
 0x26a   : > { %3827 = vst.msk [vmem:[#allocation2 + $0x448] sm:$0xff] %vm3689_vm4, %v3666_v17  ;;  %2967 = vrot.lane.b32.xlu2 %v2650_v63, %s10491_s20  ;;  %5196 = vrot.lane.b32.xlu0 %v5039_v50, %s10492_s21  ;;  %v4031_v63 = vld [vmem:[#allocation2 + $0xa1] ss:$2 sm:$0xff]  ;;  %v4191_v42 = vld [vmem:[#allocation2 + $0xa2] ss:$2 sm:$0xff] }
 0x26b   : > { %v2934_v35 = vpop.permute.xlu1 %2933  ;;  %v627_v50 = vld [vmem:[%s10601_s1 + $0x268] sm:$0xff] }
 0x26c   : > { %v3389_v7 = vadd.f32 %v2934_v35, %v2429_v12  ;;  %v12112_v9 = vpop.permute.xlu2 %1981  ;;  %v2936_v37 = vpop.permute.xlu0 %2935 }
 0x26d   : > { %v3390_v51 = vadd.f32 %v2936_v37, %v2430_v33  ;;  %v12117_v20 = vpop.f32.mrf.mxu0  ;;  %v12126_v12 = vpop.f32.mrf.mxu1  ;;  %v1689_v33 = vrot.slane %v11697_v29, 1 }
 0x26e   : > { %v3553_v45 = vadd.f32 %v11585_v38, %v3389_v7 }
 0x26f   : > { %v3554_v17 = vadd.f32 %v11585_v38, %v3390_v51  ;;  %v2652_v38 = vsel %vm2565_vm2, %v2649_v53, %v16060_v52  ;;  %v1691_v51 = vrot.slane %v11723_v59, 1  ;;  %v4341_v52 = vmax.f32 %v3873_v3, %v4033_v36 }
 0x270   : > { %3714 = vst.msk [vmem:[#allocation2 + $0xc0] sm:$0xff] %vm3689_vm4, %v3553_v45  ;;  %v4340_v45 = vmax.f32 %v3871_v61, %v4031_v63  ;;  %v16168_v63 = vrot.slane %v16165_v16, 1 }
 0x271   : > { %2003 = vrot.lane.b32.xlu1 %v1686_v5, %s10492_s21  ;;  %3715 = vst.msk [vmem:[#allocation2 + $0xc8] sm:$0xff] %vm3689_vm4, %v3554_v17 }
 0x272   : > { %5675 = vrot.lane.b32.xlu2 %v5518_v14, %s10491_s20  ;;  %2969 = vrot.lane.b32.xlu0 %v2652_v38, %s10491_s20  ;;  %v748_v38 = vpack.c.bf16 %v627_v50, %v626_v26  ;;  %v4420_v58 = vmax.f32 %v4340_v45, %v4191_v42  ;;  %v16169_v50 = vrot.slane %v12126_v12, 2 }
 0x273   : > { %v2206_v35 = vpop.permute.xlu1 %2205 }
 0x274   : > { %v2545_v7 = vadd.f32 %v2206_v35, %v11667_v19  ;;  %v12138_v37 = vpop.permute.xlu2 %2943  ;;  %v1978_v53 = vpop.permute.xlu0 %1977  ;;  %v12148_v19 = vld [vmem:[%s15978_s2] ss:$0 sm:$0xff]  ;;  %v1690_v35 = vsel %vm1605_vm3, %v16168_v63, %v1689_v33  ;;  %v5520_v3 = vsel %vm2565_vm2, %v5517_v47, %v16169_v50  ;;  %v4500_v36 = vmax.f32 %v4420_v58, 0.0 }
 0x275   : > { %v12143_v14 = vpop.f32.mrf.mxu0  ;;  %v2431_v26 = vadd.f32 %v1978_v53, %v11253_v56  ;;  %v16064_v53 = vrot.slane %v11775_v62, 2  ;;  %v1693_v47 = vrot.slane %v11751_v43, 1 }
 0x276   : > { %v3505_v5 = vadd.f32 %v12036_v46, %v2545_v7  ;;  %16167 = vst [vmem:[#allocation11_spill] sm:$0xff] %v12143_v14  ;;  %v1692_v46 = vsel %vm1605_vm3, %v1689_v33, %v1691_v51 }
 0x277   : > { %v4193_v15 = vld [vmem:[#allocation2 + $0xb2] ss:$2 sm:$0xff] }
 0x278   : > { %v3669_v61 = vadd.f32 %v12148_v19, %v3505_v5  ;;  %v4421_v17 = vmax.f32 %v4341_v52, %v4193_v15  ;;  %9658 = vmatmul.msk.bf16.gmra.mxu0 %vm791_vm1, %v748_v38  ;;  %v5040_v15 = vrot.slane %v12126_v12, 1  ;;  %v2543_v52 = vadd.f32 %v11914_v54, %v11559_v49 }
 0x279   : > { %2007 = vrot.lane.b32.xlu1 %v1690_v35, %s10492_s21  ;;  %v2653_v49 = vrot.slane %v11751_v43, 2  ;;  %v12181_v35 = vpop.f32.mrf.mxu1 }
 0x27a   : > { %3830 = vst.msk [vmem:[#allocation2 + $0x460] sm:$0xff] %vm3689_vm4, %v3669_v61  ;;  %2009 = vrot.lane.b32.xlu2 %v1692_v46, %s10492_s21  ;;  %v4501_v42 = vmax.f32 %v4421_v17, 0.0  ;;  %5677 = vrot.lane.b32.xlu0 %v5520_v3, %s10491_s20  ;;  %v16171_v61 = vrot.slane %v12080_v39, 1  ;;  %v628_v3 = vld [vmem:[%s10601_s1 + $0x270] sm:$0xff] }
 0x27b   : > { %v2938_v7 = vpop.permute.xlu1 %2937  ;;  %v2656_v46 = vsel %vm2565_vm2, %v2653_v49, %v16064_v53 }
 0x27c   : > { %v3391_v33 = vadd.f32 %v2938_v7, %v2431_v26  ;;  %v12167_v56 = vpop.permute.xlu2 %1985  ;;  %v4575_v45 = vpack.c.bf16 %v4501_v42, %v4500_v36  ;;  %v3162_v5 = vpop.permute.xlu0 %3161  ;;  %v5041_v63 = vsel %vm1605_vm3, %v16171_v61, %v5040_v15  ;;  %v1694_v26 = vsel %vm1605_vm3, %v1691_v51, %v1693_v47  ;;  %v629_v36 = vld [vmem:[%s10601_s1 + $0x278] sm:$0xff] }
 0x27d   : > { %v3503_v17 = vadd.f32 %v3162_v5, %v2543_v52  ;;  %v12173_v38 = vpop.f32.mrf.mxu0  ;;  %v2433_v42 = vadd.f32 %v12112_v9, %v16144_v32  ;;  %v16063_v51 = vrot.slane %v11800_v13, 1  ;;  %v749_v61 = vpack.c.bf16 %v629_v36, %v628_v3 }
 0x27e   : > { %v3555_v58 = vadd.f32 %v12148_v19, %v3391_v33  ;;  %9713 = vmatmul.msk.bf16.gmra.mxu1 %vm3689_vm4, %v4575_v45  ;;  %16170 = vst [vmem:[#allocation13_spill] sm:$0xff] %v12173_v38  ;;  %v1695_v33 = vrot.slane %v11775_v62, 1  ;;  %v5042_v45 = vrot.slane %v12181_v35, 1  ;;  %v16180_v38 = vld [vmem:[#allocation6_spill] sm:$0xff] }
 0x27f   : > { %v3667_v54 = vadd.f32 %v12148_v19, %v3503_v17 }
 0x280   : > { %3716 = vst.msk [vmem:[#allocation2 + $0xd0] sm:$0xff] %vm3689_vm4, %v3555_v58 }
 0x281   : > { %5198 = vrot.lane.b32.xlu1 %v5041_v63, %s10492_s21  ;;  %3828 = vst.msk [vmem:[#allocation2 + $0x450] sm:$0xff] %vm3689_vm4, %v3667_v54  ;;  %v12219_v3 = vpop.f32.mrf.mxu1 }
 0x282   : > { %2973 = vrot.lane.b32.xlu2 %v2656_v46, %s10491_s20  ;;  %2011 = vrot.lane.b32.xlu0 %v1694_v26, %s10492_s21  ;;  %v5043_v46 = vsel %vm1605_vm3, %v5040_v15, %v5042_v45  ;;  %v16175_v26 = vld [vmem:[#allocation12_spill] sm:$0xff] }
 0x283   : > { %v1980_v50 = vpop.permute.xlu1 %1979 }
 0x284   : > { %v2432_v7 = vadd.f32 %v1980_v50, %v11282_v0  ;;  %v12196_v52 = vpop.permute.xlu2 %2213  ;;  %v2942_v5 = vpop.permute.xlu0 %2941  ;;  %v16174_v0 = vrot.slane %v11723_v59, 2  ;;  %v2544_v50 = vadd.f32 %v12038_v28, %v16175_v26  ;;  %v16176_v28 = vld [vmem:[#allocation7_spill] sm:$0xff] }
 0x285   : > { %16172 = vst [vmem:[#allocation5_spill] sm:$0xff] %v12196_v52  ;;  %v3393_v17 = vadd.f32 %v2942_v5, %v2433_v42  ;;  %v12202_v54 = vpop.f32.mrf.mxu0  ;;  %v2659_v42 = vrot.slane %v16176_v28, 2  ;;  %v3875_v5 = vld [vmem:[#allocation2 + $0xc0] ss:$2 sm:$0xff] }
 0x286   : > { %v3392_v58 = vadd.f32 %v12088_v44, %v2432_v7  ;;  %16173 = vst [vmem:[#allocation14_spill] sm:$0xff] %v12202_v54  ;;  %v2654_v9 = vsel %vm2565_vm2, %v16174_v0, %v2653_v49  ;;  %v1698_v44 = vsel %vm1605_vm3, %v1695_v33, %v16063_v51  ;;  %v631_v51 = vld [vmem:[%s10601_s1 + $0x288] sm:$0xff] }
 0x287   : > { %v3557_v32 = vadd.f32 %v12148_v19, %v3393_v17  ;;  %v16068_v17 = vrot.slane %v12219_v3, 1  ;;  %v4195_v0 = vld [vmem:[#allocation2 + $0xc2] ss:$2 sm:$0xff] }
 0x288   : > { %v3556_v63 = vadd.f32 %v12148_v19, %v3392_v58  ;;  %9659 = vmatmul.msk.bf16.gmra.mxu0 %vm791_vm1, %v749_v61  ;;  %v4035_v58 = vld [vmem:[#allocation2 + $0xc1] ss:$2 sm:$0xff] }
 0x289   : > { %2971 = vrot.lane.b32.xlu1 %v2654_v9, %s10491_s20  ;;  %3718 = vst.msk [vmem:[#allocation2 + $0xe0] sm:$0xff] %vm3689_vm4, %v3557_v32  ;;  %v2657_v32 = vrot.slane %v11800_v13, 2  ;;  %v1696_v9 = vsel %vm1605_vm3, %v1693_v47, %v1695_v33  ;;  %v16178_v33 = vld [vmem:[#allocation9_spill] sm:$0xff] }
 0x28a   : > { %3717 = vst.msk [vmem:[#allocation2 + $0xd8] sm:$0xff] %vm3689_vm4, %v3556_v63  ;;  %5200 = vrot.lane.b32.xlu2 %v5043_v46, %s10492_s21  ;;  %2015 = vrot.lane.b32.xlu0 %v1698_v44, %s10492_s21  ;;  %v4342_v46 = vmax.f32 %v3875_v5, %v4035_v58  ;;  %v2435_v5 = vadd.f32 %v12167_v56, %v16178_v33  ;;  %v16179_v58 = vld [vmem:[#allocation8_spill] sm:$0xff]  ;;  %v16181_v56 = vrot.slane %v11775_v62, 2  ;;  %v5521_v33 = vrot.slane %v12181_v35, 2 }
 0x28b   : > { %v3164_v49 = vpop.permute.xlu1 %3163  ;;  %v2660_v26 = vsel %vm2565_vm2, %v2657_v32, %v2659_v42 }
 0x28c   : > { %v3504_v15 = vadd.f32 %v3164_v49, %v2544_v50  ;;  %v12223_v36 = vpop.permute.xlu2 %2949  ;;  %v12226_v7 = vpop.permute.xlu0 %2209  ;;  %v5045_v49 = vsel %vm1605_vm3, %v5042_v45, %v16068_v17  ;;  %v4422_v52 = vmax.f32 %v4342_v46, %v4195_v0  ;;  %v2661_v45 = vrot.slane %v16180_v38, 2 }
 0x28d   : > { %v12230_v63 = vpop.f32.mrf.mxu0 }
 0x28e   : > { %v3668_v61 = vadd.f32 %v12148_v19, %v3504_v15  ;;  %16177 = vst [vmem:[#allocation12_spill] sm:$0xff] %v12230_v63  ;;  %v630_v15 = vld [vmem:[%s10601_s1 + $0x280] sm:$0xff] }
 0x28f   : > { %v750_v14 = vpack.c.bf16 %v631_v51, %v630_v15  ;;  %v16183_v15 = vld [vmem:[#allocation16_spill] sm:$0xff] }
 0x290   : > { %3829 = vst.msk [vmem:[#allocation2 + $0x458] sm:$0xff] %vm3689_vm4, %v3668_v61 }
 0x291   : > { %2013 = vrot.lane.b32.xlu1 %v1696_v9, %s10492_s21  ;;  %v3877_v50 = vld [vmem:[#allocation2 + $0xd0] ss:$2 sm:$0xff]  ;;  %v4037_v44 = vld [vmem:[#allocation2 + $0xd1] ss:$2 sm:$0xff] }
 0x292   : > { %2977 = vrot.lane.b32.xlu2 %v2660_v26, %s10491_s20  ;;  %v4343_v53 = vmax.f32 %v3877_v50, %v4037_v44  ;;  %5202 = vrot.lane.b32.xlu0 %v5045_v49, %s10492_s21  ;;  %v4197_v47 = vld [vmem:[#allocation2 + $0xd2] ss:$2 sm:$0xff]  ;;  %v5523_v26 = vrot.slane %v12219_v3, 2  ;;  %v4502_v44 = vmax.f32 %v4422_v52, 0.0  ;;  %v2662_v52 = vsel %vm2565_vm2, %v2659_v42, %v2661_v45 }
 0x293   : > { %v1984_v61 = vpop.permute.xlu1 %1983  ;;  %v16184_v42 = vrot.slane %v12126_v12, 2 }
 0x294   : > { %v2434_v9 = vadd.f32 %v1984_v61, %v16179_v58  ;;  %v12247_v63 = vpop.permute.xlu2 %2953  ;;  %v4423_v54 = vmax.f32 %v4343_v53, %v4197_v47  ;;  %v2946_v17 = vpop.permute.xlu0 %2945  ;;  %v2658_v61 = vsel %vm2565_vm2, %v16181_v56, %v2657_v32  ;;  %v1701_v32 = vrot.slane %v16180_v38, 1 }
 0x295   : > { %v3395_v46 = vadd.f32 %v2946_v17, %v2435_v5  ;;  %v12252_v50 = vpop.f32.mrf.mxu0  ;;  %v1699_v17 = vrot.slane %v16176_v28, 1  ;;  %v1703_v5 = vrot.slane %v16183_v15, 1 }
 0x296   : > { %v3394_v0 = vadd.f32 %v12138_v37, %v2434_v9  ;;  %v4503_v49 = vmax.f32 %v4423_v54, 0.0  ;;  %v5524_v37 = vsel %vm2565_vm2, %v5521_v33, %v5523_v26 }
 0x297   : > { %v3559_v47 = vadd.f32 %v12148_v19, %v3395_v46  ;;  %v16185_v46 = vld [vmem:[#allocation10_spill] sm:$0xff]  ;;  %v1704_v56 = vsel %vm1605_vm3, %v1701_v32, %v1703_v5 }
 0x298   : > { %v3558_v53 = vadd.f32 %v12148_v19, %v3394_v0  ;;  %v4576_v58 = vpack.c.bf16 %v4503_v49, %v4502_v44  ;;  %9660 = vmatmul.msk.bf16.gmra.mxu0 %vm791_vm1, %v750_v14  ;;  %v5522_v0 = vsel %vm2565_vm2, %v16184_v42, %v5521_v33  ;;  %v1702_v49 = vsel %vm1605_vm3, %v1699_v17, %v1701_v32 }
 0x299   : > { %2975 = vrot.lane.b32.xlu1 %v2658_v61, %s10491_s20  ;;  %3720 = vst.msk [vmem:[#allocation2 + $0xf0] sm:$0xff] %vm3689_vm4, %v3559_v47  ;;  %v633_v47 = vld [vmem:[%s10601_s1 + $0x298] sm:$0xff]  ;;  %v2665_v32 = vrot.slane %v11894_v6, 2 }
 0x29a   : > { %3719 = vst.msk [vmem:[#allocation2 + $0xe8] sm:$0xff] %vm3689_vm4, %v3558_v53  ;;  %9714 = vmatmul.msk.bf16.gmra.mxu1 %vm3689_vm4, %v4576_v58  ;;  %5681 = vrot.lane.b32.xlu2 %v5524_v37, %s10491_s20  ;;  %v632_v53 = vld [vmem:[%s10601_s1 + $0x290] sm:$0xff]  ;;  %v2546_v58 = vadd.f32 %v12061_v10, %v11725_v31  ;;  %v16187_v10 = vrot.slane %v11800_v13, 1 }
 0x29b   : > { %v12271_v51 = vpop.permute.xlu1 %2211  ;;  %2979 = vrot.lane.b32.xlu0 %v2662_v52, %s10491_s20  ;;  %v2663_v52 = vrot.slane %v16183_v15, 2 }
 0x29c   : > { %16182 = vst [vmem:[#allocation7_spill] sm:$0xff] %v12271_v51  ;;  %v1996_v14 = vpop.permute.xlu2 %1995  ;;  %v1988_v54 = vpop.permute.xlu0 %1987 }
 0x29d   : > { %v12278_v9 = vpop.f32.mrf.mxu0  ;;  %v2436_v44 = vadd.f32 %v1988_v54, %v16185_v46  ;;  %v16071_v54 = vrot.slane %v11894_v6, 1 }
 0x2a1   : > { %5679 = vrot.lane.b32.xlu1 %v5522_v0, %s10491_s20 }
 0x2a2   : > { %2019 = vrot.lane.b32.xlu2 %v1702_v49, %s10492_s21  ;;  %v751_v49 = vpack.c.bf16 %v633_v47, %v632_v53  ;;  %v1706_v53 = vsel %vm1605_vm3, %v1703_v5, %v16071_v54 }
 0x2a3   : > { %v2948_v61 = vpop.permute.xlu1 %2947  ;;  %2021 = vrot.lane.b32.xlu0 %v1704_v56, %s10492_s21 }
 0x2a4   : > { %v3396_v37 = vadd.f32 %v2948_v61, %v2436_v44  ;;  %v12293_v33 = vpop.permute.xlu2 %1999  ;;  %v3168_v42 = vpop.permute.xlu0 %3167  ;;  %v1700_v44 = vsel %vm1605_vm3, %v16187_v10, %v1699_v17  ;;  %v2666_v61 = vsel %vm2565_vm2, %v2663_v52, %v2665_v32  ;;  %v2664_v10 = vsel %vm2565_vm2, %v2661_v45, %v2663_v52 }
 0x2a5   : > { %v3506_v46 = vadd.f32 %v3168_v42, %v2546_v58  ;;  %v12299_v56 = vpop.f32.mrf.mxu0  ;;  %v12313_v47 = vpop.f32.mrf.mxu1 }
 0x2a6   : > { %v3560_v0 = vadd.f32 %v12148_v19, %v3396_v37  ;;  %16186 = vst [vmem:[#allocation9_spill] sm:$0xff] %v12299_v56  ;;  %v4199_v56 = vld [vmem:[#allocation2 + $0xe2] ss:$2 sm:$0xff] }
 0x2a7   : > { %v3670_v31 = vadd.f32 %v12148_v19, %v3506_v46  ;;  %v16070_v46 = vrot.slane %v12313_v47, 2 }
 0x2a8   : > { %3721 = vst.msk [vmem:[#allocation2 + $0xf8] sm:$0xff] %vm3689_vm4, %v3560_v0  ;;  %9661 = vmatmul.msk.bf16.gmra.mxu0 %vm791_vm1, %v751_v49  ;;  %v16072_v0 = vrot.slane %v12313_v47, 1 }
 0x2a9   : > { %2017 = vrot.lane.b32.xlu1 %v1700_v44, %s10492_s21  ;;  %3831 = vst.msk [vmem:[#allocation2 + $0x468] sm:$0xff] %vm3689_vm4, %v3670_v31  ;;  %v4039_v44 = vld [vmem:[#allocation2 + $0xe1] ss:$2 sm:$0xff] }
 0x2aa   : > { %2023 = vrot.lane.b32.xlu2 %v1706_v53, %s10492_s21  ;;  %v16189_v53 = vrot.slane %v12219_v3, 1 }
 0x2ab   : > { %v1990_v58 = vpop.permute.xlu1 %1989  ;;  %2983 = vrot.lane.b32.xlu0 %v2666_v61, %s10491_s20 }
 0x2ac   : > { %v2437_v17 = vadd.f32 %v1990_v58, %v16158_v30  ;;  %v12318_v37 = vpop.permute.xlu2 %5194  ;;  %v1992_v42 = vpop.permute.xlu0 %1991  ;;  %v3879_v30 = vld [vmem:[#allocation2 + $0xe0] ss:$2 sm:$0xff]  ;;  %v5047_v45 = vsel %vm1605_vm3, %v16189_v53, %v16072_v0  ;;  %v2669_v0 = vrot.slane %v11945_v22, 2 }
 0x2ad   : > { %v12323_v49 = vpop.f32.mrf.mxu0  ;;  %v2438_v61 = vadd.f32 %v1992_v42, %v11456_v48  ;;  %v634_v58 = vld [vmem:[%s10601_s1 + $0x2a0] sm:$0xff]  ;;  %v2667_v48 = vrot.slane %v11919_v21, 2  ;;  %v2440_v42 = vadd.f32 %v1996_v14, %v11510_v41 }
 0x2ae   : > { %v3397_v5 = vadd.f32 %v12223_v36, %v2437_v17  ;;  %16188 = vst [vmem:[#allocation8_spill] sm:$0xff] %v12323_v49  ;;  %v5526_v36 = vsel %vm2565_vm2, %v5523_v26, %v16070_v46  ;;  %v635_v17 = vld [vmem:[%s10601_s1 + $0x2a8] sm:$0xff]  ;;  %v4344_v26 = vmax.f32 %v3879_v30, %v4039_v44 }
 0x2af   : > { %v3881_v54 = vld [vmem:[#allocation2 + $0xf0] ss:$2 sm:$0xff]  ;;  %v4041_v53 = vld [vmem:[#allocation2 + $0xf1] ss:$2 sm:$0xff]  ;;  %v752_v51 = vpack.c.bf16 %v635_v17, %v634_v58  ;;  %v2668_v14 = vsel %vm2565_vm2, %v2665_v32, %v2667_v48 }
 0x2b0   : > { %v3561_v31 = vadd.f32 %v12148_v19, %v3397_v5  ;;  %v4345_v30 = vmax.f32 %v3881_v54, %v4041_v53  ;;  %v4424_v44 = vmax.f32 %v4344_v26, %v4199_v56  ;;  %v2670_v54 = vsel %vm2565_vm2, %v2667_v48, %v2669_v0 }
 0x2b1   : > { %2981 = vrot.lane.b32.xlu1 %v2664_v10, %s10491_s20  ;;  %v1707_v10 = vrot.slane %v11919_v21, 1 }
 0x2b2   : > { %3722 = vst.msk [vmem:[#allocation2 + $0x100] sm:$0xff] %vm3689_vm4, %v3561_v31  ;;  %5204 = vrot.lane.b32.xlu2 %v5047_v45, %s10492_s21 }
 0x2b3   : > { %v2952_v52 = vpop.permute.xlu1 %2951  ;;  %5683 = vrot.lane.b32.xlu0 %v5526_v36, %s10491_s20 }
 0x2b4   : > { %v3398_v5 = vadd.f32 %v2952_v52, %v2438_v61  ;;  %v12348_v31 = vpop.permute.xlu2 %2963  ;;  %v2956_v46 = vpop.permute.xlu0 %2955 }
 0x2b5   : > { %v3400_v45 = vadd.f32 %v2956_v46, %v2440_v42  ;;  %v12353_v49 = vpop.f32.mrf.mxu0  ;;  %v12358_v61 = vpop.f32.mrf.mxu1  ;;  %v16190_v46 = vrot.slane %v11894_v6, 1 }
 0x2b6   : > { %v3562_v36 = vadd.f32 %v12148_v19, %v3398_v5  ;;  %v16078_v17 = vrot.slane %v12358_v61, 2  ;;  %v4504_v5 = vmax.f32 %v4424_v44, 0.0  ;;  %v16191_v44 = vrot.slane %v12313_v47, 2 }
 0x2b7   : > { %v3564_v41 = vadd.f32 %v12148_v19, %v3400_v45  ;;  %v1708_v58 = vsel %vm1605_vm3, %v16190_v46, %v1707_v10  ;;  %v16077_v45 = vrot.slane %v12358_v61, 1  ;;  %v16192_v46 = vrot.slane %v12313_v47, 1 }
 0x2b8   : > { %3723 = vst.msk [vmem:[#allocation2 + $0x108] sm:$0xff] %vm3689_vm4, %v3562_v36  ;;  %9662 = vmatmul.msk.bf16.gmra.mxu0 %vm791_vm1, %v752_v51  ;;  %v1711_v36 = vrot.slane %v11967_v23, 1 }
 0x2b9   : > { %2985 = vrot.lane.b32.xlu1 %v2668_v14, %s10491_s20  ;;  %v4201_v52 = vld [vmem:[#allocation2 + $0xf2] ss:$2 sm:$0xff]  ;;  %3725 = vst.msk [vmem:[#allocation2 + $0x118] sm:$0xff] %vm3689_vm4, %v3564_v41 }
 0x2ba   : > { %v4425_v32 = vmax.f32 %v4345_v30, %v4201_v52  ;;  %2987 = vrot.lane.b32.xlu2 %v2670_v54, %s10491_s20  ;;  %v1709_v30 = vrot.slane %v11945_v22, 1  ;;  %v5528_v52 = vsel %vm2565_vm2, %v16191_v44, %v16078_v17  ;;  %v5434_v17 = vadd.f32 %v12318_v37, %v11969_v55 }
 0x2bb   : > { %v1994_v56 = vpop.permute.xlu1 %1993  ;;  %2025 = vrot.lane.b32.xlu0 %v1708_v58, %s10492_s21  ;;  %v5049_v58 = vsel %vm1605_vm3, %v16192_v46, %v16077_v45 }
 0x2bc   : > { %v2439_v51 = vadd.f32 %v1994_v56, %v11481_v18  ;;  %v12375_v42 = vpop.permute.xlu2 %2005  ;;  %v4505_v26 = vmax.f32 %v4425_v32, 0.0  ;;  %v1998_v53 = vpop.permute.xlu0 %1997  ;;  %v1712_v54 = vsel %vm1605_vm3, %v1709_v30, %v1711_v36  ;;  %v636_v56 = vld [vmem:[%s10601_s1 + $0x2b0] sm:$0xff] }
 0x2bd   : > { %v12380_v14 = vpop.f32.mrf.mxu0 }
 0x2be   : > { %v3399_v48 = vadd.f32 %v12247_v63, %v2439_v51  ;;  %v4577_v41 = vpack.c.bf16 %v4505_v26, %v4504_v5  ;;  %v2547_v63 = vadd.f32 %v12226_v7, %v11762_v57  ;;  %v637_v51 = vld [vmem:[%s10601_s1 + $0x2b8] sm:$0xff]  ;;  %v2442_v57 = vadd.f32 %v12293_v33, %v11557_v27 }
 0x2bf   : > { %v2671_v26 = vrot.slane %v11967_v23, 2  ;;  %v1710_v27 = vsel %vm1605_vm3, %v1707_v10, %v1709_v30  ;;  %v2441_v33 = vadd.f32 %v1998_v53, %v11535_v1  ;;  %v16076_v10 = vrot.slane %v11990_v24, 1 }
 0x2c0   : > { %v3563_v18 = vadd.f32 %v12148_v19, %v3399_v48  ;;  %9715 = vmatmul.msk.bf16.gmra.mxu1 %vm3689_vm4, %v4577_v41  ;;  %v2673_v41 = vrot.slane %v11990_v24, 2 }
 0x2c1   : > { %5685 = vrot.lane.b32.xlu1 %v5528_v52, %s10491_s20  ;;  %v753_v52 = vpack.c.bf16 %v637_v51, %v636_v56  ;;  %v16075_v56 = vrot.slane %v12014_v4, 2 }
 0x2c2   : > { %3724 = vst.msk [vmem:[#allocation2 + $0x110] sm:$0xff] %vm3689_vm4, %v3563_v18  ;;  %2029 = vrot.lane.b32.xlu2 %v1712_v54, %s10492_s21  ;;  %v2674_v54 = vsel %vm2565_vm2, %v2671_v26, %v2673_v41 }
 0x2c3   : > { %v3170_v32 = vpop.permute.xlu1 %3169  ;;  %5206 = vrot.lane.b32.xlu0 %v5049_v58, %s10492_s21 }
 0x2c4   : > { %v3507_v7 = vadd.f32 %v3170_v32, %v2547_v63  ;;  %v12406_v5 = vpop.permute.xlu2 %2967  ;;  %v2960_v48 = vpop.permute.xlu0 %2959  ;;  %v2672_v63 = vsel %vm2565_vm2, %v2669_v0, %v2671_v26  ;;  %v4043_v26 = vld [vmem:[#allocation2 + $0x101] ss:$2 sm:$0xff] }
 0x2c5   : > { %v3402_v44 = vadd.f32 %v2960_v48, %v2442_v57  ;;  %v12411_v46 = vpop.f32.mrf.mxu0  ;;  %v1714_v57 = vsel %vm1605_vm3, %v1711_v36, %v16076_v10  ;;  %v2445_v36 = vadd.f32 %v12375_v42, %v16162_v34  ;;  %v12459_v42 = vld [vmem:[%s15980_s4] ss:$0 sm:$0xff] }
 0x2c6   : > { %v3671_v18 = vadd.f32 %v12148_v19, %v3507_v7  ;;  %v3883_v7 = vld [vmem:[#allocation2 + $0x100] ss:$2 sm:$0xff] }
 0x2c7   : > { %v3566_v58 = vadd.f32 %v12148_v19, %v3402_v44  ;;  %v638_v44 = vld [vmem:[%s10601_s1 + $0x2c0] sm:$0xff] }
 0x2c8   : > { %3832 = vst.msk [vmem:[#allocation2 + $0x470] sm:$0xff] %vm3689_vm4, %v3671_v18  ;;  %9663 = vmatmul.msk.bf16.gmra.mxu0 %vm791_vm1, %v753_v52  ;;  %v2676_v18 = vsel %vm2565_vm2, %v2673_v41, %v16075_v56  ;;  %v639_v52 = vld [vmem:[%s10601_s1 + $0x2c8] sm:$0xff] }
 0x2c9   : > { %2027 = vrot.lane.b32.xlu1 %v1710_v27, %s10492_s21  ;;  %3727 = vst.msk [vmem:[#allocation2 + $0x128] sm:$0xff] %vm3689_vm4, %v3566_v58  ;;  %v3885_v27 = vld [vmem:[#allocation2 + $0x110] ss:$2 sm:$0xff] }
 0x2ca   : > { %2991 = vrot.lane.b32.xlu2 %v2674_v54, %s10491_s20 }
 0x2cb   : > { %v2958_v32 = vpop.permute.xlu1 %2957  ;;  %2989 = vrot.lane.b32.xlu0 %v2672_v63, %s10491_s20  ;;  %v4203_v63 = vld [vmem:[#allocation2 + $0x102] ss:$2 sm:$0xff] }
 0x2cc   : > { %v3401_v1 = vadd.f32 %v2958_v32, %v2441_v33  ;;  %v5676_v53 = vpop.permute.xlu2 %5675  ;;  %v2002_v30 = vpop.permute.xlu0 %2001  ;;  %v4045_v33 = vld [vmem:[#allocation2 + $0x111] ss:$2 sm:$0xff] }
 0x2cd   : > { %v12432_v0 = vpop.f32.mrf.mxu0  ;;  %v2443_v48 = vadd.f32 %v2002_v30, %v11588_v25  ;;  %v754_v25 = vpack.c.bf16 %v639_v52, %v638_v44  ;;  %v4347_v41 = vmax.f32 %v3885_v27, %v4045_v33 }
 0x2ce   : > { %v3565_v51 = vadd.f32 %v12148_v19, %v3401_v1  ;;  %v4346_v1 = vmax.f32 %v3883_v7, %v4043_v26 }
 0x2d0   : > { %3726 = vst.msk [vmem:[#allocation2 + $0x120] sm:$0xff] %vm3689_vm4, %v3565_v51  ;;  %v4426_v56 = vmax.f32 %v4346_v1, %v4203_v63 }
 0x2d1   : > { %2031 = vrot.lane.b32.xlu1 %v1714_v57, %s10492_s21 }
 0x2d2   : > { %v4506_v7 = vmax.f32 %v4426_v56, 0.0 }
 0x2d3   : > { %v2962_v58 = vpop.permute.xlu1 %2961  ;;  %2993 = vrot.lane.b32.xlu0 %v2676_v18, %s10491_s20 }
 0x2d4   : > { %v3403_v54 = vadd.f32 %v2962_v58, %v2443_v48  ;;  %v2010_v32 = vpop.permute.xlu2 %2009  ;;  %v2966_v51 = vpop.permute.xlu0 %2965 }
 0x2d5   : > { %v3405_v57 = vadd.f32 %v2966_v51, %v2445_v36  ;;  %v12453_v34 = vpop.f32.mrf.mxu0  ;;  %v16194_v36 = vrot.slane %v12358_v61, 1  ;;  %v1715_v51 = vrot.slane %v12014_v4, 1 }
 0x2d6   : > { %v3567_v30 = vadd.f32 %v12148_v19, %v3403_v54 }
 0x2d7   : > { %v4205_v10 = vld [vmem:[#allocation2 + $0x112] ss:$2 sm:$0xff]  ;;  %v3569_v18 = vadd.f32 %v12148_v19, %v3405_v57 }
 0x2d8   : > { %3728 = vst.msk [vmem:[#allocation2 + $0x130] sm:$0xff] %vm3689_vm4, %v3567_v30  ;;  %v4427_v45 = vmax.f32 %v4347_v41, %v4205_v10  ;;  %9664 = vmatmul.msk.bf16.gmra.mxu0 %vm791_vm1, %v754_v25  ;;  %v2447_v25 = vadd.f32 %v2010_v32, %v11697_v29  ;;  %v640_v41 = vld [vmem:[%s10601_s1 + $0x2d0] sm:$0xff] }
 0x2d9   : > { %3730 = vst.msk [vmem:[#allocation2 + $0x140] sm:$0xff] %vm3689_vm4, %v3569_v18  ;;  %v641_v18 = vld [vmem:[%s10601_s1 + $0x2d8] sm:$0xff] }
 0x2da   : > { %v4507_v26 = vmax.f32 %v4427_v45, 0.0  ;;  %v16193_v45 = vrot.slane %v12358_v61, 2  ;;  %v755_v32 = vpack.c.bf16 %v641_v18, %v640_v41  ;;  %v4047_v41 = vld [vmem:[#allocation2 + $0x121] ss:$2 sm:$0xff] }
 0x2db   : > { %v5674_v48 = vpop.permute.xlu1 %5673 }
 0x2dc   : > { %v5913_v44 = vadd.f32 %v5674_v48, %v5434_v17  ;;  %v12461_v52 = vpop.permute.xlu2 %2973  ;;  %v4578_v10 = vpack.c.bf16 %v4507_v26, %v4506_v7  ;;  %v5197_v55 = vpop.permute.xlu0 %5196  ;;  %v2677_v7 = vrot.slane %v12042_v11, 2 }
 0x2dd   : > { %v12463_v58 = vpop.f32.mrf.mxu1  ;;  %v5435_v63 = vadd.f32 %v5197_v55, %v11999_v2 }
 0x2de   : > { %v5997_v37 = vadd.f32 %v12459_v42, %v5913_v44  ;;  %v5050_v27 = vrot.slane %v12463_v58, 1  ;;  %v5529_v33 = vrot.slane %v12463_v58, 2  ;;  %9716 = vmatmul.msk.bf16.gmra.mxu1 %vm3689_vm4, %v4578_v10 }
 0x2df   : > { %v5914_v17 = vadd.f32 %v5676_v53, %v5435_v63  ;;  %v12483_v53 = vpop.f32.mrf.mxu0 }
 0x2e0   : > { %6077 = vst.msk [vmem:[#allocation2] sm:$0xff] %vm3689_vm4, %v5997_v37  ;;  %v5530_v56 = vsel %vm2565_vm2, %v16193_v45, %v5529_v33  ;;  %v5051_v54 = vsel %vm1605_vm3, %v16194_v36, %v5050_v27 }
 0x2e1   : > { %5687 = vrot.lane.b32.xlu2 %v5530_v56, %s10491_s20  ;;  %v5998_v1 = vadd.f32 %v12459_v42, %v5914_v17  ;;  %5208 = vrot.lane.b32.xlu1 %v5051_v54, %s10492_s21  ;;  %v1717_v54 = vrot.slane %v12042_v11, 1 }
 0x2e3   : > { %v2004_v2 = vpop.permute.xlu1 %2003  ;;  %6078 = vst.msk [vmem:[#allocation2 + $0x8] sm:$0xff] %vm3689_vm4, %v5998_v1  ;;  %v1719_v1 = vrot.slane %v12066_v60, 1 }
 0x2e4   : > { %v2444_v30 = vadd.f32 %v2004_v2, %v11617_v40  ;;  %v12486_v57 = vpop.permute.xlu2 %5200  ;;  %v2970_v48 = vpop.permute.xlu0 %2969  ;;  %v16195_v40 = vrot.slane %v11990_v24, 1 }
 0x2e5   : > { %v12491_v26 = vpop.f32.mrf.mxu1  ;;  %v3407_v29 = vadd.f32 %v2970_v48, %v2447_v25 }
 0x2e6   : > { %v3404_v44 = vadd.f32 %v12348_v31, %v2444_v30  ;;  %v16080_v10 = vrot.slane %v12491_v26, 2  ;;  %v1716_v63 = vsel %vm1605_vm3, %v16195_v40, %v1715_v51  ;;  %v16196_v31 = vrot.slane %v12014_v4, 2  ;;  %v3887_v30 = vld [vmem:[#allocation2 + $0x120] ss:$2 sm:$0xff] }
 0x2e7   : > { %v3571_v37 = vadd.f32 %v12148_v19, %v3407_v29  ;;  %v12521_v48 = vpop.f32.mrf.mxu0 }
 0x2e8   : > { %v3568_v55 = vadd.f32 %v12148_v19, %v3404_v44  ;;  %v5532_v17 = vsel %vm2565_vm2, %v5529_v33, %v16080_v10  ;;  %v2678_v45 = vsel %vm2565_vm2, %v16196_v31, %v2677_v7  ;;  %9665 = vmatmul.msk.bf16.gmra.mxu0 %vm791_vm1, %v755_v32  ;;  %v16079_v33 = vrot.slane %v12491_v26, 1  ;;  %v4207_v44 = vld [vmem:[#allocation2 + $0x122] ss:$2 sm:$0xff] }
 0x2e9   : > { %2033 = vrot.lane.b32.xlu2 %v1716_v63, %s10492_s21  ;;  %5689 = vrot.lane.b32.xlu0 %v5532_v17, %s10491_s20  ;;  %3732 = vst.msk [vmem:[#allocation2 + $0x150] sm:$0xff] %vm3689_vm4, %v3571_v37  ;;  %v4348_v32 = vmax.f32 %v3887_v30, %v4047_v41  ;;  %v1720_v37 = vsel %vm1605_vm3, %v1717_v54, %v1719_v1  ;;  %v642_v30 = vld [vmem:[%s10601_s1 + $0x2e0] sm:$0xff] }
 0x2ea   : > { %3729 = vst.msk [vmem:[#allocation2 + $0x138] sm:$0xff] %vm3689_vm4, %v3568_v55  ;;  %2995 = vrot.lane.b32.xlu1 %v2678_v45, %s10491_s20  ;;  %v1718_v55 = vsel %vm1605_vm3, %v1715_v51, %v1717_v54  ;;  %v16197_v45 = vld [vmem:[#allocation15_spill] sm:$0xff]  ;;  %v2679_v54 = vrot.slane %v12066_v60, 2 }
 0x2eb   : > { %v2008_v56 = vpop.permute.xlu1 %2007  ;;  %v4428_v17 = vmax.f32 %v4348_v32, %v4207_v44  ;;  %v643_v51 = vld [vmem:[%s10601_s1 + $0x2e8] sm:$0xff] }
 0x2ec   : > { %v2446_v36 = vadd.f32 %v2008_v56, %v16165_v16  ;;  %v5678_v2 = vpop.permute.xlu0 %5677  ;;  %v12518_v25 = vpop.permute.xlu2 %2977  ;;  %v5053_v16 = vsel %vm1605_vm3, %v5050_v27, %v16079_v33  ;;  %v16081_v56 = vrot.slane %v16197_v45, 2  ;;  %v756_v32 = vpack.c.bf16 %v643_v51, %v642_v30 }
 0x2ee   : > { %v3406_v18 = vadd.f32 %v12406_v5, %v2446_v36 }
 0x2ef   : > { %v12546_v33 = vpop.f32.mrf.mxu0 }
 0x2f0   : > { %v3570_v29 = vadd.f32 %v12148_v19, %v3406_v18  ;;  %v1721_v18 = vrot.slane %v12094_v8, 1 }
 0x2f1   : > { %5210 = vrot.lane.b32.xlu2 %v5053_v16, %s10492_s21  ;;  %v3889_v40 = vld [vmem:[#allocation2 + $0x130] ss:$2 sm:$0xff]  ;;  %v4049_v5 = vld [vmem:[#allocation2 + $0x131] ss:$2 sm:$0xff]  ;;  %2035 = vrot.lane.b32.xlu0 %v1718_v55, %s10492_s21 }
 0x2f2   : > { %3731 = vst.msk [vmem:[#allocation2 + $0x148] sm:$0xff] %vm3689_vm4, %v3570_v29  ;;  %2037 = vrot.lane.b32.xlu1 %v1720_v37, %s10492_s21  ;;  %v4349_v63 = vmax.f32 %v3889_v40, %v4049_v5  ;;  %v4209_v31 = vld [vmem:[#allocation2 + $0x132] ss:$2 sm:$0xff]  ;;  %v2681_v29 = vrot.slane %v12094_v8, 2  ;;  %v4508_v37 = vmax.f32 %v4428_v17, 0.0 }
 0x2f3   : > { %v5199_v27 = vpop.permute.xlu1 %5198 }
 0x2f4   : > { %v5436_v36 = vadd.f32 %v5199_v27, %v12080_v39  ;;  %v4429_v41 = vmax.f32 %v4349_v63, %v4209_v31  ;;  %v2012_v16 = vpop.permute.xlu0 %2011  ;;  %v5682_v44 = vpop.permute.xlu2 %5681  ;;  %v16198_v39 = vld [vmem:[#allocation4_spill] sm:$0xff]  ;;  %v2682_v10 = vsel %vm2565_vm2, %v2679_v54, %v2681_v29 }
 0x2f5   : > { %v16199_v27 = vrot.slane %v16198_v39, 2  ;;  %v2448_v17 = vadd.f32 %v2012_v16, %v11723_v59 }
 0x2f6   : > { %v5915_v55 = vadd.f32 %v5678_v2, %v5436_v36  ;;  %v4509_v40 = vmax.f32 %v4429_v41, 0.0  ;;  %v1722_v2 = vsel %vm1605_vm3, %v1719_v1, %v1721_v18 }
 0x2f7   : > { %v2854_v63 = vsel %vm2565_vm2, %v16199_v27, %v16081_v56  ;;  %v10329_v27 = vld [vmem:[%s15981_s5 + $0x8] sm:$0xff] }
 0x2f8   : > { %v5999_v5 = vadd.f32 %v12459_v42, %v5915_v55  ;;  %v4579_v31 = vpack.c.bf16 %v4509_v40, %v4508_v37  ;;  %9666 = vmatmul.msk.bf16.gmra.mxu0 %vm791_vm1, %v756_v32  ;;  %v16200_v37 = vrot.slane %v12491_v26, 2  ;;  %v16201_v32 = vrot.slane %v12491_v26, 1  ;;  %6499 = vmatpush.bf16.msrb.mxu2 %v10329_v27 }
 0x2f9   : > { %3171 = vrot.lane.b32.xlu2 %v2854_v63, %s10491_s20  ;;  %2039 = vrot.lane.b32.xlu0 %v1722_v2, %s10492_s21  ;;  %v2683_v63 = vrot.slane %v12117_v20, 2  ;;  %v644_v2 = vld [vmem:[%s10601_s1 + $0x2f0] sm:$0xff] }
 0x2fa   : > { %6079 = vst.msk [vmem:[#allocation2 + $0x10] sm:$0xff] %vm3689_vm4, %v5999_v5  ;;  %2999 = vrot.lane.b32.xlu1 %v2682_v10, %s10491_s20  ;;  %9717 = vmatmul.msk.bf16.gmra.mxu1 %vm3689_vm4, %v4579_v31  ;;  %v2680_v10 = vsel %vm2565_vm2, %v2677_v7, %v2679_v54  ;;  %v12580_v7 = vpop.f32.mrf.mxu0 }
 0x2fb   : > { %v12557_v36 = vpop.f32.mrf.mxu1  ;;  %v2972_v30 = vpop.permute.xlu1 %2971 }
 0x2fc   : > { %v3408_v51 = vadd.f32 %v2972_v30, %v2448_v17  ;;  %v16082_v41 = vrot.slane %v12557_v36, 1  ;;  %v5533_v1 = vrot.slane %v12557_v36, 2  ;;  %v2016_v55 = vpop.permute.xlu0 %2015  ;;  %v2020_v16 = vpop.permute.xlu2 %2019  ;;  %v645_v17 = vld [vmem:[%s10601_s1 + $0x2f8] sm:$0xff]  ;;  %v1723_v30 = vrot.slane %v12117_v20, 1 }
 0x2fe   : > { %v3572_v59 = vadd.f32 %v12148_v19, %v3408_v51  ;;  %v5534_v40 = vsel %vm2565_vm2, %v16200_v37, %v5533_v1  ;;  %v5055_v5 = vsel %vm1605_vm3, %v16201_v32, %v16082_v41  ;;  %v16202_v51 = vld [vmem:[#allocation11_spill] sm:$0xff]  ;;  %v10328_v37 = vld [vmem:[%s15981_s5] sm:$0xff]  ;;  %v1724_v41 = vsel %vm1605_vm3, %v1721_v18, %v1723_v30 }
 0x2ff   : > { %6500 = vmatpush.bf16.msrb.mxu2 %v10328_v37 }
 0x300   : > { %3733 = vst.msk [vmem:[#allocation2 + $0x158] sm:$0xff] %vm3689_vm4, %v3572_v59  ;;  %v2685_v59 = vrot.slane %v16202_v51, 2 }
 0x301   : > { %2997 = vrot.lane.b32.xlu2 %v2680_v10, %s10491_s20  ;;  %5212 = vrot.lane.b32.xlu0 %v5055_v5, %s10492_s21  ;;  %v757_v5 = vpack.c.bf16 %v645_v17, %v644_v2  ;;  %v2450_v2 = vadd.f32 %v2016_v55, %v11775_v62  ;;  %v2452_v17 = vadd.f32 %v2020_v16, %v16176_v28  ;;  %v16203_v55 = vld [vmem:[#allocation13_spill] sm:$0xff]  ;;  %v1725_v28 = vrot.slane %v16202_v51, 1  ;;  %v4211_v16 = vld [vmem:[#allocation2 + $0x142] ss:$2 sm:$0xff] }
 0x302   : > { %5691 = vrot.lane.b32.xlu1 %v5534_v40, %s10491_s20  ;;  %v1727_v37 = vrot.slane %v16203_v55, 1 }
 0x303   : > { %v2014_v54 = vpop.permute.xlu1 %2013  ;;  %v12595_v56 = vpop.f32.mrf.mxu1 }
 0x304   : > { %v2449_v31 = vadd.f32 %v2014_v54, %v11751_v43  ;;  %v5203_v10 = vpop.permute.xlu0 %5202  ;;  %v2684_v54 = vsel %vm2565_vm2, %v2681_v29, %v2683_v63 }
 0x305   : > { %v5438_v32 = vadd.f32 %v5203_v10, %v12181_v35  ;;  %v3891_v35 = vld [vmem:[#allocation2 + $0x140] ss:$2 sm:$0xff] }
 0x306   : > { %v3409_v40 = vadd.f32 %v12461_v52, %v2449_v31  ;;  %v2686_v52 = vsel %vm2565_vm2, %v2683_v63, %v2685_v59  ;;  %v4051_v31 = vld [vmem:[#allocation2 + $0x141] ss:$2 sm:$0xff]  ;;  %v16084_v63 = vrot.slane %v12595_v56, 2 }
 0x307   : > { %v5917_v43 = vadd.f32 %v5682_v44, %v5438_v32  ;;  %v2024_v44 = vpop.permute.xlu2 %2023  ;;  %v4350_v62 = vmax.f32 %v3891_v35, %v4051_v31 }
 0x308   : > { %v3573_v27 = vadd.f32 %v12148_v19, %v3409_v40  ;;  %9667 = vmatmul.msk.bf16.gmra.mxu0 %vm791_vm1, %v757_v5  ;;  %v12614_v40 = vpop.f32.mrf.mxu0  ;;  %v5536_v35 = vsel %vm2565_vm2, %v5533_v1, %v16084_v63  ;;  %v5437_v1 = vadd.f32 %v12486_v57, %v12126_v12 }
 0x309   : > { %3001 = vrot.lane.b32.xlu2 %v2684_v54, %s10491_s20  ;;  %v6001_v29 = vadd.f32 %v12459_v42, %v5917_v43  ;;  %3003 = vrot.lane.b32.xlu0 %v2686_v52, %s10491_s20  ;;  %v4053_v43 = vld [vmem:[#allocation2 + $0x151] ss:$2 sm:$0xff] }
 0x30a   : > { %3734 = vst.msk [vmem:[#allocation2 + $0x160] sm:$0xff] %vm3689_vm4, %v3573_v27  ;;  %2041 = vrot.lane.b32.xlu1 %v1724_v41, %s10492_s21  ;;  %v16083_v41 = vrot.slane %v12595_v56, 1  ;;  %v3893_v27 = vld [vmem:[#allocation2 + $0x150] ss:$2 sm:$0xff] }
 0x30b   : > { %v2976_v18 = vpop.permute.xlu1 %2975  ;;  %6081 = vst.msk [vmem:[#allocation2 + $0x20] sm:$0xff] %vm3689_vm4, %v6001_v29  ;;  %v4351_v31 = vmax.f32 %v3893_v27, %v4053_v43  ;;  %v16204_v29 = vrot.slane %v12557_v36, 1 }
 0x30c   : > { %v3410_v10 = vadd.f32 %v2976_v18, %v2450_v2  ;;  %v4430_v2 = vmax.f32 %v4350_v62, %v4211_v16  ;;  %v2687_v16 = vrot.slane %v16203_v55, 2 }
 0x30d   : > { %v2980_v32 = vpop.permute.xlu0 %2979  ;;  %v5057_v18 = vsel %vm1605_vm3, %v16204_v29, %v16083_v41 }
 0x30e   : > { %v3574_v5 = vadd.f32 %v12148_v19, %v3410_v10  ;;  %v3412_v54 = vadd.f32 %v2980_v32, %v2452_v17  ;;  %v4510_v27 = vmax.f32 %v4430_v2, 0.0  ;;  %v1726_v2 = vsel %vm1605_vm3, %v1723_v30, %v1725_v28 }
 0x30f   : > { %v5205_v41 = vpop.permute.xlu2 %5204 }
 0x310   : > { %3735 = vst.msk [vmem:[#allocation2 + $0x168] sm:$0xff] %vm3689_vm4, %v3574_v5  ;;  %v3576_v52 = vadd.f32 %v12148_v19, %v3412_v54  ;;  %v1728_v19 = vsel %vm1605_vm3, %v1725_v28, %v1727_v37  ;;  %v646_v5 = vld [vmem:[%s10601_s1 + $0x300] sm:$0xff]  ;;  %v647_v54 = vld [vmem:[%s10601_s1 + $0x308] sm:$0xff] }
 0x311   : > { %5693 = vrot.lane.b32.xlu2 %v5536_v35, %s10491_s20  ;;  %v4213_v17 = vld [vmem:[#allocation2 + $0x152] ss:$2 sm:$0xff]  ;;  %2045 = vrot.lane.b32.xlu0 %v1728_v19, %s10492_s21  ;;  %v2688_v19 = vsel %vm2565_vm2, %v2685_v59, %v2687_v16 }
 0x312   : > { %3737 = vst.msk [vmem:[#allocation2 + $0x178] sm:$0xff] %vm3689_vm4, %v3576_v52  ;;  %5214 = vrot.lane.b32.xlu1 %v5057_v18, %s10492_s21  ;;  %v4431_v10 = vmax.f32 %v4351_v31, %v4213_v17  ;;  %v16205_v35 = vld [vmem:[#allocation14_spill] sm:$0xff]  ;;  %v12643_v52 = vpop.f32.mrf.mxu0  ;;  %v758_v18 = vpack.c.bf16 %v647_v54, %v646_v5 }
 0x313   : > { %v5680_v62 = vpop.permute.xlu1 %5679  ;;  %v2689_v29 = vrot.slane %v16205_v35, 2  ;;  %v6157_v28 = vld [vmem:[#allocation2] ss:$2 sm:$0xff] }
 0x314   : > { %v5916_v32 = vadd.f32 %v5680_v62, %v5437_v1  ;;  %v4511_v43 = vmax.f32 %v4431_v10, 0.0  ;;  %v1729_v10 = vrot.slane %v16205_v35, 1  ;;  %v2454_v62 = vadd.f32 %v2024_v44, %v16183_v15 }
 0x315   : > { %v2022_v63 = vpop.permute.xlu0 %2021  ;;  %v2690_v17 = vsel %vm2565_vm2, %v2687_v16, %v2689_v29 }
 0x316   : > { %v6000_v12 = vadd.f32 %v12459_v42, %v5916_v32  ;;  %v4580_v57 = vpack.c.bf16 %v4511_v43, %v4510_v27  ;;  %v6197_v32 = vld [vmem:[#allocation2 + $0x1] ss:$2 sm:$0xff]  ;;  %v16206_v27 = vld [vmem:[#allocation12_spill] sm:$0xff] }
 0x317   : > { %v12646_v31 = vpop.f32.mrf.mxu1  ;;  %v16085_v43 = vrot.slane %v16206_v27, 2 }
 0x318   : > { %6080 = vst.msk [vmem:[#allocation2 + $0x18] sm:$0xff] %vm3689_vm4, %v6000_v12  ;;  %9718 = vmatmul.msk.bf16.gmra.mxu1 %vm3689_vm4, %v4580_v57  ;;  %9668 = vmatmul.msk.bf16.gmra.mxu0 %vm791_vm1, %v758_v18  ;;  %v5537_v59 = vrot.slane %v12646_v31, 2  ;;  %v6237_v12 = vld [vmem:[#allocation2 + $0x2] ss:$2 sm:$0xff]  ;;  %v12666_v57 = vpop.permute.xlu2 %2987 }
 0x319   : > { %2043 = vrot.lane.b32.xlu2 %v1726_v2, %s10492_s21  ;;  %3007 = vrot.lane.b32.xlu0 %v2690_v17, %s10491_s20 }
 0x31a   : > { %3005 = vrot.lane.b32.xlu1 %v2688_v19, %s10491_s20  ;;  %v6277_v19 = vmax.f32 %v6157_v28, %v6197_v32  ;;  %v12678_v17 = vpop.f32.mrf.mxu0 }
 0x31b   : > { %v2018_v1 = vpop.permute.xlu1 %2017 }
 0x31c   : > { %v2451_v30 = vadd.f32 %v2018_v1, %v11800_v13  ;;  %v12671_v13 = vld [vmem:[%s15978_s2] ss:$0 sm:$0xff]  ;;  %v16207_v1 = vrot.slane %v12595_v56, 2  ;;  %v6317_v32 = vmax.f32 %v6277_v19, %v6237_v12 }
 0x31d   : > { %v2984_v5 = vpop.permute.xlu0 %2983 }
 0x31e   : > { %v3411_v54 = vadd.f32 %v12518_v25, %v2451_v30  ;;  %v3414_v16 = vadd.f32 %v2984_v5, %v2454_v62  ;;  %v1730_v25 = vsel %vm1605_vm3, %v1727_v37, %v1729_v10  ;;  %v5538_v62 = vsel %vm2565_vm2, %v16207_v1, %v5537_v59 }
 0x31f   : > { %v6158_v18 = vld [vmem:[#allocation2 + $0x10] ss:$2 sm:$0xff]  ;;  %v6198_v2 = vld [vmem:[#allocation2 + $0x11] ss:$2 sm:$0xff]  ;;  %v2692_v30 = vsel %vm2565_vm2, %v2689_v29, %v16085_v43  ;;  %v2453_v5 = vadd.f32 %v2022_v63, %v16180_v38  ;;  %v12689_v37 = vpop.f32.mrf.mxu1  ;;  %v5439_v29 = vadd.f32 %v5205_v41, %v12219_v3  ;;  %v1731_v63 = vrot.slane %v16206_v27, 1 }
 0x320   : > { %v3575_v15 = vadd.f32 %v12671_v13, %v3411_v54  ;;  %v3578_v44 = vadd.f32 %v12671_v13, %v3414_v16  ;;  %v6278_v28 = vmax.f32 %v6158_v18, %v6198_v2  ;;  %v6238_v54 = vld [vmem:[#allocation2 + $0x12] ss:$2 sm:$0xff]  ;;  %v5058_v18 = vrot.slane %v12646_v31, 1 }
 0x321   : > { %2047 = vrot.lane.b32.xlu2 %v1730_v25, %s10492_s21  ;;  %5695 = vrot.lane.b32.xlu0 %v5538_v62, %s10491_s20  ;;  %v648_v2 = vld [vmem:[%s10601_s1 + $0x310] sm:$0xff]  ;;  %v649_v38 = vld [vmem:[%s10601_s1 + $0x318] sm:$0xff]  ;;  %v16087_v19 = vrot.slane %v12689_v37, 2  ;;  %v6357_v1 = vmax.f32 %v6317_v32, 0.0  ;;  %v16208_v41 = vrot.slane %v12595_v56, 1 }
 0x322   : > { %3736 = vst.msk [vmem:[#allocation2 + $0x170] sm:$0xff] %vm3689_vm4, %v3575_v15  ;;  %3009 = vrot.lane.b32.xlu1 %v2692_v30, %s10491_s20  ;;  %v6318_v25 = vmax.f32 %v6278_v28, %v6238_v54  ;;  %v759_v35 = vpack.c.bf16 %v649_v38, %v648_v2  ;;  %v1732_v54 = vsel %vm1605_vm3, %v1729_v10, %v1731_v63  ;;  %v1733_v10 = vrot.slane %v12252_v50, 1 }
 0x323   : > { %3739 = vst.msk [vmem:[#allocation2 + $0x188] sm:$0xff] %vm3689_vm4, %v3578_v44  ;;  %v2982_v16 = vpop.permute.xlu1 %2981  ;;  %v5059_v28 = vsel %vm1605_vm3, %v16208_v41, %v5058_v18  ;;  %v5540_v32 = vsel %vm2565_vm2, %v5537_v59, %v16087_v19  ;;  %v2693_v59 = vrot.slane %v12252_v50, 2 }
 0x324   : > { %v3413_v12 = vadd.f32 %v2982_v16, %v2453_v5  ;;  %v6358_v62 = vmax.f32 %v6318_v25, 0.0  ;;  %v2030_v5 = vpop.permute.xlu2 %2029  ;;  %v3895_v16 = vld [vmem:[#allocation2 + $0x160] ss:$2 sm:$0xff]  ;;  %v4055_v25 = vld [vmem:[#allocation2 + $0x161] ss:$2 sm:$0xff] }
 0x325   : > { %v5684_v15 = vpop.permute.xlu0 %5683 }
 0x326   : > { %v3577_v30 = vadd.f32 %v12671_v13, %v3413_v12  ;;  %v5918_v43 = vadd.f32 %v5684_v15, %v5439_v29  ;;  %v6397_v44 = vpack.c.bf16 %v6358_v62, %v6357_v1  ;;  %v4352_v15 = vmax.f32 %v3895_v16, %v4055_v25 }
 0x327   : > { %v5060_v1 = vrot.slane %v12689_v37, 1  ;;  %v1734_v16 = vsel %vm1605_vm3, %v1731_v63, %v1733_v10 }
 0x328   : > { %3738 = vst.msk [vmem:[#allocation2 + $0x180] sm:$0xff] %vm3689_vm4, %v3577_v30  ;;  %v6002_v3 = vadd.f32 %v12459_v42, %v5918_v43  ;;  %9756 = vmatmul.msk.bf16.vlgmr.msrb.gmra.mxu2 %vm3689_vm4, %v6397_v44  ;;  %v12715_v43 = vpop.f32.mrf.mxu0  ;;  %9669 = vmatmul.msk.bf16.gmra.mxu0 %vm791_vm1, %v759_v35  ;;  %v16209_v35 = vrot.slane %v16206_v27, 2 }
 0x329   : > { %5216 = vrot.lane.b32.xlu2 %v5059_v28, %s10492_s21  ;;  %2049 = vrot.lane.b32.xlu0 %v1732_v54, %s10492_s21  ;;  %v3897_v12 = vld [vmem:[#allocation2 + $0x170] ss:$2 sm:$0xff]  ;;  %v4057_v2 = vld [vmem:[#allocation2 + $0x171] ss:$2 sm:$0xff]  ;;  %v5061_v19 = vsel %vm1605_vm3, %v5058_v18, %v5060_v1 }
 0x32a   : > { %6082 = vst.msk [vmem:[#allocation2 + $0x28] sm:$0xff] %vm3689_vm4, %v6002_v3  ;;  %5697 = vrot.lane.b32.xlu1 %v5540_v32, %s10491_s20  ;;  %v4215_v38 = vld [vmem:[#allocation2 + $0x162] ss:$2 sm:$0xff]  ;;  %v4353_v44 = vmax.f32 %v3897_v12, %v4057_v2  ;;  %v2694_v32 = vsel %vm2565_vm2, %v16209_v35, %v2693_v59  ;;  %v16210_v18 = vld [vmem:[#allocation17_spill] sm:$0xff]  ;;  %v16212_v35 = vrot.slane %v16197_v45, 2 }
 0x32b   : > { %v2986_v29 = vpop.permute.xlu1 %2985  ;;  %v4432_v3 = vmax.f32 %v4352_v15, %v4215_v38  ;;  %v1735_v38 = vrot.slane %v12278_v9, 1 }
 0x32d   : > { %v2026_v62 = vpop.permute.xlu0 %2025 }
 0x32e   : > { %v2455_v30 = vadd.f32 %v2026_v62, %v11894_v6  ;;  %v4512_v6 = vmax.f32 %v4432_v3, 0.0  ;;  %v16088_v62 = vrot.slane %v16210_v18, 2 }
 0x32f   : > { %v4217_v41 = vld [vmem:[#allocation2 + $0x172] ss:$2 sm:$0xff] }
 0x330   : > { %v3415_v28 = vadd.f32 %v2986_v29, %v2455_v30  ;;  %v4433_v54 = vmax.f32 %v4353_v44, %v4217_v41  ;;  %v2992_v29 = vpop.permute.xlu2 %2991  ;;  %v16211_v30 = vld [vmem:[#allocation9_spill] sm:$0xff]  ;;  %v12735_v63 = vpop.f32.mrf.mxu0 }
 0x331   : > { %3011 = vrot.lane.b32.xlu2 %v2694_v32, %s10491_s20  ;;  %5218 = vrot.lane.b32.xlu0 %v5061_v19, %s10492_s21  ;;  %v1737_v44 = vrot.slane %v16211_v30, 1  ;;  %v2856_v32 = vsel %vm2565_vm2, %v16212_v35, %v16088_v62 }
 0x332   : > { %v3579_v25 = vadd.f32 %v12671_v13, %v3415_v28  ;;  %2051 = vrot.lane.b32.xlu1 %v1734_v16, %s10492_s21  ;;  %v4513_v12 = vmax.f32 %v4433_v54, 0.0  ;;  %v1736_v28 = vsel %vm1605_vm3, %v1733_v10, %v1735_v38  ;;  %v2695_v10 = vrot.slane %v12278_v9, 2 }
 0x333   : > { %v5686_v2 = vpop.permute.xlu1 %5685  ;;  %v1738_v54 = vsel %vm1605_vm3, %v1735_v38, %v1737_v44 }
 0x334   : > { %3740 = vst.msk [vmem:[#allocation2 + $0x190] sm:$0xff] %vm3689_vm4, %v3579_v25  ;;  %v4581_v15 = vpack.c.bf16 %v4513_v12, %v4512_v6  ;;  %v2697_v6 = vrot.slane %v16211_v30, 2  ;;  %v2457_v12 = vadd.f32 %v2030_v5, %v11945_v22  ;;  %v2696_v5 = vsel %vm2565_vm2, %v2693_v59, %v2695_v10 }
 0x335   : > { %v5207_v41 = vpop.permute.xlu0 %5206 }
 0x336   : > { %v5440_v19 = vadd.f32 %v5207_v41, %v12313_v47  ;;  %9719 = vmatmul.msk.bf16.gmra.mxu1 %vm3689_vm4, %v4581_v15  ;;  %v2698_v22 = vsel %vm2565_vm2, %v2695_v10, %v2697_v6 }
 0x338   : > { %v5919_v3 = vadd.f32 %v5686_v2, %v5440_v19 }
 0x339   : > { %2053 = vrot.lane.b32.xlu2 %v1736_v28, %s10492_s21  ;;  %3173 = vrot.lane.b32.xlu0 %v2856_v32, %s10491_s20  ;;  %v12761_v28 = vpop.f32.mrf.mxu0 }
 0x33a   : > { %v6003_v16 = vadd.f32 %v12459_v42, %v5919_v3  ;;  %2055 = vrot.lane.b32.xlu1 %v1738_v54, %s10492_s21 }
 0x33b   : > { %v2028_v47 = vpop.permute.xlu1 %2027  ;;  %v12750_v25 = vpop.permute.xlu2 %5687 }
 0x33c   : > { %6083 = vst.msk [vmem:[#allocation2 + $0x30] sm:$0xff] %vm3689_vm4, %v6003_v16  ;;  %v2456_v2 = vadd.f32 %v2028_v47, %v11919_v21  ;;  %v16213_v16 = vld [vmem:[#allocation8_spill] sm:$0xff] }
 0x33d   : > { %v12757_v38 = vpop.f32.mrf.mxu1  ;;  %v2990_v15 = vpop.permute.xlu0 %2989  ;;  %v1739_v47 = vrot.slane %v16213_v16, 1 }
 0x33e   : > { %v3416_v41 = vadd.f32 %v12666_v57, %v2456_v2  ;;  %v16089_v19 = vrot.slane %v12757_v38, 1  ;;  %v3417_v3 = vadd.f32 %v2990_v15, %v2457_v12  ;;  %v2699_v12 = vrot.slane %v16213_v16, 2  ;;  %v3899_v15 = vld [vmem:[#allocation2 + $0x180] ss:$2 sm:$0xff] }
 0x340   : > { %v3580_v35 = vadd.f32 %v12671_v13, %v3416_v41  ;;  %v3581_v32 = vadd.f32 %v12671_v13, %v3417_v3  ;;  %v5063_v21 = vsel %vm1605_vm3, %v5060_v1, %v16089_v19  ;;  %v2701_v1 = vrot.slane %v12353_v49, 2  ;;  %v4059_v41 = vld [vmem:[#allocation2 + $0x181] ss:$2 sm:$0xff] }
 0x341   : > { %3015 = vrot.lane.b32.xlu2 %v2698_v22, %s10491_s20  ;;  %3013 = vrot.lane.b32.xlu0 %v2696_v5, %s10491_s20  ;;  %v4219_v22 = vld [vmem:[#allocation2 + $0x182] ss:$2 sm:$0xff]  ;;  %v4354_v62 = vmax.f32 %v3899_v15, %v4059_v41  ;;  %v1741_v15 = vrot.slane %v12353_v49, 1 }
 0x342   : > { %3741 = vst.msk [vmem:[#allocation2 + $0x198] sm:$0xff] %vm3689_vm4, %v3580_v35  ;;  %5220 = vrot.lane.b32.xlu1 %v5063_v21, %s10492_s21  ;;  %v1740_v21 = vsel %vm1605_vm3, %v1737_v44, %v1739_v47 }
 0x343   : > { %3742 = vst.msk [vmem:[#allocation2 + $0x1a0] sm:$0xff] %vm3689_vm4, %v3581_v32  ;;  %v2032_v57 = vpop.permute.xlu1 %2031  ;;  %v2034_v54 = vpop.permute.xlu2 %2033 }
 0x344   : > { %v2458_v59 = vadd.f32 %v2032_v57, %v11967_v23  ;;  %v2459_v10 = vadd.f32 %v2034_v54, %v11990_v24  ;;  %v12783_v23 = vpop.f32.mrf.mxu0  ;;  %v2700_v24 = vsel %vm2565_vm2, %v2697_v6, %v2699_v12  ;;  %v2702_v57 = vsel %vm2565_vm2, %v2699_v12, %v2701_v1 }
 0x345   : > { %v2994_v2 = vpop.permute.xlu0 %2993  ;;  %v2703_v6 = vrot.slane %v12380_v14, 2  ;;  %v1743_v12 = vrot.slane %v12380_v14, 1 }
 0x346   : > { %v3418_v3 = vadd.f32 %v2992_v29, %v2458_v59  ;;  %v3419_v35 = vadd.f32 %v2994_v2, %v2459_v10  ;;  %v4434_v59 = vmax.f32 %v4354_v62, %v4219_v22 }
 0x347   : > { %v1744_v62 = vsel %vm1605_vm3, %v1741_v15, %v1743_v12 }
 0x348   : > { %v3582_v32 = vadd.f32 %v12671_v13, %v3418_v3  ;;  %v3583_v5 = vadd.f32 %v12671_v13, %v3419_v35  ;;  %v4514_v41 = vmax.f32 %v4434_v59, 0.0  ;;  %v2704_v35 = vsel %vm2565_vm2, %v2701_v1, %v2703_v6 }
 0x349   : > { %2057 = vrot.lane.b32.xlu2 %v1740_v21, %s10492_s21  ;;  %v3901_v54 = vld [vmem:[#allocation2 + $0x190] ss:$2 sm:$0xff]  ;;  %v4061_v19 = vld [vmem:[#allocation2 + $0x191] ss:$2 sm:$0xff]  ;;  %3017 = vrot.lane.b32.xlu0 %v2700_v24, %s10491_s20  ;;  %v1742_v21 = vsel %vm1605_vm3, %v1739_v47, %v1741_v15  ;;  %v2707_v1 = vrot.slane %v12432_v0, 2 }
 0x34a   : > { %3743 = vst.msk [vmem:[#allocation2 + $0x1a8] sm:$0xff] %vm3689_vm4, %v3582_v32  ;;  %3019 = vrot.lane.b32.xlu1 %v2702_v57, %s10491_s20  ;;  %v4355_v29 = vmax.f32 %v3901_v54, %v4061_v19  ;;  %v4221_v10 = vld [vmem:[#allocation2 + $0x192] ss:$2 sm:$0xff]  ;;  %v16214_v19 = vld [vmem:[#allocation7_spill] sm:$0xff]  ;;  %v1745_v54 = vrot.slane %v12411_v46, 1 }
 0x34b   : > { %3744 = vst.msk [vmem:[#allocation2 + $0x1b0] sm:$0xff] %vm3689_vm4, %v3583_v5  ;;  %v5211_v44 = vpop.permute.xlu2 %5210  ;;  %v2548_v22 = vadd.f32 %v16214_v19, %v16198_v39 }
 0x34c   : > { %v4435_v2 = vmax.f32 %v4355_v29, %v4221_v10  ;;  %v12803_v5 = vpop.f32.mrf.mxu0  ;;  %v2705_v29 = vrot.slane %v12411_v46, 2 }
 0x34e   : > { %v4515_v3 = vmax.f32 %v4435_v2, 0.0  ;;  %v2708_v2 = vsel %vm2565_vm2, %v2705_v29, %v2707_v1 }
 0x350   : > { %v4582_v32 = vpack.c.bf16 %v4515_v3, %v4514_v41  ;;  %v2706_v41 = vsel %vm2565_vm2, %v2703_v6, %v2705_v29  ;;  %v1746_v3 = vsel %vm1605_vm3, %v1743_v12, %v1745_v54  ;;  %v2709_v6 = vrot.slane %v12453_v34, 2  ;;  %v6199_v29 = vld [vmem:[#allocation2 + $0x21] ss:$2 sm:$0xff] }
 0x351   : > { %3021 = vrot.lane.b32.xlu2 %v2704_v35, %s10491_s20  ;;  %2059 = vrot.lane.b32.xlu0 %v1742_v21, %s10492_s21  ;;  %v1747_v35 = vrot.slane %v12432_v0, 1 }
 0x352   : > { %2061 = vrot.lane.b32.xlu1 %v1744_v62, %s10492_s21  ;;  %9720 = vmatmul.msk.bf16.gmra.mxu1 %vm3689_vm4, %v4582_v32  ;;  %v1749_v32 = vrot.slane %v12453_v34, 1 }
 0x353   : > { %v3172_v24 = vpop.permute.xlu2 %3171  ;;  %v5209_v57 = vpop.permute.xlu1 %5208 }
 0x354   : > { %v3508_v47 = vadd.f32 %v3172_v24, %v2548_v22  ;;  %v5441_v59 = vadd.f32 %v5209_v57, %v12358_v61  ;;  %v5442_v61 = vadd.f32 %v5211_v44, %v12463_v58  ;;  %v12825_v12 = vpop.f32.mrf.mxu0  ;;  %v1750_v24 = vsel %vm1605_vm3, %v1747_v35, %v1749_v32 }
 0x355   : > { %v1748_v58 = vsel %vm1605_vm3, %v1745_v54, %v1747_v35  ;;  %v2710_v44 = vsel %vm2565_vm2, %v2707_v1, %v2709_v6 }
 0x356   : > { %v3672_v39 = vadd.f32 %v12671_v13, %v3508_v47  ;;  %v5920_v10 = vadd.f32 %v12750_v25, %v5441_v59  ;;  %v6159_v47 = vld [vmem:[#allocation2 + $0x20] ss:$2 sm:$0xff]  ;;  %v1751_v59 = vrot.slane %v12483_v53, 1 }
 0x357   : > { %v6279_v35 = vmax.f32 %v6159_v47, %v6199_v29  ;;  %v698_v47 = vld [vmem:[%s10601_s1 + $0x4a0] sm:$0xff] }
 0x358   : > { %3833 = vst.msk [vmem:[#allocation2 + $0x478] sm:$0xff] %vm3689_vm4, %v3672_v39  ;;  %v6004_v15 = vadd.f32 %v12459_v42, %v5920_v10  ;;  %v2711_v39 = vrot.slane %v12483_v53, 2  ;;  %v1753_v10 = vrot.slane %v12521_v48, 1 }
 0x359   : > { %3025 = vrot.lane.b32.xlu2 %v2708_v2, %s10491_s20  ;;  %2063 = vrot.lane.b32.xlu0 %v1746_v3, %s10492_s21 }
 0x35a   : > { %3023 = vrot.lane.b32.xlu1 %v2706_v41, %s10491_s20  ;;  %6084 = vst.msk [vmem:[#allocation2 + $0x38] sm:$0xff] %vm3689_vm4, %v6004_v15 }
 0x35b   : > { %v2998_v25 = vpop.permute.xlu2 %2997  ;;  %v5690_v21 = vpop.permute.xlu0 %5689 }
 0x35c   : > { %v2996_v62 = vpop.permute.xlu1 %2995  ;;  %v5921_v19 = vadd.f32 %v5690_v21, %v5442_v61  ;;  %v6239_v61 = vld [vmem:[#allocation2 + $0x22] ss:$2 sm:$0xff]  ;;  %v12842_v21 = vpop.f32.mrf.mxu0 }
 0x35d   : > { %v6319_v18 = vmax.f32 %v6279_v35, %v6239_v61  ;;  %v2713_v61 = vrot.slane %v12521_v48, 2 }
 0x35e   : > { %v6005_v22 = vadd.f32 %v12459_v42, %v5921_v19 }
 0x360   : > { %6085 = vst.msk [vmem:[#allocation2 + $0x40] sm:$0xff] %vm3689_vm4, %v6005_v22 }
 0x361   : > { %2067 = vrot.lane.b32.xlu2 %v1750_v24, %s10492_s21  ;;  %3027 = vrot.lane.b32.xlu0 %v2710_v44, %s10491_s20  ;;  %v6160_v41 = vld [vmem:[#allocation2 + $0x30] ss:$2 sm:$0xff]  ;;  %v6200_v3 = vld [vmem:[#allocation2 + $0x31] ss:$2 sm:$0xff]  ;;  %v1754_v24 = vsel %vm1605_vm3, %v1751_v59, %v1753_v10 }
 0x362   : > { %2065 = vrot.lane.b32.xlu1 %v1748_v58, %s10492_s21  ;;  %v6280_v44 = vmax.f32 %v6160_v41, %v6200_v3  ;;  %v6359_v41 = vmax.f32 %v6319_v18, 0.0 }
 0x363   : > { %v12835_v57 = vpop.permute.xlu2 %3001  ;;  %v2036_v2 = vpop.permute.xlu0 %2035 }
 0x364   : > { %v2038_v54 = vpop.permute.xlu1 %2037  ;;  %v2460_v1 = vadd.f32 %v2036_v2, %v12014_v4  ;;  %v2712_v2 = vsel %vm2565_vm2, %v2709_v6, %v2711_v39  ;;  %v2717_v6 = vrot.slane %v12580_v7, 2 }
 0x365   : > { %v2461_v15 = vadd.f32 %v2038_v54, %v12042_v11  ;;  %v1752_v54 = vsel %vm1605_vm3, %v1749_v32, %v1751_v59 }
 0x366   : > { %v3420_v19 = vadd.f32 %v2996_v62, %v2460_v1  ;;  %v699_v62 = vld [vmem:[%s10601_s1 + $0x4a8] sm:$0xff] }
 0x367   : > { %v3421_v22 = vadd.f32 %v2998_v25, %v2461_v15  ;;  %v6240_v58 = vld [vmem:[#allocation2 + $0x32] ss:$2 sm:$0xff]  ;;  %v784_v29 = vpack.c.bf16 %v699_v62, %v698_v47  ;;  %v2715_v15 = vrot.slane %v12546_v33, 2 }
 0x368   : > { %v3584_v4 = vadd.f32 %v12671_v13, %v3420_v19  ;;  %v6320_v25 = vmax.f32 %v6280_v44, %v6240_v58  ;;  %v3903_v19 = vld [vmem:[#allocation2 + $0x1a0] ss:$2 sm:$0xff] }
 0x369   : > { %v3585_v11 = vadd.f32 %v12671_v13, %v3421_v22  ;;  %2071 = vrot.lane.b32.xlu2 %v1754_v24, %s10492_s21  ;;  %2069 = vrot.lane.b32.xlu0 %v1752_v54, %s10492_s21  ;;  %v4063_v22 = vld [vmem:[#allocation2 + $0x1a1] ss:$2 sm:$0xff]  ;;  %v2718_v44 = vsel %vm2565_vm2, %v2715_v15, %v2717_v6  ;;  %v2716_v54 = vsel %vm2565_vm2, %v2713_v61, %v2715_v15  ;;  %v1755_v15 = vrot.slane %v12546_v33, 1 }
 0x36a   : > { %3029 = vrot.lane.b32.xlu1 %v2712_v2, %s10491_s20  ;;  %3745 = vst.msk [vmem:[#allocation2 + $0x1b8] sm:$0xff] %vm3689_vm4, %v3584_v4  ;;  %v6360_v3 = vmax.f32 %v6320_v25, 0.0  ;;  %9694 = vmatmul.msk.bf16.gmra.mxu3 %vm791_vm1, %v784_v29  ;;  %v4356_v4 = vmax.f32 %v3903_v19, %v4063_v22  ;;  %v2714_v2 = vsel %vm2565_vm2, %v2711_v39, %v2713_v61  ;;  %v4223_v25 = vld [vmem:[#allocation2 + $0x1a2] ss:$2 sm:$0xff]  ;;  %v1757_v61 = vrot.slane %v12580_v7, 1 }
 0x36b   : > { %v12857_v1 = vpop.permute.xlu2 %5693  ;;  %3746 = vst.msk [vmem:[#allocation2 + $0x1c0] sm:$0xff] %vm3689_vm4, %v3585_v11  ;;  %v2040_v59 = vpop.permute.xlu0 %2039 }
 0x36c   : > { %v3000_v32 = vpop.permute.xlu1 %2999  ;;  %v2462_v35 = vadd.f32 %v2040_v59, %v12066_v60  ;;  %v6398_v24 = vpack.c.bf16 %v6360_v3, %v6359_v41  ;;  %v12869_v11 = vpop.f32.mrf.mxu0  ;;  %v4436_v3 = vmax.f32 %v4356_v4, %v4223_v25  ;;  %v1758_v4 = vsel %vm1605_vm3, %v1755_v15, %v1757_v61 }
 0x36e   : > { %v3422_v58 = vadd.f32 %v3000_v32, %v2462_v35  ;;  %9757 = vmatmul.msk.bf16.gmra.mxu2 %vm3689_vm4, %v6398_v24  ;;  %v1759_v32 = vrot.slane %v12614_v40, 1 }
 0x370   : > { %v3586_v18 = vadd.f32 %v12671_v13, %v3422_v58  ;;  %v1760_v58 = vsel %vm1605_vm3, %v1757_v61, %v1759_v32 }
 0x371   : > { %3035 = vrot.lane.b32.xlu2 %v2718_v44, %s10491_s20  ;;  %3031 = vrot.lane.b32.xlu0 %v2714_v2, %s10491_s20  ;;  %v3905_v60 = vld [vmem:[#allocation2 + $0x1b0] ss:$2 sm:$0xff]  ;;  %v4065_v47 = vld [vmem:[#allocation2 + $0x1b1] ss:$2 sm:$0xff]  ;;  %v4516_v44 = vmax.f32 %v4436_v3, 0.0  ;;  %v1756_v2 = vsel %vm1605_vm3, %v1753_v10, %v1755_v15  ;;  %v2721_v10 = vrot.slane %v12643_v52, 2 }
 0x372   : > { %3033 = vrot.lane.b32.xlu1 %v2716_v54, %s10491_s20  ;;  %3747 = vst.msk [vmem:[#allocation2 + $0x1c8] sm:$0xff] %vm3689_vm4, %v3586_v18  ;;  %v4357_v29 = vmax.f32 %v3905_v60, %v4065_v47  ;;  %v4225_v39 = vld [vmem:[#allocation2 + $0x1b2] ss:$2 sm:$0xff]  ;;  %v2719_v47 = vrot.slane %v12614_v40, 2 }
 0x373   : > { %v2044_v62 = vpop.permute.xlu2 %2043  ;;  %v5213_v41 = vpop.permute.xlu0 %5212 }
 0x374   : > { %v5692_v59 = vpop.permute.xlu1 %5691  ;;  %v5443_v35 = vadd.f32 %v5213_v41, %v12491_v26  ;;  %v4437_v19 = vmax.f32 %v4357_v29, %v4225_v39  ;;  %v12891_v54 = vpop.f32.mrf.mxu0  ;;  %v2464_v60 = vadd.f32 %v2044_v62, %v12117_v20  ;;  %v2722_v62 = vsel %vm2565_vm2, %v2719_v47, %v2721_v10 }
 0x375   : > { %v2720_v61 = vsel %vm2565_vm2, %v2717_v6, %v2719_v47  ;;  %v2723_v6 = vrot.slane %v12678_v17, 2 }
 0x376   : > { %v5922_v22 = vadd.f32 %v5692_v59, %v5443_v35  ;;  %v4517_v24 = vmax.f32 %v4437_v19, 0.0  ;;  %v1761_v59 = vrot.slane %v12643_v52, 1  ;;  %v701_v19 = vld [vmem:[%s10601_s1 + $0x4b8] sm:$0xff] }
 0x378   : > { %v6006_v18 = vadd.f32 %v12459_v42, %v5922_v22  ;;  %v4583_v26 = vpack.c.bf16 %v4517_v24, %v4516_v44  ;;  %v1762_v35 = vsel %vm1605_vm3, %v1759_v32, %v1761_v59  ;;  %v1763_v24 = vrot.slane %v12678_v17, 1 }
 0x379   : > { %2077 = vrot.lane.b32.xlu2 %v1760_v58, %s10492_s21  ;;  %2073 = vrot.lane.b32.xlu0 %v1756_v2, %s10492_s21  ;;  %v2725_v32 = vrot.slane %v12715_v43, 2 }
 0x37a   : > { %2075 = vrot.lane.b32.xlu1 %v1758_v4, %s10492_s21  ;;  %6086 = vst.msk [vmem:[#allocation2 + $0x48] sm:$0xff] %vm3689_vm4, %v6006_v18  ;;  %9721 = vmatmul.msk.bf16.gmra.mxu1 %vm3689_vm4, %v4583_v26  ;;  %v1764_v26 = vsel %vm1605_vm3, %v1761_v59, %v1763_v24 }
 0x37b   : > { %v2048_v42 = vpop.permute.xlu2 %2047  ;;  %v3004_v29 = vpop.permute.xlu0 %3003 }
 0x37c   : > { %v2042_v25 = vpop.permute.xlu1 %2041  ;;  %v3424_v39 = vadd.f32 %v3004_v29, %v2464_v60  ;;  %v12919_v18 = vpop.f32.mrf.mxu0  ;;  %v12927_v60 = vld [vmem:[%s15980_s4] ss:$0 sm:$0xff]  ;;  %v2726_v29 = vsel %vm2565_vm2, %v2723_v6, %v2725_v32 }
 0x37d   : > { %v2463_v41 = vadd.f32 %v2042_v25, %v12094_v8  ;;  %v700_v8 = vld [vmem:[%s10601_s1 + $0x4b0] sm:$0xff]  ;;  %v2724_v25 = vsel %vm2565_vm2, %v2721_v10, %v2723_v6 }
 0x37e   : > { %v3588_v20 = vadd.f32 %v12671_v13, %v3424_v39 }
 0x37f   : > { %v3423_v3 = vadd.f32 %v12835_v57, %v2463_v41  ;;  %v785_v57 = vpack.c.bf16 %v701_v19, %v700_v8  ;;  %v2727_v41 = vrot.slane %v12735_v63, 2  ;;  %v702_v19 = vld [vmem:[%s10601_s1 + $0x4c0] sm:$0xff] }
 0x380   : > { %3749 = vst.msk [vmem:[#allocation2 + $0x1d8] sm:$0xff] %vm3689_vm4, %v3588_v20  ;;  %v1767_v20 = vrot.slane %v12735_v63, 1 }
 0x381   : > { %v3587_v15 = vadd.f32 %v12671_v13, %v3423_v3  ;;  %3039 = vrot.lane.b32.xlu2 %v2722_v62, %s10491_s20  ;;  %3037 = vrot.lane.b32.xlu0 %v2720_v61, %s10491_s20  ;;  %v1765_v3 = vrot.slane %v12715_v43, 1 }
 0x382   : > { %2079 = vrot.lane.b32.xlu1 %v1762_v35, %s10492_s21  ;;  %9695 = vmatmul.msk.bf16.gmra.mxu3 %vm791_vm1, %v785_v57  ;;  %v703_v57 = vld [vmem:[%s10601_s1 + $0x4c8] sm:$0xff] }
 0x383   : > { %3748 = vst.msk [vmem:[#allocation2 + $0x1d0] sm:$0xff] %vm3689_vm4, %v3587_v15  ;;  %v5217_v22 = vpop.permute.xlu2 %5216  ;;  %v2046_v44 = vpop.permute.xlu0 %2045  ;;  %v1766_v35 = vsel %vm1605_vm3, %v1763_v24, %v1765_v3  ;;  %v1768_v8 = vsel %vm1605_vm3, %v1765_v3, %v1767_v20  ;;  %v786_v6 = vpack.c.bf16 %v703_v57, %v702_v19 }
 0x384   : > { %v5215_v58 = vpop.permute.xlu1 %5214  ;;  %v12943_v61 = vpop.f32.mrf.mxu0 }
 0x385   : > { %v5444_v2 = vadd.f32 %v5215_v58, %v12557_v36  ;;  %v2466_v36 = vadd.f32 %v2048_v42, %v16203_v55  ;;  %v2728_v42 = vsel %vm2565_vm2, %v2725_v32, %v2727_v41  ;;  %v3907_v58 = vld [vmem:[#allocation2 + $0x1c0] ss:$2 sm:$0xff]  ;;  %v2731_v32 = vrot.slane %v12783_v23, 2 }
 0x387   : > { %v5923_v4 = vadd.f32 %v12857_v1, %v5444_v2  ;;  %v2465_v1 = vadd.f32 %v2046_v44, %v16202_v51  ;;  %v4067_v44 = vld [vmem:[#allocation2 + $0x1c1] ss:$2 sm:$0xff]  ;;  %v5445_v2 = vadd.f32 %v5217_v22, %v12595_v56 }
 0x389   : > { %v6007_v47 = vadd.f32 %v12927_v60, %v5923_v4  ;;  %2081 = vrot.lane.b32.xlu2 %v1764_v26, %s10492_s21  ;;  %3041 = vrot.lane.b32.xlu0 %v2724_v25, %s10491_s20 }
 0x38a   : > { %3043 = vrot.lane.b32.xlu1 %v2726_v29, %s10491_s20  ;;  %v4069_v25 = vld [vmem:[#allocation2 + $0x1d1] ss:$2 sm:$0xff]  ;;  %v4227_v29 = vld [vmem:[#allocation2 + $0x1c2] ss:$2 sm:$0xff] }
 0x38b   : > { %6087 = vst.msk [vmem:[#allocation2 + $0x50] sm:$0xff] %vm3689_vm4, %v6007_v47  ;;  %v12938_v59 = vpop.permute.xlu2 %3011  ;;  %v3008_v39 = vpop.permute.xlu0 %3007  ;;  %v3909_v47 = vld [vmem:[#allocation2 + $0x1d0] ss:$2 sm:$0xff] }
 0x38c   : > { %v3006_v10 = vpop.permute.xlu1 %3005  ;;  %v3426_v15 = vadd.f32 %v3008_v39, %v2466_v36  ;;  %v1769_v36 = vrot.slane %v12761_v28, 1  ;;  %v4358_v39 = vmax.f32 %v3907_v58, %v4067_v44  ;;  %v1771_v58 = vrot.slane %v12783_v23, 1 }
 0x38d   : > { %v3425_v62 = vadd.f32 %v3006_v10, %v2465_v1  ;;  %v2729_v1 = vrot.slane %v12761_v28, 2  ;;  %v1773_v44 = vrot.slane %v12803_v5, 1 }
 0x38e   : > { %v3590_v51 = vadd.f32 %v12671_v13, %v3426_v15  ;;  %v4438_v15 = vmax.f32 %v4358_v39, %v4227_v29 }
 0x38f   : > { %v3589_v55 = vadd.f32 %v12671_v13, %v3425_v62  ;;  %v4359_v62 = vmax.f32 %v3909_v47, %v4069_v25  ;;  %v2732_v56 = vsel %vm2565_vm2, %v2729_v1, %v2731_v32  ;;  %v1774_v29 = vsel %vm1605_vm3, %v1771_v58, %v1773_v44 }
 0x390   : > { %3751 = vst.msk [vmem:[#allocation2 + $0x1e8] sm:$0xff] %vm3689_vm4, %v3590_v51  ;;  %v2730_v51 = vsel %vm2565_vm2, %v2727_v41, %v2729_v1  ;;  %v4518_v19 = vmax.f32 %v4438_v15, 0.0  ;;  %v2733_v41 = vrot.slane %v12803_v5, 2  ;;  %v1777_v15 = vrot.slane %v12842_v21, 1 }
 0x391   : > { %3750 = vst.msk [vmem:[#allocation2 + $0x1e0] sm:$0xff] %vm3689_vm4, %v3589_v55  ;;  %3045 = vrot.lane.b32.xlu2 %v2728_v42, %s10491_s20  ;;  %2083 = vrot.lane.b32.xlu0 %v1766_v35, %s10492_s21  ;;  %v12966_v55 = vpop.f32.mrf.mxu0  ;;  %v1770_v42 = vsel %vm1605_vm3, %v1767_v20, %v1769_v36 }
 0x392   : > { %2085 = vrot.lane.b32.xlu1 %v1768_v8, %s10492_s21  ;;  %9696 = vmatmul.msk.bf16.gmra.mxu3 %vm791_vm1, %v786_v6  ;;  %v2734_v39 = vsel %vm2565_vm2, %v2731_v32, %v2733_v41 }
 0x393   : > { %v12959_v24 = vpop.permute.xlu2 %2053  ;;  %v5696_v4 = vpop.permute.xlu0 %5695 }
 0x394   : > { %v3010_v26 = vpop.permute.xlu1 %3009  ;;  %v5924_v10 = vadd.f32 %v5696_v4, %v5445_v2  ;;  %v16215_v4 = vld [vmem:[#allocation14_spill] sm:$0xff] }
 0x396   : > { %v6008_v3 = vadd.f32 %v12927_v60, %v5924_v10  ;;  %v1772_v10 = vsel %vm1605_vm3, %v1769_v36, %v1771_v58 }
 0x398   : > { %v4229_v22 = vld [vmem:[#allocation2 + $0x1d2] ss:$2 sm:$0xff]  ;;  %6088 = vst.msk [vmem:[#allocation2 + $0x58] sm:$0xff] %vm3689_vm4, %v6008_v3 }
 0x399   : > { %3049 = vrot.lane.b32.xlu2 %v2732_v56, %s10491_s20  ;;  %v4439_v35 = vmax.f32 %v4359_v62, %v4229_v22  ;;  %2087 = vrot.lane.b32.xlu0 %v1770_v42, %s10492_s21  ;;  %v12986_v3 = vpop.f32.mrf.mxu0  ;;  %v1775_v62 = vrot.slane %v12825_v12, 1  ;;  %v2735_v56 = vrot.slane %v12825_v12, 2 }
 0x39a   : > { %3047 = vrot.lane.b32.xlu1 %v2730_v51, %s10491_s20 }
 0x39b   : > { %v3016_v8 = vpop.permute.xlu2 %3015  ;;  %v4519_v57 = vmax.f32 %v4439_v35, 0.0  ;;  %v2050_v2 = vpop.permute.xlu0 %2049 }
 0x39c   : > { %v5698_v6 = vpop.permute.xlu1 %5697  ;;  %v2467_v20 = vadd.f32 %v2050_v2, %v16215_v4  ;;  %v2736_v2 = vsel %vm2565_vm2, %v2733_v41, %v2735_v56  ;;  %v1776_v4 = vsel %vm1605_vm3, %v1773_v44, %v1775_v62 }
 0x39d   : > { %v4584_v47 = vpack.c.bf16 %v4519_v57, %v4518_v19  ;;  %v1778_v19 = vsel %vm1605_vm3, %v1775_v62, %v1777_v15 }
 0x39e   : > { %v3427_v25 = vadd.f32 %v3010_v26, %v2467_v20  ;;  %v2737_v20 = vrot.slane %v12842_v21, 2 }
 0x39f   : > { %9722 = vmatmul.msk.bf16.gmra.mxu1 %vm3689_vm4, %v4584_v47  ;;  %v2741_v47 = vrot.slane %v12891_v54, 2 }
 0x3a0   : > { %v3591_v1 = vadd.f32 %v12671_v13, %v3427_v25 }
 0x3a1   : > { %2091 = vrot.lane.b32.xlu2 %v1774_v29, %s10492_s21  ;;  %3051 = vrot.lane.b32.xlu0 %v2734_v39, %s10491_s20  ;;  %v6161_v29 = vld [vmem:[#allocation2 + $0x40] ss:$2 sm:$0xff] }
 0x3a2   : > { %2089 = vrot.lane.b32.xlu1 %v1772_v10, %s10492_s21  ;;  %3752 = vst.msk [vmem:[#allocation2 + $0x1f0] sm:$0xff] %vm3689_vm4, %v3591_v1  ;;  %v6201_v1 = vld [vmem:[#allocation2 + $0x41] ss:$2 sm:$0xff]  ;;  %v13018_v10 = vpop.f32.mrf.mxu0 }
 0x3a3   : > { %v12989_v26 = vpop.permute.xlu2 %2057  ;;  %v5219_v36 = vpop.permute.xlu0 %5218 }
 0x3a4   : > { %v2052_v32 = vpop.permute.xlu1 %2051  ;;  %v5446_v22 = vadd.f32 %v5219_v36, %v12646_v31  ;;  %v704_v31 = vld [vmem:[%s10601_s1 + $0x4d0] sm:$0xff] }
 0x3a5   : > { %v2468_v51 = vadd.f32 %v2052_v32, %v16206_v27  ;;  %v705_v27 = vld [vmem:[%s10601_s1 + $0x4d8] sm:$0xff] }
 0x3a6   : > { %v5925_v42 = vadd.f32 %v5698_v6, %v5446_v22  ;;  %v787_v44 = vpack.c.bf16 %v705_v27, %v704_v31  ;;  %v6162_v36 = vld [vmem:[#allocation2 + $0x50] ss:$2 sm:$0xff]  ;;  %v6202_v32 = vld [vmem:[#allocation2 + $0x51] ss:$2 sm:$0xff] }
 0x3a7   : > { %v3428_v35 = vadd.f32 %v12938_v59, %v2468_v51  ;;  %v16216_v59 = vld [vmem:[#allocation5_spill] sm:$0xff]  ;;  %v6241_v22 = vld [vmem:[#allocation2 + $0x42] ss:$2 sm:$0xff] }
 0x3a8   : > { %v6009_v57 = vadd.f32 %v12927_v60, %v5925_v42  ;;  %v2549_v6 = vadd.f32 %v16216_v59, %v16197_v45  ;;  %v2739_v60 = vrot.slane %v12869_v11, 2  ;;  %9697 = vmatmul.msk.bf16.gmra.mxu3 %vm791_vm1, %v787_v44  ;;  %v6281_v42 = vmax.f32 %v6161_v29, %v6201_v1 }
 0x3a9   : > { %v3592_v58 = vadd.f32 %v12671_v13, %v3428_v35  ;;  %2095 = vrot.lane.b32.xlu2 %v1778_v19, %s10492_s21  ;;  %2093 = vrot.lane.b32.xlu0 %v1776_v4, %s10492_s21  ;;  %v2738_v19 = vsel %vm2565_vm2, %v2735_v56, %v2737_v20  ;;  %v2469_v56 = vadd.f32 %v12959_v24, %v12252_v50  ;;  %v1779_v59 = vrot.slane %v12869_v11, 1 }
 0x3aa   : > { %3053 = vrot.lane.b32.xlu1 %v2736_v2, %s10491_s20  ;;  %6089 = vst.msk [vmem:[#allocation2 + $0x60] sm:$0xff] %vm3689_vm4, %v6009_v57  ;;  %v2742_v57 = vsel %vm2565_vm2, %v2739_v60, %v2741_v47  ;;  %v6321_v2 = vmax.f32 %v6281_v42, %v6241_v22  ;;  %v13043_v50 = vpop.f32.mrf.mxu0  ;;  %v4071_v22 = vld [vmem:[#allocation2 + $0x1e1] ss:$2 sm:$0xff] }
 0x3ab   : > { %v13014_v41 = vpop.permute.xlu2 %3021  ;;  %3753 = vst.msk [vmem:[#allocation2 + $0x1f8] sm:$0xff] %vm3689_vm4, %v3592_v58  ;;  %v3174_v25 = vpop.permute.xlu0 %3173  ;;  %v2740_v58 = vsel %vm2565_vm2, %v2737_v20, %v2739_v60  ;;  %v1781_v60 = vrot.slane %v12891_v54, 1  ;;  %v707_v42 = vld [vmem:[%s10601_s1 + $0x4e8] sm:$0xff] }
 0x3ac   : > { %v3509_v39 = vadd.f32 %v3174_v25, %v2549_v6  ;;  %v2056_v45 = vpop.permute.xlu1 %2055  ;;  %v1783_v6 = vrot.slane %v12919_v18, 1  ;;  %v6361_v29 = vmax.f32 %v6321_v2, 0.0 }
 0x3ad   : > { %v2470_v62 = vadd.f32 %v2056_v45, %v12278_v9  ;;  %v6282_v9 = vmax.f32 %v6162_v36, %v6202_v32  ;;  %v1782_v36 = vsel %vm1605_vm3, %v1779_v59, %v1781_v60  ;;  %v3911_v32 = vld [vmem:[#allocation2 + $0x1e0] ss:$2 sm:$0xff] }
 0x3ae   : > { %v3673_v51 = vadd.f32 %v12671_v13, %v3509_v39  ;;  %v1784_v45 = vsel %vm1605_vm3, %v1781_v60, %v1783_v6 }
 0x3af   : > { %v3430_v35 = vadd.f32 %v3016_v8, %v2470_v62  ;;  %v1780_v62 = vsel %vm1605_vm3, %v1777_v15, %v1779_v59 }
 0x3b0   : > { %3834 = vst.msk [vmem:[#allocation2 + $0x480] sm:$0xff] %vm3689_vm4, %v3673_v51  ;;  %v706_v51 = vld [vmem:[%s10601_s1 + $0x4e0] sm:$0xff] }
 0x3b1   : > { %3059 = vrot.lane.b32.xlu2 %v2742_v57, %s10491_s20  ;;  %v3594_v4 = vadd.f32 %v12671_v13, %v3430_v35  ;;  %3055 = vrot.lane.b32.xlu0 %v2738_v19, %s10491_s20  ;;  %v6242_v8 = vld [vmem:[#allocation2 + $0x52] ss:$2 sm:$0xff]  ;;  %v2743_v35 = vrot.slane %v12919_v18, 2  ;;  %v2745_v19 = vrot.slane %v12943_v61, 2  ;;  %v2471_v57 = vadd.f32 %v12989_v26, %v16211_v30 }
 0x3b2   : > { %3057 = vrot.lane.b32.xlu1 %v2740_v58, %s10491_s20  ;;  %v6322_v27 = vmax.f32 %v6282_v9, %v6242_v8  ;;  %v788_v58 = vpack.c.bf16 %v707_v42, %v706_v51  ;;  %v3913_v2 = vld [vmem:[#allocation2 + $0x1f0] ss:$2 sm:$0xff]  ;;  %v2747_v51 = vrot.slane %v12966_v55, 2 }
 0x3b3   : > { %v13035_v31 = vpop.permute.xlu2 %3025  ;;  %3755 = vst.msk [vmem:[#allocation2 + $0x208] sm:$0xff] %vm3689_vm4, %v3594_v4  ;;  %v3014_v20 = vpop.permute.xlu0 %3013  ;;  %v4073_v4 = vld [vmem:[#allocation2 + $0x1f1] ss:$2 sm:$0xff]  ;;  %v4231_v8 = vld [vmem:[#allocation2 + $0x1e2] ss:$2 sm:$0xff]  ;;  %v2746_v30 = vsel %vm2565_vm2, %v2743_v35, %v2745_v19 }
 0x3b4   : > { %v3429_v44 = vadd.f32 %v3014_v20, %v2469_v56  ;;  %v13041_v25 = vpop.permute.xlu1 %5220  ;;  %v6362_v1 = vmax.f32 %v6322_v27, 0.0  ;;  %v1785_v56 = vrot.slane %v12943_v61, 1  ;;  %v4360_v20 = vmax.f32 %v3911_v32, %v4071_v22 }
 0x3b5   : > { %v1787_v32 = vrot.slane %v12966_v55, 1 }
 0x3b6   : > { %v3593_v24 = vadd.f32 %v12671_v13, %v3429_v44  ;;  %v6399_v39 = vpack.c.bf16 %v6362_v1, %v6361_v29  ;;  %v4361_v44 = vmax.f32 %v3913_v2, %v4073_v4  ;;  %v4440_v29 = vmax.f32 %v4360_v20, %v4231_v8  ;;  %v13068_v1 = vpop.f32.mrf.mxu0  ;;  %v13091_v4 = vld [vmem:[%s15978_s2] ss:$0 sm:$0xff] }
 0x3b7   : > { %v1788_v2 = vsel %vm1605_vm3, %v1785_v56, %v1787_v32  ;;  %v1789_v20 = vrot.slane %v12986_v3, 1 }
 0x3b8   : > { %3754 = vst.msk [vmem:[#allocation2 + $0x200] sm:$0xff] %vm3689_vm4, %v3593_v24  ;;  %9758 = vmatmul.msk.bf16.gmra.mxu2 %vm3689_vm4, %v6399_v39  ;;  %9698 = vmatmul.msk.bf16.gmra.mxu3 %vm791_vm1, %v788_v58  ;;  %v2744_v24 = vsel %vm2565_vm2, %v2741_v47, %v2743_v35  ;;  %v1786_v39 = vsel %vm1605_vm3, %v1783_v6, %v1785_v56  ;;  %v2749_v47 = vrot.slane %v12986_v3, 2 }
 0x3b9   : > { %2101 = vrot.lane.b32.xlu2 %v1784_v45, %s10492_s21  ;;  %2097 = vrot.lane.b32.xlu0 %v1780_v62, %s10492_s21  ;;  %v4520_v62 = vmax.f32 %v4440_v29, 0.0 }
 0x3ba   : > { %2099 = vrot.lane.b32.xlu1 %v1782_v36, %s10492_s21 }
 0x3bb   : > { %v13062_v15 = vpop.permute.xlu2 %2067  ;;  %v3018_v9 = vpop.permute.xlu0 %3017 }
 0x3bc   : > { %v3431_v27 = vadd.f32 %v3018_v9, %v2471_v57  ;;  %v3020_v59 = vpop.permute.xlu1 %3019 }
 0x3be   : > { %v3595_v60 = vadd.f32 %v12671_v13, %v3431_v27 }
 0x3bf   : > { %v4233_v26 = vld [vmem:[#allocation2 + $0x1f2] ss:$2 sm:$0xff] }
 0x3c0   : > { %3756 = vst.msk [vmem:[#allocation2 + $0x210] sm:$0xff] %vm3689_vm4, %v3595_v60  ;;  %v4441_v45 = vmax.f32 %v4361_v44, %v4233_v26  ;;  %v1791_v60 = vrot.slane %v13018_v10, 1  ;;  %v4075_v26 = vld [vmem:[#allocation2 + $0x201] ss:$2 sm:$0xff] }
 0x3c1   : > { %3063 = vrot.lane.b32.xlu2 %v2746_v30, %s10491_s20  ;;  %3061 = vrot.lane.b32.xlu0 %v2744_v24, %s10491_s20  ;;  %v3915_v30 = vld [vmem:[#allocation2 + $0x200] ss:$2 sm:$0xff] }
 0x3c2   : > { %2103 = vrot.lane.b32.xlu1 %v1786_v39, %s10492_s21  ;;  %v4521_v36 = vmax.f32 %v4441_v45, 0.0 }
 0x3c3   : > { %v13078_v13 = vpop.permute.xlu2 %2071  ;;  %v2060_v22 = vpop.permute.xlu0 %2059 }
 0x3c4   : > { %v2472_v42 = vadd.f32 %v2060_v22, %v16213_v16  ;;  %v2062_v35 = vpop.permute.xlu1 %2061  ;;  %v4585_v6 = vpack.c.bf16 %v4521_v36, %v4520_v62  ;;  %v2748_v16 = vsel %vm2565_vm2, %v2745_v19, %v2747_v51  ;;  %v1790_v36 = vsel %vm1605_vm3, %v1787_v32, %v1789_v20 }
 0x3c5   : > { %v2473_v57 = vadd.f32 %v2062_v35, %v12353_v49  ;;  %v2750_v49 = vsel %vm2565_vm2, %v2747_v51, %v2749_v47  ;;  %v1792_v22 = vsel %vm1605_vm3, %v1789_v20, %v1791_v60  ;;  %v4362_v51 = vmax.f32 %v3915_v30, %v4075_v26 }
 0x3c6   : > { %v3432_v58 = vadd.f32 %v3020_v59, %v2472_v42  ;;  %9723 = vmatmul.msk.bf16.gmra.mxu1 %vm3689_vm4, %v4585_v6  ;;  %v2751_v59 = vrot.slane %v13018_v10, 2  ;;  %v2476_v35 = vadd.f32 %v13062_v15, %v12432_v0  ;;  %v13128_v15 = vpop.f32.mrf.mxu1 }
 0x3c7   : > { %v3433_v9 = vadd.f32 %v13014_v41, %v2473_v57  ;;  %v13100_v41 = vpop.f32.mrf.mxu0  ;;  %v4235_v45 = vld [vmem:[#allocation2 + $0x202] ss:$2 sm:$0xff]  ;;  %v2755_v57 = vrot.slane %v13068_v1, 2 }
 0x3c8   : > { %v3596_v8 = vadd.f32 %v13091_v4, %v3432_v58  ;;  %v2752_v39 = vsel %vm2565_vm2, %v2749_v47, %v2751_v59  ;;  %v4442_v32 = vmax.f32 %v4362_v51, %v4235_v45 }
 0x3c9   : > { %2105 = vrot.lane.b32.xlu2 %v1788_v2, %s10492_s21  ;;  %v3597_v27 = vadd.f32 %v13091_v4, %v3433_v9  ;;  %3065 = vrot.lane.b32.xlu0 %v2748_v16, %s10491_s20  ;;  %v1793_v2 = vrot.slane %v13043_v50, 1 }
 0x3ca   : > { %3067 = vrot.lane.b32.xlu1 %v2750_v49, %s10491_s20  ;;  %3757 = vst.msk [vmem:[#allocation2 + $0x218] sm:$0xff] %vm3689_vm4, %v3596_v8  ;;  %v2753_v8 = vrot.slane %v13043_v50, 2 }
 0x3cb   : > { %v13103_v56 = vpop.permute.xlu2 %3035  ;;  %3758 = vst.msk [vmem:[#allocation2 + $0x220] sm:$0xff] %vm3689_vm4, %v3597_v27  ;;  %v2064_v19 = vpop.permute.xlu0 %2063 }
 0x3cc   : > { %v3024_v44 = vpop.permute.xlu1 %3023  ;;  %v2474_v29 = vadd.f32 %v2064_v19, %v12380_v14  ;;  %v2756_v26 = vsel %vm2565_vm2, %v2753_v8, %v2755_v57 }
 0x3ce   : > { %v3434_v24 = vadd.f32 %v3024_v44, %v2474_v29  ;;  %v4522_v44 = vmax.f32 %v4442_v32, 0.0 }
 0x3cf   : > { %v13125_v16 = vpop.f32.mrf.mxu0 }
 0x3d0   : > { %v3598_v62 = vadd.f32 %v13091_v4, %v3434_v24  ;;  %v2754_v24 = vsel %vm2565_vm2, %v2751_v59, %v2753_v8  ;;  %v709_v8 = vld [vmem:[%s10601_s1 + $0x4f8] sm:$0xff] }
 0x3d1   : > { %3069 = vrot.lane.b32.xlu2 %v2752_v39, %s10491_s20  ;;  %2107 = vrot.lane.b32.xlu0 %v1790_v36, %s10492_s21  ;;  %v3917_v14 = vld [vmem:[#allocation2 + $0x210] ss:$2 sm:$0xff]  ;;  %v4077_v42 = vld [vmem:[#allocation2 + $0x211] ss:$2 sm:$0xff]  ;;  %v1794_v39 = vsel %vm1605_vm3, %v1791_v60, %v1793_v2  ;;  %v1797_v36 = vrot.slane %v13100_v41, 1  ;;  %v2757_v60 = vrot.slane %v13100_v41, 2 }
 0x3d2   : > { %2109 = vrot.lane.b32.xlu1 %v1792_v22, %s10492_s21  ;;  %3759 = vst.msk [vmem:[#allocation2 + $0x228] sm:$0xff] %vm3689_vm4, %v3598_v62  ;;  %v4363_v6 = vmax.f32 %v3917_v14, %v4077_v42  ;;  %v4237_v9 = vld [vmem:[#allocation2 + $0x212] ss:$2 sm:$0xff]  ;;  %v1795_v62 = vrot.slane %v13068_v1, 1  ;;  %v13148_v14 = vpop.f32.mrf.mxu1 }
 0x3d3   : > { %v13120_v47 = vpop.permute.xlu2 %2077  ;;  %v3028_v58 = vpop.permute.xlu0 %3027 }
 0x3d4   : > { %v2066_v49 = vpop.permute.xlu1 %2065  ;;  %v3436_v27 = vadd.f32 %v3028_v58, %v2476_v35  ;;  %v4443_v19 = vmax.f32 %v4363_v6, %v4237_v9  ;;  %v1798_v6 = vsel %vm1605_vm3, %v1795_v62, %v1797_v36  ;;  %v1796_v58 = vsel %vm1605_vm3, %v1793_v2, %v1795_v62 }
 0x3d5   : > { %v2475_v0 = vadd.f32 %v2066_v49, %v12411_v46  ;;  %v2758_v9 = vsel %vm2565_vm2, %v2755_v57, %v2757_v60  ;;  %v1799_v49 = vrot.slane %v13125_v16, 1  ;;  %v2759_v57 = vrot.slane %v13125_v16, 2 }
 0x3d6   : > { %v3600_v20 = vadd.f32 %v13091_v4, %v3436_v27  ;;  %v4523_v29 = vmax.f32 %v4443_v19, 0.0  ;;  %v2478_v27 = vadd.f32 %v13078_v13, %v12483_v53 }
 0x3d7   : > { %v3435_v30 = vadd.f32 %v13035_v31, %v2475_v0  ;;  %v13150_v42 = vpop.f32.mrf.mxu0 }
 0x3d8   : > { %3761 = vst.msk [vmem:[#allocation2 + $0x238] sm:$0xff] %vm3689_vm4, %v3600_v20  ;;  %v4586_v45 = vpack.c.bf16 %v4523_v29, %v4522_v44  ;;  %v1801_v0 = vrot.slane %v13150_v42, 1 }
 0x3d9   : > { %3073 = vrot.lane.b32.xlu2 %v2756_v26, %s10491_s20  ;;  %v3599_v46 = vadd.f32 %v13091_v4, %v3435_v30  ;;  %2111 = vrot.lane.b32.xlu0 %v1794_v39, %s10492_s21  ;;  %v3919_v44 = vld [vmem:[#allocation2 + $0x220] ss:$2 sm:$0xff]  ;;  %v4079_v29 = vld [vmem:[#allocation2 + $0x221] ss:$2 sm:$0xff] }
 0x3da   : > { %3071 = vrot.lane.b32.xlu1 %v2754_v24, %s10491_s20  ;;  %9724 = vmatmul.msk.bf16.gmra.mxu1 %vm3689_vm4, %v4586_v45  ;;  %v4364_v13 = vmax.f32 %v3919_v44, %v4079_v29  ;;  %v1802_v62 = vsel %vm1605_vm3, %v1799_v49, %v1801_v0 }
 0x3db   : > { %v13141_v31 = vpop.permute.xlu2 %3039  ;;  %3760 = vst.msk [vmem:[#allocation2 + $0x230] sm:$0xff] %vm3689_vm4, %v3599_v46  ;;  %v2070_v59 = vpop.permute.xlu0 %2069  ;;  %v2760_v46 = vsel %vm2565_vm2, %v2757_v60, %v2759_v57 }
 0x3dc   : > { %v3030_v22 = vpop.permute.xlu1 %3029  ;;  %v2477_v51 = vadd.f32 %v2070_v59, %v12453_v34  ;;  %v708_v34 = vld [vmem:[%s10601_s1 + $0x4f0] sm:$0xff]  ;;  %v13175_v59 = vpop.f32.mrf.mxu1 }
 0x3dd   : > { %v789_v2 = vpack.c.bf16 %v709_v8, %v708_v34 }
 0x3de   : > { %v3437_v35 = vadd.f32 %v3030_v22, %v2477_v51  ;;  %v1800_v51 = vsel %vm1605_vm3, %v1797_v36, %v1799_v49 }
 0x3df   : > { %9699 = vmatmul.msk.bf16.gmra.mxu3 %vm791_vm1, %v789_v2  ;;  %v13177_v22 = vpop.f32.mrf.mxu0 }
 0x3e0   : > { %v3601_v32 = vadd.f32 %v13091_v4, %v3437_v35  ;;  %v2763_v34 = vrot.slane %v13177_v22, 2 }
 0x3e1   : > { %2115 = vrot.lane.b32.xlu2 %v1798_v6, %s10492_s21  ;;  %3075 = vrot.lane.b32.xlu0 %v2758_v9, %s10491_s20  ;;  %v2761_v9 = vrot.slane %v13150_v42, 2 }
 0x3e2   : > { %2113 = vrot.lane.b32.xlu1 %v1796_v58, %s10492_s21  ;;  %3762 = vst.msk [vmem:[#allocation2 + $0x240] sm:$0xff] %vm3689_vm4, %v3601_v32  ;;  %v3921_v24 = vld [vmem:[#allocation2 + $0x230] ss:$2 sm:$0xff]  ;;  %v4081_v39 = vld [vmem:[#allocation2 + $0x231] ss:$2 sm:$0xff] }
 0x3e3   : > { %v13165_v19 = vpop.permute.xlu2 %2081  ;;  %v3032_v20 = vpop.permute.xlu0 %3031  ;;  %v4239_v45 = vld [vmem:[#allocation2 + $0x222] ss:$2 sm:$0xff]  ;;  %v4365_v35 = vmax.f32 %v3921_v24, %v4081_v39 }
 0x3e4   : > { %v3438_v30 = vadd.f32 %v3032_v20, %v2478_v27  ;;  %v3034_v26 = vpop.permute.xlu1 %3033  ;;  %v4444_v6 = vmax.f32 %v4364_v13, %v4239_v45  ;;  %v1803_v27 = vrot.slane %v13177_v22, 1  ;;  %v16217_v39 = vld [vmem:[#allocation3_spill] sm:$0xff]  ;;  %v13195_v13 = vpop.f32.mrf.mxu1 }
 0x3e5   : > { %v16218_v45 = vrot.slane %v16217_v39, 2 }
 0x3e6   : > { %v3602_v53 = vadd.f32 %v13091_v4, %v3438_v30  ;;  %v4524_v2 = vmax.f32 %v4444_v6, 0.0 }
 0x3e8   : > { %3763 = vst.msk [vmem:[#allocation2 + $0x248] sm:$0xff] %vm3689_vm4, %v3602_v53  ;;  %v2766_v53 = vsel %vm2565_vm2, %v2763_v34, %v16218_v45 }
 0x3e9   : > { %2119 = vrot.lane.b32.xlu2 %v1802_v62, %s10492_s21  ;;  %2117 = vrot.lane.b32.xlu0 %v1800_v51, %s10492_s21  ;;  %v4241_v60 = vld [vmem:[#allocation2 + $0x232] ss:$2 sm:$0xff]  ;;  %v2481_v62 = vadd.f32 %v13120_v47, %v12580_v7  ;;  %v16220_v7 = vrot.slane %v12757_v38, 1 }
 0x3ea   : > { %3077 = vrot.lane.b32.xlu1 %v2760_v46, %s10491_s20  ;;  %v4445_v58 = vmax.f32 %v4365_v35, %v4241_v60  ;;  %v5064_v35 = vrot.slane %v13128_v15, 1 }
 0x3eb   : > { %v13184_v32 = vpop.permute.xlu2 %3045  ;;  %v2074_v8 = vpop.permute.xlu0 %2073 }
 0x3ec   : > { %v2479_v36 = vadd.f32 %v2074_v8, %v12521_v48  ;;  %v2076_v49 = vpop.permute.xlu1 %2075  ;;  %v4525_v20 = vmax.f32 %v4445_v58, 0.0  ;;  %v2762_v48 = vsel %vm2565_vm2, %v2759_v57, %v2761_v9  ;;  %v13212_v57 = vpop.f32.mrf.mxu3  ;;  %v5065_v47 = vsel %vm1605_vm3, %v16220_v7, %v5064_v35 }
 0x3ed   : > { %v2480_v44 = vadd.f32 %v2076_v49, %v12546_v33  ;;  %v16219_v33 = vrot.slane %v16217_v39, 1 }
 0x3ee   : > { %v3439_v29 = vadd.f32 %v3034_v26, %v2479_v36  ;;  %v4587_v30 = vpack.c.bf16 %v4525_v20, %v4524_v2  ;;  %v2764_v2 = vsel %vm2565_vm2, %v2761_v9, %v2763_v34  ;;  %v1804_v20 = vsel %vm1605_vm3, %v1801_v0, %v1803_v27 }
 0x3ef   : > { %v3440_v24 = vadd.f32 %v13103_v56, %v2480_v44  ;;  %v1806_v26 = vsel %vm1605_vm3, %v1803_v27, %v16219_v33  ;;  %v4083_v44 = vld [vmem:[#allocation2 + $0x241] ss:$2 sm:$0xff]  ;;  %v5541_v34 = vrot.slane %v12757_v38, 2 }
 0x3f0   : > { %v3603_v46 = vadd.f32 %v13091_v4, %v3439_v29  ;;  %9725 = vmatmul.msk.bf16.gmra.mxu1 %vm3689_vm4, %v4587_v30  ;;  %v13231_v29 = vpop.f32.mrf.mxu1  ;;  %v2483_v30 = vadd.f32 %v13165_v19, %v12643_v52 }
 0x3f1   : > { %3083 = vrot.lane.b32.xlu2 %v2766_v53, %s10491_s20  ;;  %v3604_v56 = vadd.f32 %v13091_v4, %v3440_v24  ;;  %3079 = vrot.lane.b32.xlu0 %v2762_v48, %s10491_s20  ;;  %v5066_v53 = vrot.slane %v13148_v14, 1 }
 0x3f2   : > { %2123 = vrot.lane.b32.xlu1 %v1806_v26, %s10492_s21  ;;  %3764 = vst.msk [vmem:[#allocation2 + $0x250] sm:$0xff] %vm3689_vm4, %v3603_v46  ;;  %v5068_v46 = vrot.slane %v13175_v59, 1 }
 0x3f3   : > { %v13210_v51 = vpop.permute.xlu2 %3049  ;;  %3765 = vst.msk [vmem:[#allocation2 + $0x258] sm:$0xff] %vm3689_vm4, %v3604_v56  ;;  %v3038_v6 = vpop.permute.xlu0 %3037 }
 0x3f4   : > { %v3441_v60 = vadd.f32 %v3038_v6, %v2481_v62  ;;  %v2080_v58 = vpop.permute.xlu1 %2079  ;;  %v13239_v27 = vpop.f32.mrf.mxu3  ;;  %v16221_v62 = vrot.slane %v12689_v37, 2 }
 0x3f5   : > { %v2482_v8 = vadd.f32 %v2080_v58, %v12614_v40  ;;  %v5069_v58 = vsel %vm1605_vm3, %v5066_v53, %v5068_v46 }
 0x3f6   : > { %v3605_v36 = vadd.f32 %v13091_v4, %v3441_v60  ;;  %v5542_v6 = vsel %vm2565_vm2, %v16221_v62, %v5541_v34  ;;  %v1897_v62 = vrot.slane %v13212_v57, 1 }
 0x3f7   : > { %v3442_v49 = vadd.f32 %v13141_v31, %v2482_v8  ;;  %v3923_v31 = vld [vmem:[#allocation2 + $0x240] ss:$2 sm:$0xff]  ;;  %v5067_v8 = vsel %vm1605_vm3, %v5064_v35, %v5066_v53 }
 0x3f8   : > { %3766 = vst.msk [vmem:[#allocation2 + $0x260] sm:$0xff] %vm3689_vm4, %v3605_v36  ;;  %v4366_v26 = vmax.f32 %v3923_v31, %v4083_v44  ;;  %v5543_v31 = vrot.slane %v13128_v15, 2  ;;  %v5545_v44 = vrot.slane %v13148_v14, 2 }
 0x3f9   : > { %5222 = vrot.lane.b32.xlu2 %v5065_v47, %s10492_s21  ;;  %v3606_v40 = vadd.f32 %v13091_v4, %v3442_v49  ;;  %2121 = vrot.lane.b32.xlu0 %v1804_v20, %s10492_s21  ;;  %v4243_v9 = vld [vmem:[#allocation2 + $0x242] ss:$2 sm:$0xff]  ;;  %v13258_v20 = vpop.f32.mrf.mxu1 }
 0x3fa   : > { %3081 = vrot.lane.b32.xlu1 %v2764_v2, %s10491_s20  ;;  %v3925_v39 = vld [vmem:[#allocation2 + $0x250] ss:$2 sm:$0xff]  ;;  %v4085_v45 = vld [vmem:[#allocation2 + $0x251] ss:$2 sm:$0xff]  ;;  %v4446_v56 = vmax.f32 %v4366_v26, %v4243_v9  ;;  %v5547_v2 = vrot.slane %v13175_v59, 2 }
 0x3fb   : > { %v13235_v24 = vpop.permute.xlu2 %2091  ;;  %3767 = vst.msk [vmem:[#allocation2 + $0x268] sm:$0xff] %vm3689_vm4, %v3606_v40  ;;  %v3042_v0 = vpop.permute.xlu0 %3041  ;;  %v4367_v19 = vmax.f32 %v3925_v39, %v4085_v45 }
 0x3fc   : > { %v3443_v48 = vadd.f32 %v3042_v0, %v2483_v30  ;;  %v3044_v33 = vpop.permute.xlu1 %3043  ;;  %v4526_v7 = vmax.f32 %v4446_v56, 0.0  ;;  %v13264_v39 = vpop.f32.mrf.mxu3 }
 0x3fe   : > { %v3607_v52 = vadd.f32 %v13091_v4, %v3443_v48  ;;  %v5548_v48 = vsel %vm2565_vm2, %v5545_v44, %v5547_v2 }
 0x3ff   : > { %v4245_v60 = vld [vmem:[#allocation2 + $0x252] ss:$2 sm:$0xff] }
 0x400   : > { %3768 = vst.msk [vmem:[#allocation2 + $0x270] sm:$0xff] %vm3689_vm4, %v3607_v52  ;;  %v4447_v36 = vmax.f32 %v4367_v19, %v4245_v60  ;;  %v5544_v52 = vsel %vm2565_vm2, %v5541_v34, %v5543_v31 }
 0x401   : > { %5699 = vrot.lane.b32.xlu2 %v5542_v6, %s10491_s20  ;;  %5224 = vrot.lane.b32.xlu0 %v5067_v8, %s10492_s21  ;;  %v13286_v60 = vpop.f32.mrf.mxu1 }
 0x402   : > { %5226 = vrot.lane.b32.xlu1 %v5069_v58, %s10492_s21  ;;  %v4527_v47 = vmax.f32 %v4447_v36, 0.0  ;;  %v3927_v8 = vld [vmem:[#allocation2 + $0x260] ss:$2 sm:$0xff]  ;;  %v4087_v36 = vld [vmem:[#allocation2 + $0x261] ss:$2 sm:$0xff] }
 0x403   : > { %v13255_v49 = vpop.permute.xlu2 %2095  ;;  %v2084_v40 = vpop.permute.xlu0 %2083 }
 0x404   : > { %v2484_v35 = vadd.f32 %v2084_v40, %v12678_v17  ;;  %v2086_v30 = vpop.permute.xlu1 %2085  ;;  %v4588_v9 = vpack.c.bf16 %v4527_v47, %v4526_v7  ;;  %v5546_v17 = vsel %vm2565_vm2, %v5543_v31, %v5545_v44  ;;  %v13290_v40 = vpop.f32.mrf.mxu3 }
 0x405   : > { %v2485_v0 = vadd.f32 %v2086_v30, %v12715_v43 }
 0x406   : > { %v3444_v45 = vadd.f32 %v3044_v33, %v2484_v35  ;;  %9726 = vmatmul.msk.bf16.gmra.mxu1 %vm3689_vm4, %v4588_v9  ;;  %v1899_v33 = vrot.slane %v13239_v27, 1  ;;  %v16222_v35 = vld [vmem:[#allocation17_spill] sm:$0xff]  ;;  %v4368_v9 = vmax.f32 %v3927_v8, %v4087_v36 }
 0x407   : > { %v3445_v53 = vadd.f32 %v13184_v32, %v2485_v0  ;;  %v1901_v32 = vrot.slane %v13264_v39, 1  ;;  %v4247_v31 = vld [vmem:[#allocation2 + $0x262] ss:$2 sm:$0xff]  ;;  %v16223_v30 = vrot.slane %v16222_v35, 1  ;;  %v2859_v0 = vrot.slane %v13239_v27, 2 }
 0x408   : > { %v3608_v26 = vadd.f32 %v13091_v4, %v3444_v45  ;;  %v1900_v47 = vsel %vm1605_vm3, %v1897_v62, %v1899_v33 }
 0x409   : > { %5705 = vrot.lane.b32.xlu2 %v5548_v48, %s10491_s20  ;;  %v3609_v43 = vadd.f32 %v13091_v4, %v3445_v53  ;;  %5701 = vrot.lane.b32.xlu0 %v5544_v52, %s10491_s20  ;;  %v1902_v58 = vsel %vm1605_vm3, %v1899_v33, %v1901_v32  ;;  %v2488_v48 = vadd.f32 %v13235_v24, %v12783_v23  ;;  %v2857_v33 = vrot.slane %v13212_v57, 2  ;;  %v13307_v8 = vpop.f32.mrf.mxu1 }
 0x40a   : > { %5703 = vrot.lane.b32.xlu1 %v5546_v17, %s10491_s20  ;;  %3769 = vst.msk [vmem:[#allocation2 + $0x278] sm:$0xff] %vm3689_vm4, %v3608_v26  ;;  %v1903_v17 = vrot.slane %v13290_v40, 1 }
 0x40b   : > { %v13281_v19 = vpop.permute.xlu2 %3059  ;;  %3770 = vst.msk [vmem:[#allocation2 + $0x280] sm:$0xff] %vm3689_vm4, %v3609_v43  ;;  %v2088_v56 = vpop.permute.xlu0 %2087  ;;  %v4448_v43 = vmax.f32 %v4368_v9, %v4247_v31  ;;  %v2860_v23 = vsel %vm2565_vm2, %v2857_v33, %v2859_v0 }
 0x40c   : > { %v3048_v34 = vpop.permute.xlu1 %3047  ;;  %v2486_v6 = vadd.f32 %v2088_v56, %v12735_v63  ;;  %v1898_v63 = vsel %vm1605_vm3, %v16223_v30, %v1897_v62  ;;  %v16224_v30 = vrot.slane %v16222_v35, 2 }
 0x40e   : > { %v3446_v7 = vadd.f32 %v3048_v34, %v2486_v6 }
 0x410   : > { %v3610_v44 = vadd.f32 %v13091_v4, %v3446_v7  ;;  %v1904_v7 = vsel %vm1605_vm3, %v1901_v32, %v1903_v17  ;;  %v13324_v32 = vpop.f32.mrf.mxu3 }
 0x411   : > { %2219 = vrot.lane.b32.xlu2 %v1902_v58, %s10492_s21  ;;  %2215 = vrot.lane.b32.xlu0 %v1898_v63, %s10492_s21  ;;  %v3929_v45 = vld [vmem:[#allocation2 + $0x270] ss:$2 sm:$0xff]  ;;  %v4089_v53 = vld [vmem:[#allocation2 + $0x271] ss:$2 sm:$0xff] }
 0x412   : > { %2217 = vrot.lane.b32.xlu1 %v1900_v47, %s10492_s21  ;;  %3771 = vst.msk [vmem:[#allocation2 + $0x288] sm:$0xff] %vm3689_vm4, %v3610_v44  ;;  %v4369_v52 = vmax.f32 %v3929_v45, %v4089_v53  ;;  %v4249_v62 = vld [vmem:[#allocation2 + $0x272] ss:$2 sm:$0xff]  ;;  %v4528_v47 = vmax.f32 %v4448_v43, 0.0  ;;  %v2861_v45 = vrot.slane %v13264_v39, 2 }
 0x413   : > { %v13303_v26 = vpop.permute.xlu2 %2101  ;;  %v3052_v56 = vpop.permute.xlu0 %3051 }
 0x414   : > { %v2090_v34 = vpop.permute.xlu1 %2089  ;;  %v3448_v6 = vadd.f32 %v3052_v56, %v2488_v48  ;;  %v4449_v58 = vmax.f32 %v4369_v52, %v4249_v62  ;;  %v5070_v48 = vrot.slane %v13195_v13, 1 }
 0x415   : > { %v2487_v36 = vadd.f32 %v2090_v34, %v12761_v28  ;;  %v2858_v28 = vsel %vm2565_vm2, %v16224_v30, %v2857_v33  ;;  %v2862_v34 = vsel %vm2565_vm2, %v2859_v0, %v2861_v45 }
 0x416   : > { %v3612_v24 = vadd.f32 %v13091_v4, %v3448_v6  ;;  %v4529_v31 = vmax.f32 %v4449_v58, 0.0  ;;  %v13338_v6 = vpop.f32.mrf.mxu1  ;;  %v5071_v58 = vsel %vm1605_vm3, %v5068_v46, %v5070_v48 }
 0x417   : > { %v3447_v44 = vadd.f32 %v13210_v51, %v2487_v36  ;;  %v2863_v51 = vrot.slane %v13290_v40, 2 }
 0x418   : > { %3773 = vst.msk [vmem:[#allocation2 + $0x298] sm:$0xff] %vm3689_vm4, %v3612_v24  ;;  %v4589_v63 = vpack.c.bf16 %v4529_v31, %v4528_v47  ;;  %v5076_v24 = vrot.slane %v13286_v60, 1 }
 0x419   : > { %3177 = vrot.lane.b32.xlu2 %v2860_v23, %s10491_s20  ;;  %v3611_v9 = vadd.f32 %v13091_v4, %v3447_v44  ;;  %2221 = vrot.lane.b32.xlu0 %v1904_v7, %s10492_s21  ;;  %v2864_v62 = vsel %vm2565_vm2, %v2861_v45, %v2863_v51  ;;  %v5072_v23 = vrot.slane %v13231_v29, 1  ;;  %v13354_v7 = vpop.f32.mrf.mxu3  ;;  %v3931_v47 = vld [vmem:[#allocation2 + $0x280] ss:$2 sm:$0xff]  ;;  %v4091_v31 = vld [vmem:[#allocation2 + $0x281] ss:$2 sm:$0xff]  ;;  %v5074_v44 = vrot.slane %v13258_v20, 1 }
 0x41a   : > { %3175 = vrot.lane.b32.xlu1 %v2858_v28, %s10491_s20  ;;  %9727 = vmatmul.msk.bf16.gmra.mxu1 %vm3689_vm4, %v4589_v63  ;;  %v4370_v45 = vmax.f32 %v3931_v47, %v4091_v31  ;;  %v5551_v31 = vrot.slane %v13231_v29, 2 }
 0x41b   : > { %v13329_v53 = vpop.permute.xlu2 %3063  ;;  %3772 = vst.msk [vmem:[#allocation2 + $0x290] sm:$0xff] %vm3689_vm4, %v3611_v9  ;;  %v2094_v52 = vpop.permute.xlu0 %2093 }
 0x41c   : > { %v3054_v43 = vpop.permute.xlu1 %3053  ;;  %v2489_v33 = vadd.f32 %v2094_v52, %v12803_v5  ;;  %v2490_v5 = vadd.f32 %v13255_v49, %v12825_v12 }
 0x41e   : > { %v3449_v56 = vadd.f32 %v3054_v43, %v2489_v33  ;;  %v13358_v52 = vpop.f32.mrf.mxu1  ;;  %v5077_v43 = vsel %vm1605_vm3, %v5074_v44, %v5076_v24  ;;  %v5073_v33 = vsel %vm1605_vm3, %v5070_v48, %v5072_v23  ;;  %v5553_v48 = vrot.slane %v13258_v20, 2 }
 0x420   : > { %v3613_v36 = vadd.f32 %v13091_v4, %v3449_v56  ;;  %v5075_v56 = vsel %vm1605_vm3, %v5072_v23, %v5074_v44 }
 0x421   : > { %5228 = vrot.lane.b32.xlu2 %v5071_v58, %s10492_s21  ;;  %3179 = vrot.lane.b32.xlu0 %v2862_v34, %s10491_s20 }
 0x422   : > { %3181 = vrot.lane.b32.xlu1 %v2864_v62, %s10491_s20  ;;  %3774 = vst.msk [vmem:[#allocation2 + $0x2a0] sm:$0xff] %vm3689_vm4, %v3613_v36  ;;  %v3933_v63 = vld [vmem:[#allocation2 + $0x290] ss:$2 sm:$0xff]  ;;  %v4093_v9 = vld [vmem:[#allocation2 + $0x291] ss:$2 sm:$0xff] }
 0x423   : > { %v13350_v0 = vpop.permute.xlu2 %2105  ;;  %v3056_v46 = vpop.permute.xlu0 %3055  ;;  %v4251_v12 = vld [vmem:[#allocation2 + $0x282] ss:$2 sm:$0xff]  ;;  %v4371_v62 = vmax.f32 %v3933_v63, %v4093_v9 }
 0x424   : > { %v3450_v30 = vadd.f32 %v3056_v46, %v2490_v5  ;;  %v3058_v28 = vpop.permute.xlu1 %3057  ;;  %v4450_v34 = vmax.f32 %v4370_v45, %v4251_v12  ;;  %v5549_v46 = vrot.slane %v13195_v13, 2  ;;  %v13376_v12 = vpop.f32.mrf.mxu3 }
 0x426   : > { %v3614_v49 = vadd.f32 %v13091_v4, %v3450_v30  ;;  %v4530_v44 = vmax.f32 %v4450_v34, 0.0  ;;  %v1907_v34 = vrot.slane %v13354_v7, 1 }
 0x428   : > { %3775 = vst.msk [vmem:[#allocation2 + $0x2a8] sm:$0xff] %vm3689_vm4, %v3614_v49 }
 0x429   : > { %5234 = vrot.lane.b32.xlu2 %v5077_v43, %s10492_s21  ;;  %5230 = vrot.lane.b32.xlu0 %v5073_v33, %s10492_s21  ;;  %v4253_v58 = vld [vmem:[#allocation2 + $0x292] ss:$2 sm:$0xff]  ;;  %v5554_v33 = vsel %vm2565_vm2, %v5551_v31, %v5553_v48 }
 0x42a   : > { %5232 = vrot.lane.b32.xlu1 %v5075_v56, %s10492_s21  ;;  %v4451_v5 = vmax.f32 %v4371_v62, %v4253_v58  ;;  %v13387_v62 = vpop.f32.mrf.mxu1  ;;  %v2493_v58 = vadd.f32 %v13303_v26, %v12891_v54 }
 0x42b   : > { %v13369_v36 = vpop.permute.xlu2 %3069  ;;  %v2098_v47 = vpop.permute.xlu0 %2097 }
 0x42c   : > { %v2491_v30 = vadd.f32 %v2098_v47, %v12842_v21  ;;  %v2100_v23 = vpop.permute.xlu1 %2099  ;;  %v4531_v63 = vmax.f32 %v4451_v5, 0.0  ;;  %v5552_v21 = vsel %vm2565_vm2, %v5549_v46, %v5551_v31 }
 0x42d   : > { %v2492_v9 = vadd.f32 %v2100_v23, %v12869_v11  ;;  %v5550_v11 = vsel %vm2565_vm2, %v5547_v2, %v5549_v46  ;;  %v5555_v46 = vrot.slane %v13286_v60, 2 }
 0x42e   : > { %v3451_v49 = vadd.f32 %v3058_v28, %v2491_v30  ;;  %v4590_v45 = vpack.c.bf16 %v4531_v63, %v4530_v44  ;;  %v1905_v28 = vrot.slane %v13324_v32, 1  ;;  %v13408_v63 = vpop.f32.mrf.mxu3 }
 0x42f   : > { %v3452_v43 = vadd.f32 %v13281_v19, %v2492_v9 }
 0x430   : > { %v3615_v56 = vadd.f32 %v13091_v4, %v3451_v49  ;;  %9728 = vmatmul.msk.bf16.gmra.mxu1 %vm3689_vm4, %v4590_v45  ;;  %v1908_v23 = vsel %vm1605_vm3, %v1905_v28, %v1907_v34  ;;  %v1906_v54 = vsel %vm1605_vm3, %v1903_v17, %v1905_v28  ;;  %v2865_v49 = vrot.slane %v13324_v32, 2 }
 0x431   : > { %5711 = vrot.lane.b32.xlu2 %v5554_v33, %s10491_s20  ;;  %v3616_v19 = vadd.f32 %v13091_v4, %v3452_v43  ;;  %5707 = vrot.lane.b32.xlu0 %v5550_v11, %s10491_s20  ;;  %v2495_v17 = vadd.f32 %v13350_v0, %v12943_v61  ;;  %v1911_v33 = vrot.slane %v13408_v63, 1 }
 0x432   : > { %5709 = vrot.lane.b32.xlu1 %v5552_v21, %s10491_s20  ;;  %3776 = vst.msk [vmem:[#allocation2 + $0x2b0] sm:$0xff] %vm3689_vm4, %v3615_v56  ;;  %v13415_v9 = vpop.f32.mrf.mxu1  ;;  %v4095_v56 = vld [vmem:[#allocation2 + $0x2a1] ss:$2 sm:$0xff]  ;;  %v2866_v61 = vsel %vm2565_vm2, %v2863_v51, %v2865_v49  ;;  %v2869_v51 = vrot.slane %v13376_v12, 2 }
 0x433   : > { %v13397_v5 = vpop.permute.xlu2 %3073  ;;  %3777 = vst.msk [vmem:[#allocation2 + $0x2b8] sm:$0xff] %vm3689_vm4, %v3616_v19  ;;  %v3062_v2 = vpop.permute.xlu0 %3061 }
 0x434   : > { %v3453_v47 = vadd.f32 %v3062_v2, %v2493_v58  ;;  %v2104_v31 = vpop.permute.xlu1 %2103 }
 0x435   : > { %v2494_v30 = vadd.f32 %v2104_v31, %v12919_v18  ;;  %v5556_v18 = vsel %vm2565_vm2, %v5553_v48, %v5555_v46  ;;  %v3935_v48 = vld [vmem:[#allocation2 + $0x2a0] ss:$2 sm:$0xff] }
 0x436   : > { %v3617_v44 = vadd.f32 %v13091_v4, %v3453_v47  ;;  %v4372_v0 = vmax.f32 %v3935_v48, %v4095_v56 }
 0x437   : > { %v3454_v26 = vadd.f32 %v13329_v53, %v2494_v30  ;;  %v1909_v53 = vrot.slane %v13376_v12, 1 }
 0x438   : > { %3778 = vst.msk [vmem:[#allocation2 + $0x2c0] sm:$0xff] %vm3689_vm4, %v3617_v44 }
 0x439   : > { %2225 = vrot.lane.b32.xlu2 %v1908_v23, %s10492_s21  ;;  %v3618_v45 = vadd.f32 %v13091_v4, %v3454_v26  ;;  %5713 = vrot.lane.b32.xlu0 %v5556_v18, %s10491_s20  ;;  %v4255_v2 = vld [vmem:[#allocation2 + $0x2a2] ss:$2 sm:$0xff]  ;;  %v1912_v31 = vsel %vm1605_vm3, %v1909_v53, %v1911_v33  ;;  %v1910_v30 = vsel %vm1605_vm3, %v1907_v34, %v1909_v53  ;;  %v13436_v26 = vpop.f32.mrf.mxu3  ;;  %v2867_v34 = vrot.slane %v13354_v7, 2 }
 0x43a   : > { %2223 = vrot.lane.b32.xlu1 %v1906_v54, %s10492_s21  ;;  %v3937_v11 = vld [vmem:[#allocation2 + $0x2b0] ss:$2 sm:$0xff]  ;;  %v4097_v28 = vld [vmem:[#allocation2 + $0x2b1] ss:$2 sm:$0xff]  ;;  %v4452_v54 = vmax.f32 %v4372_v0, %v4255_v2  ;;  %v13447_v48 = vpop.f32.mrf.mxu1 }
 0x43b   : > { %v13424_v43 = vpop.permute.xlu2 %2115  ;;  %3779 = vst.msk [vmem:[#allocation2 + $0x2c8] sm:$0xff] %vm3689_vm4, %v3618_v45  ;;  %v3066_v21 = vpop.permute.xlu0 %3065  ;;  %v4373_v23 = vmax.f32 %v3937_v11, %v4097_v28  ;;  %v2871_v45 = vrot.slane %v13408_v63, 2  ;;  %v2870_v0 = vsel %vm2565_vm2, %v2867_v34, %v2869_v51 }
 0x43c   : > { %v3455_v19 = vadd.f32 %v3066_v21, %v2495_v17  ;;  %v3068_v58 = vpop.permute.xlu1 %3067  ;;  %v4532_v56 = vmax.f32 %v4452_v54, 0.0  ;;  %v5080_v54 = vrot.slane %v13338_v6, 1 }
 0x43e   : > { %v3619_v47 = vadd.f32 %v13091_v4, %v3455_v19 }
 0x43f   : > { %v4257_v44 = vld [vmem:[#allocation2 + $0x2b2] ss:$2 sm:$0xff] }
 0x440   : > { %3780 = vst.msk [vmem:[#allocation2 + $0x2d0] sm:$0xff] %vm3689_vm4, %v3619_v47  ;;  %v4453_v18 = vmax.f32 %v4373_v23, %v4257_v44  ;;  %v2868_v47 = vsel %vm2565_vm2, %v2865_v49, %v2867_v34  ;;  %v5082_v49 = vrot.slane %v13358_v52, 1 }
 0x441   : > { %3183 = vrot.lane.b32.xlu2 %v2866_v61, %s10491_s20  ;;  %2227 = vrot.lane.b32.xlu0 %v1910_v30, %s10492_s21  ;;  %v2872_v61 = vsel %vm2565_vm2, %v2869_v51, %v2871_v45  ;;  %v13463_v23 = vpop.f32.mrf.mxu3 }
 0x442   : > { %2229 = vrot.lane.b32.xlu1 %v1912_v31, %s10492_s21  ;;  %v4533_v53 = vmax.f32 %v4453_v18, 0.0 }
 0x443   : > { %v13445_v17 = vpop.permute.xlu2 %2119  ;;  %v2108_v21 = vpop.permute.xlu0 %2107 }
 0x444   : > { %v2110_v11 = vpop.permute.xlu1 %2109  ;;  %v2496_v28 = vadd.f32 %v2108_v21, %v12966_v55  ;;  %v4591_v2 = vpack.c.bf16 %v4533_v53, %v4532_v56  ;;  %v3939_v53 = vld [vmem:[#allocation2 + $0x2c0] ss:$2 sm:$0xff]  ;;  %v4099_v56 = vld [vmem:[#allocation2 + $0x2c1] ss:$2 sm:$0xff] }
 0x445   : > { %v2497_v19 = vadd.f32 %v2110_v11, %v12986_v3  ;;  %v5083_v11 = vsel %vm1605_vm3, %v5080_v54, %v5082_v49 }
 0x446   : > { %v3456_v31 = vadd.f32 %v3068_v58, %v2496_v28  ;;  %9729 = vmatmul.msk.bf16.gmra.mxu1 %vm3689_vm4, %v4591_v2  ;;  %v13468_v58 = vpop.f32.mrf.mxu1 }
 0x447   : > { %v3457_v30 = vadd.f32 %v13369_v36, %v2497_v19  ;;  %v5078_v36 = vrot.slane %v13307_v8, 1  ;;  %v4259_v2 = vld [vmem:[#allocation2 + $0x2c2] ss:$2 sm:$0xff] }
 0x448   : > { %v3620_v55 = vadd.f32 %v13091_v4, %v3456_v31 }
 0x449   : > { %3189 = vrot.lane.b32.xlu2 %v2872_v61, %s10491_s20  ;;  %v3621_v3 = vadd.f32 %v13091_v4, %v3457_v30  ;;  %3185 = vrot.lane.b32.xlu0 %v2868_v47, %s10491_s20  ;;  %v5081_v28 = vsel %vm1605_vm3, %v5078_v36, %v5080_v54  ;;  %v5079_v19 = vsel %vm1605_vm3, %v5076_v24, %v5078_v36  ;;  %v13490_v36 = vpop.f32.mrf.mxu3  ;;  %v5557_v54 = vrot.slane %v13307_v8, 2 }
 0x44a   : > { %3187 = vrot.lane.b32.xlu1 %v2870_v0, %s10491_s20  ;;  %3781 = vst.msk [vmem:[#allocation2 + $0x2d8] sm:$0xff] %vm3689_vm4, %v3620_v55  ;;  %v5559_v0 = vrot.slane %v13338_v6, 2  ;;  %v2500_v55 = vadd.f32 %v13424_v43, %v13068_v1 }
 0x44b   : > { %v13465_v44 = vpop.permute.xlu2 %3083  ;;  %3782 = vst.msk [vmem:[#allocation2 + $0x2e0] sm:$0xff] %vm3689_vm4, %v3621_v3  ;;  %v2112_v51 = vpop.permute.xlu0 %2111 }
 0x44c   : > { %v3072_v18 = vpop.permute.xlu1 %3071  ;;  %v2498_v34 = vadd.f32 %v2112_v51, %v13018_v10  ;;  %v4374_v10 = vmax.f32 %v3939_v53, %v4099_v56  ;;  %v5560_v1 = vsel %vm2565_vm2, %v5557_v54, %v5559_v0 }
 0x44e   : > { %v3458_v21 = vadd.f32 %v3072_v18, %v2498_v34  ;;  %v4454_v3 = vmax.f32 %v4374_v10, %v4259_v2  ;;  %v5084_v18 = vrot.slane %v13387_v62, 1  ;;  %v13494_v56 = vpop.f32.mrf.mxu1  ;;  %v5447_v10 = vadd.f32 %v13041_v25, %v12689_v37 }
 0x450   : > { %v3622_v61 = vadd.f32 %v13091_v4, %v3458_v21  ;;  %v4534_v2 = vmax.f32 %v4454_v3, 0.0 }
 0x451   : > { %5240 = vrot.lane.b32.xlu2 %v5083_v11, %s10492_s21  ;;  %5236 = vrot.lane.b32.xlu0 %v5079_v19, %s10492_s21  ;;  %v3941_v31 = vld [vmem:[#allocation2 + $0x2d0] ss:$2 sm:$0xff]  ;;  %v4101_v30 = vld [vmem:[#allocation2 + $0x2d1] ss:$2 sm:$0xff] }
 0x452   : > { %5238 = vrot.lane.b32.xlu1 %v5081_v28, %s10492_s21  ;;  %3783 = vst.msk [vmem:[#allocation2 + $0x2e8] sm:$0xff] %vm3689_vm4, %v3622_v61  ;;  %v4375_v24 = vmax.f32 %v3941_v31, %v4101_v30  ;;  %v4261_v53 = vld [vmem:[#allocation2 + $0x2d2] ss:$2 sm:$0xff]  ;;  %v5558_v31 = vsel %vm2565_vm2, %v5555_v46, %v5557_v54  ;;  %v1913_v30 = vrot.slane %v13436_v26, 1 }
 0x453   : > { %v13485_v47 = vpop.permute.xlu2 %5222  ;;  %v3076_v34 = vpop.permute.xlu0 %3075 }
 0x454   : > { %v2114_v51 = vpop.permute.xlu1 %2113  ;;  %v3460_v11 = vadd.f32 %v3076_v34, %v2500_v55  ;;  %v4455_v28 = vmax.f32 %v4375_v24, %v4261_v53  ;;  %v5561_v55 = vrot.slane %v13358_v52, 2  ;;  %v13524_v34 = vld [vmem:[%s15980_s4] ss:$0 sm:$0xff] }
 0x455   : > { %v2499_v21 = vadd.f32 %v2114_v51, %v13043_v50  ;;  %v5085_v50 = vsel %vm1605_vm3, %v5082_v49, %v5084_v18  ;;  %v5563_v49 = vrot.slane %v13387_v62, 2 }
 0x456   : > { %v3624_v19 = vadd.f32 %v13091_v4, %v3460_v11  ;;  %v4535_v61 = vmax.f32 %v4455_v28, 0.0  ;;  %v13518_v54 = vpop.f32.mrf.mxu1  ;;  %v13530_v11 = vpop.f32.mrf.mxu3 }
 0x457   : > { %v3459_v43 = vadd.f32 %v13397_v5, %v2499_v21  ;;  %v1914_v21 = vsel %vm1605_vm3, %v1911_v33, %v1913_v30  ;;  %v1919_v33 = vrot.slane %v13530_v11, 1 }
 0x458   : > { %3785 = vst.msk [vmem:[#allocation2 + $0x2f8] sm:$0xff] %vm3689_vm4, %v3624_v19  ;;  %v4592_v37 = vpack.c.bf16 %v4535_v61, %v4534_v2  ;;  %v1917_v19 = vrot.slane %v13490_v36, 1  ;;  %v1915_v2 = vrot.slane %v13463_v23, 1 }
 0x459   : > { %5717 = vrot.lane.b32.xlu2 %v5560_v1, %s10491_s20  ;;  %v3623_v5 = vadd.f32 %v13091_v4, %v3459_v43  ;;  %5242 = vrot.lane.b32.xlu0 %v5085_v50, %s10492_s21  ;;  %v5562_v1 = vsel %vm2565_vm2, %v5559_v0, %v5561_v55  ;;  %v3943_v50 = vld [vmem:[#allocation2 + $0x2e0] ss:$2 sm:$0xff] }
 0x45a   : > { %5715 = vrot.lane.b32.xlu1 %v5558_v31, %s10491_s20  ;;  %9730 = vmatmul.msk.bf16.gmra.mxu1 %vm3689_vm4, %v4592_v37 }
 0x45b   : > { %v5700_v25 = vpop.permute.xlu2 %5699  ;;  %3784 = vst.msk [vmem:[#allocation2 + $0x2f0] sm:$0xff] %vm3689_vm4, %v3623_v5  ;;  %v2118_v3 = vpop.permute.xlu0 %2117  ;;  %v4103_v5 = vld [vmem:[#allocation2 + $0x2e1] ss:$2 sm:$0xff] }
 0x45c   : > { %v5926_v46 = vadd.f32 %v5700_v25, %v5447_v10  ;;  %v3078_v24 = vpop.permute.xlu1 %3077  ;;  %v2501_v51 = vadd.f32 %v2118_v3, %v13100_v41  ;;  %v5564_v41 = vsel %vm2565_vm2, %v5561_v55, %v5563_v49  ;;  %v2502_v10 = vadd.f32 %v13445_v17, %v13125_v16 }
 0x45d   : > { %v1918_v55 = vsel %vm1605_vm3, %v1915_v2, %v1917_v19 }
 0x45e   : > { %v6010_v53 = vadd.f32 %v13524_v34, %v5926_v46  ;;  %v3461_v28 = vadd.f32 %v3078_v24, %v2501_v51  ;;  %v1920_v46 = vsel %vm1605_vm3, %v1917_v19, %v1919_v33  ;;  %v1916_v24 = vsel %vm1605_vm3, %v1913_v30, %v1915_v2  ;;  %v13553_v17 = vpop.f32.mrf.mxu1 }
 0x45f   : > { %v2873_v19 = vrot.slane %v13436_v26, 2 }
 0x460   : > { %6090 = vst.msk [vmem:[#allocation2 + $0x68] sm:$0xff] %vm3689_vm4, %v6010_v53  ;;  %v3625_v43 = vadd.f32 %v13091_v4, %v3461_v28  ;;  %v4376_v28 = vmax.f32 %v3943_v50, %v4103_v5 }
 0x461   : > { %2231 = vrot.lane.b32.xlu2 %v1914_v21, %s10492_s21  ;;  %5719 = vrot.lane.b32.xlu0 %v5562_v1, %s10491_s20 }
 0x462   : > { %5721 = vrot.lane.b32.xlu1 %v5564_v41, %s10491_s20  ;;  %3786 = vst.msk [vmem:[#allocation2 + $0x300] sm:$0xff] %vm3689_vm4, %v3625_v43  ;;  %v3945_v3 = vld [vmem:[#allocation2 + $0x2f0] ss:$2 sm:$0xff]  ;;  %v4105_v51 = vld [vmem:[#allocation2 + $0x2f1] ss:$2 sm:$0xff]  ;;  %v2877_v41 = vrot.slane %v13490_v36, 2 }
 0x463   : > { %v5706_v61 = vpop.permute.xlu2 %5705  ;;  %v3080_v31 = vpop.permute.xlu0 %3079  ;;  %v4263_v16 = vld [vmem:[#allocation2 + $0x2e2] ss:$2 sm:$0xff]  ;;  %v4377_v1 = vmax.f32 %v3945_v3, %v4105_v51  ;;  %v2874_v3 = vsel %vm2565_vm2, %v2871_v45, %v2873_v19  ;;  %v16093_v45 = vrot.slane %v13530_v11, 2 }
 0x464   : > { %v2124_v0 = vpop.permute.xlu1 %2123  ;;  %v3462_v37 = vadd.f32 %v3080_v31, %v2502_v10  ;;  %v4456_v43 = vmax.f32 %v4376_v28, %v4263_v16 }
 0x465   : > { %v2504_v25 = vadd.f32 %v2124_v0, %v13177_v22  ;;  %v2875_v22 = vrot.slane %v13463_v23, 2 }
 0x466   : > { %v3626_v53 = vadd.f32 %v13091_v4, %v3462_v37  ;;  %v4536_v5 = vmax.f32 %v4456_v43, 0.0 }
 0x467   : > { %v3464_v21 = vadd.f32 %v13465_v44, %v2504_v25  ;;  %v2878_v37 = vsel %vm2565_vm2, %v2875_v22, %v2877_v41  ;;  %v2876_v25 = vsel %vm2565_vm2, %v2873_v19, %v2875_v22 }
 0x468   : > { %3787 = vst.msk [vmem:[#allocation2 + $0x308] sm:$0xff] %vm3689_vm4, %v3626_v53  ;;  %v5088_v53 = vrot.slane %v13447_v48, 1 }
 0x469   : > { %2237 = vrot.lane.b32.xlu2 %v1920_v46, %s10492_s21  ;;  %v3628_v30 = vadd.f32 %v13091_v4, %v3464_v21  ;;  %2233 = vrot.lane.b32.xlu0 %v1916_v24, %s10492_s21  ;;  %v4265_v2 = vld [vmem:[#allocation2 + $0x2f2] ss:$2 sm:$0xff]  ;;  %v13571_v46 = vpop.f32.mrf.mxu1  ;;  %v5086_v21 = vrot.slane %v13415_v9, 1 }
 0x46a   : > { %2235 = vrot.lane.b32.xlu1 %v1918_v55, %s10492_s21  ;;  %v4457_v10 = vmax.f32 %v4377_v1, %v4265_v2 }
 0x46b   : > { %v13565_v44 = vpop.permute.xlu2 %2219  ;;  %3789 = vst.msk [vmem:[#allocation2 + $0x318] sm:$0xff] %vm3689_vm4, %v3628_v30  ;;  %v2122_v0 = vpop.permute.xlu0 %2121  ;;  %v5089_v2 = vsel %vm1605_vm3, %v5086_v21, %v5088_v53 }
 0x46c   : > { %v3082_v31 = vpop.permute.xlu1 %3081  ;;  %v2503_v50 = vadd.f32 %v2122_v0, %v13150_v42  ;;  %v4537_v4 = vmax.f32 %v4457_v10, 0.0  ;;  %v13580_v42 = vld [vmem:[%s15978_s2] ss:$0 sm:$0xff]  ;;  %v2880_v10 = vsel %vm2565_vm2, %v2877_v41, %v16093_v45  ;;  %v5565_v0 = vrot.slane %v13415_v9, 2 }
 0x46e   : > { %v3463_v55 = vadd.f32 %v3082_v31, %v2503_v50  ;;  %v4593_v24 = vpack.c.bf16 %v4537_v4, %v4536_v5  ;;  %v5087_v31 = vsel %vm1605_vm3, %v5084_v18, %v5086_v21 }
 0x46f   : > { %v3947_v1 = vld [vmem:[#allocation2 + $0x300] ss:$2 sm:$0xff]  ;;  %v4107_v43 = vld [vmem:[#allocation2 + $0x301] ss:$2 sm:$0xff] }
 0x470   : > { %v3627_v51 = vadd.f32 %v13580_v42, %v3463_v55  ;;  %9731 = vmatmul.msk.bf16.gmra.mxu1 %vm3689_vm4, %v4593_v24 }
 0x471   : > { %3195 = vrot.lane.b32.xlu2 %v2878_v37, %s10491_s20  ;;  %3191 = vrot.lane.b32.xlu0 %v2874_v3, %s10491_s20  ;;  %v13602_v50 = vpop.f32.mrf.mxu1  ;;  %v16092_v3 = vrot.slane %v13494_v56, 1 }
 0x472   : > { %3193 = vrot.lane.b32.xlu1 %v2876_v25, %s10491_s20  ;;  %3788 = vst.msk [vmem:[#allocation2 + $0x310] sm:$0xff] %vm3689_vm4, %v3627_v51  ;;  %v5448_v25 = vadd.f32 %v13485_v47, %v12757_v38  ;;  %v5566_v38 = vsel %vm2565_vm2, %v5563_v49, %v5565_v0 }
 0x473   : > { %v13586_v16 = vpop.permute.xlu2 %3177  ;;  %v5225_v22 = vpop.permute.xlu0 %5224 }
 0x474   : > { %v5227_v28 = vpop.permute.xlu1 %5226  ;;  %v5449_v18 = vadd.f32 %v5225_v22, %v13128_v15 }
 0x475   : > { %v5450_v30 = vadd.f32 %v5227_v28, %v13148_v14 }
 0x477   : > { %v5929_v19 = vadd.f32 %v5706_v61, %v5450_v30  ;;  %v4378_v61 = vmax.f32 %v3947_v1, %v4107_v43  ;;  %v5090_v30 = vrot.slane %v13468_v58, 1 }
 0x479   : > { %5246 = vrot.lane.b32.xlu2 %v5089_v2, %s10492_s21  ;;  %v6013_v14 = vadd.f32 %v13524_v34, %v5929_v19  ;;  %3197 = vrot.lane.b32.xlu0 %v2880_v10, %s10491_s20  ;;  %v3949_v41 = vld [vmem:[#allocation2 + $0x310] ss:$2 sm:$0xff]  ;;  %v4109_v4 = vld [vmem:[#allocation2 + $0x311] ss:$2 sm:$0xff]  ;;  %v13615_v2 = vpop.f32.mrf.mxu3  ;;  %v5091_v49 = vsel %vm1605_vm3, %v5088_v53, %v5090_v30 }
 0x47a   : > { %5244 = vrot.lane.b32.xlu1 %v5087_v31, %s10492_s21  ;;  %v4267_v37 = vld [vmem:[#allocation2 + $0x302] ss:$2 sm:$0xff]  ;;  %v4379_v55 = vmax.f32 %v3949_v41, %v4109_v4  ;;  %v4269_v28 = vld [vmem:[#allocation2 + $0x312] ss:$2 sm:$0xff]  ;;  %v5093_v31 = vsel %vm1605_vm3, %v5090_v30, %v16092_v3  ;;  %v16091_v4 = vrot.slane %v13494_v56, 2 }
 0x47b   : > { %v13607_v5 = vpop.permute.xlu2 %5228  ;;  %6093 = vst.msk [vmem:[#allocation2 + $0x80] sm:$0xff] %vm3689_vm4, %v6013_v14  ;;  %v4458_v24 = vmax.f32 %v4378_v61, %v4267_v37  ;;  %v5702_v21 = vpop.permute.xlu0 %5701  ;;  %v5569_v37 = vrot.slane %v13468_v58, 2  ;;  %v3951_v30 = vld [vmem:[#allocation2 + $0x320] ss:$2 sm:$0xff] }
 0x47c   : > { %v5704_v51 = vpop.permute.xlu1 %5703  ;;  %v5927_v43 = vadd.f32 %v5702_v21, %v5448_v25  ;;  %v4459_v19 = vmax.f32 %v4379_v55, %v4269_v28  ;;  %v13628_v14 = vpop.f32.mrf.mxu1  ;;  %v3953_v55 = vld [vmem:[#allocation2 + $0x330] ss:$2 sm:$0xff]  ;;  %v6163_v21 = vld [vmem:[#allocation2 + $0x60] ss:$2 sm:$0xff]  ;;  %v6203_v28 = vld [vmem:[#allocation2 + $0x61] ss:$2 sm:$0xff] }
 0x47d   : > { %v5928_v1 = vadd.f32 %v5704_v51, %v5449_v18  ;;  %v4538_v22 = vmax.f32 %v4458_v24, 0.0  ;;  %v4113_v24 = vld [vmem:[#allocation2 + $0x331] ss:$2 sm:$0xff]  ;;  %v5567_v51 = vrot.slane %v13447_v48, 2 }
 0x47e   : > { %v6011_v47 = vadd.f32 %v13524_v34, %v5927_v43  ;;  %v4539_v10 = vmax.f32 %v4459_v19, 0.0  ;;  %v4273_v43 = vld [vmem:[#allocation2 + $0x332] ss:$2 sm:$0xff] }
 0x47f   : > { %v6012_v15 = vadd.f32 %v13524_v34, %v5928_v1  ;;  %v4111_v1 = vld [vmem:[#allocation2 + $0x321] ss:$2 sm:$0xff] }
 0x480   : > { %v4594_v61 = vpack.c.bf16 %v4539_v10, %v4538_v22  ;;  %6091 = vst.msk [vmem:[#allocation2 + $0x70] sm:$0xff] %vm3689_vm4, %v6011_v47  ;;  %v4381_v47 = vmax.f32 %v3953_v55, %v4113_v24  ;;  %v5570_v22 = vsel %vm2565_vm2, %v5567_v51, %v5569_v37  ;;  %v6283_v10 = vmax.f32 %v6163_v21, %v6203_v28 }
 0x481   : > { %5723 = vrot.lane.b32.xlu2 %v5566_v38, %s10491_s20  ;;  %6092 = vst.msk [vmem:[#allocation2 + $0x78] sm:$0xff] %vm3689_vm4, %v6012_v15  ;;  %5248 = vrot.lane.b32.xlu0 %v5091_v49, %s10492_s21  ;;  %v5572_v38 = vsel %vm2565_vm2, %v5569_v37, %v16091_v4  ;;  %v13646_v15 = vpop.f32.mrf.mxu3  ;;  %v1921_v55 = vrot.slane %v13615_v2, 1 }
 0x482   : > { %5250 = vrot.lane.b32.xlu1 %v5093_v31, %s10492_s21  ;;  %9732 = vmatmul.msk.bf16.gmra.mxu1 %vm3689_vm4, %v4594_v61  ;;  %v4461_v4 = vmax.f32 %v4381_v47, %v4273_v43  ;;  %v1923_v24 = vrot.slane %v13646_v15, 1 }
 0x483   : > { %v13635_v41 = vpop.permute.xlu2 %5234  ;;  %v2216_v18 = vpop.permute.xlu0 %2215 }
 0x484   : > { %v2218_v25 = vpop.permute.xlu1 %2217  ;;  %v1924_v45 = vsel %vm1605_vm3, %v1921_v55, %v1923_v24 }
 0x485   : > { %v2551_v53 = vadd.f32 %v2218_v25, %v13212_v57  ;;  %v4271_v57 = vld [vmem:[#allocation2 + $0x322] ss:$2 sm:$0xff] }
 0x487   : > { %v3511_v19 = vadd.f32 %v13586_v16, %v2551_v53  ;;  %v5568_v16 = vsel %vm2565_vm2, %v5565_v0, %v5567_v51  ;;  %v6243_v25 = vld [vmem:[#allocation2 + $0x62] ss:$2 sm:$0xff]  ;;  %v4380_v53 = vmax.f32 %v3951_v30, %v4111_v1  ;;  %v2550_v0 = vadd.f32 %v2216_v18, %v16222_v35 }
 0x488   : > { %v6164_v49 = vld [vmem:[#allocation2 + $0x70] ss:$2 sm:$0xff]  ;;  %v6204_v61 = vld [vmem:[#allocation2 + $0x71] ss:$2 sm:$0xff]  ;;  %v6323_v28 = vmax.f32 %v6283_v10, %v6243_v25  ;;  %v1922_v10 = vsel %vm1605_vm3, %v1919_v33, %v1921_v55  ;;  %v2883_v18 = vrot.slane %v13646_v15, 2  ;;  %v2552_v33 = vadd.f32 %v13565_v44, %v13239_v27 }
 0x489   : > { %5729 = vrot.lane.b32.xlu2 %v5572_v38, %s10491_s20  ;;  %v3675_v31 = vadd.f32 %v13580_v42, %v3511_v19  ;;  %5725 = vrot.lane.b32.xlu0 %v5568_v16, %s10491_s20  ;;  %v6284_v21 = vmax.f32 %v6164_v49, %v6204_v61  ;;  %v13660_v19 = vpop.f32.mrf.mxu1  ;;  %v6244_v51 = vld [vmem:[#allocation2 + $0x72] ss:$2 sm:$0xff]  ;;  %v4460_v38 = vmax.f32 %v4380_v53, %v4271_v57  ;;  %v16225_v44 = vrot.slane %v13530_v11, 2 }
 0x48a   : > { %5727 = vrot.lane.b32.xlu1 %v5570_v22, %s10491_s20  ;;  %v4541_v22 = vmax.f32 %v4461_v4, 0.0  ;;  %v6363_v16 = vmax.f32 %v6323_v28, 0.0  ;;  %v2881_v4 = vrot.slane %v13615_v2, 2  ;;  %v3957_v55 = vld [vmem:[#allocation2 + $0x350] ss:$2 sm:$0xff] }
 0x48b   : > { %v13657_v37 = vpop.permute.xlu2 %5711  ;;  %3836 = vst.msk [vmem:[#allocation2 + $0x490] sm:$0xff] %vm3689_vm4, %v3675_v31  ;;  %v2222_v1 = vpop.permute.xlu0 %2221  ;;  %v6324_v43 = vmax.f32 %v6284_v21, %v6244_v51  ;;  %v4540_v31 = vmax.f32 %v4460_v38, 0.0  ;;  %v3955_v51 = vld [vmem:[#allocation2 + $0x340] ss:$2 sm:$0xff]  ;;  %v4115_v38 = vld [vmem:[#allocation2 + $0x341] ss:$2 sm:$0xff] }
 0x48c   : > { %v3176_v30 = vpop.permute.xlu1 %3175  ;;  %v2553_v25 = vadd.f32 %v2222_v1, %v13264_v39  ;;  %v2882_v39 = vsel %vm2565_vm2, %v16225_v44, %v2881_v4 }
 0x48d   : > { %v3510_v47 = vadd.f32 %v3176_v30, %v2550_v0  ;;  %v6364_v3 = vmax.f32 %v6324_v43, 0.0  ;;  %v4595_v35 = vpack.c.bf16 %v4541_v22, %v4540_v31  ;;  %v2884_v0 = vsel %vm2565_vm2, %v2881_v4, %v2883_v18  ;;  %v4277_v30 = vld [vmem:[#allocation2 + $0x352] ss:$2 sm:$0xff] }
 0x48e   : > { %v4382_v22 = vmax.f32 %v3955_v51, %v4115_v38 }
 0x48f   : > { %v3674_v49 = vadd.f32 %v13580_v42, %v3510_v47  ;;  %v6400_v61 = vpack.c.bf16 %v6364_v3, %v6363_v16  ;;  %v4275_v47 = vld [vmem:[#allocation2 + $0x342] ss:$2 sm:$0xff] }
 0x490   : > { %v4462_v31 = vmax.f32 %v4382_v22, %v4275_v47  ;;  %v4121_v47 = vld [vmem:[#allocation2 + $0x371] ss:$2 sm:$0xff]  ;;  %v5100_v22 = vrot.slane %v13602_v50, 1 }
 0x491   : > { %2243 = vrot.lane.b32.xlu2 %v1923_v24, %s10492_s21  ;;  %3835 = vst.msk [vmem:[#allocation2 + $0x488] sm:$0xff] %vm3689_vm4, %v3674_v49  ;;  %9759 = vmatmul.msk.bf16.gmra.mxu2 %vm3689_vm4, %v6400_v61  ;;  %v13680_v3 = vpop.f32.mrf.mxu1  ;;  %v4117_v24 = vld [vmem:[#allocation2 + $0x351] ss:$2 sm:$0xff]  ;;  %v5096_v61 = vrot.slane %v13553_v17, 1 }
 0x492   : > { %2241 = vrot.lane.b32.xlu1 %v1924_v45, %s10492_s21  ;;  %2239 = vrot.lane.b32.xlu0 %v1922_v10, %s10492_s21  ;;  %v4383_v1 = vmax.f32 %v3957_v55, %v4117_v24  ;;  %v5098_v10 = vrot.slane %v13571_v46, 1  ;;  %v4542_v24 = vmax.f32 %v4462_v31, 0.0 }
 0x493   : > { %v13676_v57 = vpop.permute.xlu2 %2225  ;;  %9733 = vmatmul.msk.bf16.gmra.mxu1 %vm3689_vm4, %v4595_v35  ;;  %v3180_v53 = vpop.permute.xlu0 %3179 }
 0x494   : > { %v3182_v45 = vpop.permute.xlu1 %3181  ;;  %v3512_v28 = vadd.f32 %v3180_v53, %v2552_v33  ;;  %v4463_v16 = vmax.f32 %v4383_v1, %v4277_v30  ;;  %v5099_v55 = vsel %vm1605_vm3, %v5096_v61, %v5098_v10  ;;  %v5451_v30 = vadd.f32 %v13607_v5, %v13175_v59  ;;  %v3961_v1 = vld [vmem:[#allocation2 + $0x370] ss:$2 sm:$0xff]  ;;  %v4119_v59 = vld [vmem:[#allocation2 + $0x361] ss:$2 sm:$0xff] }
 0x495   : > { %v3513_v21 = vadd.f32 %v3182_v45, %v2553_v25  ;;  %v4281_v5 = vld [vmem:[#allocation2 + $0x372] ss:$2 sm:$0xff] }
 0x496   : > { %v3676_v27 = vadd.f32 %v13580_v42, %v3512_v28  ;;  %v4543_v25 = vmax.f32 %v4463_v16, 0.0 }
 0x497   : > { %v3677_v43 = vadd.f32 %v13580_v42, %v3513_v21 }
 0x498   : > { %3837 = vst.msk [vmem:[#allocation2 + $0x498] sm:$0xff] %vm3689_vm4, %v3676_v27  ;;  %v4596_v51 = vpack.c.bf16 %v4543_v25, %v4542_v24  ;;  %v5573_v27 = vrot.slane %v13518_v54, 2  ;;  %v16227_v25 = vrot.slane %v13494_v56, 2  ;;  %v5101_v24 = vsel %vm1605_vm3, %v5098_v10, %v5100_v22 }
 0x499   : > { %3203 = vrot.lane.b32.xlu2 %v2883_v18, %s10491_s20  ;;  %3838 = vst.msk [vmem:[#allocation2 + $0x4a0] sm:$0xff] %vm3689_vm4, %v3677_v43  ;;  %v5094_v18 = vrot.slane %v13518_v54, 1  ;;  %v13701_v45 = vpop.f32.mrf.mxu1  ;;  %v5577_v10 = vrot.slane %v13571_v46, 2 }
 0x49a   : > { %3201 = vrot.lane.b32.xlu1 %v2884_v0, %s10491_s20  ;;  %3199 = vrot.lane.b32.xlu0 %v2882_v39, %s10491_s20  ;;  %v16226_v0 = vrot.slane %v13494_v56, 1 }
 0x49b   : > { %v13695_v49 = vpop.permute.xlu2 %3183  ;;  %v5231_v4 = vpop.permute.xlu0 %5230  ;;  %v5097_v21 = vsel %vm1605_vm3, %v5094_v18, %v5096_v61 }
 0x49c   : > { %v5233_v35 = vpop.permute.xlu1 %5232  ;;  %v5452_v43 = vadd.f32 %v5231_v4, %v13195_v13 }
 0x49d   : > { %v5453_v33 = vadd.f32 %v5233_v35, %v13231_v29  ;;  %v5095_v29 = vsel %vm1605_vm3, %v16226_v0, %v5094_v18  ;;  %v3959_v35 = vld [vmem:[#allocation2 + $0x360] ss:$2 sm:$0xff] }
 0x49f   : > { %v5932_v53 = vadd.f32 %v13657_v37, %v5453_v33  ;;  %v5575_v37 = vrot.slane %v13553_v17, 2  ;;  %v4385_v33 = vmax.f32 %v3961_v1, %v4121_v47 }
 0x4a1   : > { %5256 = vrot.lane.b32.xlu2 %v5099_v55, %s10492_s21  ;;  %v6016_v28 = vadd.f32 %v13524_v34, %v5932_v53  ;;  %v13723_v61 = vpop.f32.mrf.mxu1  ;;  %v5576_v4 = vsel %vm2565_vm2, %v5573_v27, %v5575_v37  ;;  %v5574_v53 = vsel %vm2565_vm2, %v16227_v25, %v5573_v27  ;;  %v4279_v55 = vld [vmem:[#allocation2 + $0x362] ss:$2 sm:$0xff] }
 0x4a2   : > { %5254 = vrot.lane.b32.xlu1 %v5097_v21, %s10492_s21  ;;  %5252 = vrot.lane.b32.xlu0 %v5095_v29, %s10492_s21  ;;  %v4384_v21 = vmax.f32 %v3959_v35, %v4119_v59  ;;  %v5102_v29 = vrot.slane %v13628_v14, 1  ;;  %v3963_v25 = vld [vmem:[#allocation2 + $0x380] ss:$2 sm:$0xff] }
 0x4a3   : > { %v13713_v38 = vpop.permute.xlu2 %3189  ;;  %6096 = vst.msk [vmem:[#allocation2 + $0x98] sm:$0xff] %vm3689_vm4, %v6016_v28  ;;  %9734 = vmatmul.msk.bf16.gmra.mxu1 %vm3689_vm4, %v4596_v51  ;;  %v5708_v39 = vpop.permute.xlu0 %5707  ;;  %v4465_v28 = vmax.f32 %v4385_v33, %v4281_v5  ;;  %v5454_v51 = vadd.f32 %v13635_v41, %v13258_v20 }
 0x4a4   : > { %v5710_v44 = vpop.permute.xlu1 %5709  ;;  %v5930_v31 = vadd.f32 %v5708_v39, %v5451_v30  ;;  %v4464_v30 = vmax.f32 %v4384_v21, %v4279_v55  ;;  %v5103_v35 = vsel %vm1605_vm3, %v5100_v22, %v5102_v29  ;;  %v4125_v55 = vld [vmem:[#allocation2 + $0x391] ss:$2 sm:$0xff] }
 0x4a5   : > { %v5931_v16 = vadd.f32 %v5710_v44, %v5452_v43  ;;  %v5579_v43 = vrot.slane %v13602_v50, 2  ;;  %v4545_v47 = vmax.f32 %v4465_v28, 0.0 }
 0x4a6   : > { %v6014_v13 = vadd.f32 %v13524_v34, %v5930_v31  ;;  %v4544_v59 = vmax.f32 %v4464_v30, 0.0  ;;  %v5104_v30 = vrot.slane %v13660_v19, 1 }
 0x4a7   : > { %v6015_v18 = vadd.f32 %v13524_v34, %v5931_v16  ;;  %v5580_v20 = vsel %vm2565_vm2, %v5577_v10, %v5579_v43 }
 0x4a8   : > { %6094 = vst.msk [vmem:[#allocation2 + $0x88] sm:$0xff] %vm3689_vm4, %v6014_v13 }
 0x4a9   : > { %5733 = vrot.lane.b32.xlu2 %v5576_v4, %s10491_s20  ;;  %6095 = vst.msk [vmem:[#allocation2 + $0x90] sm:$0xff] %vm3689_vm4, %v6015_v18  ;;  %v13748_v5 = vpop.f32.mrf.mxu1  ;;  %v5108_v4 = vrot.slane %v13701_v45, 1 }
 0x4aa   : > { %5731 = vrot.lane.b32.xlu1 %v5574_v53, %s10491_s20  ;;  %5258 = vrot.lane.b32.xlu0 %v5101_v24, %s10492_s21  ;;  %v3965_v53 = vld [vmem:[#allocation2 + $0x390] ss:$2 sm:$0xff]  ;;  %v5106_v24 = vrot.slane %v13680_v3, 1 }
 0x4ab   : > { %v13737_v0 = vpop.permute.xlu2 %5240  ;;  %v5714_v44 = vpop.permute.xlu0 %5713 }
 0x4ac   : > { %v2224_v27 = vpop.permute.xlu1 %2223  ;;  %v5933_v1 = vadd.f32 %v5714_v44, %v5454_v51  ;;  %v4123_v44 = vld [vmem:[#allocation2 + $0x381] ss:$2 sm:$0xff] }
 0x4ad   : > { %v2554_v39 = vadd.f32 %v2224_v27, %v13290_v40  ;;  %v5578_v40 = vsel %vm2565_vm2, %v5575_v37, %v5577_v10  ;;  %v4285_v10 = vld [vmem:[#allocation2 + $0x392] ss:$2 sm:$0xff] }
 0x4ae   : > { %v6017_v31 = vadd.f32 %v13524_v34, %v5933_v1  ;;  %v4387_v1 = vmax.f32 %v3965_v53, %v4125_v55  ;;  %v5585_v55 = vrot.slane %v13680_v3, 2 }
 0x4af   : > { %v3514_v16 = vadd.f32 %v13695_v49, %v2554_v39  ;;  %v4597_v49 = vpack.c.bf16 %v4545_v47, %v4544_v59  ;;  %v6165_v18 = vld [vmem:[#allocation2 + $0x80] ss:$2 sm:$0xff]  ;;  %v6205_v22 = vld [vmem:[#allocation2 + $0x81] ss:$2 sm:$0xff]  ;;  %v13767_v47 = vpop.f32.mrf.mxu2 }
 0x4b0   : > { %6097 = vst.msk [vmem:[#allocation2 + $0xa0] sm:$0xff] %vm3689_vm4, %v6017_v31  ;;  %v6285_v33 = vmax.f32 %v6165_v18, %v6205_v22  ;;  %v6166_v28 = vld [vmem:[#allocation2 + $0x90] ss:$2 sm:$0xff]  ;;  %v6206_v51 = vld [vmem:[#allocation2 + $0x91] ss:$2 sm:$0xff]  ;;  %v5109_v31 = vsel %vm1605_vm3, %v5106_v24, %v5108_v4  ;;  %v4467_v18 = vmax.f32 %v4387_v1, %v4285_v10  ;;  %v5581_v10 = vrot.slane %v13628_v14, 2 }
 0x4b1   : > { %5260 = vrot.lane.b32.xlu2 %v5103_v35, %s10492_s21  ;;  %v3678_v41 = vadd.f32 %v13580_v42, %v3514_v16  ;;  %v6245_v39 = vld [vmem:[#allocation2 + $0x82] ss:$2 sm:$0xff]  ;;  %v6286_v35 = vmax.f32 %v6166_v28, %v6206_v51 }
 0x4b2   : > { %5737 = vrot.lane.b32.xlu1 %v5580_v20, %s10491_s20  ;;  %5735 = vrot.lane.b32.xlu0 %v5578_v40, %s10491_s20  ;;  %v6325_v59 = vmax.f32 %v6285_v33, %v6245_v39  ;;  %v4283_v20 = vld [vmem:[#allocation2 + $0x382] ss:$2 sm:$0xff] }
 0x4b3   : > { %v13759_v13 = vpop.permute.xlu2 %5717  ;;  %3839 = vst.msk [vmem:[#allocation2 + $0x4a8] sm:$0xff] %vm3689_vm4, %v3678_v41  ;;  %9735 = vmatmul.msk.bf16.gmra.mxu1 %vm3689_vm4, %v4597_v49  ;;  %v2228_v21 = vpop.permute.xlu0 %2227  ;;  %v4386_v49 = vmax.f32 %v3963_v25, %v4123_v44  ;;  %v4547_v44 = vmax.f32 %v4467_v18, 0.0  ;;  %v4129_v18 = vld [vmem:[#allocation2 + $0x3b1] ss:$2 sm:$0xff] }
 0x4b4   : > { %v2230_v37 = vpop.permute.xlu1 %2229  ;;  %v13773_v41 = vpop.f32.mrf.mxu1  ;;  %v2556_v25 = vadd.f32 %v2228_v21, %v13354_v7  ;;  %v6365_v28 = vmax.f32 %v6325_v59, 0.0  ;;  %v5582_v59 = vsel %vm2565_vm2, %v5579_v43, %v5581_v10  ;;  %v5587_v43 = vrot.slane %v13701_v45, 2 }
 0x4b5   : > { %v2557_v27 = vadd.f32 %v2230_v37, %v13376_v12  ;;  %v5107_v12 = vsel %vm1605_vm3, %v5104_v30, %v5106_v24  ;;  %v4466_v37 = vmax.f32 %v4386_v49, %v4283_v20  ;;  %v2555_v24 = vadd.f32 %v13676_v57, %v13324_v32  ;;  %v3969_v49 = vld [vmem:[#allocation2 + $0x3b0] ss:$2 sm:$0xff] }
 0x4b7   : > { %v3517_v16 = vadd.f32 %v13713_v38, %v2557_v27  ;;  %v6246_v40 = vld [vmem:[#allocation2 + $0x92] ss:$2 sm:$0xff]  ;;  %v5105_v38 = vsel %vm1605_vm3, %v5102_v29, %v5104_v30  ;;  %v5583_v27 = vrot.slane %v13660_v19, 2  ;;  %v4546_v57 = vmax.f32 %v4466_v37, 0.0 }
 0x4b8   : > { %v6326_v53 = vmax.f32 %v6286_v35, %v6246_v40  ;;  %v13796_v35 = vpop.f32.mrf.mxu2 }
 0x4b9   : > { %5266 = vrot.lane.b32.xlu2 %v5109_v31, %s10492_s21  ;;  %v3681_v22 = vadd.f32 %v13580_v42, %v3517_v16  ;;  %v5586_v7 = vsel %vm2565_vm2, %v5583_v27, %v5585_v55  ;;  %v5584_v21 = vsel %vm2565_vm2, %v5581_v10, %v5583_v27  ;;  %v4598_v20 = vpack.c.bf16 %v4547_v44, %v4546_v57  ;;  %v4287_v44 = vld [vmem:[#allocation2 + $0x3a2] ss:$2 sm:$0xff]  ;;  %v4289_v10 = vld [vmem:[#allocation2 + $0x3b2] ss:$2 sm:$0xff] }
 0x4ba   : > { %5264 = vrot.lane.b32.xlu1 %v5107_v12, %s10492_s21  ;;  %5262 = vrot.lane.b32.xlu0 %v5105_v38, %s10492_s21  ;;  %v6366_v51 = vmax.f32 %v6326_v53, 0.0  ;;  %v5110_v38 = vrot.slane %v13723_v61, 1 }
 0x4bb   : > { %v13782_v33 = vpop.permute.xlu2 %2231  ;;  %3842 = vst.msk [vmem:[#allocation2 + $0x4c0] sm:$0xff] %vm3689_vm4, %v3681_v22  ;;  %v3186_v30 = vpop.permute.xlu0 %3185  ;;  %v5589_v22 = vrot.slane %v13723_v61, 2 }
 0x4bc   : > { %v3188_v29 = vpop.permute.xlu1 %3187  ;;  %v3515_v1 = vadd.f32 %v3186_v30, %v2555_v24  ;;  %v6401_v16 = vpack.c.bf16 %v6366_v51, %v6365_v28  ;;  %v13803_v12 = vpop.f32.mrf.mxu1  ;;  %v3967_v28 = vld [vmem:[#allocation2 + $0x3a0] ss:$2 sm:$0xff]  ;;  %v4127_v51 = vld [vmem:[#allocation2 + $0x3a1] ss:$2 sm:$0xff]  ;;  %v5111_v30 = vsel %vm1605_vm3, %v5108_v4, %v5110_v38  ;;  %v5112_v4 = vrot.slane %v13748_v5, 1 }
 0x4bd   : > { %v3516_v39 = vadd.f32 %v3188_v29, %v2556_v25  ;;  %v4389_v25 = vmax.f32 %v3969_v49, %v4129_v18  ;;  %v5590_v29 = vsel %vm2565_vm2, %v5587_v43, %v5589_v22 }
 0x4be   : > { %v3679_v32 = vadd.f32 %v13580_v42, %v3515_v1  ;;  %9760 = vmatmul.msk.bf16.gmra.mxu2 %vm3689_vm4, %v6401_v16  ;;  %v5588_v1 = vsel %vm2565_vm2, %v5585_v55, %v5587_v43  ;;  %v4388_v16 = vmax.f32 %v3967_v28, %v4127_v51  ;;  %v5591_v55 = vrot.slane %v13748_v5, 2 }
 0x4bf   : > { %v3680_v31 = vadd.f32 %v13580_v42, %v3516_v39 }
 0x4c0   : > { %3840 = vst.msk [vmem:[#allocation2 + $0x4b0] sm:$0xff] %vm3689_vm4, %v3679_v32  ;;  %v13820_v39 = vpop.f32.mrf.mxu2  ;;  %v4468_v57 = vmax.f32 %v4388_v16, %v4287_v44 }
 0x4c1   : > { %5743 = vrot.lane.b32.xlu2 %v5586_v7, %s10491_s20  ;;  %3841 = vst.msk [vmem:[#allocation2 + $0x4b8] sm:$0xff] %vm3689_vm4, %v3680_v31 }
 0x4c2   : > { %5741 = vrot.lane.b32.xlu1 %v5584_v21, %s10491_s20  ;;  %5739 = vrot.lane.b32.xlu0 %v5582_v59, %s10491_s20  ;;  %v6645_v21 = vrot.slane %v13820_v39, 1 }
 0x4c3   : > { %v13807_v40 = vpop.permute.xlu2 %2237  ;;  %9736 = vmatmul.msk.bf16.gmra.mxu1 %vm3689_vm4, %v4598_v20  ;;  %v5237_v24 = vpop.permute.xlu0 %5236 }
 0x4c4   : > { %v5239_v53 = vpop.permute.xlu1 %5238  ;;  %v13825_v31 = vpop.f32.mrf.mxu1  ;;  %v5455_v7 = vadd.f32 %v5237_v24, %v13286_v60  ;;  %v5592_v24 = vsel %vm2565_vm2, %v5589_v22, %v5591_v55  ;;  %v3973_v22 = vld [vmem:[#allocation2 + $0x3d0] ss:$2 sm:$0xff] }
 0x4c5   : > { %v5456_v37 = vadd.f32 %v5239_v53, %v13307_v8  ;;  %v6643_v53 = vrot.slane %v13796_v35, 1 }
 0x4c7   : > { %v5935_v27 = vadd.f32 %v13759_v13, %v5456_v37  ;;  %v4469_v13 = vmax.f32 %v4389_v25, %v4289_v10  ;;  %v5113_v37 = vsel %vm1605_vm3, %v5110_v38, %v5112_v4  ;;  %v4548_v25 = vmax.f32 %v4468_v57, 0.0  ;;  %v4131_v57 = vld [vmem:[#allocation2 + $0x3c1] ss:$2 sm:$0xff] }
 0x4c8   : > { %v6646_v60 = vsel %vm1605_vm3, %v6643_v53, %v6645_v21  ;;  %v5595_v38 = vrot.slane %v13803_v12, 2 }
 0x4c9   : > { %5747 = vrot.lane.b32.xlu2 %v5590_v29, %s10491_s20  ;;  %v6019_v8 = vadd.f32 %v13524_v34, %v5935_v27  ;;  %v4549_v18 = vmax.f32 %v4469_v13, 0.0  ;;  %v5457_v29 = vadd.f32 %v13737_v0, %v13338_v6 }
 0x4ca   : > { %5268 = vrot.lane.b32.xlu1 %v5111_v30, %s10492_s21  ;;  %5745 = vrot.lane.b32.xlu0 %v5588_v1, %s10491_s20  ;;  %v5593_v30 = vrot.slane %v13773_v41, 2 }
 0x4cb   : > { %v13828_v32 = vpop.permute.xlu2 %3195  ;;  %6099 = vst.msk [vmem:[#allocation2 + $0xb0] sm:$0xff] %vm3689_vm4, %v6019_v8  ;;  %v5243_v49 = vpop.permute.xlu0 %5242  ;;  %v4599_v28 = vpack.c.bf16 %v4549_v18, %v4548_v25  ;;  %v4133_v8 = vld [vmem:[#allocation2 + $0x3d1] ss:$2 sm:$0xff] }
 0x4cc   : > { %v5716_v59 = vpop.permute.xlu1 %5715  ;;  %v5458_v27 = vadd.f32 %v5243_v49, %v13358_v52  ;;  %v13856_v44 = vpop.f32.mrf.mxu1  ;;  %v6642_v52 = vrot.slane %v13767_v47, 1  ;;  %v5596_v6 = vsel %vm2565_vm2, %v5593_v30, %v5595_v38  ;;  %v4391_v0 = vmax.f32 %v3973_v22, %v4133_v8 }
 0x4cd   : > { %v5934_v20 = vadd.f32 %v5716_v59, %v5455_v7  ;;  %v3971_v7 = vld [vmem:[#allocation2 + $0x3c0] ss:$2 sm:$0xff]  ;;  %v5594_v18 = vsel %vm2565_vm2, %v5591_v55, %v5593_v30  ;;  %v5597_v22 = vrot.slane %v13825_v31, 2 }
 0x4ce   : > { %v4293_v59 = vld [vmem:[#allocation2 + $0x3d2] ss:$2 sm:$0xff]  ;;  %v4390_v25 = vmax.f32 %v3971_v7, %v4131_v57 }
 0x4cf   : > { %v6018_v43 = vadd.f32 %v13524_v34, %v5934_v20 }
 0x4d1   : > { %5270 = vrot.lane.b32.xlu2 %v5113_v37, %s10492_s21  ;;  %6098 = vst.msk [vmem:[#allocation2 + $0xa8] sm:$0xff] %vm3689_vm4, %v6018_v43  ;;  %v4291_v43 = vld [vmem:[#allocation2 + $0x3c2] ss:$2 sm:$0xff]  ;;  %v6644_v37 = vsel %vm1605_vm3, %v6642_v52, %v6643_v53  ;;  %v5114_v53 = vrot.slane %v13773_v41, 1 }
 0x4d2   : > { %6723 = vrot.lane.b32.xlu1 %v6646_v60, %s10492_s21  ;;  %5749 = vrot.lane.b32.xlu0 %v5592_v24, %s10491_s20  ;;  %v4471_v60 = vmax.f32 %v4391_v0, %v4293_v59 }
 0x4d3   : > { %v13848_v51 = vpop.permute.xlu2 %5246  ;;  %9737 = vmatmul.msk.bf16.gmra.mxu1 %vm3689_vm4, %v4599_v28  ;;  %v5720_v16 = vpop.permute.xlu0 %5719  ;;  %v4470_v28 = vmax.f32 %v4390_v25, %v4291_v43  ;;  %v3977_v25 = vld [vmem:[#allocation2 + $0x3f0] ss:$2 sm:$0xff] }
 0x4d4   : > { %v5722_v10 = vpop.permute.xlu1 %5721  ;;  %v5936_v13 = vadd.f32 %v5720_v16, %v5457_v29  ;;  %v5116_v29 = vrot.slane %v13803_v12, 1  ;;  %v4551_v16 = vmax.f32 %v4471_v60, 0.0 }
 0x4d5   : > { %v5937_v1 = vadd.f32 %v5722_v10, %v5458_v27  ;;  %v4550_v59 = vmax.f32 %v4470_v28, 0.0 }
 0x4d6   : > { %v6020_v49 = vadd.f32 %v13524_v34, %v5936_v13  ;;  %v5117_v52 = vsel %vm1605_vm3, %v5114_v53, %v5116_v29 }
 0x4d7   : > { %v6021_v20 = vadd.f32 %v13524_v34, %v5937_v1  ;;  %v5599_v34 = vrot.slane %v13856_v44, 2  ;;  %v13875_v30 = vpop.f32.mrf.mxu1 }
 0x4d8   : > { %6100 = vst.msk [vmem:[#allocation2 + $0xb8] sm:$0xff] %vm3689_vm4, %v6020_v49  ;;  %v6167_v27 = vld [vmem:[#allocation2 + $0xa0] ss:$2 sm:$0xff]  ;;  %v6207_v55 = vld [vmem:[#allocation2 + $0xa1] ss:$2 sm:$0xff]  ;;  %v5122_v60 = vrot.slane %v13875_v30, 1 }
 0x4d9   : > { %5753 = vrot.lane.b32.xlu2 %v5596_v6, %s10491_s20  ;;  %6101 = vst.msk [vmem:[#allocation2 + $0xc0] sm:$0xff] %vm3689_vm4, %v6021_v20  ;;  %v6287_v13 = vmax.f32 %v6167_v27, %v6207_v55  ;;  %v5600_v57 = vsel %vm2565_vm2, %v5597_v22, %v5599_v34  ;;  %v4600_v6 = vpack.c.bf16 %v4551_v16, %v4550_v59  ;;  %v6247_v49 = vld [vmem:[#allocation2 + $0xa2] ss:$2 sm:$0xff]  ;;  %v4137_v27 = vld [vmem:[#allocation2 + $0x3f1] ss:$2 sm:$0xff] }
 0x4da   : > { %5751 = vrot.lane.b32.xlu1 %v5594_v18, %s10491_s20  ;;  %6721 = vrot.lane.b32.xlu0 %v6644_v37, %s10492_s21  ;;  %v2558_v55 = vadd.f32 %v13782_v33, %v13408_v63  ;;  %v4135_v16 = vld [vmem:[#allocation2 + $0x3e1] ss:$2 sm:$0xff]  ;;  %v4295_v33 = vld [vmem:[#allocation2 + $0x3e2] ss:$2 sm:$0xff] }
 0x4db   : > { %v13871_v24 = vpop.permute.xlu2 %5723  ;;  %v2234_v1 = vpop.permute.xlu0 %2233  ;;  %v6327_v37 = vmax.f32 %v6287_v13, %v6247_v49  ;;  %v5118_v13 = vrot.slane %v13825_v31, 1 }
 0x4dc   : > { %v2236_v10 = vpop.permute.xlu1 %2235  ;;  %v2559_v28 = vadd.f32 %v2234_v1, %v13436_v26 }
 0x4dd   : > { %v2560_v8 = vadd.f32 %v2236_v10, %v13463_v23  ;;  %v5115_v23 = vsel %vm1605_vm3, %v5112_v4, %v5114_v53  ;;  %v6367_v1 = vmax.f32 %v6327_v37, 0.0 }
 0x4df   : > { %v3520_v7 = vadd.f32 %v13828_v32, %v2560_v8  ;;  %v6168_v0 = vld [vmem:[#allocation2 + $0xb0] ss:$2 sm:$0xff]  ;;  %v6208_v32 = vld [vmem:[#allocation2 + $0xb1] ss:$2 sm:$0xff]  ;;  %v3975_v8 = vld [vmem:[#allocation2 + $0x3e0] ss:$2 sm:$0xff] }
 0x4e0   : > { %v6288_v43 = vmax.f32 %v6168_v0, %v6208_v32  ;;  %v6248_v4 = vld [vmem:[#allocation2 + $0xb2] ss:$2 sm:$0xff]  ;;  %v4392_v32 = vmax.f32 %v3975_v8, %v4135_v16 }
 0x4e1   : > { %5757 = vrot.lane.b32.xlu2 %v5600_v57, %s10491_s20  ;;  %v3684_v20 = vadd.f32 %v13580_v42, %v3520_v7  ;;  %v5120_v7 = vrot.slane %v13856_v44, 1 }
 0x4e2   : > { %5274 = vrot.lane.b32.xlu1 %v5117_v52, %s10492_s21  ;;  %5272 = vrot.lane.b32.xlu0 %v5115_v23, %s10492_s21  ;;  %v6328_v53 = vmax.f32 %v6288_v43, %v6248_v4  ;;  %v4297_v52 = vld [vmem:[#allocation2 + $0x3f2] ss:$2 sm:$0xff] }
 0x4e3   : > { %v13892_v18 = vpop.permute.xlu2 %5729  ;;  %3845 = vst.msk [vmem:[#allocation2 + $0x4d8] sm:$0xff] %vm3689_vm4, %v3684_v20  ;;  %9738 = vmatmul.msk.bf16.gmra.mxu1 %vm3689_vm4, %v4600_v6  ;;  %v3192_v59 = vpop.permute.xlu0 %3191  ;;  %v4393_v6 = vmax.f32 %v3977_v25, %v4137_v27  ;;  %v5123_v63 = vsel %vm1605_vm3, %v5120_v7, %v5122_v60  ;;  %v5119_v25 = vsel %vm1605_vm3, %v5116_v29, %v5118_v13 }
 0x4e4   : > { %v3194_v10 = vpop.permute.xlu1 %3193  ;;  %v13902_v20 = vpop.f32.mrf.mxu1  ;;  %v3518_v26 = vadd.f32 %v3192_v59, %v2558_v55  ;;  %v6368_v23 = vmax.f32 %v6328_v53, 0.0  ;;  %v4472_v27 = vmax.f32 %v4392_v32, %v4295_v33  ;;  %v2561_v55 = vadd.f32 %v13807_v40, %v13490_v36  ;;  %v3981_v33 = vld [vmem:[#allocation2 + $0x410] ss:$2 sm:$0xff]  ;;  %v4141_v32 = vld [vmem:[#allocation2 + $0x411] ss:$2 sm:$0xff] }
 0x4e5   : > { %v3519_v57 = vadd.f32 %v3194_v10, %v2559_v28  ;;  %v5598_v28 = vsel %vm2565_vm2, %v5595_v38, %v5597_v22  ;;  %v4473_v37 = vmax.f32 %v4393_v6, %v4297_v52  ;;  %v5601_v22 = vrot.slane %v13875_v30, 2 }
 0x4e6   : > { %v3682_v49 = vadd.f32 %v13580_v42, %v3518_v26  ;;  %v6402_v43 = vpack.c.bf16 %v6368_v23, %v6367_v1  ;;  %v5124_v59 = vrot.slane %v13902_v20, 1  ;;  %v5121_v36 = vsel %vm1605_vm3, %v5118_v13, %v5120_v7 }
 0x4e7   : > { %v3683_v0 = vadd.f32 %v13580_v42, %v3519_v57  ;;  %v4553_v38 = vmax.f32 %v4473_v37, 0.0  ;;  %v4552_v57 = vmax.f32 %v4472_v27, 0.0  ;;  %v5602_v13 = vsel %vm2565_vm2, %v5599_v34, %v5601_v22  ;;  %v4139_v37 = vld [vmem:[#allocation2 + $0x401] ss:$2 sm:$0xff] }
 0x4e8   : > { %3843 = vst.msk [vmem:[#allocation2 + $0x4c8] sm:$0xff] %vm3689_vm4, %v3682_v49  ;;  %9761 = vmatmul.msk.bf16.gmra.mxu2 %vm3689_vm4, %v6402_v43  ;;  %v4395_v27 = vmax.f32 %v3981_v33, %v4141_v32  ;;  %v4145_v33 = vld [vmem:[#allocation2 + $0x431] ss:$2 sm:$0xff] }
 0x4e9   : > { %5280 = vrot.lane.b32.xlu2 %v5123_v63, %s10492_s21  ;;  %3844 = vst.msk [vmem:[#allocation2 + $0x4d0] sm:$0xff] %vm3689_vm4, %v3683_v0  ;;  %v4601_v40 = vpack.c.bf16 %v4553_v38, %v4552_v57  ;;  %v5603_v0 = vrot.slane %v13902_v20, 2  ;;  %v4299_v38 = vld [vmem:[#allocation2 + $0x402] ss:$2 sm:$0xff] }
 0x4ea   : > { %5755 = vrot.lane.b32.xlu1 %v5598_v28, %s10491_s20  ;;  %5276 = vrot.lane.b32.xlu0 %v5119_v25, %s10492_s21  ;;  %v3979_v28 = vld [vmem:[#allocation2 + $0x400] ss:$2 sm:$0xff] }
 0x4eb   : > { %v2244_v4 = vpop.permute.xlu2 %2243  ;;  %v3198_v8 = vpop.permute.xlu0 %3197  ;;  %v4301_v25 = vld [vmem:[#allocation2 + $0x412] ss:$2 sm:$0xff] }
 0x4ec   : > { %v5245_v10 = vpop.permute.xlu1 %5244  ;;  %v3521_v16 = vadd.f32 %v3198_v8, %v2561_v55  ;;  %v2564_v23 = vadd.f32 %v2244_v4, %v13646_v15  ;;  %v4475_v8 = vmax.f32 %v4395_v27, %v4301_v25 }
 0x4ed   : > { %v5459_v53 = vadd.f32 %v5245_v10, %v13387_v62  ;;  %v13923_v29 = vpop.f32.mrf.mxu1  ;;  %v13934_v62 = vld [vmem:[%s15980_s4] ss:$0 sm:$0xff]  ;;  %v5604_v10 = vsel %vm2565_vm2, %v5601_v22, %v5603_v0  ;;  %v5460_v22 = vadd.f32 %v13848_v51, %v13415_v9 }
 0x4ee   : > { %v5126_v26 = vrot.slane %v13923_v29, 1  ;;  %v3685_v1 = vadd.f32 %v13580_v42, %v3521_v16 }
 0x4ef   : > { %v5938_v52 = vadd.f32 %v13871_v24, %v5459_v53 }
 0x4f0   : > { %v5127_v24 = vsel %vm1605_vm3, %v5124_v59, %v5126_v26  ;;  %3846 = vst.msk [vmem:[#allocation2 + $0x4e0] sm:$0xff] %vm3689_vm4, %v3685_v1  ;;  %v5605_v1 = vrot.slane %v13923_v29, 2 }
 0x4f1   : > { %v6022_v6 = vadd.f32 %v13934_v62, %v5938_v52  ;;  %5284 = vrot.lane.b32.xlu2 %v5127_v24, %s10492_s21 }
 0x4f2   : > { %5278 = vrot.lane.b32.xlu1 %v5121_v36, %s10492_s21  ;;  %5759 = vrot.lane.b32.xlu0 %v5602_v13, %s10491_s20 }
 0x4f3   : > { %v3204_v15 = vpop.permute.xlu2 %3203  ;;  %6102 = vst.msk [vmem:[#allocation2 + $0xc8] sm:$0xff] %vm3689_vm4, %v6022_v6  ;;  %9739 = vmatmul.msk.bf16.gmra.mxu1 %vm3689_vm4, %v4601_v40  ;;  %v5249_v43 = vpop.permute.xlu0 %5248 }
 0x4f4   : > { %v3524_v7 = vadd.f32 %v3204_v15, %v2564_v23  ;;  %v5251_v63 = vpop.permute.xlu1 %5250  ;;  %v5606_v15 = vsel %vm2565_vm2, %v5603_v0, %v5605_v1  ;;  %v3983_v0 = vld [vmem:[#allocation2 + $0x420] ss:$2 sm:$0xff] }
 0x4f5   : > { %v5462_v49 = vadd.f32 %v5251_v63, %v13468_v58  ;;  %v13954_v55 = vpop.f32.mrf.mxu1  ;;  %v5125_v58 = vsel %vm1605_vm3, %v5122_v60, %v5124_v59  ;;  %v4555_v60 = vmax.f32 %v4475_v8, 0.0  ;;  %v3985_v63 = vld [vmem:[#allocation2 + $0x430] ss:$2 sm:$0xff] }
 0x4f6   : > { %v3688_v34 = vadd.f32 %v13580_v42, %v3524_v7  ;;  %v4394_v42 = vmax.f32 %v3979_v28, %v4139_v37  ;;  %v5607_v57 = vrot.slane %v13954_v55, 2  ;;  %v4143_v37 = vld [vmem:[#allocation2 + $0x421] ss:$2 sm:$0xff]  ;;  %v4397_v25 = vmax.f32 %v3985_v63, %v4145_v33 }
 0x4f7   : > { %v5941_v4 = vadd.f32 %v13892_v18, %v5462_v49  ;;  %v5461_v18 = vadd.f32 %v5249_v43, %v13447_v48  ;;  %v5128_v43 = vrot.slane %v13954_v55, 1 }
 0x4f8   : > { %3850 = vst.msk [vmem:[#allocation2 + $0x4f8] sm:$0x3f] %vm3849_vm5, %v3688_v34  ;;  %v4474_v16 = vmax.f32 %v4394_v42, %v4299_v38  ;;  %v5608_v9 = vsel %vm2565_vm2, %v5605_v1, %v5607_v57  ;;  %v4396_v42 = vmax.f32 %v3983_v0, %v4143_v37 }
 0x4f9   : > { %v6025_v53 = vadd.f32 %v13934_v62, %v5941_v4 }
 0x4fa   : > { %5761 = vrot.lane.b32.xlu1 %v5604_v10, %s10491_s20  ;;  %5282 = vrot.lane.b32.xlu0 %v5125_v58, %s10492_s21  ;;  %v4554_v6 = vmax.f32 %v4474_v16, 0.0  ;;  %v6169_v4 = vld [vmem:[#allocation2 + $0xc0] ss:$2 sm:$0xff]  ;;  %v6209_v27 = vld [vmem:[#allocation2 + $0xc1] ss:$2 sm:$0xff] }
 0x4fb   : > { %6105 = vst.msk [vmem:[#allocation2 + $0xe0] sm:$0xff] %vm3689_vm4, %v6025_v53  ;;  %v5726_v40 = vpop.permute.xlu0 %5725  ;;  %v13970_v24 = vpop.permute.xlu2 %5256  ;;  %v4303_v53 = vld [vmem:[#allocation2 + $0x422] ss:$2 sm:$0xff]  ;;  %v4305_v58 = vld [vmem:[#allocation2 + $0x432] ss:$2 sm:$0xff] }
 0x4fc   : > { %v5728_v52 = vpop.permute.xlu1 %5727  ;;  %v5939_v59 = vadd.f32 %v5726_v40, %v5460_v22  ;;  %v4602_v7 = vpack.c.bf16 %v4555_v60, %v4554_v6 }
 0x4fd   : > { %v5940_v36 = vadd.f32 %v5728_v52, %v5461_v18  ;;  %v5129_v18 = vsel %vm1605_vm3, %v5126_v26, %v5128_v43  ;;  %v4477_v52 = vmax.f32 %v4397_v25, %v4305_v58  ;;  %v3989_v58 = vld [vmem:[#allocation2 + $0x450] ss:$2 sm:$0xff] }
 0x4fe   : > { %v6023_v48 = vadd.f32 %v13934_v62, %v5939_v59 }
 0x4ff   : > { %v6024_v23 = vadd.f32 %v13934_v62, %v5940_v36  ;;  %v13973_v13 = vpop.f32.mrf.mxu1 }
 0x500   : > { %v5609_v51 = vrot.slane %v13973_v13, 2  ;;  %6103 = vst.msk [vmem:[#allocation2 + $0xd0] sm:$0xff] %vm3689_vm4, %v6023_v48  ;;  %v5130_v34 = vrot.slane %v13973_v13, 1  ;;  %v4476_v48 = vmax.f32 %v4396_v42, %v4303_v53  ;;  %v4149_v42 = vld [vmem:[#allocation2 + $0x451] ss:$2 sm:$0xff] }
 0x501   : > { %6104 = vst.msk [vmem:[#allocation2 + $0xd8] sm:$0xff] %vm3689_vm4, %v6024_v23 }
 0x502   : > { %5765 = vrot.lane.b32.xlu1 %v5608_v9, %s10491_s20  ;;  %5763 = vrot.lane.b32.xlu0 %v5606_v15, %s10491_s20  ;;  %v5610_v32 = vsel %vm2565_vm2, %v5607_v57, %v5609_v51  ;;  %v5131_v38 = vsel %vm1605_vm3, %v5128_v43, %v5130_v34  ;;  %v6289_v57 = vmax.f32 %v6169_v4, %v6209_v27 }
 0x503   : > { %9740 = vmatmul.msk.bf16.gmra.mxu1 %vm3689_vm4, %v4602_v7  ;;  %5767 = vrot.lane.b32.xlu2 %v5610_v32, %s10491_s20  ;;  %v5734_v1 = vpop.permute.xlu2 %5733  ;;  %v4557_v32 = vmax.f32 %v4477_v52, 0.0 }
 0x504   : > { %v2242_v49 = vpop.permute.xlu1 %2241  ;;  %v2240_v28 = vpop.permute.xlu0 %2239 }
 0x505   : > { %v2563_v60 = vadd.f32 %v2242_v49, %v13615_v2  ;;  %v2562_v26 = vadd.f32 %v2240_v28, %v13530_v11  ;;  %v10479_v2 = vld [vmem:[%s15978_s2] ss:$0 sm:$0xff]  ;;  %v4556_v49 = vmax.f32 %v4476_v48, 0.0 }
 0x506   : > { %v4309_v48 = vld [vmem:[#allocation2 + $0x452] ss:$2 sm:$0xff] }
 0x507   : > { %v13987_v10 = vpop.f32.mrf.mxu1  ;;  %v6249_v36 = vld [vmem:[#allocation2 + $0xc2] ss:$2 sm:$0xff]  ;;  %v4603_v53 = vpack.c.bf16 %v4557_v32, %v4556_v49 }
 0x508   : > { %v5132_v8 = vrot.slane %v13987_v10, 1  ;;  %v6170_v16 = vld [vmem:[#allocation2 + $0xd0] ss:$2 sm:$0xff]  ;;  %v6210_v22 = vld [vmem:[#allocation2 + $0xd1] ss:$2 sm:$0xff]  ;;  %v6329_v6 = vmax.f32 %v6289_v57, %v6249_v36  ;;  %v5611_v7 = vrot.slane %v13987_v10, 2 }
 0x509   : > { %v6290_v40 = vmax.f32 %v6170_v16, %v6210_v22  ;;  %v6250_v23 = vld [vmem:[#allocation2 + $0xd2] ss:$2 sm:$0xff] }
 0x50a   : > { %5288 = vrot.lane.b32.xlu1 %v5131_v38, %s10492_s21  ;;  %5286 = vrot.lane.b32.xlu0 %v5129_v18, %s10492_s21  ;;  %v5133_v59 = vsel %vm1605_vm3, %v5130_v34, %v5132_v8  ;;  %v6369_v0 = vmax.f32 %v6329_v6, 0.0  ;;  %v5612_v38 = vsel %vm2565_vm2, %v5609_v51, %v5611_v7  ;;  %v3987_v36 = vld [vmem:[#allocation2 + $0x440] ss:$2 sm:$0xff] }
 0x50b   : > { %5290 = vrot.lane.b32.xlu2 %v5133_v59, %s10492_s21  ;;  %v6330_v15 = vmax.f32 %v6290_v40, %v6250_v23  ;;  %v14016_v22 = vpop.permute.xlu2 %5260  ;;  %v4147_v40 = vld [vmem:[#allocation2 + $0x441] ss:$2 sm:$0xff]  ;;  %v4307_v6 = vld [vmem:[#allocation2 + $0x442] ss:$2 sm:$0xff] }
 0x50c   : > { %v3202_v9 = vpop.permute.xlu1 %3201  ;;  %v3200_v33 = vpop.permute.xlu0 %3199 }
 0x50d   : > { %v3523_v63 = vadd.f32 %v3202_v9, %v2563_v60  ;;  %v3522_v43 = vadd.f32 %v3200_v33, %v2562_v26  ;;  %v6370_v37 = vmax.f32 %v6330_v15, 0.0  ;;  %v4399_v60 = vmax.f32 %v3989_v58, %v4149_v42 }
 0x50e   : > { %v4398_v26 = vmax.f32 %v3987_v36, %v4147_v40  ;;  %v5465_v58 = vadd.f32 %v13970_v24, %v13553_v17  ;;  %v4151_v36 = vld [vmem:[#allocation2 + $0x461] ss:$2 sm:$0xff]  ;;  %v4313_v40 = vld [vmem:[#allocation2 + $0x472] ss:$2 sm:$0xff]  ;;  %v4311_v24 = vld [vmem:[#allocation2 + $0x462] ss:$2 sm:$0xff] }
 0x50f   : > { %v3687_v34 = vadd.f32 %v10479_v2, %v3523_v63  ;;  %v3686_v25 = vadd.f32 %v10479_v2, %v3522_v43  ;;  %v6403_v28 = vpack.c.bf16 %v6370_v37, %v6369_v0 }
 0x510   : > { %v14004_v11 = vpop.f32.mrf.mxu1  ;;  %v4478_v33 = vmax.f32 %v4398_v26, %v4307_v6 }
 0x511   : > { %3848 = vst.msk [vmem:[#allocation2 + $0x4f0] sm:$0xff] %vm3689_vm4, %v3687_v34  ;;  %v5134_v4 = vrot.slane %v14004_v11, 1  ;;  %v5613_v27 = vrot.slane %v14004_v11, 2  ;;  %9762 = vmatmul.msk.bf16.gmra.mxu2 %vm3689_vm4, %v6403_v28 }
 0x512   : > { %3847 = vst.msk [vmem:[#allocation2 + $0x4e8] sm:$0xff] %vm3689_vm4, %v3686_v25  ;;  %5769 = vrot.lane.b32.xlu0 %v5612_v38, %s10491_s20  ;;  %v4558_v49 = vmax.f32 %v4478_v33, 0.0 }
 0x513   : > { %9741 = vmatmul.msk.bf16.gmra.mxu1 %vm3689_vm4, %v4603_v53  ;;  %v5614_v18 = vsel %vm2565_vm2, %v5611_v7, %v5613_v27  ;;  %v5135_v16 = vsel %vm1605_vm3, %v5132_v8, %v5134_v4  ;;  %v4479_v7 = vmax.f32 %v4399_v60, %v4309_v48  ;;  %v14032_v2 = vpop.permute.xlu2 %5266 }
 0x514   : > { %v5255_v57 = vpop.permute.xlu1 %5254  ;;  %5771 = vrot.lane.b32.xlu2 %v5614_v18, %s10491_s20  ;;  %5292 = vrot.lane.b32.xlu1 %v5135_v16, %s10492_s21  ;;  %v5253_v52 = vpop.permute.xlu0 %5252  ;;  %v3993_v18 = vld [vmem:[#allocation2 + $0x470] ss:$2 sm:$0xff]  ;;  %v4153_v16 = vld [vmem:[#allocation2 + $0x471] ss:$2 sm:$0xff] }
 0x515   : > { %v5464_v51 = vadd.f32 %v5255_v57, %v13518_v54  ;;  %v5463_v54 = vadd.f32 %v5253_v52, %v13494_v56  ;;  %v4559_v37 = vmax.f32 %v4479_v7, 0.0 }
 0x517   : > { %v5943_v59 = vadd.f32 %v5734_v1, %v5464_v51 }
 0x518   : > { %v14021_v23 = vpop.f32.mrf.mxu1 }
 0x519   : > { %v6027_v8 = vadd.f32 %v13934_v62, %v5943_v59  ;;  %v5136_v9 = vrot.slane %v14021_v23, 1  ;;  %v5615_v15 = vrot.slane %v14021_v23, 2  ;;  %v4401_v59 = vmax.f32 %v3993_v18, %v4153_v16 }
 0x51b   : > { %6107 = vst.msk [vmem:[#allocation2 + $0xf0] sm:$0xff] %vm3689_vm4, %v6027_v8  ;;  %v5616_v63 = vsel %vm2565_vm2, %v5613_v27, %v5615_v15  ;;  %v5137_v1 = vsel %vm1605_vm3, %v5134_v4, %v5136_v9  ;;  %v4604_v4 = vpack.c.bf16 %v4559_v37, %v4558_v49  ;;  %v5744_v6 = vpop.permute.xlu2 %5743 }
 0x51c   : > { %v5732_v32 = vpop.permute.xlu1 %5731  ;;  %5773 = vrot.lane.b32.xlu0 %v5616_v63, %s10491_s20  ;;  %5294 = vrot.lane.b32.xlu2 %v5137_v1, %s10492_s21  ;;  %v5259_v0 = vpop.permute.xlu0 %5258 }
 0x51d   : > { %v5942_v43 = vadd.f32 %v5732_v32, %v5463_v54  ;;  %v5466_v27 = vadd.f32 %v5259_v0, %v13571_v46  ;;  %v3991_v46 = vld [vmem:[#allocation2 + $0x460] ss:$2 sm:$0xff] }
 0x51f   : > { %v6026_v34 = vadd.f32 %v13934_v62, %v5942_v43 }
 0x520   : > { %v14035_v25 = vpop.f32.mrf.mxu1 }
 0x521   : > { %6106 = vst.msk [vmem:[#allocation2 + $0xe8] sm:$0xff] %vm3689_vm4, %v6026_v34  ;;  %v5138_v56 = vrot.slane %v14035_v25, 1  ;;  %v5617_v28 = vrot.slane %v14035_v25, 2 }
 0x523   : > { %9742 = vmatmul.msk.bf16.gmra.mxu1 %vm3689_vm4, %v4604_v4  ;;  %v5618_v38 = vsel %vm2565_vm2, %v5615_v15, %v5617_v28  ;;  %v5139_v53 = vsel %vm1605_vm3, %v5136_v9, %v5138_v56  ;;  %v4400_v9 = vmax.f32 %v3991_v46, %v4151_v36  ;;  %v4481_v15 = vmax.f32 %v4401_v59, %v4313_v40  ;;  %v5748_v16 = vpop.permute.xlu2 %5747 }
 0x524   : > { %v5738_v42 = vpop.permute.xlu1 %5737  ;;  %5775 = vrot.lane.b32.xlu1 %v5618_v38, %s10491_s20  ;;  %5296 = vrot.lane.b32.xlu0 %v5139_v53, %s10492_s21  ;;  %v5736_v51 = vpop.permute.xlu0 %5735  ;;  %v5467_v59 = vadd.f32 %v14016_v22, %v13602_v50 }
 0x525   : > { %v5945_v57 = vadd.f32 %v5738_v42, %v5466_v27  ;;  %v5944_v52 = vadd.f32 %v5736_v51, %v5465_v58  ;;  %v4480_v63 = vmax.f32 %v4400_v9, %v4311_v24  ;;  %v4561_v37 = vmax.f32 %v4481_v15, 0.0  ;;  %v3997_v51 = vld [vmem:[#allocation2 + $0x490] ss:$2 sm:$0xff]  ;;  %v3995_v24 = vld [vmem:[#allocation2 + $0x480] ss:$2 sm:$0xff] }
 0x526   : > { %v4155_v9 = vld [vmem:[#allocation2 + $0x481] ss:$2 sm:$0xff] }
 0x527   : > { %v6029_v60 = vadd.f32 %v13934_v62, %v5945_v57  ;;  %v6028_v48 = vadd.f32 %v13934_v62, %v5944_v52  ;;  %v4560_v4 = vmax.f32 %v4480_v63, 0.0  ;;  %v4157_v52 = vld [vmem:[#allocation2 + $0x491] ss:$2 sm:$0xff] }
 0x528   : > { %v14050_v17 = vpop.f32.mrf.mxu1  ;;  %v6171_v1 = vld [vmem:[#allocation2 + $0xe0] ss:$2 sm:$0xff]  ;;  %v6211_v33 = vld [vmem:[#allocation2 + $0xe1] ss:$2 sm:$0xff] }
 0x529   : > { %6109 = vst.msk [vmem:[#allocation2 + $0x100] sm:$0xff] %vm3689_vm4, %v6029_v60  ;;  %v5140_v26 = vrot.slane %v14050_v17, 1  ;;  %v5619_v8 = vrot.slane %v14050_v17, 2  ;;  %v6291_v34 = vmax.f32 %v6171_v1, %v6211_v33  ;;  %v4605_v58 = vpack.c.bf16 %v4561_v37, %v4560_v4 }
 0x52a   : > { %6108 = vst.msk [vmem:[#allocation2 + $0xf8] sm:$0xff] %vm3689_vm4, %v6028_v48  ;;  %v4402_v1 = vmax.f32 %v3995_v24, %v4155_v9 }
 0x52b   : > { %v5620_v7 = vsel %vm2565_vm2, %v5617_v28, %v5619_v8  ;;  %v5141_v54 = vsel %vm1605_vm3, %v5138_v56, %v5140_v26  ;;  %v6251_v28 = vld [vmem:[#allocation2 + $0xe2] ss:$2 sm:$0xff] }
 0x52c   : > { %v5265_v32 = vpop.permute.xlu1 %5264  ;;  %5777 = vrot.lane.b32.xlu2 %v5620_v7, %s10491_s20  ;;  %5298 = vrot.lane.b32.xlu1 %v5141_v54, %s10492_s21  ;;  %v5263_v0 = vpop.permute.xlu0 %5262  ;;  %v4403_v7 = vmax.f32 %v3997_v51, %v4157_v52 }
 0x52d   : > { %v5469_v43 = vadd.f32 %v5265_v32, %v13660_v19  ;;  %v6331_v19 = vmax.f32 %v6291_v34, %v6251_v28  ;;  %v5468_v46 = vadd.f32 %v5263_v0, %v13628_v14  ;;  %v4317_v32 = vld [vmem:[#allocation2 + $0x492] ss:$2 sm:$0xff]  ;;  %v4315_v34 = vld [vmem:[#allocation2 + $0x482] ss:$2 sm:$0xff] }
 0x52e   : > { %v4483_v37 = vmax.f32 %v4403_v7, %v4317_v32  ;;  %v4482_v28 = vmax.f32 %v4402_v1, %v4315_v34  ;;  %v3999_v1 = vld [vmem:[#allocation2 + $0x4a0] ss:$2 sm:$0xff] }
 0x52f   : > { %v5948_v49 = vadd.f32 %v5744_v6, %v5469_v43  ;;  %v6371_v63 = vmax.f32 %v6331_v19, 0.0  ;;  %v4319_v34 = vld [vmem:[#allocation2 + $0x4a2] ss:$2 sm:$0xff] }
 0x530   : > { %v14061_v27 = vpop.f32.mrf.mxu1  ;;  %v4563_v19 = vmax.f32 %v4483_v37, 0.0 }
 0x531   : > { %v6032_v56 = vadd.f32 %v13934_v62, %v5948_v49  ;;  %v5142_v38 = vrot.slane %v14061_v27, 1  ;;  %v5621_v53 = vrot.slane %v14061_v27, 2  ;;  %v6172_v42 = vld [vmem:[#allocation2 + $0xf0] ss:$2 sm:$0xff]  ;;  %v6212_v18 = vld [vmem:[#allocation2 + $0xf1] ss:$2 sm:$0xff] }
 0x532   : > { %v6292_v57 = vmax.f32 %v6172_v42, %v6212_v18  ;;  %v6252_v60 = vld [vmem:[#allocation2 + $0xf2] ss:$2 sm:$0xff] }
 0x533   : > { %6112 = vst.msk [vmem:[#allocation2 + $0x118] sm:$0xff] %vm3689_vm4, %v6032_v56  ;;  %9743 = vmatmul.msk.bf16.gmra.mxu1 %vm3689_vm4, %v4605_v58  ;;  %v5622_v36 = vsel %vm2565_vm2, %v5619_v8, %v5621_v53  ;;  %v5143_v40 = vsel %vm1605_vm3, %v5140_v26, %v5142_v38  ;;  %v5470_v56 = vadd.f32 %v14032_v2, %v13680_v3  ;;  %v5271_v58 = vpop.permute.xlu2 %5270 }
 0x534   : > { %v5742_v6 = vpop.permute.xlu1 %5741  ;;  %5779 = vrot.lane.b32.xlu1 %v5622_v36, %s10491_s20  ;;  %5300 = vrot.lane.b32.xlu0 %v5143_v40, %s10492_s21  ;;  %v6332_v48 = vmax.f32 %v6292_v57, %v6252_v60  ;;  %v5740_v14 = vpop.permute.xlu0 %5739 }
 0x535   : > { %v5947_v15 = vadd.f32 %v5742_v6, %v5468_v46  ;;  %v5946_v54 = vadd.f32 %v5740_v14, %v5467_v59  ;;  %v4562_v46 = vmax.f32 %v4482_v28, 0.0  ;;  %v4161_v6 = vld [vmem:[#allocation2 + $0x4b1] ss:$2 sm:$0xff] }
 0x536   : > { %v6372_v8 = vmax.f32 %v6332_v48, 0.0  ;;  %v5472_v48 = vadd.f32 %v5271_v58, %v13723_v61 }
 0x537   : > { %v6031_v26 = vadd.f32 %v13934_v62, %v5947_v15  ;;  %v6030_v33 = vadd.f32 %v13934_v62, %v5946_v54  ;;  %v4606_v40 = vpack.c.bf16 %v4563_v19, %v4562_v46 }
 0x538   : > { %v14077_v50 = vpop.f32.mrf.mxu1  ;;  %v6404_v22 = vpack.c.bf16 %v6372_v8, %v6371_v63 }
 0x539   : > { %6111 = vst.msk [vmem:[#allocation2 + $0x110] sm:$0xff] %vm3689_vm4, %v6031_v26  ;;  %v5144_v43 = vrot.slane %v14077_v50, 1  ;;  %v5623_v0 = vrot.slane %v14077_v50, 2 }
 0x53a   : > { %6110 = vst.msk [vmem:[#allocation2 + $0x108] sm:$0xff] %vm3689_vm4, %v6030_v33  ;;  %9763 = vmatmul.msk.bf16.gmra.mxu2 %vm3689_vm4, %v6404_v22  ;;  %v4159_v33 = vld [vmem:[#allocation2 + $0x4a1] ss:$2 sm:$0xff] }
 0x53b   : > { %v5624_v49 = vsel %vm2565_vm2, %v5621_v53, %v5623_v0  ;;  %v5145_v4 = vsel %vm1605_vm3, %v5142_v38, %v5144_v43  ;;  %v5754_v8 = vpop.permute.xlu2 %5753 }
 0x53c   : > { %v5269_v42 = vpop.permute.xlu1 %5268  ;;  %5781 = vrot.lane.b32.xlu2 %v5624_v49, %s10491_s20  ;;  %5302 = vrot.lane.b32.xlu1 %v5145_v4, %s10492_s21  ;;  %v5746_v57 = vpop.permute.xlu0 %5745 }
 0x53d   : > { %v5471_v18 = vadd.f32 %v5269_v42, %v13701_v45  ;;  %v5949_v51 = vadd.f32 %v5746_v57, %v5470_v56  ;;  %v4001_v45 = vld [vmem:[#allocation2 + $0x4b0] ss:$2 sm:$0xff]  ;;  %v4404_v56 = vmax.f32 %v3999_v1, %v4159_v33 }
 0x53e   : > { %v4405_v63 = vmax.f32 %v4001_v45, %v4161_v6  ;;  %v4325_v33 = vld [vmem:[#allocation2 + $0x4d2] ss:$2 sm:$0xff] }
 0x53f   : > { %v5950_v52 = vadd.f32 %v5748_v16, %v5471_v18  ;;  %v6033_v53 = vadd.f32 %v13934_v62, %v5949_v51  ;;  %v4484_v19 = vmax.f32 %v4404_v56, %v4319_v34 }
 0x540   : > { %v14092_v38 = vpop.f32.mrf.mxu1  ;;  %v6174_v7 = vld [vmem:[#allocation2 + $0x110] ss:$2 sm:$0xff]  ;;  %v6214_v54 = vld [vmem:[#allocation2 + $0x111] ss:$2 sm:$0xff] }
 0x541   : > { %v6034_v36 = vadd.f32 %v13934_v62, %v5950_v52  ;;  %v5146_v3 = vrot.slane %v14092_v38, 1  ;;  %v5625_v2 = vrot.slane %v14092_v38, 2  ;;  %v6173_v60 = vld [vmem:[#allocation2 + $0x100] ss:$2 sm:$0xff]  ;;  %v6213_v59 = vld [vmem:[#allocation2 + $0x101] ss:$2 sm:$0xff] }
 0x542   : > { %6113 = vst.msk [vmem:[#allocation2 + $0x120] sm:$0xff] %vm3689_vm4, %v6033_v53  ;;  %v6293_v15 = vmax.f32 %v6173_v60, %v6213_v59  ;;  %v6253_v22 = vld [vmem:[#allocation2 + $0x102] ss:$2 sm:$0xff]  ;;  %v4564_v60 = vmax.f32 %v4484_v19, 0.0 }
 0x543   : > { %6114 = vst.msk [vmem:[#allocation2 + $0x128] sm:$0xff] %vm3689_vm4, %v6034_v36  ;;  %9744 = vmatmul.msk.bf16.gmra.mxu1 %vm3689_vm4, %v4606_v40  ;;  %v5626_v16 = vsel %vm2565_vm2, %v5623_v0, %v5625_v2  ;;  %v5147_v9 = vsel %vm1605_vm3, %v5144_v43, %v5146_v3  ;;  %v6294_v0 = vmax.f32 %v6174_v7, %v6214_v54  ;;  %v4321_v43 = vld [vmem:[#allocation2 + $0x4b2] ss:$2 sm:$0xff]  ;;  %v14119_v59 = vpop.permute.xlu2 %5757  ;;  %v4163_v7 = vld [vmem:[#allocation2 + $0x4c1] ss:$2 sm:$0xff] }
 0x544   : > { %v14102_v24 = vpop.permute.xlu1 %6723  ;;  %5783 = vrot.lane.b32.xlu0 %v5626_v16, %s10491_s20  ;;  %5304 = vrot.lane.b32.xlu2 %v5147_v9, %s10492_s21  ;;  %v5750_v14 = vpop.permute.xlu0 %5749  ;;  %v6333_v37 = vmax.f32 %v6293_v15, %v6253_v22  ;;  %v4485_v58 = vmax.f32 %v4405_v63, %v4321_v43  ;;  %v4005_v9 = vld [vmem:[#allocation2 + $0x4d0] ss:$2 sm:$0xff]  ;;  %v4165_v54 = vld [vmem:[#allocation2 + $0x4d1] ss:$2 sm:$0xff] }
 0x545   : > { %v5951_v26 = vadd.f32 %v5750_v14, %v5472_v48  ;;  %v4003_v14 = vld [vmem:[#allocation2 + $0x4c0] ss:$2 sm:$0xff] }
 0x546   : > { %v6373_v52 = vmax.f32 %v6333_v37, 0.0  ;;  %v4565_v36 = vmax.f32 %v4485_v58, 0.0  ;;  %v4323_v58 = vld [vmem:[#allocation2 + $0x4c2] ss:$2 sm:$0xff] }
 0x547   : > { %v6035_v61 = vadd.f32 %v13934_v62, %v5951_v26 }
 0x548   : > { %v14108_v32 = vpop.f32.mrf.mxu1  ;;  %v4607_v6 = vpack.c.bf16 %v4565_v36, %v4564_v60 }
 0x549   : > { %v5148_v49 = vrot.slane %v14108_v32, 1  ;;  %v5627_v4 = vrot.slane %v14108_v32, 2  ;;  %v6254_v28 = vld [vmem:[#allocation2 + $0x112] ss:$2 sm:$0xff]  ;;  %6115 = vst.msk [vmem:[#allocation2 + $0x130] sm:$0xff] %vm3689_vm4, %v6035_v61  ;;  %v4406_v61 = vmax.f32 %v4003_v14, %v4163_v7 }
 0x54a   : > { %v6334_v42 = vmax.f32 %v6294_v0, %v6254_v28  ;;  %v4407_v0 = vmax.f32 %v4005_v9, %v4165_v54  ;;  %v6215_v36 = vld [vmem:[#allocation2 + $0x121] ss:$2 sm:$0xff]  ;;  %v4007_v7 = vld [vmem:[#allocation2 + $0x4e0] ss:$2 sm:$0xff] }
 0x54b   : > { %v5628_v18 = vsel %vm2565_vm2, %v5625_v2, %v5627_v4  ;;  %v5149_v57 = vsel %vm1605_vm3, %v5146_v3, %v5148_v49  ;;  %v5281_v56 = vpop.permute.xlu2 %5280  ;;  %v4167_v54 = vld [vmem:[#allocation2 + $0x4e1] ss:$2 sm:$0xff] }
 0x54c   : > { %v5752_v51 = vpop.permute.xlu1 %5751  ;;  %5785 = vrot.lane.b32.xlu1 %v5628_v18, %s10491_s20  ;;  %5306 = vrot.lane.b32.xlu0 %v5149_v57, %s10492_s21  ;;  %v6374_v46 = vmax.f32 %v6334_v42, 0.0  ;;  %v14117_v53 = vpop.permute.xlu0 %6721  ;;  %v4487_v28 = vmax.f32 %v4407_v0, %v4325_v33  ;;  %v4486_v42 = vmax.f32 %v4406_v61, %v4323_v58 }
 0x54e   : > { %v6405_v40 = vpack.c.bf16 %v6374_v46, %v6373_v52  ;;  %v4567_v19 = vmax.f32 %v4487_v28, 0.0  ;;  %v4566_v52 = vmax.f32 %v4486_v42, 0.0  ;;  %v6175_v46 = vld [vmem:[#allocation2 + $0x120] ss:$2 sm:$0xff] }
 0x54f   : > { %v6295_v14 = vmax.f32 %v6175_v46, %v6215_v36 }
 0x550   : > { %9764 = vmatmul.msk.bf16.gmra.mxu2 %vm3689_vm4, %v6405_v40  ;;  %v14122_v2 = vpop.f32.mrf.mxu1  ;;  %v6255_v9 = vld [vmem:[#allocation2 + $0x122] ss:$2 sm:$0xff] }
 0x551   : > { %v5150_v3 = vrot.slane %v14122_v2, 1  ;;  %v5629_v45 = vrot.slane %v14122_v2, 2 }
 0x553   : > { %9745 = vmatmul.msk.bf16.gmra.mxu1 %vm3689_vm4, %v4607_v6  ;;  %v5630_v16 = vsel %vm2565_vm2, %v5627_v4, %v5629_v45  ;;  %v5151_v48 = vsel %vm1605_vm3, %v5148_v49, %v5150_v3  ;;  %v5285_v61 = vpop.permute.xlu2 %5284 }
 0x554   : > { %v5275_v15 = vpop.permute.xlu1 %5274  ;;  %5787 = vrot.lane.b32.xlu0 %v5630_v16, %s10491_s20  ;;  %5308 = vrot.lane.b32.xlu2 %v5151_v48, %s10492_s21  ;;  %v5273_v26 = vpop.permute.xlu0 %5272  ;;  %v4608_v48 = vpack.c.bf16 %v4567_v19, %v4566_v52  ;;  %v4327_v19 = vld [vmem:[#allocation2 + $0x4e2] ss:$2 sm:$0xff] }
 0x555   : > { %v5474_v63 = vadd.f32 %v5275_v15, %v13773_v41  ;;  %v5473_v1 = vadd.f32 %v5273_v26, %v13748_v5 }
 0x557   : > { %v5953_v22 = vadd.f32 %v5754_v8, %v5474_v63  ;;  %v5952_v37 = vadd.f32 %v5752_v51, %v5473_v1 }
 0x558   : > { %v14133_v34 = vpop.f32.mrf.mxu1 }
 0x559   : > { %v6037_v43 = vadd.f32 %v13934_v62, %v5953_v22  ;;  %v5152_v49 = vrot.slane %v14133_v34, 1  ;;  %v5631_v4 = vrot.slane %v14133_v34, 2  ;;  %v6036_v41 = vadd.f32 %v13934_v62, %v5952_v37 }
 0x55a   : > { %v5477_v22 = vadd.f32 %v5281_v56, %v13856_v44  ;;  %v4329_v44 = vld [vmem:[#allocation2 + $0x4f2] ss:$2 sm:$0xff] }
 0x55b   : > { %6117 = vst.msk [vmem:[#allocation2 + $0x140] sm:$0xff] %vm3689_vm4, %v6037_v43  ;;  %v5632_v5 = vsel %vm2565_vm2, %v5629_v45, %v5631_v4  ;;  %v5153_v8 = vsel %vm1605_vm3, %v5150_v3, %v5152_v49  ;;  %v4009_v45 = vld [vmem:[#allocation2 + $0x4f0] ss:$2 sm:$0xff]  ;;  %v4169_v3 = vld [vmem:[#allocation2 + $0x4f1] ss:$2 sm:$0xff]  ;;  %v6335_v43 = vmax.f32 %v6295_v14, %v6255_v9 }
 0x55c   : > { %6116 = vst.msk [vmem:[#allocation2 + $0x138] sm:$0xff] %vm3689_vm4, %v6036_v41  ;;  %v5756_v18 = vpop.permute.xlu1 %5755  ;;  %5789 = vrot.lane.b32.xlu1 %v5632_v5, %s10491_s20  ;;  %5310 = vrot.lane.b32.xlu0 %v5153_v8, %s10492_s21  ;;  %v5277_v57 = vpop.permute.xlu0 %5276  ;;  %v4409_v33 = vmax.f32 %v4009_v45, %v4169_v3 }
 0x55d   : > { %v5475_v51 = vadd.f32 %v5277_v57, %v13803_v12  ;;  %v5768_v3 = vpop.permute.xlu2 %5767 }
 0x55f   : > { %v5954_v40 = vadd.f32 %v5756_v18, %v5475_v51  ;;  %v6375_v18 = vmax.f32 %v6335_v43, 0.0  ;;  %v4489_v51 = vmax.f32 %v4409_v33, %v4329_v44 }
 0x560   : > { %v14146_v60 = vpop.f32.mrf.mxu1 }
 0x561   : > { %v5154_v6 = vrot.slane %v14146_v60, 1  ;;  %v5633_v16 = vrot.slane %v14146_v60, 2  ;;  %v6038_v15 = vadd.f32 %v13934_v62, %v5954_v40  ;;  %v4569_v14 = vmax.f32 %v4489_v51, 0.0 }
 0x563   : > { %9746 = vmatmul.msk.bf16.gmra.mxu1 %vm3689_vm4, %v4608_v48  ;;  %v5634_v12 = vsel %vm2565_vm2, %v5631_v4, %v5633_v16  ;;  %v5155_v63 = vsel %vm1605_vm3, %v5152_v49, %v5154_v6  ;;  %v6176_v26 = vld [vmem:[#allocation2 + $0x130] ss:$2 sm:$0xff]  ;;  %v6216_v1 = vld [vmem:[#allocation2 + $0x131] ss:$2 sm:$0xff]  ;;  %6118 = vst.msk [vmem:[#allocation2 + $0x148] sm:$0xff] %vm3689_vm4, %v6038_v15  ;;  %v4408_v49 = vmax.f32 %v4007_v7, %v4167_v54 }
 0x564   : > { %v5279_v0 = vpop.permute.xlu1 %5278  ;;  %5791 = vrot.lane.b32.xlu2 %v5634_v12, %s10491_s20  ;;  %5312 = vrot.lane.b32.xlu1 %v5155_v63, %s10492_s21  ;;  %v6296_v37 = vmax.f32 %v6176_v26, %v6216_v1  ;;  %v5760_v4 = vpop.permute.xlu0 %5759  ;;  %v6256_v41 = vld [vmem:[#allocation2 + $0x132] ss:$2 sm:$0xff] }
 0x565   : > { %v5476_v28 = vadd.f32 %v5279_v0, %v13825_v31  ;;  %v5956_v58 = vadd.f32 %v5760_v4, %v5477_v22  ;;  %v4488_v36 = vmax.f32 %v4408_v49, %v4327_v19  ;;  %v5479_v22 = vadd.f32 %v5285_v61, %v13902_v20 }
 0x566   : > { %v6336_v5 = vmax.f32 %v6296_v37, %v6256_v41 }
 0x567   : > { %v5955_v8 = vadd.f32 %v14119_v59, %v5476_v28  ;;  %v6040_v56 = vadd.f32 %v13934_v62, %v5956_v58  ;;  %v4568_v15 = vmax.f32 %v4488_v36, 0.0  ;;  %v5291_v28 = vpop.permute.xlu2 %5290 }
 0x568   : > { %v14161_v42 = vpop.f32.mrf.mxu1  ;;  %v6376_v57 = vmax.f32 %v6336_v5, 0.0 }
 0x569   : > { %v6039_v52 = vadd.f32 %v13934_v62, %v5955_v8  ;;  %v5156_v31 = vrot.slane %v14161_v42, 1  ;;  %v5635_v46 = vrot.slane %v14161_v42, 2  ;;  %6120 = vst.msk [vmem:[#allocation2 + $0x158] sm:$0xff] %vm3689_vm4, %v6040_v56  ;;  %v4609_v63 = vpack.c.bf16 %v4569_v14, %v4568_v15 }
 0x56a   : > { %v6406_v40 = vpack.c.bf16 %v6376_v57, %v6375_v18  ;;  %v6177_v37 = vld [vmem:[#allocation2 + $0x140] ss:$2 sm:$0xff]  ;;  %v6217_v43 = vld [vmem:[#allocation2 + $0x141] ss:$2 sm:$0xff] }
 0x56b   : > { %6119 = vst.msk [vmem:[#allocation2 + $0x150] sm:$0xff] %vm3689_vm4, %v6039_v52  ;;  %v5636_v59 = vsel %vm2565_vm2, %v5633_v16, %v5635_v46  ;;  %v5157_v45 = vsel %vm1605_vm3, %v5154_v6, %v5156_v31  ;;  %v6297_v20 = vmax.f32 %v6177_v37, %v6217_v43 }
 0x56c   : > { %9765 = vmatmul.msk.bf16.gmra.mxu2 %vm3689_vm4, %v6406_v40  ;;  %v5762_v48 = vpop.permute.xlu1 %5761  ;;  %5793 = vrot.lane.b32.xlu0 %v5636_v59, %s10491_s20  ;;  %v5283_v9 = vpop.permute.xlu0 %5282 }
 0x56d   : > { %5314 = vrot.lane.b32.xlu2 %v5157_v45, %s10492_s21  ;;  %v5478_v7 = vadd.f32 %v5283_v9, %v13875_v30 }
 0x56f   : > { %v5957_v54 = vadd.f32 %v5762_v48, %v5478_v7  ;;  %v5772_v9 = vpop.permute.xlu2 %5771 }
 0x570   : > { %v14174_v12 = vpop.f32.mrf.mxu1 }
 0x571   : > { %v5158_v16 = vrot.slane %v14174_v12, 1  ;;  %v5637_v6 = vrot.slane %v14174_v12, 2  ;;  %v6041_v26 = vadd.f32 %v13934_v62, %v5957_v54 }
 0x572   : > { %v6178_v41 = vld [vmem:[#allocation2 + $0x150] ss:$2 sm:$0xff]  ;;  %v6218_v49 = vld [vmem:[#allocation2 + $0x151] ss:$2 sm:$0xff] }
 0x573   : > { %9747 = vmatmul.msk.bf16.gmra.mxu1 %vm3689_vm4, %v4609_v63  ;;  %v5638_v1 = vsel %vm2565_vm2, %v5635_v46, %v5637_v6  ;;  %v5159_v33 = vsel %vm1605_vm3, %v5156_v31, %v5158_v16  ;;  %6121 = vst.msk [vmem:[#allocation2 + $0x160] sm:$0xff] %vm3689_vm4, %v6041_v26  ;;  %v6257_v58 = vld [vmem:[#allocation2 + $0x142] ss:$2 sm:$0xff]  ;;  %v6298_v56 = vmax.f32 %v6178_v41, %v6218_v49 }
 0x574   : > { %v5766_v30 = vpop.permute.xlu1 %5765  ;;  %5316 = vrot.lane.b32.xlu1 %v5159_v33, %s10492_s21  ;;  %v5764_v0 = vpop.permute.xlu0 %5763  ;;  %v6337_v18 = vmax.f32 %v6297_v20, %v6257_v58  ;;  %v5482_v63 = vadd.f32 %v5291_v28, %v13973_v13 }
 0x575   : > { %5795 = vrot.lane.b32.xlu2 %v5638_v1, %s10491_s20  ;;  %v5958_v4 = vadd.f32 %v5764_v0, %v5479_v22 }
 0x576   : > { %v6377_v59 = vmax.f32 %v6337_v18, 0.0 }
 0x577   : > { %v6042_v5 = vadd.f32 %v13934_v62, %v5958_v4  ;;  %v5295_v28 = vpop.permute.xlu2 %5294 }
 0x578   : > { %v14187_v8 = vpop.f32.mrf.mxu1  ;;  %v5484_v20 = vadd.f32 %v5295_v28, %v14004_v11 }
 0x579   : > { %v5160_v61 = vrot.slane %v14187_v8, 1  ;;  %v5639_v44 = vrot.slane %v14187_v8, 2  ;;  %6122 = vst.msk [vmem:[#allocation2 + $0x168] sm:$0xff] %vm3689_vm4, %v6042_v5 }
 0x57a   : > { %v6258_v51 = vld [vmem:[#allocation2 + $0x152] ss:$2 sm:$0xff] }
 0x57b   : > { %v5640_v57 = vsel %vm2565_vm2, %v5637_v6, %v5639_v44  ;;  %v5161_v19 = vsel %vm1605_vm3, %v5158_v16, %v5160_v61  ;;  %v6338_v31 = vmax.f32 %v6298_v56, %v6258_v51 }
 0x57c   : > { %v5289_v52 = vpop.permute.xlu1 %5288  ;;  %5797 = vrot.lane.b32.xlu0 %v5640_v57, %s10491_s20  ;;  %v5287_v36 = vpop.permute.xlu0 %5286 }
 0x57d   : > { %v5481_v46 = vadd.f32 %v5289_v52, %v13954_v55  ;;  %5318 = vrot.lane.b32.xlu2 %v5161_v19, %s10492_s21  ;;  %v5480_v40 = vadd.f32 %v5287_v36, %v13923_v29  ;;  %v6378_v45 = vmax.f32 %v6338_v31, 0.0 }
 0x57f   : > { %v5960_v48 = vadd.f32 %v5768_v3, %v5481_v46  ;;  %v5959_v15 = vadd.f32 %v5766_v30, %v5480_v40  ;;  %v6407_v7 = vpack.c.bf16 %v6378_v45, %v6377_v59 }
 0x580   : > { %v14198_v14 = vpop.f32.mrf.mxu1  ;;  %v6179_v58 = vld [vmem:[#allocation2 + $0x160] ss:$2 sm:$0xff] }
 0x581   : > { %v6044_v54 = vadd.f32 %v13934_v62, %v5960_v48  ;;  %v5162_v16 = vrot.slane %v14198_v14, 1  ;;  %v5641_v6 = vrot.slane %v14198_v14, 2  ;;  %v6043_v55 = vadd.f32 %v13934_v62, %v5959_v15  ;;  %9766 = vmatmul.msk.bf16.gmra.mxu2 %vm3689_vm4, %v6407_v7 }
 0x583   : > { %6124 = vst.msk [vmem:[#allocation2 + $0x178] sm:$0xff] %vm3689_vm4, %v6044_v54  ;;  %v5642_v29 = vsel %vm2565_vm2, %v5639_v44, %v5641_v6  ;;  %v5163_v3 = vsel %vm1605_vm3, %v5160_v61, %v5162_v16 }
 0x584   : > { %6123 = vst.msk [vmem:[#allocation2 + $0x170] sm:$0xff] %vm3689_vm4, %v6043_v55  ;;  %5799 = vrot.lane.b32.xlu1 %v5642_v29, %s10491_s20  ;;  %5320 = vrot.lane.b32.xlu0 %v5163_v3, %s10492_s21  ;;  %v5770_v26 = vpop.permute.xlu0 %5769 }
 0x585   : > { %v5961_v1 = vadd.f32 %v5770_v26, %v5482_v63  ;;  %v14247_v26 = vld [vmem:[%s15980_s4] ss:$0 sm:$0xff] }
 0x586   : > { %v5293_v33 = vpop.permute.xlu1 %5292 }
 0x587   : > { %v5483_v22 = vadd.f32 %v5293_v33, %v13987_v10  ;;  %v6045_v30 = vadd.f32 %v13934_v62, %v5961_v1  ;;  %v6219_v10 = vld [vmem:[#allocation2 + $0x161] ss:$2 sm:$0xff]  ;;  %v14253_v33 = vpop.f32.mrf.mxu2 }
 0x588   : > { %v14214_v0 = vpop.f32.mrf.mxu1  ;;  %v6299_v18 = vmax.f32 %v6179_v58, %v6219_v10 }
 0x589   : > { %v5962_v37 = vadd.f32 %v5772_v9, %v5483_v22  ;;  %v5164_v43 = vrot.slane %v14214_v0, 1  ;;  %v5643_v13 = vrot.slane %v14214_v0, 2  ;;  %6125 = vst.msk [vmem:[#allocation2 + $0x180] sm:$0xff] %vm3689_vm4, %v6045_v30  ;;  %v5778_v30 = vpop.permute.xlu2 %5777 }
 0x58b   : > { %v6046_v4 = vadd.f32 %v13934_v62, %v5962_v37  ;;  %v5644_v41 = vsel %vm2565_vm2, %v5641_v6, %v5643_v13  ;;  %v5165_v49 = vsel %vm1605_vm3, %v5162_v16, %v5164_v43  ;;  %v6180_v5 = vld [vmem:[#allocation2 + $0x170] ss:$2 sm:$0xff]  ;;  %v6220_v61 = vld [vmem:[#allocation2 + $0x171] ss:$2 sm:$0xff] }
 0x58c   : > { %5801 = vrot.lane.b32.xlu2 %v5644_v41, %s10491_s20  ;;  %5322 = vrot.lane.b32.xlu1 %v5165_v49, %s10492_s21  ;;  %v6259_v44 = vld [vmem:[#allocation2 + $0x162] ss:$2 sm:$0xff]  ;;  %v6300_v51 = vmax.f32 %v6180_v5, %v6220_v61 }
 0x58d   : > { %6126 = vst.msk [vmem:[#allocation2 + $0x188] sm:$0xff] %vm3689_vm4, %v6046_v4  ;;  %v6339_v52 = vmax.f32 %v6299_v18, %v6259_v44 }
 0x58e   : > { %v5774_v56 = vpop.permute.xlu0 %5773 }
 0x58f   : > { %v5963_v57 = vadd.f32 %v5774_v56, %v5484_v20  ;;  %v6379_v48 = vmax.f32 %v6339_v52, 0.0  ;;  %v14266_v20 = vpop.f32.mrf.mxu2 }
 0x590   : > { %v14226_v19 = vpop.f32.mrf.mxu1  ;;  %v6260_v40 = vld [vmem:[#allocation2 + $0x172] ss:$2 sm:$0xff] }
 0x591   : > { %v6047_v31 = vadd.f32 %v13934_v62, %v5963_v57  ;;  %v5166_v46 = vrot.slane %v14226_v19, 1  ;;  %v5645_v36 = vrot.slane %v14226_v19, 2  ;;  %v6340_v59 = vmax.f32 %v6300_v51, %v6260_v40 }
 0x593   : > { %6127 = vst.msk [vmem:[#allocation2 + $0x190] sm:$0xff] %vm3689_vm4, %v6047_v31  ;;  %v5646_v11 = vsel %vm2565_vm2, %v5643_v13, %v5645_v36  ;;  %v5167_v45 = vsel %vm1605_vm3, %v5164_v43, %v5166_v46  ;;  %v6380_v9 = vmax.f32 %v6340_v59, 0.0 }
 0x594   : > { %5803 = vrot.lane.b32.xlu1 %v5646_v11, %s10491_s20  ;;  %5324 = vrot.lane.b32.xlu0 %v5167_v45, %s10492_s21  ;;  %v6221_v58 = vld [vmem:[#allocation2 + $0x181] ss:$2 sm:$0xff] }
 0x595   : > { %v6408_v62 = vpack.c.bf16 %v6380_v9, %v6379_v48 }
 0x596   : > { %v5776_v15 = vpop.permute.xlu1 %5775  ;;  %v5297_v7 = vpop.permute.xlu0 %5296 }
 0x597   : > { %v5485_v54 = vadd.f32 %v5297_v7, %v14021_v23  ;;  %9767 = vmatmul.msk.bf16.gmra.mxu2 %vm3689_vm4, %v6408_v62  ;;  %v5782_v56 = vpop.permute.xlu2 %5781 }
 0x598   : > { %v14238_v16 = vpop.f32.mrf.mxu1 }
 0x599   : > { %v5168_v6 = vrot.slane %v14238_v16, 1  ;;  %v5647_v55 = vrot.slane %v14238_v16, 2  ;;  %v5964_v29 = vadd.f32 %v5776_v15, %v5485_v54 }
 0x59a   : > { %v6261_v44 = vld [vmem:[#allocation2 + $0x182] ss:$2 sm:$0xff] }
 0x59b   : > { %v5648_v3 = vsel %vm2565_vm2, %v5645_v36, %v5647_v55  ;;  %v5169_v63 = vsel %vm1605_vm3, %v5166_v46, %v5168_v6  ;;  %v6048_v23 = vadd.f32 %v14247_v26, %v5964_v29 }
 0x59c   : > { %5805 = vrot.lane.b32.xlu2 %v5648_v3, %s10491_s20  ;;  %5326 = vrot.lane.b32.xlu1 %v5169_v63, %s10492_s21 }
 0x59d   : > { %6128 = vst.msk [vmem:[#allocation2 + $0x198] sm:$0xff] %vm3689_vm4, %v6048_v23 }
 0x59e   : > { %v5299_v1 = vpop.permute.xlu1 %5298 }
 0x59f   : > { %v5486_v22 = vadd.f32 %v5299_v1, %v14035_v25  ;;  %v6181_v25 = vld [vmem:[#allocation2 + $0x180] ss:$2 sm:$0xff]  ;;  %v5305_v1 = vpop.permute.xlu2 %5304 }
 0x5a0   : > { %v14256_v37 = vpop.f32.mrf.mxu1  ;;  %v6301_v52 = vmax.f32 %v6181_v25, %v6221_v58 }
 0x5a1   : > { %v5965_v43 = vadd.f32 %v5778_v30, %v5486_v22  ;;  %v5170_v13 = vrot.slane %v14256_v37, 1  ;;  %v5649_v28 = vrot.slane %v14256_v37, 2 }
 0x5a2   : > { %v6341_v40 = vmax.f32 %v6301_v52, %v6261_v44 }
 0x5a3   : > { %v6049_v4 = vadd.f32 %v14247_v26, %v5965_v43  ;;  %v5650_v41 = vsel %vm2565_vm2, %v5647_v55, %v5649_v28  ;;  %v5171_v49 = vsel %vm1605_vm3, %v5168_v6, %v5170_v13  ;;  %v14282_v55 = vpop.f32.mrf.mxu2  ;;  %v5489_v43 = vadd.f32 %v5305_v1, %v14077_v50 }
 0x5a4   : > { %5807 = vrot.lane.b32.xlu0 %v5650_v41, %s10491_s20  ;;  %5328 = vrot.lane.b32.xlu2 %v5171_v49, %s10492_s21  ;;  %v6182_v57 = vld [vmem:[#allocation2 + $0x190] ss:$2 sm:$0xff]  ;;  %v6222_v51 = vld [vmem:[#allocation2 + $0x191] ss:$2 sm:$0xff]  ;;  %v6381_v7 = vmax.f32 %v6341_v40, 0.0 }
 0x5a5   : > { %6129 = vst.msk [vmem:[#allocation2 + $0x1a0] sm:$0xff] %vm3689_vm4, %v6049_v4 }
 0x5a6   : > { %v5780_v10 = vpop.permute.xlu1 %5779  ;;  %v5301_v5 = vpop.permute.xlu0 %5300 }
 0x5a7   : > { %v5487_v61 = vadd.f32 %v5301_v5, %v14050_v17  ;;  %v6302_v17 = vmax.f32 %v6182_v57, %v6222_v51 }
 0x5a8   : > { %v14269_v18 = vpop.f32.mrf.mxu1 }
 0x5a9   : > { %v5966_v31 = vadd.f32 %v5780_v10, %v5487_v61  ;;  %v5172_v46 = vrot.slane %v14269_v18, 1  ;;  %v5651_v36 = vrot.slane %v14269_v18, 2 }
 0x5ab   : > { %v6050_v59 = vadd.f32 %v14247_v26, %v5966_v31  ;;  %v5652_v11 = vsel %vm2565_vm2, %v5649_v28, %v5651_v36  ;;  %v5173_v45 = vsel %vm1605_vm3, %v5170_v13, %v5172_v46  ;;  %v14296_v41 = vpop.f32.mrf.mxu2 }
 0x5ac   : > { %5809 = vrot.lane.b32.xlu1 %v5652_v11, %s10491_s20  ;;  %5330 = vrot.lane.b32.xlu0 %v5173_v45, %s10492_s21  ;;  %v6262_v48 = vld [vmem:[#allocation2 + $0x192] ss:$2 sm:$0xff] }
 0x5ad   : > { %6130 = vst.msk [vmem:[#allocation2 + $0x1a8] sm:$0xff] %vm3689_vm4, %v6050_v59  ;;  %v6342_v9 = vmax.f32 %v6302_v17, %v6262_v48 }
 0x5ae   : > { %v5303_v15 = vpop.permute.xlu1 %5302 }
 0x5af   : > { %v5488_v62 = vadd.f32 %v5303_v15, %v14061_v27  ;;  %v6382_v54 = vmax.f32 %v6342_v9, 0.0 }
 0x5b0   : > { %v14280_v6 = vpop.f32.mrf.mxu1 }
 0x5b1   : > { %v5967_v29 = vadd.f32 %v5782_v56, %v5488_v62  ;;  %v5174_v3 = vrot.slane %v14280_v6, 1  ;;  %v5653_v63 = vrot.slane %v14280_v6, 2  ;;  %v6409_v23 = vpack.c.bf16 %v6382_v54, %v6381_v7 }
 0x5b3   : > { %v6051_v22 = vadd.f32 %v14247_v26, %v5967_v29  ;;  %9768 = vmatmul.msk.bf16.gmra.mxu2 %vm3689_vm4, %v6409_v23  ;;  %v5654_v30 = vsel %vm2565_vm2, %v5651_v36, %v5653_v63  ;;  %v5175_v27 = vsel %vm1605_vm3, %v5172_v46, %v5174_v3  ;;  %v14311_v31 = vpop.f32.mrf.mxu2  ;;  %v5309_v46 = vpop.permute.xlu2 %5308 }
 0x5b4   : > { %5811 = vrot.lane.b32.xlu0 %v5654_v30, %s10491_s20  ;;  %5332 = vrot.lane.b32.xlu2 %v5175_v27, %s10492_s21  ;;  %v6183_v45 = vld [vmem:[#allocation2 + $0x1a0] ss:$2 sm:$0xff]  ;;  %v6223_v17 = vld [vmem:[#allocation2 + $0x1a1] ss:$2 sm:$0xff] }
 0x5b5   : > { %6131 = vst.msk [vmem:[#allocation2 + $0x1b0] sm:$0xff] %vm3689_vm4, %v6051_v22 }
 0x5b6   : > { %v5784_v13 = vpop.permute.xlu0 %5783 }
 0x5b7   : > { %v5968_v28 = vadd.f32 %v5784_v13, %v5489_v43 }
 0x5b8   : > { %v14294_v4 = vpop.f32.mrf.mxu1 }
 0x5b9   : > { %v6052_v49 = vadd.f32 %v14247_v26, %v5968_v28  ;;  %v5176_v25 = vrot.slane %v14294_v4, 1  ;;  %v5655_v58 = vrot.slane %v14294_v4, 2 }
 0x5bb   : > { %6132 = vst.msk [vmem:[#allocation2 + $0x1b8] sm:$0xff] %vm3689_vm4, %v6052_v49  ;;  %v5656_v10 = vsel %vm2565_vm2, %v5653_v63, %v5655_v58  ;;  %v5177_v50 = vsel %vm1605_vm3, %v5174_v3, %v5176_v25  ;;  %v6303_v63 = vmax.f32 %v6183_v45, %v6223_v17  ;;  %v14325_v23 = vpop.f32.mrf.mxu2 }
 0x5bc   : > { %5813 = vrot.lane.b32.xlu1 %v5656_v10, %s10491_s20  ;;  %5334 = vrot.lane.b32.xlu0 %v5177_v50, %s10492_s21  ;;  %v6263_v15 = vld [vmem:[#allocation2 + $0x1a2] ss:$2 sm:$0xff] }
 0x5bd   : > { %v6343_v27 = vmax.f32 %v6303_v63, %v6263_v15 }
 0x5be   : > { %v5307_v5 = vpop.permute.xlu0 %5306  ;;  %v5786_v56 = vpop.permute.xlu1 %5785 }
 0x5bf   : > { %v5490_v61 = vadd.f32 %v5307_v5, %v14092_v38  ;;  %v5491_v38 = vadd.f32 %v5309_v46, %v14108_v32  ;;  %v5792_v22 = vpop.permute.xlu2 %5791  ;;  %v6383_v10 = vmax.f32 %v6343_v27, 0.0 }
 0x5c0   : > { %v14307_v44 = vpop.f32.mrf.mxu1 }
 0x5c1   : > { %v5178_v57 = vrot.slane %v14307_v44, 1  ;;  %v5657_v51 = vrot.slane %v14307_v44, 2  ;;  %v5969_v52 = vadd.f32 %v5786_v56, %v5490_v61 }
 0x5c2   : > { %v6184_v54 = vld [vmem:[#allocation2 + $0x1b0] ss:$2 sm:$0xff]  ;;  %v6224_v29 = vld [vmem:[#allocation2 + $0x1b1] ss:$2 sm:$0xff] }
 0x5c3   : > { %v5658_v36 = vsel %vm2565_vm2, %v5655_v58, %v5657_v51  ;;  %v5179_v40 = vsel %vm1605_vm3, %v5176_v25, %v5178_v57  ;;  %v6053_v59 = vadd.f32 %v14247_v26, %v5969_v52  ;;  %v6304_v30 = vmax.f32 %v6184_v54, %v6224_v29 }
 0x5c4   : > { %5815 = vrot.lane.b32.xlu2 %v5658_v36, %s10491_s20  ;;  %5336 = vrot.lane.b32.xlu1 %v5179_v40, %s10492_s21 }
 0x5c5   : > { %6133 = vst.msk [vmem:[#allocation2 + $0x1c0] sm:$0xff] %vm3689_vm4, %v6053_v59 }
 0x5c6   : > { %v5788_v11 = vpop.permute.xlu0 %5787 }
 0x5c7   : > { %v5970_v48 = vadd.f32 %v5788_v11, %v5491_v38  ;;  %v5315_v36 = vpop.permute.xlu2 %5314 }
 0x5c8   : > { %v14320_v9 = vpop.f32.mrf.mxu1 }
 0x5c9   : > { %v5180_v62 = vrot.slane %v14320_v9, 1  ;;  %v5659_v7 = vrot.slane %v14320_v9, 2  ;;  %v6054_v3 = vadd.f32 %v14247_v26, %v5970_v48 }
 0x5cb   : > { %v5660_v32 = vsel %vm2565_vm2, %v5657_v51, %v5659_v7  ;;  %v5181_v1 = vsel %vm1605_vm3, %v5178_v57, %v5180_v62  ;;  %6134 = vst.msk [vmem:[#allocation2 + $0x1c8] sm:$0xff] %vm3689_vm4, %v6054_v3 }
 0x5cc   : > { %5817 = vrot.lane.b32.xlu0 %v5660_v32, %s10491_s20  ;;  %5338 = vrot.lane.b32.xlu2 %v5181_v1, %s10492_s21  ;;  %v6264_v43 = vld [vmem:[#allocation2 + $0x1b2] ss:$2 sm:$0xff] }
 0x5cd   : > { %v6344_v28 = vmax.f32 %v6304_v30, %v6264_v43 }
 0x5ce   : > { %v5790_v13 = vpop.permute.xlu1 %5789  ;;  %v5311_v49 = vpop.permute.xlu0 %5310 }
 0x5cf   : > { %v5492_v25 = vadd.f32 %v5311_v49, %v14122_v2  ;;  %v6384_v50 = vmax.f32 %v6344_v28, 0.0  ;;  %v14342_v2 = vpop.f32.mrf.mxu2  ;;  %v5796_v3 = vpop.permute.xlu2 %5795 }
 0x5d0   : > { %v14333_v58 = vpop.f32.mrf.mxu1 }
 0x5d1   : > { %v5182_v5 = vrot.slane %v14333_v58, 1  ;;  %v5661_v61 = vrot.slane %v14333_v58, 2  ;;  %v5971_v56 = vadd.f32 %v5790_v13, %v5492_v25  ;;  %v6410_v57 = vpack.c.bf16 %v6384_v50, %v6383_v10 }
 0x5d2   : > { %v6185_v27 = vld [vmem:[#allocation2 + $0x1c0] ss:$2 sm:$0xff]  ;;  %v6225_v43 = vld [vmem:[#allocation2 + $0x1c1] ss:$2 sm:$0xff] }
 0x5d3   : > { %v5662_v51 = vsel %vm2565_vm2, %v5659_v7, %v5661_v61  ;;  %v5183_v52 = vsel %vm1605_vm3, %v5180_v62, %v5182_v5  ;;  %v6055_v46 = vadd.f32 %v14247_v26, %v5971_v56  ;;  %9769 = vmatmul.msk.bf16.gmra.mxu2 %vm3689_vm4, %v6410_v57  ;;  %v5494_v7 = vadd.f32 %v5315_v36, %v14146_v60 }
 0x5d4   : > { %5819 = vrot.lane.b32.xlu2 %v5662_v51, %s10491_s20  ;;  %5340 = vrot.lane.b32.xlu1 %v5183_v52, %s10492_s21  ;;  %v6305_v10 = vmax.f32 %v6185_v27, %v6225_v43 }
 0x5d5   : > { %6135 = vst.msk [vmem:[#allocation2 + $0x1d0] sm:$0xff] %vm3689_vm4, %v6055_v46 }
 0x5d6   : > { %v5313_v40 = vpop.permute.xlu1 %5312 }
 0x5d7   : > { %v5493_v59 = vadd.f32 %v5313_v40, %v14133_v34  ;;  %v14358_v34 = vpop.f32.mrf.mxu2  ;;  %v5319_v36 = vpop.permute.xlu2 %5318 }
 0x5d8   : > { %v14347_v38 = vpop.f32.mrf.mxu1 }
 0x5d9   : > { %v5972_v11 = vadd.f32 %v5792_v22, %v5493_v59  ;;  %v5184_v45 = vrot.slane %v14347_v38, 1  ;;  %v5663_v17 = vrot.slane %v14347_v38, 2 }
 0x5db   : > { %v6056_v48 = vadd.f32 %v14247_v26, %v5972_v11  ;;  %v5664_v15 = vsel %vm2565_vm2, %v5661_v61, %v5663_v17  ;;  %v5185_v62 = vsel %vm1605_vm3, %v5182_v5, %v5184_v45 }
 0x5dc   : > { %5821 = vrot.lane.b32.xlu0 %v5664_v15, %s10491_s20  ;;  %5342 = vrot.lane.b32.xlu2 %v5185_v62, %s10492_s21  ;;  %v6265_v13 = vld [vmem:[#allocation2 + $0x1c2] ss:$2 sm:$0xff] }
 0x5dd   : > { %6136 = vst.msk [vmem:[#allocation2 + $0x1d8] sm:$0xff] %vm3689_vm4, %v6056_v48  ;;  %v6345_v56 = vmax.f32 %v6305_v10, %v6265_v13 }
 0x5de   : > { %v5794_v54 = vpop.permute.xlu0 %5793 }
 0x5df   : > { %v5973_v29 = vadd.f32 %v5794_v54, %v5494_v7  ;;  %v14371_v5 = vpop.f32.mrf.mxu2  ;;  %v6385_v48 = vmax.f32 %v6345_v56, 0.0  ;;  %v6649_v56 = vrot.slane %v14266_v20, 1 }
 0x5e0   : > { %v14360_v63 = vpop.f32.mrf.mxu1 }
 0x5e1   : > { %v6057_v32 = vadd.f32 %v14247_v26, %v5973_v29  ;;  %v5186_v1 = vrot.slane %v14360_v63, 1  ;;  %v5665_v22 = vrot.slane %v14360_v63, 2 }
 0x5e3   : > { %6137 = vst.msk [vmem:[#allocation2 + $0x1e0] sm:$0xff] %vm3689_vm4, %v6057_v32  ;;  %v5666_v30 = vsel %vm2565_vm2, %v5663_v17, %v5665_v22  ;;  %v5187_v60 = vsel %vm1605_vm3, %v5184_v45, %v5186_v1  ;;  %v5496_v17 = vadd.f32 %v5319_v36, %v14174_v12 }
 0x5e4   : > { %5823 = vrot.lane.b32.xlu1 %v5666_v30, %s10491_s20  ;;  %5344 = vrot.lane.b32.xlu0 %v5187_v60, %s10492_s21  ;;  %v6186_v49 = vld [vmem:[#allocation2 + $0x1d0] ss:$2 sm:$0xff]  ;;  %v6226_v25 = vld [vmem:[#allocation2 + $0x1d1] ss:$2 sm:$0xff] }
 0x5e5   : > { %v6306_v46 = vmax.f32 %v6186_v49, %v6226_v25 }
 0x5e6   : > { %v5317_v28 = vpop.permute.xlu1 %5316 }
 0x5e7   : > { %v5495_v50 = vadd.f32 %v5317_v28, %v14161_v42  ;;  %v14384_v29 = vpop.f32.mrf.mxu2 }
 0x5e8   : > { %v14373_v61 = vpop.f32.mrf.mxu1 }
 0x5e9   : > { %v5974_v57 = vadd.f32 %v5796_v3, %v5495_v50  ;;  %v5188_v51 = vrot.slane %v14373_v61, 1  ;;  %v5667_v52 = vrot.slane %v14373_v61, 2 }
 0x5ea   : > { %v6266_v40 = vld [vmem:[#allocation2 + $0x1d2] ss:$2 sm:$0xff] }
 0x5eb   : > { %v6058_v59 = vadd.f32 %v14247_v26, %v5974_v57  ;;  %v5668_v11 = vsel %vm2565_vm2, %v5665_v22, %v5667_v52  ;;  %v5189_v45 = vsel %vm1605_vm3, %v5186_v1, %v5188_v51  ;;  %v6346_v42 = vmax.f32 %v6306_v46, %v6266_v40  ;;  %v5802_v46 = vpop.permute.xlu2 %5801 }
 0x5ec   : > { %5825 = vrot.lane.b32.xlu2 %v5668_v11, %s10491_s20  ;;  %5346 = vrot.lane.b32.xlu1 %v5189_v45, %s10492_s21 }
 0x5ed   : > { %6138 = vst.msk [vmem:[#allocation2 + $0x1e8] sm:$0xff] %vm3689_vm4, %v6058_v59  ;;  %v6386_v15 = vmax.f32 %v6346_v42, 0.0 }
 0x5ee   : > { %v5798_v62 = vpop.permute.xlu0 %5797 }
 0x5ef   : > { %v5975_v7 = vadd.f32 %v5798_v62, %v5496_v17  ;;  %v6411_v54 = vpack.c.bf16 %v6386_v15, %v6385_v48  ;;  %v14399_v28 = vpop.f32.mrf.mxu2  ;;  %v6882_v62 = vrot.slane %v13796_v35, 2 }
 0x5f0   : > { %v14386_v3 = vpop.f32.mrf.mxu1 }
 0x5f1   : > { %v6059_v32 = vadd.f32 %v14247_v26, %v5975_v7  ;;  %v5190_v1 = vrot.slane %v14386_v3, 1  ;;  %9770 = vmatmul.msk.bf16.gmra.mxu2 %vm3689_vm4, %v6411_v54  ;;  %v5669_v30 = vrot.slane %v14386_v3, 2  ;;  %v6651_v7 = vrot.slane %v14282_v55, 1 }
 0x5f3   : > { %6139 = vst.msk [vmem:[#allocation2 + $0x1f0] sm:$0xff] %vm3689_vm4, %v6059_v32  ;;  %v5191_v12 = vsel %vm1605_vm3, %v5188_v51, %v5190_v1  ;;  %v5670_v25 = vsel %vm2565_vm2, %v5667_v52, %v5669_v30  ;;  %v6647_v52 = vrot.slane %v14253_v33, 1 }
 0x5f4   : > { %5348 = vrot.lane.b32.xlu0 %v5191_v12, %s10492_s21  ;;  %v6187_v48 = vld [vmem:[#allocation2 + $0x1e0] ss:$2 sm:$0xff]  ;;  %v6227_v15 = vld [vmem:[#allocation2 + $0x1e1] ss:$2 sm:$0xff] }
 0x5f5   : > { %v6650_v11 = vsel %vm1605_vm3, %v6647_v52, %v6649_v56 }
 0x5f6   : > { %v5800_v22 = vpop.permute.xlu1 %5799  ;;  %v5321_v60 = vpop.permute.xlu0 %5320 }
 0x5f7   : > { %v5497_v27 = vadd.f32 %v5321_v60, %v14187_v8  ;;  %v14412_v40 = vpop.f32.mrf.mxu2  ;;  %v5806_v32 = vpop.permute.xlu2 %5805  ;;  %v6307_v60 = vmax.f32 %v6187_v48, %v6227_v15 }
 0x5f8   : > { %v14396_v43 = vpop.f32.mrf.mxu1 }
 0x5f9   : > { %v5192_v13 = vrot.slane %v14396_v43, 1  ;;  %v5976_v49 = vadd.f32 %v5800_v22, %v5497_v27  ;;  %v5671_v57 = vrot.slane %v14396_v43, 2  ;;  %v6648_v27 = vsel %vm1605_vm3, %v6645_v21, %v6647_v52 }
 0x5fa   : > { %v6267_v22 = vld [vmem:[#allocation2 + $0x1e2] ss:$2 sm:$0xff] }
 0x5fb   : > { %5352 = vrot.lane.b32.xlu2 %v5192_v13, %s10492_s21  ;;  %v5193_v10 = vsel %vm1605_vm3, %v5190_v1, %v5192_v13  ;;  %v6060_v50 = vadd.f32 %v14247_v26, %v5976_v49  ;;  %v5672_v45 = vsel %vm2565_vm2, %v5669_v30, %v5671_v57 }
 0x5fc   : > { %5827 = vrot.lane.b32.xlu0 %v5670_v25, %s10491_s20  ;;  %5350 = vrot.lane.b32.xlu1 %v5193_v10, %s10492_s21  ;;  %v6652_v25 = vsel %vm1605_vm3, %v6649_v56, %v6651_v7 }
 0x5fd   : > { %6140 = vst.msk [vmem:[#allocation2 + $0x1f8] sm:$0xff] %vm3689_vm4, %v6060_v50 }
 0x5fe   : > { %v5323_v8 = vpop.permute.xlu1 %5322 }
 0x5ff   : > { %v5498_v51 = vadd.f32 %v5323_v8, %v14198_v14  ;;  %v6884_v14 = vrot.slane %v13820_v39, 2  ;;  %v14432_v50 = vpop.f32.mrf.mxu2 }
 0x601   : > { %v5977_v36 = vadd.f32 %v5802_v46, %v5498_v51  ;;  %v6885_v13 = vsel %vm2565_vm2, %v6882_v62, %v6884_v14  ;;  %v6890_v46 = vrot.slane %v14282_v55, 2 }
 0x603   : > { %v6061_v59 = vadd.f32 %v14247_v26, %v5977_v36  ;;  %5831 = vrot.lane.b32.xlu2 %v5671_v57, %s10491_s20  ;;  %v6886_v57 = vrot.slane %v14253_v33, 2 }
 0x604   : > { %6727 = vrot.lane.b32.xlu0 %v6650_v11, %s10492_s21  ;;  %5829 = vrot.lane.b32.xlu1 %v5672_v45, %s10491_s20  ;;  %v6188_v1 = vld [vmem:[#allocation2 + $0x1f0] ss:$2 sm:$0xff]  ;;  %v6228_v12 = vld [vmem:[#allocation2 + $0x1f1] ss:$2 sm:$0xff]  ;;  %v6888_v11 = vrot.slane %v14266_v20, 2 }
 0x605   : > { %6141 = vst.msk [vmem:[#allocation2 + $0x200] sm:$0xff] %vm3689_vm4, %v6061_v59  ;;  %v6308_v10 = vmax.f32 %v6188_v1, %v6228_v12  ;;  %v6881_v59 = vrot.slane %v13767_v47, 2  ;;  %v6653_v12 = vrot.slane %v14296_v41, 1 }
 0x606   : > { %v5804_v42 = vpop.permute.xlu1 %5803  ;;  %v5325_v17 = vpop.permute.xlu0 %5324 }
 0x607   : > { %v5499_v54 = vadd.f32 %v5325_v17, %v14214_v0  ;;  %v6347_v0 = vmax.f32 %v6307_v60, %v6267_v22  ;;  %v5329_v17 = vpop.permute.xlu2 %5328  ;;  %v6883_v48 = vsel %vm2565_vm2, %v6881_v59, %v6882_v62  ;;  %v14450_v1 = vpop.f32.mrf.mxu2  ;;  %v6657_v22 = vrot.slane %v14325_v23, 1 }
 0x608   : > { %v5501_v62 = vadd.f32 %v5329_v17, %v14238_v16  ;;  %v6655_v60 = vrot.slane %v14311_v31, 1 }
 0x609   : > { %v5978_v30 = vadd.f32 %v5804_v42, %v5499_v54  ;;  %v6387_v56 = vmax.f32 %v6347_v0, 0.0  ;;  %v6887_v54 = vsel %vm2565_vm2, %v6884_v14, %v6886_v57 }
 0x60a   : > { %v6658_v16 = vsel %vm1605_vm3, %v6655_v60, %v6657_v22 }
 0x60b   : > { %v6062_v49 = vadd.f32 %v14247_v26, %v5978_v30  ;;  %6725 = vrot.lane.b32.xlu2 %v6648_v27, %s10492_s21  ;;  %v6889_v27 = vsel %vm2565_vm2, %v6886_v57, %v6888_v11  ;;  %v6892_v57 = vrot.slane %v14296_v41, 2 }
 0x60c   : > { %6962 = vrot.lane.b32.xlu0 %v6885_v13, %s10491_s20  ;;  %6729 = vrot.lane.b32.xlu1 %v6652_v25, %s10492_s21  ;;  %v6268_v8 = vld [vmem:[#allocation2 + $0x1f2] ss:$2 sm:$0xff]  ;;  %v6654_v13 = vsel %vm1605_vm3, %v6651_v7, %v6653_v12  ;;  %v6894_v25 = vrot.slane %v14311_v31, 2  ;;  %v6656_v7 = vsel %vm1605_vm3, %v6653_v12, %v6655_v60 }
 0x60d   : > { %6142 = vst.msk [vmem:[#allocation2 + $0x208] sm:$0xff] %vm3689_vm4, %v6062_v49  ;;  %v6348_v21 = vmax.f32 %v6308_v10, %v6268_v8  ;;  %v6659_v10 = vrot.slane %v14342_v2, 1 }
 0x60e   : > { %v5327_v51 = vpop.permute.xlu1 %5326 }
 0x60f   : > { %v5500_v52 = vadd.f32 %v5327_v51, %v14226_v19  ;;  %v6388_v36 = vmax.f32 %v6348_v21, 0.0  ;;  %v6891_v19 = vsel %vm2565_vm2, %v6888_v11, %v6890_v46  ;;  %v14467_v49 = vpop.f32.mrf.mxu2  ;;  %v5333_v0 = vpop.permute.xlu2 %5332 }
 0x611   : > { %v5979_v45 = vadd.f32 %v5806_v32, %v5500_v52  ;;  %v6412_v42 = vpack.c.bf16 %v6388_v36, %v6387_v56  ;;  %v6895_v56 = vsel %vm2565_vm2, %v6892_v57, %v6894_v25  ;;  %v6660_v36 = vsel %vm1605_vm3, %v6657_v22, %v6659_v10 }
 0x613   : > { %v6063_v15 = vadd.f32 %v14247_v26, %v5979_v45  ;;  %6960 = vrot.lane.b32.xlu2 %v6883_v48, %s10491_s20  ;;  %9771 = vmatmul.msk.bf16.gmra.mxu2 %vm3689_vm4, %v6412_v42  ;;  %v6896_v45 = vrot.slane %v14325_v23, 2  ;;  %v6661_v42 = vrot.slane %v14358_v34, 1 }
 0x614   : > { %6968 = vrot.lane.b32.xlu0 %v6891_v19, %s10491_s20  ;;  %6964 = vrot.lane.b32.xlu1 %v6887_v54, %s10491_s20  ;;  %v6229_v19 = vld [vmem:[#allocation2 + $0x201] ss:$2 sm:$0xff] }
 0x615   : > { %6143 = vst.msk [vmem:[#allocation2 + $0x210] sm:$0xff] %vm3689_vm4, %v6063_v15  ;;  %v6189_v15 = vld [vmem:[#allocation2 + $0x200] ss:$2 sm:$0xff]  ;;  %v6662_v60 = vsel %vm1605_vm3, %v6659_v10, %v6661_v42  ;;  %v6663_v10 = vrot.slane %v14371_v5, 1 }
 0x616   : > { %v5808_v32 = vpop.permute.xlu0 %5807 }
 0x617   : > { %v5980_v30 = vadd.f32 %v5808_v32, %v5501_v62  ;;  %v14480_v11 = vpop.f32.mrf.mxu2 }
 0x619   : > { %v6064_v14 = vadd.f32 %v14247_v26, %v5980_v30  ;;  %v6309_v30 = vmax.f32 %v6189_v15, %v6229_v19 }
 0x61b   : > { %6144 = vst.msk [vmem:[#allocation2 + $0x218] sm:$0xff] %vm3689_vm4, %v6064_v14  ;;  %6966 = vrot.lane.b32.xlu2 %v6889_v27, %s10491_s20  ;;  %v6897_v14 = vsel %vm2565_vm2, %v6894_v25, %v6896_v45 }
 0x61c   : > { %6735 = vrot.lane.b32.xlu0 %v6658_v16, %s10492_s21  ;;  %6731 = vrot.lane.b32.xlu1 %v6654_v13, %s10492_s21  ;;  %v6269_v12 = vld [vmem:[#allocation2 + $0x202] ss:$2 sm:$0xff] }
 0x61d   : > { %v6349_v16 = vmax.f32 %v6309_v30, %v6269_v12  ;;  %v6902_v12 = vrot.slane %v14371_v5, 2 }
 0x61e   : > { %v5331_v8 = vpop.permute.xlu0 %5330  ;;  %v5810_v51 = vpop.permute.xlu1 %5809 }
 0x61f   : > { %v5502_v21 = vadd.f32 %v5331_v8, %v14256_v37  ;;  %v5503_v37 = vadd.f32 %v5333_v0, %v14269_v18  ;;  %v5816_v17 = vpop.permute.xlu2 %5815  ;;  %v6893_v18 = vsel %vm2565_vm2, %v6890_v46, %v6892_v57  ;;  %v6898_v0 = vrot.slane %v14342_v2, 2 }
 0x621   : > { %v5981_v52 = vadd.f32 %v5810_v51, %v5502_v21  ;;  %v6667_v21 = vrot.slane %v14399_v28, 1  ;;  %v6389_v51 = vmax.f32 %v6349_v16, 0.0  ;;  %v6671_v16 = vrot.slane %v14432_v50, 1 }
 0x622   : > { %v6190_v62 = vld [vmem:[#allocation2 + $0x210] ss:$2 sm:$0xff]  ;;  %v6230_v32 = vld [vmem:[#allocation2 + $0x211] ss:$2 sm:$0xff] }
 0x623   : > { %6733 = vrot.lane.b32.xlu2 %v6656_v7, %s10492_s21  ;;  %v6065_v59 = vadd.f32 %v14247_v26, %v5981_v52  ;;  %v6310_v27 = vmax.f32 %v6190_v62, %v6230_v32  ;;  %v6665_v7 = vrot.slane %v14384_v29, 1  ;;  %v6900_v32 = vrot.slane %v14358_v34, 2 }
 0x624   : > { %6972 = vrot.lane.b32.xlu0 %v6895_v56, %s10491_s20  ;;  %6737 = vrot.lane.b32.xlu1 %v6660_v36, %s10492_s21  ;;  %v14501_v56 = vpop.f32.mrf.mxu2 }
 0x625   : > { %6145 = vst.msk [vmem:[#allocation2 + $0x220] sm:$0xff] %vm3689_vm4, %v6065_v59  ;;  %v6668_v15 = vsel %vm1605_vm3, %v6665_v7, %v6667_v21  ;;  %v6666_v30 = vsel %vm1605_vm3, %v6663_v10, %v6665_v7 }
 0x626   : > { %v5812_v48 = vpop.permute.xlu0 %5811 }
 0x627   : > { %v5982_v54 = vadd.f32 %v5812_v48, %v5503_v37  ;;  %v5339_v36 = vpop.permute.xlu2 %5338  ;;  %v6899_v37 = vsel %vm2565_vm2, %v6896_v45, %v6898_v0 }
 0x629   : > { %v6066_v22 = vadd.f32 %v14247_v26, %v5982_v54  ;;  %v6904_v54 = vrot.slane %v14384_v29, 2 }
 0x62b   : > { %6970 = vrot.lane.b32.xlu2 %v6893_v18, %s10491_s20  ;;  %6146 = vst.msk [vmem:[#allocation2 + $0x228] sm:$0xff] %vm3689_vm4, %v6066_v22 }
 0x62c   : > { %6739 = vrot.lane.b32.xlu0 %v6662_v60, %s10492_s21  ;;  %6974 = vrot.lane.b32.xlu1 %v6897_v14, %s10491_s20  ;;  %v6270_v13 = vld [vmem:[#allocation2 + $0x212] ss:$2 sm:$0xff]  ;;  %v14518_v22 = vpop.f32.mrf.mxu2  ;;  %v6905_v14 = vsel %vm2565_vm2, %v6902_v12, %v6904_v54 }
 0x62d   : > { %v6350_v46 = vmax.f32 %v6310_v27, %v6270_v13  ;;  %v5506_v27 = vadd.f32 %v5339_v36, %v14307_v44 }
 0x62e   : > { %v5814_v8 = vpop.permute.xlu1 %5813  ;;  %v5335_v57 = vpop.permute.xlu0 %5334 }
 0x62f   : > { %v5504_v25 = vadd.f32 %v5335_v57, %v14280_v6  ;;  %v6390_v52 = vmax.f32 %v6350_v46, 0.0  ;;  %v6664_v6 = vsel %vm1605_vm3, %v6661_v42, %v6663_v10  ;;  %v5820_v60 = vpop.permute.xlu2 %5819  ;;  %v6669_v46 = vrot.slane %v14412_v40, 1 }
 0x630   : > { %v6903_v10 = vsel %vm2565_vm2, %v6900_v32, %v6902_v12 }
 0x631   : > { %v5983_v59 = vadd.f32 %v5814_v8, %v5504_v25  ;;  %v6413_v48 = vpack.c.bf16 %v6390_v52, %v6389_v51  ;;  %v6906_v8 = vrot.slane %v14399_v28, 2  ;;  %v6672_v44 = vsel %vm1605_vm3, %v6669_v46, %v6671_v16 }
 0x632   : > { %v6191_v51 = vld [vmem:[#allocation2 + $0x220] ss:$2 sm:$0xff]  ;;  %v6231_v52 = vld [vmem:[#allocation2 + $0x221] ss:$2 sm:$0xff]  ;;  %v6670_v12 = vsel %vm1605_vm3, %v6667_v21, %v6669_v46 }
 0x633   : > { %6976 = vrot.lane.b32.xlu2 %v6899_v37, %s10491_s20  ;;  %v6067_v19 = vadd.f32 %v14247_v26, %v5983_v59  ;;  %9772 = vmatmul.msk.bf16.gmra.mxu2 %vm3689_vm4, %v6413_v48  ;;  %v6908_v48 = vrot.slane %v14412_v40, 2 }
 0x634   : > { %6745 = vrot.lane.b32.xlu0 %v6668_v15, %s10492_s21  ;;  %6741 = vrot.lane.b32.xlu1 %v6664_v6, %s10492_s21  ;;  %v14534_v25 = vpop.f32.mrf.mxu2  ;;  %v6673_v6 = vrot.slane %v14450_v1, 1 }
 0x635   : > { %6147 = vst.msk [vmem:[#allocation2 + $0x230] sm:$0xff] %vm3689_vm4, %v6067_v19  ;;  %v6311_v19 = vmax.f32 %v6191_v51, %v6231_v52 }
 0x636   : > { %v5337_v45 = vpop.permute.xlu1 %5336 }
 0x637   : > { %v5505_v62 = vadd.f32 %v5337_v45, %v14294_v4  ;;  %v6901_v4 = vsel %vm2565_vm2, %v6898_v0, %v6900_v32  ;;  %v6907_v0 = vsel %vm2565_vm2, %v6904_v54, %v6906_v8  ;;  %v5343_v7 = vpop.permute.xlu2 %5342 }
 0x639   : > { %v5984_v18 = vadd.f32 %v5816_v17, %v5505_v62 }
 0x63b   : > { %v6068_v42 = vadd.f32 %v14247_v26, %v5984_v18  ;;  %6743 = vrot.lane.b32.xlu2 %v6666_v30, %s10492_s21 }
 0x63c   : > { %6982 = vrot.lane.b32.xlu0 %v6905_v14, %s10491_s20  ;;  %6978 = vrot.lane.b32.xlu1 %v6901_v4, %s10491_s20  ;;  %v6271_v37 = vld [vmem:[#allocation2 + $0x222] ss:$2 sm:$0xff]  ;;  %v14548_v30 = vpop.f32.mrf.mxu2 }
 0x63d   : > { %6148 = vst.msk [vmem:[#allocation2 + $0x238] sm:$0xff] %vm3689_vm4, %v6068_v42  ;;  %v6351_v54 = vmax.f32 %v6311_v19, %v6271_v37  ;;  %v6909_v42 = vsel %vm2565_vm2, %v6906_v8, %v6908_v48  ;;  %v6914_v8 = vrot.slane %v14467_v49, 2 }
 0x63e   : > { %v5818_v17 = vpop.permute.xlu0 %5817 }
 0x63f   : > { %v5985_v13 = vadd.f32 %v5818_v17, %v5506_v27  ;;  %v6391_v21 = vmax.f32 %v6351_v54, 0.0 }
 0x641   : > { %v6069_v57 = vadd.f32 %v14247_v26, %v5985_v13  ;;  %v6675_v13 = vrot.slane %v14467_v49, 1 }
 0x643   : > { %6149 = vst.msk [vmem:[#allocation2 + $0x240] sm:$0xff] %vm3689_vm4, %v6069_v57  ;;  %6980 = vrot.lane.b32.xlu2 %v6903_v10, %s10491_s20 }
 0x644   : > { %6749 = vrot.lane.b32.xlu0 %v6672_v44, %s10492_s21  ;;  %6984 = vrot.lane.b32.xlu1 %v6907_v0, %s10491_s20  ;;  %v6192_v36 = vld [vmem:[#allocation2 + $0x230] ss:$2 sm:$0xff]  ;;  %v6232_v59 = vld [vmem:[#allocation2 + $0x231] ss:$2 sm:$0xff]  ;;  %v6910_v44 = vrot.slane %v14432_v50, 2  ;;  %v6676_v0 = vsel %vm1605_vm3, %v6673_v6, %v6675_v13 }
 0x645   : > { %v6312_v62 = vmax.f32 %v6192_v36, %v6232_v59 }
 0x646   : > { %v5341_v15 = vpop.permute.xlu1 %5340  ;;  %v5826_v27 = vpop.permute.xlu2 %5825  ;;  %v6911_v52 = vsel %vm2565_vm2, %v6908_v48, %v6910_v44 }
 0x647   : > { %v5507_v45 = vadd.f32 %v5341_v15, %v14320_v9  ;;  %v6674_v9 = vsel %vm1605_vm3, %v6671_v16, %v6673_v6  ;;  %v6912_v16 = vrot.slane %v14450_v1, 2  ;;  %v6681_v15 = vrot.slane %v14518_v22, 1 }
 0x648   : > { %v6677_v6 = vrot.slane %v14480_v11, 1 }
 0x649   : > { %v5986_v32 = vadd.f32 %v5820_v60, %v5507_v45  ;;  %v5508_v60 = vadd.f32 %v5343_v7, %v14333_v58  ;;  %v6915_v51 = vsel %vm2565_vm2, %v6912_v16, %v6914_v8  ;;  %v14572_v7 = vpop.f32.mrf.mxu2  ;;  %v6679_v45 = vrot.slane %v14501_v56, 1 }
 0x64a   : > { %v6272_v18 = vld [vmem:[#allocation2 + $0x232] ss:$2 sm:$0xff]  ;;  %v6913_v48 = vsel %vm2565_vm2, %v6910_v44, %v6912_v16 }
 0x64b   : > { %6747 = vrot.lane.b32.xlu2 %v6670_v12, %s10492_s21  ;;  %v6352_v14 = vmax.f32 %v6312_v62, %v6272_v18  ;;  %v6070_v4 = vadd.f32 %v14247_v26, %v5986_v32  ;;  %v6682_v32 = vsel %vm1605_vm3, %v6679_v45, %v6681_v15  ;;  %v6678_v18 = vsel %vm1605_vm3, %v6675_v13, %v6677_v6 }
 0x64c   : > { %6986 = vrot.lane.b32.xlu0 %v6909_v42, %s10491_s20  ;;  %6751 = vrot.lane.b32.xlu1 %v6674_v9, %s10492_s21  ;;  %v6918_v9 = vrot.slane %v14501_v56, 2 }
 0x64d   : > { %v6392_v17 = vmax.f32 %v6352_v14, 0.0  ;;  %6150 = vst.msk [vmem:[#allocation2 + $0x248] sm:$0xff] %vm3689_vm4, %v6070_v4 }
 0x64e   : > { %v5822_v46 = vpop.permute.xlu0 %5821 }
 0x64f   : > { %v5987_v57 = vadd.f32 %v5822_v46, %v5508_v60  ;;  %v6414_v10 = vpack.c.bf16 %v6392_v17, %v6391_v21  ;;  %v6683_v21 = vrot.slane %v14534_v25, 1  ;;  %v6916_v17 = vrot.slane %v14480_v11, 2 }
 0x650   : > { %v6680_v46 = vsel %vm1605_vm3, %v6677_v6, %v6679_v45 }
 0x651   : > { %v6071_v58 = vadd.f32 %v14247_v26, %v5987_v57  ;;  %9773 = vmatmul.msk.bf16.gmra.mxu2 %vm3689_vm4, %v6414_v10  ;;  %v14588_v42 = vpop.f32.mrf.mxu2  ;;  %v6919_v10 = vsel %vm2565_vm2, %v6916_v17, %v6918_v9  ;;  %v6917_v6 = vsel %vm2565_vm2, %v6914_v8, %v6916_v17 }
 0x653   : > { %6151 = vst.msk [vmem:[#allocation2 + $0x250] sm:$0xff] %vm3689_vm4, %v6071_v58  ;;  %6753 = vrot.lane.b32.xlu2 %v6676_v0, %s10492_s21 }
 0x654   : > { %6992 = vrot.lane.b32.xlu0 %v6915_v51, %s10491_s20  ;;  %6988 = vrot.lane.b32.xlu1 %v6911_v52, %s10491_s20  ;;  %v6193_v58 = vld [vmem:[#allocation2 + $0x240] ss:$2 sm:$0xff]  ;;  %v6233_v0 = vld [vmem:[#allocation2 + $0x241] ss:$2 sm:$0xff]  ;;  %v6920_v51 = vrot.slane %v14518_v22, 2  ;;  %v6685_v52 = vrot.slane %v14548_v30, 1 }
 0x655   : > { %v5353_v36 = vpop.permute.xlu2 %5352 }
 0x656   : > { %v5824_v59 = vpop.permute.xlu1 %5823  ;;  %v5345_v37 = vpop.permute.xlu0 %5344  ;;  %v5513_v12 = vadd.f32 %v5353_v36, %v14396_v43  ;;  %v6686_v45 = vsel %vm1605_vm3, %v6683_v21, %v6685_v52 }
 0x657   : > { %v5509_v19 = vadd.f32 %v5345_v37, %v14347_v38 }
 0x659   : > { %v5988_v62 = vadd.f32 %v5824_v59, %v5509_v19  ;;  %v14611_v36 = vpop.f32.mrf.mxu2  ;;  %v6313_v19 = vmax.f32 %v6193_v58, %v6233_v0 }
 0x65b   : > { %v6072_v54 = vadd.f32 %v14247_v26, %v5988_v62  ;;  %6990 = vrot.lane.b32.xlu2 %v6913_v48, %s10491_s20 }
 0x65c   : > { %6759 = vrot.lane.b32.xlu0 %v6682_v32, %s10492_s21  ;;  %6755 = vrot.lane.b32.xlu1 %v6678_v18, %s10492_s21  ;;  %v6921_v32 = vsel %vm2565_vm2, %v6918_v9, %v6920_v51  ;;  %v6928_v9 = vrot.slane %v14588_v42, 2 }
 0x65d   : > { %6152 = vst.msk [vmem:[#allocation2 + $0x258] sm:$0xff] %vm3689_vm4, %v6072_v54  ;;  %v5832_v38 = vpop.permute.xlu2 %5831  ;;  %v6841_v54 = vadd.f32 %v14117_v53, %v13767_v47 }
 0x65e   : > { %v5992_v14 = vadd.f32 %v5832_v38, %v5513_v12  ;;  %v5347_v4 = vpop.permute.xlu1 %5346  ;;  %v14627_v12 = vld [vmem:[%s15982_s6] ss:$0 sm:$0xff] }
 0x65f   : > { %v5510_v60 = vadd.f32 %v5347_v4, %v14360_v63  ;;  %v6684_v63 = vsel %vm1605_vm3, %v6681_v15, %v6683_v21  ;;  %v6273_v15 = vld [vmem:[#allocation2 + $0x242] ss:$2 sm:$0xff]  ;;  %v6922_v4 = vrot.slane %v14534_v25, 2 }
 0x660   : > { %v6076_v43 = vadd.f32 %v14247_v26, %v5992_v14  ;;  %v6353_v48 = vmax.f32 %v6313_v19, %v6273_v15 }
 0x661   : > { %v5989_v13 = vadd.f32 %v5826_v27, %v5510_v60  ;;  %v10331_v27 = vld [vmem:[%s15983_s7 + $0x8] sm:$0xff] }
 0x662   : > { %6156 = vst.msk [vmem:[#allocation2 + $0x278] sm:$0x3f] %vm3849_vm5, %v6076_v43  ;;  %7386 = vmatpush.bf16.msrb.mxu3 %v10331_v27  ;;  %v6393_v43 = vmax.f32 %v6353_v48, 0.0  ;;  %v6923_v27 = vsel %vm2565_vm2, %v6920_v51, %v6922_v4 }
 0x663   : > { %v6073_v57 = vadd.f32 %v14247_v26, %v5989_v13  ;;  %6757 = vrot.lane.b32.xlu2 %v6680_v46, %s10492_s21  ;;  %v6924_v13 = vrot.slane %v14548_v30, 2  ;;  %v14634_v46 = vpop.f32.mrf.mxu2 }
 0x664   : > { %6996 = vrot.lane.b32.xlu0 %v6919_v10, %s10491_s20  ;;  %6761 = vrot.lane.b32.xlu1 %v6684_v63, %s10492_s21  ;;  %v6194_v59 = vld [vmem:[#allocation2 + $0x250] ss:$2 sm:$0xff]  ;;  %v6234_v37 = vld [vmem:[#allocation2 + $0x251] ss:$2 sm:$0xff] }
 0x665   : > { %6153 = vst.msk [vmem:[#allocation2 + $0x260] sm:$0xff] %vm3689_vm4, %v6073_v57  ;;  %v14604_v44 = vpop.permute.xlu2 %6725  ;;  %v6314_v62 = vmax.f32 %v6194_v59, %v6234_v37  ;;  %v6926_v57 = vrot.slane %v14572_v7, 2  ;;  %v6925_v58 = vsel %vm2565_vm2, %v6922_v4, %v6924_v13  ;;  %v6691_v37 = vrot.slane %v14611_v36, 1 }
 0x666   : > { %v5349_v16 = vpop.permute.xlu0 %5348 }
 0x667   : > { %v5511_v18 = vadd.f32 %v5349_v16, %v14373_v61  ;;  %v6929_v16 = vsel %vm2565_vm2, %v6926_v57, %v6928_v9 }
 0x66b   : > { %6994 = vrot.lane.b32.xlu2 %v6917_v6, %s10491_s20  ;;  %v6687_v6 = vrot.slane %v14572_v7, 1 }
 0x66c   : > { %6763 = vrot.lane.b32.xlu0 %v6686_v45, %s10492_s21  ;;  %v6274_v8 = vld [vmem:[#allocation2 + $0x252] ss:$2 sm:$0xff]  ;;  %6998 = vrot.lane.b32.xlu1 %v6921_v32, %s10491_s20  ;;  %v14661_v32 = vpop.f32.mrf.mxu2 }
 0x66d   : > { %v6961_v38 = vpop.permute.xlu2 %6960  ;;  %v6354_v14 = vmax.f32 %v6314_v62, %v6274_v8  ;;  %v10330_v45 = vld [vmem:[%s15983_s7] sm:$0xff]  ;;  %v6689_v62 = vrot.slane %v14588_v42, 1  ;;  %v6927_v8 = vsel %vm2565_vm2, %v6924_v13, %v6926_v57 }
 0x66e   : > { %v7080_v60 = vadd.f32 %v6961_v38, %v6841_v54  ;;  %v5351_v47 = vpop.permute.xlu1 %5350  ;;  %v5828_v53 = vpop.permute.xlu0 %5827  ;;  %7387 = vmatpush.bf16.msrb.mxu3 %v10330_v45  ;;  %v6688_v38 = vsel %vm1605_vm3, %v6685_v52, %v6687_v6  ;;  %v6930_v52 = vrot.slane %v14611_v36, 2  ;;  %v6695_v45 = vrot.slane %v14661_v32, 1 }
 0x66f   : > { %v5990_v21 = vadd.f32 %v5828_v53, %v5511_v18  ;;  %v6394_v17 = vmax.f32 %v6354_v14, 0.0  ;;  %v6692_v18 = vsel %vm1605_vm3, %v6689_v62, %v6691_v37  ;;  %v6842_v14 = vadd.f32 %v14102_v24, %v13796_v35 }
 0x670   : > { %v7124_v61 = vadd.f32 %v14627_v12, %v7080_v60  ;;  %v6690_v35 = vsel %vm1605_vm3, %v6687_v6, %v6689_v62  ;;  %v6693_v6 = vrot.slane %v14634_v46, 1 }
 0x671   : > { %v6074_v10 = vadd.f32 %v14247_v26, %v5990_v21  ;;  %v6415_v63 = vpack.c.bf16 %v6394_v17, %v6393_v43  ;;  %v5512_v26 = vadd.f32 %v5351_v47, %v14386_v3  ;;  %v10481_v3 = vld [vmem:[%s15980_s4] ss:$0 sm:$0xff]  ;;  %v6932_v43 = vrot.slane %v14634_v46, 2 }
 0x672   : > { %7164 = vst.msk [vmem:[#allocation2] sm:$0xff] %vm3689_vm4, %v7124_v61 }
 0x673   : > { %6154 = vst.msk [vmem:[#allocation2 + $0x268] sm:$0xff] %vm3689_vm4, %v6074_v10  ;;  %7000 = vrot.lane.b32.xlu2 %v6923_v27, %s10491_s20  ;;  %9774 = vmatmul.msk.bf16.gmra.mxu2 %vm3689_vm4, %v6415_v63  ;;  %v6933_v27 = vsel %vm2565_vm2, %v6930_v52, %v6932_v43 }
 0x674   : > { %7006 = vrot.lane.b32.xlu0 %v6929_v16, %s10491_s20  ;;  %7002 = vrot.lane.b32.xlu1 %v6925_v58, %s10491_s20  ;;  %v14681_v57 = vpop.f32.mrf.mxu2 }
 0x675   : > { %v6967_v0 = vpop.permute.xlu2 %6966 }
 0x676   : > { %v5830_v51 = vpop.permute.xlu1 %5829  ;;  %v6728_v59 = vpop.permute.xlu0 %6727 }
 0x677   : > { %v5991_v15 = vadd.f32 %v5830_v51, %v5512_v26  ;;  %v6844_v19 = vadd.f32 %v6728_v59, %v14253_v33  ;;  %v6931_v26 = vsel %vm2565_vm2, %v6928_v9, %v6930_v52  ;;  %v6843_v51 = vadd.f32 %v14604_v44, %v13820_v39 }
 0x679   : > { %v6075_v48 = vadd.f32 %v10481_v3, %v5991_v15  ;;  %v7083_v54 = vadd.f32 %v6967_v0, %v6844_v19 }
 0x67a   : > { %v6195_v53 = vld [vmem:[#allocation2 + $0x260] ss:$2 sm:$0xff]  ;;  %v6235_v21 = vld [vmem:[#allocation2 + $0x261] ss:$2 sm:$0xff] }
 0x67b   : > { %6155 = vst.msk [vmem:[#allocation2 + $0x270] sm:$0xff] %vm3689_vm4, %v6075_v48  ;;  %v7127_v33 = vadd.f32 %v14627_v12, %v7083_v54  ;;  %7004 = vrot.lane.b32.xlu2 %v6927_v8, %s10491_s20  ;;  %v6315_v61 = vmax.f32 %v6195_v53, %v6235_v21 }
 0x67c   : > { %6769 = vrot.lane.b32.xlu0 %v6692_v18, %s10492_s21  ;;  %6765 = vrot.lane.b32.xlu1 %v6688_v38, %s10492_s21  ;;  %v6694_v18 = vsel %vm1605_vm3, %v6691_v37, %v6693_v6  ;;  %v6696_v38 = vsel %vm1605_vm3, %v6693_v6, %v6695_v45  ;;  %v6936_v37 = vrot.slane %v14681_v57, 2 }
 0x67d   : > { %7167 = vst.msk [vmem:[#allocation2 + $0x18] sm:$0xff] %vm3689_vm4, %v7127_v33  ;;  %v14676_v4 = vpop.permute.xlu2 %6733  ;;  %v6934_v33 = vrot.slane %v14661_v32, 2 }
 0x67e   : > { %v6730_v60 = vpop.permute.xlu1 %6729  ;;  %v6963_v47 = vpop.permute.xlu0 %6962 }
 0x67f   : > { %v7081_v17 = vadd.f32 %v6963_v47, %v6842_v14  ;;  %v6845_v59 = vadd.f32 %v6730_v60, %v14266_v20  ;;  %v14705_v14 = vpop.f32.mrf.mxu2  ;;  %v6935_v60 = vsel %vm2565_vm2, %v6932_v43, %v6934_v33  ;;  %v6937_v43 = vsel %vm2565_vm2, %v6934_v33, %v6936_v37 }
 0x680   : > { %v6699_v6 = vrot.slane %v14705_v14, 1 }
 0x681   : > { %v7125_v13 = vadd.f32 %v14627_v12, %v7081_v17 }
 0x682   : > { %v6196_v24 = vld [vmem:[#allocation2 + $0x270] ss:$2 sm:$0xff]  ;;  %v6236_v10 = vld [vmem:[#allocation2 + $0x271] ss:$2 sm:$0xff] }
 0x683   : > { %v6275_v63 = vld [vmem:[#allocation2 + $0x262] ss:$2 sm:$0xff]  ;;  %7165 = vst.msk [vmem:[#allocation2 + $0x8] sm:$0xff] %vm3689_vm4, %v7125_v13  ;;  %6767 = vrot.lane.b32.xlu2 %v6690_v35, %s10492_s21  ;;  %v6316_v16 = vmax.f32 %v6196_v24, %v6236_v10  ;;  %v6276_v0 = vld [vmem:[#allocation2 + $0x272] ss:$2 sm:$0xff]  ;;  %v6938_v13 = vrot.slane %v14705_v14, 2 }
 0x684   : > { %v6355_v58 = vmax.f32 %v6315_v61, %v6275_v63  ;;  %7010 = vrot.lane.b32.xlu0 %v6933_v27, %s10491_s20  ;;  %7008 = vrot.lane.b32.xlu1 %v6931_v26, %s10491_s20  ;;  %v6697_v35 = vrot.slane %v14681_v57, 1 }
 0x685   : > { %v6971_v15 = vpop.permute.xlu2 %6970  ;;  %v6356_v19 = vmax.f32 %v6316_v16, %v6276_v0  ;;  %v6939_v26 = vsel %vm2565_vm2, %v6936_v37, %v6938_v13 }
 0x686   : > { %v6965_v62 = vpop.permute.xlu1 %6964  ;;  %v6969_v3 = vpop.permute.xlu0 %6968  ;;  %v6395_v54 = vmax.f32 %v6355_v58, 0.0 }
 0x687   : > { %v7082_v48 = vadd.f32 %v6965_v62, %v6843_v51  ;;  %v7084_v9 = vadd.f32 %v6969_v3, %v6845_v59  ;;  %v6396_v8 = vmax.f32 %v6356_v19, 0.0  ;;  %v6698_v59 = vsel %vm1605_vm3, %v6695_v45, %v6697_v35 }
 0x688   : > { %v6847_v62 = vadd.f32 %v14676_v4, %v14296_v41 }
 0x689   : > { %v7126_v39 = vadd.f32 %v14627_v12, %v7082_v48  ;;  %v7128_v20 = vadd.f32 %v14627_v12, %v7084_v9  ;;  %v6416_v44 = vpack.c.bf16 %v6396_v8, %v6395_v54 }
 0x68a   : > { %v7204_v17 = vld [vmem:[#allocation2] ss:$2 sm:$0xff]  ;;  %v7224_v52 = vld [vmem:[#allocation2 + $0x1] ss:$2 sm:$0xff] }
 0x68b   : > { %7166 = vst.msk [vmem:[#allocation2 + $0x10] sm:$0xff] %vm3689_vm4, %v7126_v39  ;;  %6771 = vrot.lane.b32.xlu2 %v6694_v18, %s10492_s21  ;;  %9775 = vmatmul.msk.bf16.gmra.mxu2 %vm3689_vm4, %v6416_v44  ;;  %v7264_v10 = vmax.f32 %v7204_v17, %v7224_v52 }
 0x68c   : > { %7168 = vst.msk [vmem:[#allocation2 + $0x20] sm:$0xff] %vm3689_vm4, %v7128_v20  ;;  %6773 = vrot.lane.b32.xlu0 %v6696_v38, %s10492_s21  ;;  %7012 = vrot.lane.b32.xlu1 %v6935_v60, %s10491_s20  ;;  %v6700_v38 = vsel %vm1605_vm3, %v6697_v35, %v6699_v6 }
 0x68d   : > { %v6977_v47 = vpop.permute.xlu2 %6976 }
 0x68e   : > { %v6732_v53 = vpop.permute.xlu1 %6731  ;;  %v6736_v21 = vpop.permute.xlu0 %6735 }
 0x68f   : > { %v6846_v61 = vadd.f32 %v6732_v53, %v14282_v55 }
 0x691   : > { %v7085_v24 = vadd.f32 %v6971_v15, %v6846_v61 }
 0x692   : > { %v7205_v63 = vld [vmem:[#allocation2 + $0x10] ss:$2 sm:$0xff]  ;;  %v7225_v27 = vld [vmem:[#allocation2 + $0x11] ss:$2 sm:$0xff] }
 0x693   : > { %v7244_v16 = vld [vmem:[#allocation2 + $0x2] ss:$2 sm:$0xff]  ;;  %v7129_v58 = vadd.f32 %v14627_v12, %v7085_v24  ;;  %7014 = vrot.lane.b32.xlu2 %v6937_v43, %s10491_s20  ;;  %v7265_v0 = vmax.f32 %v7205_v63, %v7225_v27  ;;  %v7245_v55 = vld [vmem:[#allocation2 + $0x12] ss:$2 sm:$0xff] }
 0x694   : > { %v7284_v51 = vmax.f32 %v7264_v10, %v7244_v16  ;;  %7016 = vrot.lane.b32.xlu0 %v6939_v26, %s10491_s20  ;;  %6775 = vrot.lane.b32.xlu1 %v6698_v59, %s10492_s21 }
 0x695   : > { %7169 = vst.msk [vmem:[#allocation2 + $0x28] sm:$0xff] %vm3689_vm4, %v7129_v58  ;;  %v6744_v15 = vpop.permute.xlu2 %6743  ;;  %v7285_v19 = vmax.f32 %v7265_v0, %v7245_v55 }
 0x696   : > { %v6738_v3 = vpop.permute.xlu1 %6737  ;;  %v14726_v48 = vpop.f32.mrf.mxu2  ;;  %v7304_v54 = vmax.f32 %v7284_v51, 0.0 }
 0x697   : > { %v6849_v9 = vadd.f32 %v6738_v3, %v14325_v23  ;;  %v6973_v45 = vpop.permute.xlu0 %6972  ;;  %v7305_v8 = vmax.f32 %v7285_v19, 0.0  ;;  %v6701_v33 = vrot.slane %v14726_v48, 1  ;;  %v6848_v23 = vadd.f32 %v6736_v21, %v14311_v31 }
 0x698   : > { %v7086_v39 = vadd.f32 %v6973_v45, %v6847_v62 }
 0x699   : > { %v7088_v20 = vadd.f32 %v6977_v47, %v6849_v9  ;;  %v7324_v44 = vpack.c.bf16 %v7305_v8, %v7304_v54  ;;  %v6702_v41 = vsel %vm1605_vm3, %v6699_v6, %v6701_v33  ;;  %v6940_v47 = vrot.slane %v14726_v48, 2 }
 0x69a   : > { %v7130_v18 = vadd.f32 %v14627_v12, %v7086_v39  ;;  %v6852_v54 = vadd.f32 %v6744_v15, %v14371_v5 }
 0x69b   : > { %v7132_v60 = vadd.f32 %v14627_v12, %v7088_v20  ;;  %6777 = vrot.lane.b32.xlu2 %v6700_v38, %s10492_s21  ;;  %9784 = vmatmul.msk.bf16.vlgmr.msrb.gmra.mxu3 %vm3689_vm4, %v7324_v44  ;;  %v6941_v31 = vsel %vm2565_vm2, %v6938_v13, %v6940_v47 }
 0x69c   : > { %7170 = vst.msk [vmem:[#allocation2 + $0x30] sm:$0xff] %vm3689_vm4, %v7130_v18  ;;  %6779 = vrot.lane.b32.xlu1 %v6702_v41, %s10492_s21  ;;  %v7206_v43 = vld [vmem:[#allocation2 + $0x20] ss:$2 sm:$0xff]  ;;  %v7226_v63 = vld [vmem:[#allocation2 + $0x21] ss:$2 sm:$0xff] }
 0x69d   : > { %7172 = vst.msk [vmem:[#allocation2 + $0x40] sm:$0xff] %vm3689_vm4, %v7132_v60  ;;  %v6981_v4 = vpop.permute.xlu2 %6980  ;;  %v7266_v0 = vmax.f32 %v7206_v43, %v7226_v63 }
 0x69e   : > { %v6975_v37 = vpop.permute.xlu1 %6974  ;;  %v14741_v53 = vpop.f32.mrf.mxu2 }
 0x69f   : > { %v7087_v17 = vadd.f32 %v6975_v37, %v6848_v23  ;;  %v6942_v52 = vrot.slane %v14741_v53, 2  ;;  %v6740_v61 = vpop.permute.xlu0 %6739  ;;  %v6703_v10 = vrot.slane %v14741_v53, 1 }
 0x6a1   : > { %v7131_v35 = vadd.f32 %v14627_v12, %v7087_v17  ;;  %v6943_v24 = vsel %vm2565_vm2, %v6940_v47, %v6942_v52  ;;  %v6704_v59 = vsel %vm1605_vm3, %v6701_v33, %v6703_v10 }
 0x6a2   : > { %7020 = vrot.lane.b32.xlu0 %v6943_v24, %s10491_s20 }
 0x6a3   : > { %7171 = vst.msk [vmem:[#allocation2 + $0x38] sm:$0xff] %vm3689_vm4, %v7131_v35  ;;  %7018 = vrot.lane.b32.xlu2 %v6941_v31, %s10491_s20  ;;  %v7246_v26 = vld [vmem:[#allocation2 + $0x22] ss:$2 sm:$0xff] }
 0x6a4   : > { %v7286_v6 = vmax.f32 %v7266_v0, %v7246_v26 }
 0x6a5   : > { %v6748_v21 = vpop.permute.xlu2 %6747 }
 0x6a6   : > { %v6742_v27 = vpop.permute.xlu1 %6741  ;;  %v7306_v39 = vmax.f32 %v7286_v6, 0.0 }
 0x6a7   : > { %v6746_v16 = vpop.permute.xlu0 %6745  ;;  %v6851_v58 = vadd.f32 %v6742_v27, %v14358_v34  ;;  %v6850_v34 = vadd.f32 %v6740_v61, %v14342_v2 }
 0x6a8   : > { %v6853_v5 = vadd.f32 %v6746_v16, %v14384_v29 }
 0x6a9   : > { %v7090_v51 = vadd.f32 %v6981_v4, %v6851_v58  ;;  %v6854_v58 = vadd.f32 %v6748_v21, %v14399_v28 }
 0x6aa   : > { %v7207_v55 = vld [vmem:[#allocation2 + $0x30] ss:$2 sm:$0xff]  ;;  %v7227_v13 = vld [vmem:[#allocation2 + $0x31] ss:$2 sm:$0xff] }
 0x6ab   : > { %6781 = vrot.lane.b32.xlu2 %v6704_v59, %s10492_s21  ;;  %v7267_v19 = vmax.f32 %v7207_v55, %v7227_v13  ;;  %v7134_v62 = vadd.f32 %v14627_v12, %v7090_v51  ;;  %v7247_v3 = vld [vmem:[#allocation2 + $0x32] ss:$2 sm:$0xff] }
 0x6ad   : > { %v14755_v9 = vpop.permute.xlu2 %6753  ;;  %v7287_v45 = vmax.f32 %v7267_v19, %v7247_v3  ;;  %7174 = vst.msk [vmem:[#allocation2 + $0x50] sm:$0xff] %vm3689_vm4, %v7134_v62 }
 0x6ae   : > { %v6979_v8 = vpop.permute.xlu1 %6978 }
 0x6af   : > { %v6983_v33 = vpop.permute.xlu0 %6982  ;;  %v7307_v20 = vmax.f32 %v7287_v45, 0.0  ;;  %v7089_v44 = vadd.f32 %v6979_v8, %v6850_v34 }
 0x6b0   : > { %v7091_v18 = vadd.f32 %v6983_v33, %v6852_v54 }
 0x6b1   : > { %v7325_v38 = vpack.c.bf16 %v7307_v20, %v7306_v39  ;;  %v7133_v60 = vadd.f32 %v14627_v12, %v7089_v44  ;;  %v6857_v20 = vadd.f32 %v14755_v9, %v14450_v1 }
 0x6b2   : > { %v7135_v41 = vadd.f32 %v14627_v12, %v7091_v18 }
 0x6b3   : > { %9785 = vmatmul.msk.bf16.gmra.mxu3 %vm3689_vm4, %v7325_v38  ;;  %7173 = vst.msk [vmem:[#allocation2 + $0x48] sm:$0xff] %vm3689_vm4, %v7133_v60 }
 0x6b4   : > { %7175 = vst.msk [vmem:[#allocation2 + $0x58] sm:$0xff] %vm3689_vm4, %v7135_v41 }
 0x6b5   : > { %v6991_v2 = vpop.permute.xlu2 %6990 }
 0x6b6   : > { %v6985_v15 = vpop.permute.xlu1 %6984  ;;  %v14766_v23 = vpop.f32.mrf.mxu2 }
 0x6b7   : > { %v7092_v4 = vadd.f32 %v6985_v15, %v6853_v5  ;;  %v6705_v47 = vrot.slane %v14766_v23, 1  ;;  %v6944_v37 = vrot.slane %v14766_v23, 2  ;;  %v6750_v17 = vpop.permute.xlu0 %6749 }
 0x6b8   : > { %v6855_v8 = vadd.f32 %v6750_v17, %v14412_v40 }
 0x6b9   : > { %v7136_v61 = vadd.f32 %v14627_v12, %v7092_v4  ;;  %v6945_v35 = vsel %vm2565_vm2, %v6942_v52, %v6944_v37  ;;  %v6706_v24 = vsel %vm1605_vm3, %v6703_v10, %v6705_v47 }
 0x6ba   : > { %7022 = vrot.lane.b32.xlu1 %v6945_v35, %s10491_s20  ;;  %6783 = vrot.lane.b32.xlu0 %v6706_v24, %s10492_s21  ;;  %v7208_v29 = vld [vmem:[#allocation2 + $0x40] ss:$2 sm:$0xff]  ;;  %v7228_v31 = vld [vmem:[#allocation2 + $0x41] ss:$2 sm:$0xff] }
 0x6bb   : > { %7176 = vst.msk [vmem:[#allocation2 + $0x60] sm:$0xff] %vm3689_vm4, %v7136_v61  ;;  %v7209_v63 = vld [vmem:[#allocation2 + $0x50] ss:$2 sm:$0xff]  ;;  %v7229_v27 = vld [vmem:[#allocation2 + $0x51] ss:$2 sm:$0xff]  ;;  %v7268_v16 = vmax.f32 %v7208_v29, %v7228_v31 }
 0x6bc   : > { %v7248_v13 = vld [vmem:[#allocation2 + $0x42] ss:$2 sm:$0xff]  ;;  %v7269_v19 = vmax.f32 %v7209_v63, %v7229_v27 }
 0x6bd   : > { %v6758_v43 = vpop.permute.xlu2 %6757  ;;  %v7288_v45 = vmax.f32 %v7268_v16, %v7248_v13 }
 0x6be   : > { %v6752_v26 = vpop.permute.xlu1 %6751  ;;  %v14777_v0 = vpop.f32.mrf.mxu2 }
 0x6bf   : > { %v6856_v52 = vadd.f32 %v6752_v26, %v14432_v50  ;;  %v6707_v10 = vrot.slane %v14777_v0, 1  ;;  %v6946_v51 = vrot.slane %v14777_v0, 2  ;;  %v6987_v59 = vpop.permute.xlu0 %6986  ;;  %v7308_v33 = vmax.f32 %v7288_v45, 0.0 }
 0x6c0   : > { %v7093_v55 = vadd.f32 %v6987_v59, %v6854_v58  ;;  %v6859_v59 = vadd.f32 %v6758_v43, %v14480_v11 }
 0x6c1   : > { %v7095_v6 = vadd.f32 %v6991_v2, %v6856_v52  ;;  %v6947_v62 = vsel %vm2565_vm2, %v6944_v37, %v6946_v51  ;;  %v6708_v3 = vsel %vm1605_vm3, %v6705_v47, %v6707_v10 }
 0x6c2   : > { %v7137_v28 = vadd.f32 %v14627_v12, %v7093_v55  ;;  %7024 = vrot.lane.b32.xlu2 %v6947_v62, %s10491_s20  ;;  %6785 = vrot.lane.b32.xlu1 %v6708_v3, %s10492_s21  ;;  %v7249_v50 = vld [vmem:[#allocation2 + $0x52] ss:$2 sm:$0xff] }
 0x6c3   : > { %v7139_v21 = vadd.f32 %v14627_v12, %v7095_v6  ;;  %v7289_v54 = vmax.f32 %v7269_v19, %v7249_v50 }
 0x6c4   : > { %7177 = vst.msk [vmem:[#allocation2 + $0x68] sm:$0xff] %vm3689_vm4, %v7137_v28 }
 0x6c5   : > { %v6995_v34 = vpop.permute.xlu2 %6994  ;;  %7179 = vst.msk [vmem:[#allocation2 + $0x78] sm:$0xff] %vm3689_vm4, %v7139_v21  ;;  %v7309_v39 = vmax.f32 %v7289_v54, 0.0 }
 0x6c6   : > { %v6989_v44 = vpop.permute.xlu1 %6988 }
 0x6c7   : > { %v7094_v18 = vadd.f32 %v6989_v44, %v6855_v8  ;;  %v6993_v38 = vpop.permute.xlu0 %6992  ;;  %v7326_v60 = vpack.c.bf16 %v7309_v39, %v7308_v33 }
 0x6c8   : > { %v7096_v41 = vadd.f32 %v6993_v38, %v6857_v20 }
 0x6c9   : > { %v7138_v2 = vadd.f32 %v14627_v12, %v7094_v18  ;;  %9786 = vmatmul.msk.bf16.gmra.mxu3 %vm3689_vm4, %v7326_v60 }
 0x6ca   : > { %v7140_v5 = vadd.f32 %v14627_v12, %v7096_v41 }
 0x6cb   : > { %7178 = vst.msk [vmem:[#allocation2 + $0x70] sm:$0xff] %vm3689_vm4, %v7138_v2  ;;  %v7210_v4 = vld [vmem:[#allocation2 + $0x60] ss:$2 sm:$0xff]  ;;  %v7230_v47 = vld [vmem:[#allocation2 + $0x61] ss:$2 sm:$0xff] }
 0x6cc   : > { %7180 = vst.msk [vmem:[#allocation2 + $0x80] sm:$0xff] %vm3689_vm4, %v7140_v5  ;;  %v7270_v17 = vmax.f32 %v7210_v4, %v7230_v47 }
 0x6cd   : > { %v7001_v40 = vpop.permute.xlu2 %7000 }
 0x6ce   : > { %v6756_v15 = vpop.permute.xlu1 %6755 }
 0x6cf   : > { %v6858_v1 = vadd.f32 %v6756_v15, %v14467_v49  ;;  %v6760_v9 = vpop.permute.xlu0 %6759 }
 0x6d1   : > { %v7097_v37 = vadd.f32 %v6995_v34, %v6858_v1 }
 0x6d2   : > { %v7211_v61 = vld [vmem:[#allocation2 + $0x70] ss:$2 sm:$0xff]  ;;  %v7231_v35 = vld [vmem:[#allocation2 + $0x71] ss:$2 sm:$0xff] }
 0x6d3   : > { %v7250_v24 = vld [vmem:[#allocation2 + $0x62] ss:$2 sm:$0xff]  ;;  %v7141_v29 = vadd.f32 %v14627_v12, %v7097_v37  ;;  %v7271_v63 = vmax.f32 %v7211_v61, %v7231_v35  ;;  %v7251_v52 = vld [vmem:[#allocation2 + $0x72] ss:$2 sm:$0xff] }
 0x6d4   : > { %v14800_v31 = vpop.f32.mrf.mxu2  ;;  %v7290_v27 = vmax.f32 %v7270_v17, %v7250_v24 }
 0x6d5   : > { %v6709_v16 = vrot.slane %v14800_v31, 1  ;;  %v6948_v58 = vrot.slane %v14800_v31, 2  ;;  %v7005_v26 = vpop.permute.xlu2 %7004  ;;  %7181 = vst.msk [vmem:[#allocation2 + $0x88] sm:$0xff] %vm3689_vm4, %v7141_v29  ;;  %v7291_v49 = vmax.f32 %v7271_v63, %v7251_v52 }
 0x6d6   : > { %v6762_v55 = vpop.permute.xlu1 %6761  ;;  %v7310_v3 = vmax.f32 %v7290_v27, 0.0 }
 0x6d7   : > { %v6949_v13 = vsel %vm2565_vm2, %v6946_v51, %v6948_v58  ;;  %v6710_v19 = vsel %vm1605_vm3, %v6707_v10, %v6709_v16  ;;  %v6861_v6 = vadd.f32 %v6762_v55, %v14518_v22  ;;  %v6997_v62 = vpop.permute.xlu0 %6996  ;;  %v7311_v45 = vmax.f32 %v7291_v49, 0.0 }
 0x6d8   : > { %7026 = vrot.lane.b32.xlu1 %v6949_v13, %s10491_s20  ;;  %6787 = vrot.lane.b32.xlu0 %v6710_v19, %s10492_s21  ;;  %v7098_v28 = vadd.f32 %v6997_v62, %v6859_v59  ;;  %v6860_v10 = vadd.f32 %v6760_v9, %v14501_v56 }
 0x6d9   : > { %v7100_v50 = vadd.f32 %v7001_v40, %v6861_v6  ;;  %v7327_v21 = vpack.c.bf16 %v7311_v45, %v7310_v3 }
 0x6da   : > { %v7142_v11 = vadd.f32 %v14627_v12, %v7098_v28 }
 0x6db   : > { %v7144_v43 = vadd.f32 %v14627_v12, %v7100_v50  ;;  %9787 = vmatmul.msk.bf16.gmra.mxu3 %vm3689_vm4, %v7327_v21 }
 0x6dc   : > { %v14816_v51 = vpop.f32.mrf.mxu2  ;;  %7182 = vst.msk [vmem:[#allocation2 + $0x90] sm:$0xff] %vm3689_vm4, %v7142_v11  ;;  %v7212_v56 = vld [vmem:[#allocation2 + $0x80] ss:$2 sm:$0xff]  ;;  %v7232_v60 = vld [vmem:[#allocation2 + $0x81] ss:$2 sm:$0xff] }
 0x6dd   : > { %v6711_v22 = vrot.slane %v14816_v51, 1  ;;  %7184 = vst.msk [vmem:[#allocation2 + $0xa0] sm:$0xff] %vm3689_vm4, %v7144_v43  ;;  %v6768_v54 = vpop.permute.xlu2 %6767  ;;  %v7272_v47 = vmax.f32 %v7212_v56, %v7232_v60  ;;  %v6950_v19 = vrot.slane %v14816_v51, 2 }
 0x6de   : > { %v6999_v34 = vpop.permute.xlu1 %6998  ;;  %v6864_v18 = vadd.f32 %v6768_v54, %v14572_v7 }
 0x6df   : > { %v6712_v8 = vsel %vm1605_vm3, %v6709_v16, %v6711_v22  ;;  %v7099_v33 = vadd.f32 %v6999_v34, %v6860_v10  ;;  %v6764_v39 = vpop.permute.xlu0 %6763  ;;  %v6951_v56 = vsel %vm2565_vm2, %v6948_v58, %v6950_v19 }
 0x6e0   : > { %6789 = vrot.lane.b32.xlu1 %v6712_v8, %s10492_s21  ;;  %v6862_v44 = vadd.f32 %v6764_v39, %v14534_v25 }
 0x6e1   : > { %v7143_v20 = vadd.f32 %v14627_v12, %v7099_v33 }
 0x6e3   : > { %7183 = vst.msk [vmem:[#allocation2 + $0x98] sm:$0xff] %vm3689_vm4, %v7143_v20  ;;  %v7252_v15 = vld [vmem:[#allocation2 + $0x82] ss:$2 sm:$0xff] }
 0x6e4   : > { %v7292_v17 = vmax.f32 %v7272_v47, %v7252_v15 }
 0x6e5   : > { %v6772_v41 = vpop.permute.xlu2 %6771 }
 0x6e6   : > { %v7003_v38 = vpop.permute.xlu1 %7002  ;;  %v7312_v63 = vmax.f32 %v7292_v17, 0.0 }
 0x6e7   : > { %v7101_v2 = vadd.f32 %v7003_v38, %v6862_v44  ;;  %v7007_v5 = vpop.permute.xlu0 %7006 }
 0x6e8   : > { %v7103_v40 = vadd.f32 %v7007_v5, %v6864_v18 }
 0x6e9   : > { %v7145_v4 = vadd.f32 %v14627_v12, %v7101_v2 }
 0x6ea   : > { %v7147_v1 = vadd.f32 %v14627_v12, %v7103_v40  ;;  %v7213_v9 = vld [vmem:[#allocation2 + $0x90] ss:$2 sm:$0xff]  ;;  %v7233_v37 = vld [vmem:[#allocation2 + $0x91] ss:$2 sm:$0xff] }
 0x6eb   : > { %7185 = vst.msk [vmem:[#allocation2 + $0xa8] sm:$0xff] %vm3689_vm4, %v7145_v4  ;;  %v7273_v25 = vmax.f32 %v7213_v9, %v7233_v37  ;;  %v7253_v7 = vld [vmem:[#allocation2 + $0x92] ss:$2 sm:$0xff] }
 0x6ec   : > { %7187 = vst.msk [vmem:[#allocation2 + $0xb8] sm:$0xff] %vm3689_vm4, %v7147_v1 }
 0x6ed   : > { %v7293_v61 = vmax.f32 %v7273_v25, %v7253_v7  ;;  %v7015_v16 = vpop.permute.xlu2 %7014 }
 0x6ee   : > { %v6766_v35 = vpop.permute.xlu1 %6765 }
 0x6ef   : > { %v6863_v24 = vadd.f32 %v6766_v35, %v14548_v30  ;;  %v6770_v29 = vpop.permute.xlu0 %6769  ;;  %v7313_v27 = vmax.f32 %v7293_v61, 0.0  ;;  %v6866_v30 = vadd.f32 %v6772_v41, %v14611_v36 }
 0x6f0   : > { %v6865_v55 = vadd.f32 %v6770_v29, %v14588_v42 }
 0x6f1   : > { %v7102_v52 = vadd.f32 %v7005_v26, %v6863_v24  ;;  %v7328_v49 = vpack.c.bf16 %v7313_v27, %v7312_v63 }
 0x6f2   : > { %v7214_v43 = vld [vmem:[#allocation2 + $0xa0] ss:$2 sm:$0xff]  ;;  %v7234_v10 = vld [vmem:[#allocation2 + $0xa1] ss:$2 sm:$0xff] }
 0x6f3   : > { %v7146_v59 = vadd.f32 %v14627_v12, %v7102_v52  ;;  %9788 = vmatmul.msk.bf16.gmra.mxu3 %vm3689_vm4, %v7328_v49  ;;  %v7274_v18 = vmax.f32 %v7214_v43, %v7234_v10 }
 0x6f5   : > { %7186 = vst.msk [vmem:[#allocation2 + $0xb0] sm:$0xff] %vm3689_vm4, %v7146_v59  ;;  %v6778_v11 = vpop.permute.xlu2 %6777 }
 0x6f6   : > { %v14837_v13 = vpop.f32.mrf.mxu2  ;;  %v7009_v6 = vpop.permute.xlu1 %7008  ;;  %v6869_v9 = vadd.f32 %v6778_v11, %v14681_v57 }
 0x6f7   : > { %v6713_v62 = vrot.slane %v14837_v13, 1  ;;  %v6952_v26 = vrot.slane %v14837_v13, 2  ;;  %v7104_v3 = vadd.f32 %v7009_v6, %v6865_v55  ;;  %v7011_v45 = vpop.permute.xlu0 %7010 }
 0x6f8   : > { %v7105_v28 = vadd.f32 %v7011_v45, %v6866_v30 }
 0x6f9   : > { %v6953_v50 = vsel %vm2565_vm2, %v6950_v19, %v6952_v26  ;;  %v6714_v21 = vsel %vm1605_vm3, %v6711_v22, %v6713_v62  ;;  %v7148_v42 = vadd.f32 %v14627_v12, %v7104_v3 }
 0x6fa   : > { %7030 = vrot.lane.b32.xlu0 %v6953_v50, %s10491_s20  ;;  %6791 = vrot.lane.b32.xlu2 %v6714_v21, %s10492_s21  ;;  %v7149_v36 = vadd.f32 %v14627_v12, %v7105_v28 }
 0x6fb   : > { %7188 = vst.msk [vmem:[#allocation2 + $0xc0] sm:$0xff] %vm3689_vm4, %v7148_v42 }
 0x6fc   : > { %7189 = vst.msk [vmem:[#allocation2 + $0xc8] sm:$0xff] %vm3689_vm4, %v7149_v36  ;;  %v7215_v34 = vld [vmem:[#allocation2 + $0xb0] ss:$2 sm:$0xff]  ;;  %v7235_v39 = vld [vmem:[#allocation2 + $0xb1] ss:$2 sm:$0xff] }
 0x6fd   : > { %v7254_v20 = vld [vmem:[#allocation2 + $0xa2] ss:$2 sm:$0xff]  ;;  %v7275_v2 = vmax.f32 %v7215_v34, %v7235_v39  ;;  %v7019_v58 = vpop.permute.xlu2 %7018 }
 0x6fe   : > { %v14851_v54 = vpop.f32.mrf.mxu2  ;;  %v7013_v8 = vpop.permute.xlu1 %7012  ;;  %v7294_v5 = vmax.f32 %v7274_v18, %v7254_v20 }
 0x6ff   : > { %v6715_v22 = vrot.slane %v14851_v54, 1  ;;  %v6954_v33 = vrot.slane %v14851_v54, 2  ;;  %v6774_v44 = vpop.permute.xlu0 %6773 }
 0x700   : > { %v6867_v38 = vadd.f32 %v6774_v44, %v14634_v46  ;;  %v7314_v47 = vmax.f32 %v7294_v5, 0.0 }
 0x701   : > { %v6955_v60 = vsel %vm2565_vm2, %v6952_v26, %v6954_v33  ;;  %v6716_v41 = vsel %vm1605_vm3, %v6713_v62, %v6715_v22 }
 0x702   : > { %7028 = vrot.lane.b32.xlu2 %v6951_v56, %s10491_s20  ;;  %7032 = vrot.lane.b32.xlu1 %v6955_v60, %s10491_s20  ;;  %v7106_v40 = vadd.f32 %v7013_v8, %v6867_v38  ;;  %v7255_v46 = vld [vmem:[#allocation2 + $0xb2] ss:$2 sm:$0xff] }
 0x703   : > { %6793 = vrot.lane.b32.xlu0 %v6716_v41, %s10492_s21  ;;  %v7295_v15 = vmax.f32 %v7275_v2, %v7255_v46  ;;  %v7216_v49 = vld [vmem:[#allocation2 + $0xc0] ss:$2 sm:$0xff]  ;;  %v7236_v59 = vld [vmem:[#allocation2 + $0xc1] ss:$2 sm:$0xff] }
 0x704   : > { %v7150_v4 = vadd.f32 %v14627_v12, %v7106_v40  ;;  %v7276_v26 = vmax.f32 %v7216_v49, %v7236_v59 }
 0x705   : > { %v7315_v1 = vmax.f32 %v7295_v15, 0.0 }
 0x706   : > { %7190 = vst.msk [vmem:[#allocation2 + $0xd0] sm:$0xff] %vm3689_vm4, %v7150_v4  ;;  %v6776_v37 = vpop.permute.xlu1 %6775 }
 0x707   : > { %v6868_v25 = vadd.f32 %v6776_v37, %v14661_v32  ;;  %v7017_v17 = vpop.permute.xlu0 %7016  ;;  %v7329_v7 = vpack.c.bf16 %v7315_v1, %v7314_v47  ;;  %v6782_v32 = vpop.permute.xlu2 %6781 }
 0x708   : > { %v7108_v61 = vadd.f32 %v7017_v17, %v6869_v9  ;;  %v6871_v19 = vadd.f32 %v6782_v32, %v14726_v48 }
 0x709   : > { %v7107_v35 = vadd.f32 %v7015_v16, %v6868_v25  ;;  %9789 = vmatmul.msk.bf16.gmra.mxu3 %vm3689_vm4, %v7329_v7 }
 0x70a   : > { %v7152_v24 = vadd.f32 %v14627_v12, %v7108_v61 }
 0x70b   : > { %v7151_v29 = vadd.f32 %v14627_v12, %v7107_v35 }
 0x70c   : > { %7192 = vst.msk [vmem:[#allocation2 + $0xe0] sm:$0xff] %vm3689_vm4, %v7152_v24 }
 0x70d   : > { %7191 = vst.msk [vmem:[#allocation2 + $0xd8] sm:$0xff] %vm3689_vm4, %v7151_v29  ;;  %v7256_v30 = vld [vmem:[#allocation2 + $0xc2] ss:$2 sm:$0xff] }
 0x70e   : > { %v14875_v57 = vpop.f32.mrf.mxu2  ;;  %v6780_v63 = vpop.permute.xlu1 %6779  ;;  %v7296_v42 = vmax.f32 %v7276_v26, %v7256_v30 }
 0x70f   : > { %v6717_v27 = vrot.slane %v14875_v57, 1  ;;  %v6870_v52 = vadd.f32 %v6780_v63, %v14705_v14  ;;  %v6956_v3 = vrot.slane %v14875_v57, 2 }
 0x710   : > { %v7316_v8 = vmax.f32 %v7296_v42, 0.0 }
 0x711   : > { %v6718_v16 = vsel %vm1605_vm3, %v6715_v22, %v6717_v27  ;;  %v7109_v55 = vadd.f32 %v7019_v58, %v6870_v52  ;;  %v6957_v10 = vsel %vm2565_vm2, %v6954_v33, %v6956_v3 }
 0x712   : > { %6795 = vrot.lane.b32.xlu2 %v6718_v16, %s10492_s21 }
 0x713   : > { %v7153_v6 = vadd.f32 %v14627_v12, %v7109_v55 }
 0x714   : > { %v7021_v62 = vpop.permute.xlu0 %7020  ;;  %v7217_v28 = vld [vmem:[#allocation2 + $0xd0] ss:$2 sm:$0xff]  ;;  %v7237_v50 = vld [vmem:[#allocation2 + $0xd1] ss:$2 sm:$0xff] }
 0x715   : > { %v7110_v45 = vadd.f32 %v7021_v62, %v6871_v19  ;;  %7193 = vst.msk [vmem:[#allocation2 + $0xe8] sm:$0xff] %vm3689_vm4, %v7153_v6  ;;  %v7277_v21 = vmax.f32 %v7217_v28, %v7237_v50  ;;  %v7257_v11 = vld [vmem:[#allocation2 + $0xd2] ss:$2 sm:$0xff] }
 0x716   : > { %v14885_v14 = vpop.f32.mrf.mxu2 }
 0x717   : > { %v7154_v36 = vadd.f32 %v14627_v12, %v7110_v45  ;;  %v6719_v48 = vrot.slane %v14885_v14, 1  ;;  %v7297_v43 = vmax.f32 %v7277_v21, %v7257_v11  ;;  %v6958_v20 = vrot.slane %v14885_v14, 2 }
 0x719   : > { %7194 = vst.msk [vmem:[#allocation2 + $0xf0] sm:$0xff] %vm3689_vm4, %v7154_v36  ;;  %6799 = vrot.lane.b32.xlu1 %v6719_v48, %s10492_s21  ;;  %v6720_v34 = vsel %vm1605_vm3, %v6717_v27, %v6719_v48  ;;  %v7317_v22 = vmax.f32 %v7297_v43, 0.0  ;;  %v6959_v18 = vsel %vm2565_vm2, %v6956_v3, %v6958_v20 }
 0x71a   : > { %7034 = vrot.lane.b32.xlu2 %v6957_v10, %s10491_s20  ;;  %6797 = vrot.lane.b32.xlu0 %v6720_v34, %s10492_s21 }
 0x71b   : > { %v7330_v39 = vpack.c.bf16 %v7317_v22, %v7316_v8 }
 0x71c   : > { %v7025_v47 = vpop.permute.xlu2 %7024  ;;  %v7238_v17 = vld [vmem:[#allocation2 + $0xe1] ss:$2 sm:$0xff] }
 0x71d   : > { %9790 = vmatmul.msk.bf16.gmra.mxu3 %vm3689_vm4, %v7330_v39 }
 0x71e   : > { %v14899_v44 = vpop.f32.mrf.mxu3 }
 0x71f   : > { %v7459_v38 = vrot.slane %v14899_v44, 1  ;;  %v7578_v19 = vrot.slane %v14899_v44, 2 }
 0x720   : > { %v7258_v61 = vld [vmem:[#allocation2 + $0xe2] ss:$2 sm:$0xff] }
 0x721   : > { %7038 = vrot.lane.b32.xlu1 %v6958_v20, %s10491_s20 }
 0x722   : > { %7036 = vrot.lane.b32.xlu0 %v6959_v18, %s10491_s20 }
 0x726   : > { %v14904_v33 = vpop.f32.mrf.mxu3 }
 0x727   : > { %v7460_v56 = vrot.slane %v14904_v33, 1  ;;  %v7579_v49 = vrot.slane %v14904_v33, 2 }
 0x729   : > { %v7461_v60 = vsel %vm1605_vm3, %v7459_v38, %v7460_v56  ;;  %v7580_v6 = vsel %vm2565_vm2, %v7578_v19, %v7579_v49 }
 0x72a   : > { %7498 = vrot.lane.b32.xlu2 %v7461_v60, %s10492_s21 }
 0x72c   : > { %v7023_v41 = vpop.permute.xlu1 %7022  ;;  %v6784_v2 = vpop.permute.xlu0 %6783 }
 0x72d   : > { %v6872_v5 = vadd.f32 %v6784_v2, %v14741_v53  ;;  %v7218_v53 = vld [vmem:[#allocation2 + $0xe0] ss:$2 sm:$0xff] }
 0x72e   : > { %v7278_v29 = vmax.f32 %v7218_v53, %v7238_v17 }
 0x72f   : > { %v7111_v40 = vadd.f32 %v7023_v41, %v6872_v5 }
 0x730   : > { %v7298_v32 = vmax.f32 %v7278_v29, %v7258_v61 }
 0x731   : > { %v7155_v46 = vadd.f32 %v14627_v12, %v7111_v40 }
 0x732   : > { %v7318_v59 = vmax.f32 %v7298_v32, 0.0 }
 0x733   : > { %7195 = vst.msk [vmem:[#allocation2 + $0xf8] sm:$0xff] %vm3689_vm4, %v7155_v46 }
 0x734   : > { %v6786_v15 = vpop.permute.xlu1 %6785 }
 0x735   : > { %v6873_v4 = vadd.f32 %v6786_v15, %v14766_v23 }
 0x736   : > { %v14914_v58 = vpop.f32.mrf.mxu3 }
 0x737   : > { %v7462_v1 = vrot.slane %v14914_v58, 1  ;;  %v7112_v9 = vadd.f32 %v7025_v47, %v6873_v4  ;;  %v7581_v11 = vrot.slane %v14914_v58, 2 }
 0x739   : > { %v7463_v37 = vsel %vm1605_vm3, %v7460_v56, %v7462_v1  ;;  %v7156_v25 = vadd.f32 %v14627_v12, %v7112_v9  ;;  %v7582_v22 = vsel %vm2565_vm2, %v7579_v49, %v7581_v11 }
 0x73a   : > { %7500 = vrot.lane.b32.xlu0 %v7463_v37, %s10492_s21  ;;  %v7219_v35 = vld [vmem:[#allocation2 + $0xf0] ss:$2 sm:$0xff]  ;;  %v7239_v24 = vld [vmem:[#allocation2 + $0xf1] ss:$2 sm:$0xff] }
 0x73b   : > { %7196 = vst.msk [vmem:[#allocation2 + $0x100] sm:$0xff] %vm3689_vm4, %v7156_v25  ;;  %v7279_v27 = vmax.f32 %v7219_v35, %v7239_v24  ;;  %v14974_v25 = vld [vmem:[%s15982_s6] ss:$0 sm:$0xff] }
 0x73e   : > { %v14921_v7 = vpop.f32.mrf.mxu3 }
 0x73f   : > { %v7464_v23 = vrot.slane %v14921_v7, 1  ;;  %v7583_v42 = vrot.slane %v14921_v7, 2 }
 0x741   : > { %v7465_v63 = vsel %vm1605_vm3, %v7462_v1, %v7464_v23  ;;  %v7584_v5 = vsel %vm2565_vm2, %v7581_v11, %v7583_v42 }
 0x742   : > { %7502 = vrot.lane.b32.xlu1 %v7465_v63, %s10492_s21  ;;  %v7259_v52 = vld [vmem:[#allocation2 + $0xf2] ss:$2 sm:$0xff] }
 0x743   : > { %v7299_v16 = vmax.f32 %v7279_v27, %v7259_v52 }
 0x745   : > { %v7319_v55 = vmax.f32 %v7299_v16, 0.0 }
 0x747   : > { %v7331_v30 = vpack.c.bf16 %v7319_v55, %v7318_v59 }
 0x749   : > { %9791 = vmatmul.msk.bf16.gmra.mxu3 %vm3689_vm4, %v7331_v30 }
 0x74a   : > { %7617 = vrot.lane.b32.xlu1 %v7580_v6, %s10491_s20  ;;  %v6788_v62 = vpop.permute.xlu0 %6787  ;;  %v7027_v3 = vpop.permute.xlu1 %7026 }
 0x74b   : > { %v6874_v26 = vadd.f32 %v6788_v62, %v14777_v0 }
 0x74c   : > { %v14932_v28 = vpop.f32.mrf.mxu3 }
 0x74d   : > { %v7113_v45 = vadd.f32 %v7027_v3, %v6874_v26  ;;  %v7466_v50 = vrot.slane %v14932_v28, 1  ;;  %v7585_v21 = vrot.slane %v14932_v28, 2 }
 0x74f   : > { %v7157_v36 = vadd.f32 %v14627_v12, %v7113_v45  ;;  %v7467_v48 = vsel %vm1605_vm3, %v7464_v23, %v7466_v50  ;;  %v7586_v0 = vsel %vm2565_vm2, %v7583_v42, %v7585_v21 }
 0x750   : > { %7504 = vrot.lane.b32.xlu2 %v7467_v48, %s10492_s21 }
 0x751   : > { %7197 = vst.msk [vmem:[#allocation2 + $0x108] sm:$0xff] %vm3689_vm4, %v7157_v36 }
 0x752   : > { %7623 = vrot.lane.b32.xlu1 %v7586_v0, %s10491_s20  ;;  %v6790_v8 = vpop.permute.xlu1 %6789 }
 0x753   : > { %v6875_v20 = vadd.f32 %v6790_v8, %v14800_v31 }
 0x754   : > { %v6792_v43 = vpop.permute.xlu2 %6791  ;;  %v14944_v10 = vpop.f32.mrf.mxu3 }
 0x755   : > { %v7468_v34 = vrot.slane %v14944_v10, 1  ;;  %v7587_v18 = vrot.slane %v14944_v10, 2  ;;  %v6876_v4 = vadd.f32 %v6792_v43, %v14816_v51 }
 0x757   : > { %v7469_v39 = vsel %vm1605_vm3, %v7466_v50, %v7468_v34  ;;  %v7588_v2 = vsel %vm2565_vm2, %v7585_v21, %v7587_v18 }
 0x758   : > { %7619 = vrot.lane.b32.xlu2 %v7582_v22, %s10491_s20  ;;  %7506 = vrot.lane.b32.xlu0 %v7469_v39, %s10492_s21  ;;  %v7220_v49 = vld [vmem:[#allocation2 + $0x100] ss:$2 sm:$0xff] }
 0x75c   : > { %v7029_v38 = vpop.permute.xlu2 %7028 }
 0x75d   : > { %v7114_v56 = vadd.f32 %v7029_v38, %v6875_v20 }
 0x75e   : > { %v14954_v41 = vpop.f32.mrf.mxu3 }
 0x75f   : > { %v7158_v60 = vadd.f32 %v14627_v12, %v7114_v56  ;;  %v7470_v31 = vrot.slane %v14954_v41, 1  ;;  %v7589_v37 = vrot.slane %v14954_v41, 2 }
 0x760   : > { %7625 = vrot.lane.b32.xlu2 %v7588_v2, %s10491_s20  ;;  %7621 = vrot.lane.b32.xlu0 %v7584_v5, %s10491_s20 }
 0x761   : > { %7198 = vst.msk [vmem:[#allocation2 + $0x110] sm:$0xff] %vm3689_vm4, %v7158_v60  ;;  %v7471_v12 = vsel %vm1605_vm3, %v7468_v34, %v7470_v31  ;;  %v7590_v17 = vsel %vm2565_vm2, %v7587_v18, %v7589_v37 }
 0x766   : > { %v14962_v40 = vpop.f32.mrf.mxu3 }
 0x767   : > { %v7472_v46 = vrot.slane %v14962_v40, 1  ;;  %v7591_v59 = vrot.slane %v14962_v40, 2 }
 0x768   : > { %7508 = vrot.lane.b32.xlu0 %v7471_v12, %s10492_s21  ;;  %v7260_v55 = vld [vmem:[#allocation2 + $0x102] ss:$2 sm:$0xff] }
 0x769   : > { %v7473_v15 = vsel %vm1605_vm3, %v7470_v31, %v7472_v46  ;;  %v7592_v21 = vsel %vm2565_vm2, %v7589_v37, %v7591_v59 }
 0x76a   : > { %7510 = vrot.lane.b32.xlu1 %v7473_v15, %s10492_s21 }
 0x76c   : > { %v6796_v47 = vpop.permute.xlu2 %6795  ;;  %v7031_v1 = vpop.permute.xlu0 %7030 }
 0x76d   : > { %v7115_v9 = vadd.f32 %v7031_v1, %v6876_v4  ;;  %v6878_v51 = vadd.f32 %v6796_v47, %v14851_v54 }
 0x76f   : > { %v7159_v53 = vadd.f32 %v14974_v25, %v7115_v9 }
 0x771   : > { %7199 = vst.msk [vmem:[#allocation2 + $0x118] sm:$0xff] %vm3689_vm4, %v7159_v53 }
 0x772   : > { %7627 = vrot.lane.b32.xlu1 %v7590_v17, %s10491_s20 }
 0x774   : > { %v7035_v61 = vpop.permute.xlu2 %7034  ;;  %v7033_v29 = vpop.permute.xlu1 %7032 }
 0x775   : > { %v7117_v23 = vadd.f32 %v7035_v61, %v6878_v51  ;;  %v6794_v35 = vpop.permute.xlu0 %6793 }
 0x776   : > { %v6877_v24 = vadd.f32 %v6794_v35, %v14837_v13  ;;  %v14983_v27 = vpop.f32.mrf.mxu3  ;;  %v7240_v13 = vld [vmem:[#allocation2 + $0x101] ss:$2 sm:$0xff] }
 0x777   : > { %v7161_v63 = vadd.f32 %v14974_v25, %v7117_v23  ;;  %v7474_v52 = vrot.slane %v14983_v27, 1  ;;  %v7280_v62 = vmax.f32 %v7220_v49, %v7240_v13  ;;  %v7593_v26 = vrot.slane %v14983_v27, 2 }
 0x778   : > { %v7116_v32 = vadd.f32 %v7033_v29, %v6877_v24  ;;  %v7221_v30 = vld [vmem:[#allocation2 + $0x110] ss:$2 sm:$0xff]  ;;  %v7241_v6 = vld [vmem:[#allocation2 + $0x111] ss:$2 sm:$0xff] }
 0x779   : > { %7201 = vst.msk [vmem:[#allocation2 + $0x128] sm:$0xff] %vm3689_vm4, %v7161_v63  ;;  %v7475_v54 = vsel %vm1605_vm3, %v7472_v46, %v7474_v52  ;;  %v7300_v50 = vmax.f32 %v7280_v62, %v7260_v55  ;;  %v7281_v48 = vmax.f32 %v7221_v30, %v7241_v6  ;;  %v7594_v22 = vsel %vm2565_vm2, %v7591_v59, %v7593_v26 }
 0x77a   : > { %v7160_v16 = vadd.f32 %v14974_v25, %v7116_v32  ;;  %7512 = vrot.lane.b32.xlu2 %v7475_v54, %s10492_s21 }
 0x77b   : > { %v7320_v43 = vmax.f32 %v7300_v50, 0.0 }
 0x77c   : > { %7200 = vst.msk [vmem:[#allocation2 + $0x120] sm:$0xff] %vm3689_vm4, %v7160_v16 }
 0x77e   : > { %v14992_v19 = vpop.f32.mrf.mxu3 }
 0x77f   : > { %v7476_v3 = vrot.slane %v14992_v19, 1  ;;  %v7595_v45 = vrot.slane %v14992_v19, 2 }
 0x781   : > { %v7596_v42 = vsel %vm2565_vm2, %v7593_v26, %v7595_v45  ;;  %v7477_v36 = vsel %vm1605_vm3, %v7474_v52, %v7476_v3 }
 0x782   : > { %7629 = vrot.lane.b32.xlu2 %v7592_v21, %s10491_s20  ;;  %7633 = vrot.lane.b32.xlu1 %v7596_v42, %s10491_s20 }
 0x783   : > { %v7261_v0 = vld [vmem:[#allocation2 + $0x112] ss:$2 sm:$0xff]  ;;  %7514 = vrot.lane.b32.xlu0 %v7477_v36, %s10492_s21  ;;  %v7242_v51 = vld [vmem:[#allocation2 + $0x121] ss:$2 sm:$0xff] }
 0x784   : > { %v7301_v11 = vmax.f32 %v7281_v48, %v7261_v0  ;;  %v7222_v17 = vld [vmem:[#allocation2 + $0x120] ss:$2 sm:$0xff]  ;;  %v7499_v54 = vpop.permute.xlu2 %7498 }
 0x785   : > { %v7282_v61 = vmax.f32 %v7222_v17, %v7242_v51  ;;  %v15049_v48 = vld [vmem:[%s15984_s8] ss:$0 sm:$0xff] }
 0x786   : > { %v7321_v34 = vmax.f32 %v7301_v11, 0.0 }
 0x788   : > { %v7332_v8 = vpack.c.bf16 %v7321_v34, %v7320_v43 }
 0x78a   : > { %9792 = vmatmul.msk.bf16.gmra.mxu3 %vm3689_vm4, %v7332_v8  ;;  %v7558_v8 = vadd.f32 %v7499_v54, %v14899_v44 }
 0x78b   : > { %v6800_v39 = vpop.permute.xlu1 %6799  ;;  %7631 = vrot.lane.b32.xlu0 %v7594_v22, %s10491_s20 }
 0x78c   : > { %v6798_v20 = vpop.permute.xlu0 %6797  ;;  %v15006_v18 = vpop.f32.mrf.mxu3  ;;  %v6880_v2 = vadd.f32 %v6800_v39, %v14885_v14 }
 0x78d   : > { %v7478_v38 = vrot.slane %v15006_v18, 1  ;;  %v7597_v56 = vrot.slane %v15006_v18, 2  ;;  %v6879_v5 = vadd.f32 %v6798_v20, %v14875_v57 }
 0x78f   : > { %v7479_v60 = vsel %vm1605_vm3, %v7476_v3, %v7478_v38  ;;  %v7598_v31 = vsel %vm2565_vm2, %v7595_v45, %v7597_v56 }
 0x790   : > { %7516 = vrot.lane.b32.xlu2 %v7479_v60, %s10492_s21  ;;  %v10332_v60 = vld [vmem:[%s15985_s9] sm:$0xff] }
 0x793   : > { %v7039_v46 = vpop.permute.xlu1 %7038  ;;  %7635 = vrot.lane.b32.xlu0 %v7598_v31, %s10491_s20 }
 0x794   : > { %v7119_v12 = vadd.f32 %v7039_v46, %v6880_v2  ;;  %v7037_v15 = vpop.permute.xlu0 %7036  ;;  %v15016_v4 = vpop.f32.mrf.mxu3 }
 0x795   : > { %v7118_v47 = vadd.f32 %v7037_v15, %v6879_v5  ;;  %v7599_v9 = vrot.slane %v15016_v4, 2  ;;  %v7480_v37 = vrot.slane %v15016_v4, 1 }
 0x796   : > { %v7163_v1 = vadd.f32 %v14974_v25, %v7119_v12 }
 0x797   : > { %v7162_v14 = vadd.f32 %v14974_v25, %v7118_v47  ;;  %v7600_v57 = vsel %vm2565_vm2, %v7597_v56, %v7599_v9  ;;  %v7481_v53 = vsel %vm1605_vm3, %v7478_v38, %v7480_v37 }
 0x798   : > { %7203 = vst.msk [vmem:[#allocation2 + $0x138] sm:$0x3f] %vm3849_vm5, %v7163_v1  ;;  %7637 = vrot.lane.b32.xlu1 %v7600_v57, %s10491_s20 }
 0x799   : > { %7202 = vst.msk [vmem:[#allocation2 + $0x130] sm:$0xff] %vm3689_vm4, %v7162_v14 }
 0x79b   : > { %7518 = vrot.lane.b32.xlu0 %v7481_v53, %s10492_s21 }
 0x7a0   : > { %v7223_v23 = vld [vmem:[#allocation2 + $0x130] ss:$2 sm:$0xff]  ;;  %v7243_v35 = vld [vmem:[#allocation2 + $0x131] ss:$2 sm:$0xff]  ;;  %v15028_v29 = vpop.f32.mrf.mxu3 }
 0x7a1   : > { %v7262_v24 = vld [vmem:[#allocation2 + $0x122] ss:$2 sm:$0xff]  ;;  %v7283_v25 = vmax.f32 %v7223_v23, %v7243_v35  ;;  %v7482_v32 = vrot.slane %v15028_v29, 1  ;;  %v7601_v52 = vrot.slane %v15028_v29, 2  ;;  %v7263_v16 = vld [vmem:[#allocation2 + $0x132] ss:$2 sm:$0xff] }
 0x7a2   : > { %v7302_v63 = vmax.f32 %v7282_v61, %v7262_v24 }
 0x7a3   : > { %v7303_v49 = vmax.f32 %v7283_v25, %v7263_v16  ;;  %v7602_v13 = vsel %vm2565_vm2, %v7599_v9, %v7601_v52  ;;  %v7483_v59 = vsel %vm1605_vm3, %v7480_v37, %v7482_v32 }
 0x7a4   : > { %7639 = vrot.lane.b32.xlu2 %v7602_v13, %s10491_s20  ;;  %7520 = vrot.lane.b32.xlu1 %v7483_v59, %s10492_s21  ;;  %v7322_v55 = vmax.f32 %v7302_v63, 0.0 }
 0x7a5   : > { %v7323_v30 = vmax.f32 %v7303_v49, 0.0 }
 0x7a7   : > { %v7333_v6 = vpack.c.bf16 %v7323_v30, %v7322_v55 }
 0x7a8   : > { %v15036_v62 = vpop.f32.mrf.mxu3 }
 0x7a9   : > { %9793 = vmatmul.msk.bf16.gmra.mxu3 %vm3689_vm4, %v7333_v6  ;;  %v7484_v26 = vrot.slane %v15036_v62, 1  ;;  %v7603_v3 = vrot.slane %v15036_v62, 2 }
 0x7aa   : > { %v7505_v45 = vpop.permute.xlu2 %7504 }
 0x7ab   : > { %v7604_v50 = vsel %vm2565_vm2, %v7601_v52, %v7603_v3  ;;  %v7485_v21 = vsel %vm1605_vm3, %v7482_v32, %v7484_v26  ;;  %v7561_v38 = vadd.f32 %v7505_v45, %v14921_v7 }
 0x7ac   : > { %7641 = vrot.lane.b32.xlu0 %v7604_v50, %s10491_s20  ;;  %7522 = vrot.lane.b32.xlu2 %v7485_v21, %s10492_s21  ;;  %v7501_v42 = vpop.permute.xlu0 %7500 }
 0x7ad   : > { %v7559_v36 = vadd.f32 %v7501_v42, %v14904_v33  ;;  %v10333_v33 = vld [vmem:[%s15985_s9 + $0x8] sm:$0xff] }
 0x7ae   : > { %7843 = vmatpush.bf16.msra.mxu3 %v10333_v33 }
 0x7b2   : > { %v7620_v0 = vpop.permute.xlu2 %7619  ;;  %7844 = vmatpush.bf16.msra.mxu3 %v10332_v60 }
 0x7b3   : > { %v7678_v11 = vadd.f32 %v7620_v0, %v7559_v36 }
 0x7b4   : > { %v7503_v43 = vpop.permute.xlu1 %7502 }
 0x7b5   : > { %v7702_v34 = vadd.f32 %v15049_v48, %v7678_v11 }
 0x7b7   : > { %7722 = vst.msk [vmem:[#allocation2 + $0x8] sm:$0xff] %vm3689_vm4, %v7702_v34 }
 0x7ba   : > { %v7626_v46 = vpop.permute.xlu2 %7625 }
 0x7bc   : > { %v7618_v22 = vpop.permute.xlu1 %7617 }
 0x7bd   : > { %v7677_v39 = vadd.f32 %v7618_v22, %v7558_v8 }
 0x7bf   : > { %v7701_v20 = vadd.f32 %v15049_v48, %v7677_v39 }
 0x7c1   : > { %7721 = vst.msk [vmem:[#allocation2] sm:$0xff] %vm3689_vm4, %v7701_v20 }
 0x7c4   : > { %v7624_v56 = vpop.permute.xlu1 %7623 }
 0x7c5   : > { %v7680_v2 = vadd.f32 %v7624_v56, %v7561_v38 }
 0x7c7   : > { %v7704_v44 = vadd.f32 %v15049_v48, %v7680_v2 }
 0x7c8   : > { %v7751_v35 = vld [vmem:[#allocation2 + $0x1] ss:$2 sm:$0xff] }
 0x7c9   : > { %7724 = vst.msk [vmem:[#allocation2 + $0x18] sm:$0xff] %vm3689_vm4, %v7704_v44 }
 0x7ca   : > { %v7507_v5 = vpop.permute.xlu0 %7506 }
 0x7cb   : > { %v7562_v31 = vadd.f32 %v7507_v5, %v14932_v28  ;;  %v7560_v28 = vadd.f32 %v7503_v43, %v14914_v58  ;;  %v7741_v58 = vld [vmem:[#allocation2] ss:$2 sm:$0xff] }
 0x7cc   : > { %v15066_v12 = vpop.f32.mrf.mxu3  ;;  %v7771_v63 = vmax.f32 %v7741_v58, %v7751_v35 }
 0x7cd   : > { %v7681_v15 = vadd.f32 %v7626_v46, %v7562_v31  ;;  %v7486_v7 = vrot.slane %v15066_v12, 1  ;;  %v7605_v47 = vrot.slane %v15066_v12, 2 }
 0x7cf   : > { %v7705_v1 = vadd.f32 %v15049_v48, %v7681_v15  ;;  %v7606_v9 = vsel %vm2565_vm2, %v7603_v3, %v7605_v47  ;;  %v7487_v37 = vsel %vm1605_vm3, %v7484_v26, %v7486_v7 }
 0x7d0   : > { %7643 = vrot.lane.b32.xlu2 %v7606_v9, %s10491_s20  ;;  %7524 = vrot.lane.b32.xlu1 %v7487_v37, %s10492_s21 }
 0x7d1   : > { %7725 = vst.msk [vmem:[#allocation2 + $0x20] sm:$0xff] %vm3689_vm4, %v7705_v1 }
 0x7d2   : > { %v7622_v14 = vpop.permute.xlu0 %7621 }
 0x7d3   : > { %v7679_v57 = vadd.f32 %v7622_v14, %v7560_v28 }
 0x7d4   : > { %v7513_v53 = vpop.permute.xlu2 %7512  ;;  %v15079_v17 = vpop.f32.mrf.mxu3 }
 0x7d5   : > { %v7703_v51 = vadd.f32 %v15049_v48, %v7679_v57  ;;  %v7488_v61 = vrot.slane %v15079_v17, 1  ;;  %v7565_v8 = vadd.f32 %v7513_v53, %v14962_v40  ;;  %v7607_v28 = vrot.slane %v15079_v17, 2 }
 0x7d7   : > { %7723 = vst.msk [vmem:[#allocation2 + $0x10] sm:$0xff] %vm3689_vm4, %v7703_v51  ;;  %v7489_v23 = vsel %vm1605_vm3, %v7486_v7, %v7488_v61 }
 0x7d8   : > { %7526 = vrot.lane.b32.xlu2 %v7489_v23, %s10492_s21 }
 0x7da   : > { %v7509_v55 = vpop.permute.xlu0 %7508 }
 0x7db   : > { %v7563_v3 = vadd.f32 %v7509_v55, %v14944_v10 }
 0x7dc   : > { %v7511_v24 = vpop.permute.xlu1 %7510  ;;  %v7630_v32 = vpop.permute.xlu2 %7629 }
 0x7dd   : > { %v7564_v25 = vadd.f32 %v7511_v24, %v14954_v41 }
 0x7de   : > { %v7742_v52 = vld [vmem:[#allocation2 + $0x10] ss:$2 sm:$0xff]  ;;  %v7752_v16 = vld [vmem:[#allocation2 + $0x11] ss:$2 sm:$0xff] }
 0x7df   : > { %v7761_v54 = vld [vmem:[#allocation2 + $0x2] ss:$2 sm:$0xff]  ;;  %v7683_v49 = vadd.f32 %v7630_v32, %v7564_v25  ;;  %v7772_v13 = vmax.f32 %v7742_v52, %v7752_v16  ;;  %v7762_v30 = vld [vmem:[#allocation2 + $0x12] ss:$2 sm:$0xff] }
 0x7e0   : > { %v7781_v59 = vmax.f32 %v7771_v63, %v7761_v54 }
 0x7e1   : > { %v7707_v6 = vadd.f32 %v15049_v48, %v7683_v49  ;;  %v7782_v26 = vmax.f32 %v7772_v13, %v7762_v30  ;;  %v7608_v13 = vsel %vm2565_vm2, %v7605_v47, %v7607_v28 }
 0x7e2   : > { %v7791_v45 = vmax.f32 %v7781_v59, 0.0 }
 0x7e3   : > { %7727 = vst.msk [vmem:[#allocation2 + $0x30] sm:$0xff] %vm3689_vm4, %v7707_v6  ;;  %v7792_v50 = vmax.f32 %v7782_v26, 0.0 }
 0x7e4   : > { %v7628_v41 = vpop.permute.xlu1 %7627 }
 0x7e5   : > { %v7682_v21 = vadd.f32 %v7628_v41, %v7563_v3  ;;  %v7801_v42 = vpack.c.bf16 %v7792_v50, %v7791_v45 }
 0x7e7   : > { %v7706_v36 = vadd.f32 %v15049_v48, %v7682_v21  ;;  %9802 = vmatmul.msk.bf16.vlgmr.msra.gmra.mxu3 %vm3689_vm4, %v7801_v42 }
 0x7e9   : > { %7726 = vst.msk [vmem:[#allocation2 + $0x28] sm:$0xff] %vm3689_vm4, %v7706_v36 }
 0x7ea   : > { %v7517_v33 = vpop.permute.xlu2 %7516 }
 0x7eb   : > { %v7567_v60 = vadd.f32 %v7517_v33, %v14992_v19 }
 0x7f0   : > { %v7743_v38 = vld [vmem:[#allocation2 + $0x20] ss:$2 sm:$0xff]  ;;  %v7753_v56 = vld [vmem:[#allocation2 + $0x21] ss:$2 sm:$0xff] }
 0x7f1   : > { %v7773_v44 = vmax.f32 %v7743_v38, %v7753_v56  ;;  %v7763_v46 = vld [vmem:[#allocation2 + $0x22] ss:$2 sm:$0xff] }
 0x7f3   : > { %v7783_v7 = vmax.f32 %v7773_v44, %v7763_v46 }
 0x7f4   : > { %v7634_v43 = vpop.permute.xlu1 %7633 }
 0x7f5   : > { %v7515_v0 = vpop.permute.xlu0 %7514  ;;  %v7793_v23 = vmax.f32 %v7783_v7, 0.0 }
 0x7f6   : > { %v7566_v11 = vadd.f32 %v7515_v0, %v14983_v27 }
 0x7f8   : > { %v7685_v34 = vadd.f32 %v7634_v43, %v7566_v11 }
 0x7fa   : > { %v7709_v10 = vadd.f32 %v15049_v48, %v7685_v34 }
 0x7fc   : > { %7729 = vst.msk [vmem:[#allocation2 + $0x40] sm:$0xff] %vm3689_vm4, %v7709_v10 }
 0x7fd   : > { %v7632_v22 = vpop.permute.xlu0 %7631 }
 0x7fe   : > { %v7684_v39 = vadd.f32 %v7632_v22, %v7565_v8  ;;  %v7640_v25 = vpop.permute.xlu2 %7639 }
 0x800   : > { %v7708_v20 = vadd.f32 %v15049_v48, %v7684_v39 }
 0x802   : > { %7728 = vst.msk [vmem:[#allocation2 + $0x38] sm:$0xff] %vm3689_vm4, %v7708_v20 }
 0x805   : > { %v7636_v27 = vpop.permute.xlu0 %7635 }
 0x806   : > { %v7686_v2 = vadd.f32 %v7636_v27, %v7567_v60  ;;  %v7523_v6 = vpop.permute.xlu2 %7522 }
 0x808   : > { %v7710_v5 = vadd.f32 %v15049_v48, %v7686_v2 }
 0x809   : > { %v7744_v31 = vld [vmem:[#allocation2 + $0x30] ss:$2 sm:$0xff]  ;;  %v7754_v40 = vld [vmem:[#allocation2 + $0x31] ss:$2 sm:$0xff] }
 0x80a   : > { %7730 = vst.msk [vmem:[#allocation2 + $0x48] sm:$0xff] %vm3689_vm4, %v7710_v5  ;;  %v7774_v15 = vmax.f32 %v7744_v31, %v7754_v40  ;;  %v7764_v1 = vld [vmem:[#allocation2 + $0x32] ss:$2 sm:$0xff]  ;;  %v7638_v53 = vpop.permute.xlu1 %7637 }
 0x80c   : > { %v7784_v37 = vmax.f32 %v7774_v15, %v7764_v1 }
 0x80d   : > { %v15104_v9 = vpop.f32.mrf.mxu3  ;;  %v7519_v57 = vpop.permute.xlu0 %7518 }
 0x80e   : > { %v7490_v19 = vrot.slane %v15104_v9, 1  ;;  %v7609_v14 = vrot.slane %v15104_v9, 2  ;;  %v7568_v51 = vadd.f32 %v7519_v57, %v15006_v18  ;;  %v7794_v58 = vmax.f32 %v7784_v37, 0.0 }
 0x810   : > { %v7610_v35 = vsel %vm2565_vm2, %v7607_v28, %v7609_v14  ;;  %v7491_v24 = vsel %vm1605_vm3, %v7488_v61, %v7490_v19  ;;  %v7687_v63 = vadd.f32 %v7638_v53, %v7568_v51  ;;  %v7802_v32 = vpack.c.bf16 %v7794_v58, %v7793_v23 }
 0x811   : > { %7647 = vrot.lane.b32.xlu1 %v7610_v35, %s10491_s20  ;;  %7528 = vrot.lane.b32.xlu0 %v7491_v24, %s10492_s21  ;;  %v7745_v50 = vld [vmem:[#allocation2 + $0x40] ss:$2 sm:$0xff]  ;;  %v7755_v41 = vld [vmem:[#allocation2 + $0x41] ss:$2 sm:$0xff] }
 0x812   : > { %v7711_v52 = vadd.f32 %v15049_v48, %v7687_v63  ;;  %9803 = vmatmul.msk.bf16.gmra.mxu3 %vm3689_vm4, %v7802_v32  ;;  %v7775_v0 = vmax.f32 %v7745_v50, %v7755_v41 }
 0x814   : > { %7731 = vst.msk [vmem:[#allocation2 + $0x50] sm:$0xff] %vm3689_vm4, %v7711_v52 }
 0x815   : > { %v15119_v18 = vpop.f32.mrf.mxu3 }
 0x816   : > { %v7492_v16 = vrot.slane %v15119_v18, 1  ;;  %v7611_v54 = vrot.slane %v15119_v18, 2  ;;  %v7521_v61 = vpop.permute.xlu1 %7520 }
 0x817   : > { %v7569_v49 = vadd.f32 %v7521_v61, %v15016_v4  ;;  %v7570_v4 = vadd.f32 %v7523_v6, %v15028_v29 }
 0x818   : > { %v7612_v59 = vsel %vm2565_vm2, %v7609_v14, %v7611_v54  ;;  %v7493_v55 = vsel %vm1605_vm3, %v7490_v19, %v7492_v16 }
 0x819   : > { %7645 = vrot.lane.b32.xlu0 %v7608_v13, %s10491_s20  ;;  %7649 = vrot.lane.b32.xlu2 %v7612_v59, %s10491_s20  ;;  %v7688_v30 = vadd.f32 %v7640_v25, %v7569_v49 }
 0x81a   : > { %7530 = vrot.lane.b32.xlu1 %v7493_v55, %s10492_s21 }
 0x81b   : > { %v7712_v26 = vadd.f32 %v15049_v48, %v7688_v30  ;;  %v7765_v36 = vld [vmem:[#allocation2 + $0x42] ss:$2 sm:$0xff] }
 0x81c   : > { %v7785_v43 = vmax.f32 %v7775_v0, %v7765_v36 }
 0x81d   : > { %7732 = vst.msk [vmem:[#allocation2 + $0x58] sm:$0xff] %vm3689_vm4, %v7712_v26 }
 0x81e   : > { %v7642_v3 = vpop.permute.xlu0 %7641  ;;  %v7795_v22 = vmax.f32 %v7785_v43, 0.0 }
 0x81f   : > { %v7689_v47 = vadd.f32 %v7642_v3, %v7570_v4 }
 0x821   : > { %v7713_v45 = vadd.f32 %v15049_v48, %v7689_v47 }
 0x823   : > { %7733 = vst.msk [vmem:[#allocation2 + $0x60] sm:$0xff] %vm3689_vm4, %v7713_v45 }
 0x824   : > { %v7746_v21 = vld [vmem:[#allocation2 + $0x50] ss:$2 sm:$0xff]  ;;  %v7756_v42 = vld [vmem:[#allocation2 + $0x51] ss:$2 sm:$0xff] }
 0x825   : > { %v7776_v11 = vmax.f32 %v7746_v21, %v7756_v42 }
 0x82a   : > { %v7766_v34 = vld [vmem:[#allocation2 + $0x52] ss:$2 sm:$0xff]  ;;  %v7644_v46 = vpop.permute.xlu2 %7643 }
 0x82b   : > { %v7786_v29 = vmax.f32 %v7776_v11, %v7766_v34 }
 0x82c   : > { %v15137_v10 = vpop.f32.mrf.mxu3 }
 0x82d   : > { %v7494_v8 = vrot.slane %v15137_v10, 1  ;;  %v7796_v39 = vmax.f32 %v7786_v29, 0.0  ;;  %v7613_v38 = vrot.slane %v15137_v10, 2 }
 0x82f   : > { %v7495_v20 = vsel %vm1605_vm3, %v7492_v16, %v7494_v8  ;;  %v7803_v33 = vpack.c.bf16 %v7796_v39, %v7795_v22  ;;  %v7614_v27 = vsel %vm2565_vm2, %v7611_v54, %v7613_v38 }
 0x830   : > { %7532 = vrot.lane.b32.xlu0 %v7495_v20, %s10492_s21 }
 0x831   : > { %9804 = vmatmul.msk.bf16.gmra.mxu3 %vm3689_vm4, %v7803_v33 }
 0x832   : > { %v7527_v51 = vpop.permute.xlu2 %7526 }
 0x833   : > { %v7572_v32 = vadd.f32 %v7527_v51, %v15066_v12 }
 0x834   : > { %v7436_v56 = vpop.f32.mrf.mxu3 }
 0x835   : > { %v7496_v60 = vrot.slane %v7436_v56, 1  ;;  %v7615_v44 = vrot.slane %v7436_v56, 2 }
 0x837   : > { %7536 = vrot.lane.b32.xlu2 %v7496_v60, %s10492_s21  ;;  %v7497_v2 = vsel %vm1605_vm3, %v7494_v8, %v7496_v60  ;;  %v7616_v5 = vsel %vm2565_vm2, %v7613_v38, %v7615_v44 }
 0x838   : > { %7651 = vrot.lane.b32.xlu0 %v7614_v27, %s10491_s20  ;;  %7534 = vrot.lane.b32.xlu1 %v7497_v2, %s10492_s21 }
 0x83f   : > { %7655 = vrot.lane.b32.xlu2 %v7615_v44, %s10491_s20 }
 0x840   : > { %7653 = vrot.lane.b32.xlu1 %v7616_v5, %s10491_s20 }
 0x842   : > { %v7525_v31 = vpop.permute.xlu1 %7524 }
 0x843   : > { %v7571_v40 = vadd.f32 %v7525_v31, %v15036_v62 }
 0x845   : > { %v7690_v15 = vadd.f32 %v7644_v46, %v7571_v40 }
 0x847   : > { %v7714_v7 = vadd.f32 %v15049_v48, %v7690_v15 }
 0x849   : > { %7734 = vst.msk [vmem:[#allocation2 + $0x68] sm:$0xff] %vm3689_vm4, %v7714_v7 }
 0x850   : > { %v7747_v55 = vld [vmem:[#allocation2 + $0x60] ss:$2 sm:$0xff]  ;;  %v7757_v30 = vld [vmem:[#allocation2 + $0x61] ss:$2 sm:$0xff] }
 0x851   : > { %v7777_v3 = vmax.f32 %v7747_v55, %v7757_v30 }
 0x86a   : > { %v15155_v1 = vpop.f32.mrf.mxu3 }
 0x86b   : > { %v7881_v28 = vrot.slane %v15155_v1, 1  ;;  %v7940_v19 = vrot.slane %v15155_v1, 2 }
 0x872   : > { %v15157_v37 = vpop.f32.mrf.mxu3 }
 0x873   : > { %v7882_v14 = vrot.slane %v15157_v37, 1  ;;  %v7941_v57 = vrot.slane %v15157_v37, 2  ;;  %v7650_v63 = vpop.permute.xlu2 %7649 }
 0x875   : > { %v7942_v62 = vsel %vm2565_vm2, %v7940_v19, %v7941_v57  ;;  %v7883_v53 = vsel %vm1605_vm3, %v7881_v28, %v7882_v14 }
 0x876   : > { %7959 = vrot.lane.b32.xlu2 %v7942_v62, %s10491_s20  ;;  %7900 = vrot.lane.b32.xlu0 %v7883_v53, %s10492_s21 }
 0x883   : > { %v7648_v23 = vpop.permute.xlu1 %7647  ;;  %v7529_v58 = vpop.permute.xlu0 %7528 }
 0x884   : > { %v7573_v35 = vadd.f32 %v7529_v58, %v15079_v17 }
 0x886   : > { %v7692_v24 = vadd.f32 %v7648_v23, %v7573_v35 }
 0x888   : > { %v7716_v25 = vadd.f32 %v15049_v48, %v7692_v24 }
 0x88a   : > { %7736 = vst.msk [vmem:[#allocation2 + $0x78] sm:$0xff] %vm3689_vm4, %v7716_v25 }
 0x88b   : > { %v7646_v52 = vpop.permute.xlu0 %7645 }
 0x88c   : > { %v7531_v16 = vpop.permute.xlu1 %7530  ;;  %v7691_v54 = vadd.f32 %v7646_v52, %v7572_v32 }
 0x88d   : > { %v7574_v61 = vadd.f32 %v7531_v16, %v15104_v9 }
 0x88e   : > { %v7715_v49 = vadd.f32 %v15049_v48, %v7691_v54 }
 0x88f   : > { %v7693_v13 = vadd.f32 %v7650_v63, %v7574_v61 }
 0x890   : > { %7735 = vst.msk [vmem:[#allocation2 + $0x70] sm:$0xff] %vm3689_vm4, %v7715_v49 }
 0x891   : > { %v7717_v17 = vadd.f32 %v15049_v48, %v7693_v13  ;;  %v7537_v59 = vpop.permute.xlu2 %7536 }
 0x892   : > { %v7577_v47 = vadd.f32 %v7537_v59, %v7436_v56  ;;  %v10334_v59 = vld [vmem:[%s15987_s11] sm:$0xff] }
 0x893   : > { %7737 = vst.msk [vmem:[#allocation2 + $0x80] sm:$0xff] %vm3689_vm4, %v7717_v17  ;;  %v10335_v17 = vld [vmem:[%s15987_s11 + $0x8] sm:$0xff] }
 0x894   : > { %8065 = vmatpush.bf16.msrb.mxu3 %v10335_v17 }
 0x895   : > { %v15176_v12 = vpop.f32.mrf.mxu3 }
 0x896   : > { %v7884_v6 = vrot.slane %v15176_v12, 1  ;;  %v7943_v26 = vrot.slane %v15176_v12, 2 }
 0x897   : > { %v7748_v4 = vld [vmem:[#allocation2 + $0x70] ss:$2 sm:$0xff]  ;;  %v7758_v9 = vld [vmem:[#allocation2 + $0x71] ss:$2 sm:$0xff] }
 0x898   : > { %v7767_v45 = vld [vmem:[#allocation2 + $0x62] ss:$2 sm:$0xff]  ;;  %v7778_v50 = vmax.f32 %v7748_v4, %v7758_v9  ;;  %v7944_v41 = vsel %vm2565_vm2, %v7941_v57, %v7943_v26  ;;  %v7885_v21 = vsel %vm1605_vm3, %v7882_v14, %v7884_v6  ;;  %8066 = vmatpush.bf16.msrb.mxu3 %v10334_v59 }
 0x899   : > { %v7656_v42 = vpop.permute.xlu2 %7655  ;;  %v7787_v36 = vmax.f32 %v7777_v3, %v7767_v45  ;;  %7961 = vrot.lane.b32.xlu0 %v7944_v41, %s10491_s20  ;;  %7902 = vrot.lane.b32.xlu1 %v7885_v21, %s10492_s21 }
 0x89a   : > { %v7696_v0 = vadd.f32 %v7656_v42, %v7577_v47  ;;  %v7768_v11 = vld [vmem:[#allocation2 + $0x72] ss:$2 sm:$0xff] }
 0x89b   : > { %v7788_v43 = vmax.f32 %v7778_v50, %v7768_v11  ;;  %v7797_v29 = vmax.f32 %v7787_v36, 0.0 }
 0x89c   : > { %v7720_v34 = vadd.f32 %v15049_v48, %v7696_v0 }
 0x89d   : > { %v7798_v8 = vmax.f32 %v7788_v43, 0.0  ;;  %v15186_v22 = vpop.f32.mrf.mxu3 }
 0x89e   : > { %7740 = vst.msk [vmem:[#allocation2 + $0x98] sm:$0x3f] %vm3849_vm5, %v7720_v34  ;;  %v7886_v39 = vrot.slane %v15186_v22, 1  ;;  %v7945_v20 = vrot.slane %v15186_v22, 2 }
 0x89f   : > { %v7804_v33 = vpack.c.bf16 %v7798_v8, %v7797_v29 }
 0x8a0   : > { %v7946_v38 = vsel %vm2565_vm2, %v7943_v26, %v7945_v20  ;;  %v7887_v56 = vsel %vm1605_vm3, %v7884_v6, %v7886_v39  ;;  %v15228_v26 = vld [vmem:[%s15986_s10] ss:$0 sm:$0xff] }
 0x8a1   : > { %9805 = vmatmul.msk.bf16.gmra.mxu3 %vm3689_vm4, %v7804_v33  ;;  %7963 = vrot.lane.b32.xlu0 %v7946_v38, %s10491_s20 }
 0x8a2   : > { %7904 = vrot.lane.b32.xlu1 %v7887_v56, %s10492_s21  ;;  %v7533_v60 = vpop.permute.xlu0 %7532 }
 0x8a3   : > { %v7575_v27 = vadd.f32 %v7533_v60, %v15119_v18 }
 0x8aa   : > { %v7535_v2 = vpop.permute.xlu1 %7534  ;;  %v7652_v44 = vpop.permute.xlu0 %7651 }
 0x8ab   : > { %v7694_v5 = vadd.f32 %v7652_v44, %v7575_v27  ;;  %v7576_v40 = vadd.f32 %v7535_v2, %v15137_v10 }
 0x8ad   : > { %v7718_v31 = vadd.f32 %v15049_v48, %v7694_v5 }
 0x8af   : > { %7738 = vst.msk [vmem:[#allocation2 + $0x88] sm:$0xff] %vm3689_vm4, %v7718_v31 }
 0x8b2   : > { %v7654_v46 = vpop.permute.xlu1 %7653 }
 0x8b3   : > { %v7695_v15 = vadd.f32 %v7654_v46, %v7576_v40 }
 0x8b4   : > { %v15200_v28 = vpop.f32.mrf.mxu3 }
 0x8b5   : > { %v7719_v7 = vadd.f32 %v15049_v48, %v7695_v15  ;;  %v7888_v19 = vrot.slane %v15200_v28, 1  ;;  %v7947_v14 = vrot.slane %v15200_v28, 2 }
 0x8b6   : > { %v7749_v10 = vld [vmem:[#allocation2 + $0x80] ss:$2 sm:$0xff]  ;;  %v7759_v62 = vld [vmem:[#allocation2 + $0x81] ss:$2 sm:$0xff] }
 0x8b7   : > { %7739 = vst.msk [vmem:[#allocation2 + $0x90] sm:$0xff] %vm3689_vm4, %v7719_v7  ;;  %v7948_v18 = vsel %vm2565_vm2, %v7945_v20, %v7947_v14  ;;  %v7889_v57 = vsel %vm1605_vm3, %v7886_v39, %v7888_v19  ;;  %v7779_v35 = vmax.f32 %v7749_v10, %v7759_v62 }
 0x8b8   : > { %7965 = vrot.lane.b32.xlu1 %v7948_v18, %s10491_s20  ;;  %7906 = vrot.lane.b32.xlu2 %v7889_v57, %s10492_s21 }
 0x8bc   : > { %v15209_v53 = vpop.f32.mrf.mxu3 }
 0x8bd   : > { %v7890_v48 = vrot.slane %v15209_v53, 1  ;;  %v7949_v51 = vrot.slane %v15209_v53, 2 }
 0x8be   : > { %v7750_v23 = vld [vmem:[#allocation2 + $0x90] ss:$2 sm:$0xff]  ;;  %v7760_v58 = vld [vmem:[#allocation2 + $0x91] ss:$2 sm:$0xff] }
 0x8bf   : > { %v7769_v24 = vld [vmem:[#allocation2 + $0x82] ss:$2 sm:$0xff]  ;;  %v7780_v25 = vmax.f32 %v7750_v23, %v7760_v58  ;;  %v7950_v63 = vsel %vm2565_vm2, %v7947_v14, %v7949_v51  ;;  %v7891_v32 = vsel %vm1605_vm3, %v7888_v19, %v7890_v48  ;;  %v7770_v52 = vld [vmem:[#allocation2 + $0x92] ss:$2 sm:$0xff] }
 0x8c0   : > { %v7789_v16 = vmax.f32 %v7779_v35, %v7769_v24  ;;  %7967 = vrot.lane.b32.xlu1 %v7950_v63, %s10491_s20  ;;  %7908 = vrot.lane.b32.xlu2 %v7891_v32, %s10492_s21 }
 0x8c1   : > { %v7790_v54 = vmax.f32 %v7780_v25, %v7770_v52 }
 0x8c2   : > { %v7799_v61 = vmax.f32 %v7789_v16, 0.0 }
 0x8c3   : > { %v7800_v49 = vmax.f32 %v7790_v54, 0.0 }
 0x8c5   : > { %v7805_v13 = vpack.c.bf16 %v7800_v49, %v7799_v61 }
 0x8c7   : > { %9806 = vmatmul.msk.bf16.gmra.mxu3 %vm3689_vm4, %v7805_v13 }
 0x8d0   : > { %v7960_v6 = vpop.permute.xlu2 %7959 }
 0x8e8   : > { %v7901_v55 = vpop.permute.xlu0 %7900 }
 0x8e9   : > { %v7930_v30 = vadd.f32 %v7901_v55, %v15155_v1 }
 0x8eb   : > { %v7989_v4 = vadd.f32 %v7960_v6, %v7930_v30 }
 0x8ed   : > { %v8003_v45 = vadd.f32 %v15228_v26, %v7989_v4 }
 0x8ef   : > { %v8013_v21 = vmax.f32 %v8003_v45, 0.0 }
 0x90b   : > { %v7903_v9 = vpop.permute.xlu1 %7902  ;;  %v7962_v47 = vpop.permute.xlu0 %7961 }
 0x90c   : > { %v7931_v3 = vadd.f32 %v7903_v9, %v15157_v37  ;;  %v9870_v9 = vld [vmem:[%s15989_s13 + $0xc0] sm:$0xf] }
 0x90e   : > { %v7990_v50 = vadd.f32 %v7962_v47, %v7931_v3  ;;  %v10364_v3 = vld [vmem:[%s15989_s13 + $0xdc] sm:$0xf0] }
 0x90f   : > { %v9871_v47 = vor.u32 %v10364_v3, %v9870_v9  ;;  %v10356_v9 = vld [vmem:[%s15989_s13 + $0x9c] sm:$0xf0] }
 0x910   : > { %v8004_v41 = vadd.f32 %v15228_v26, %v7990_v50 }
 0x911   : > { %8382 = vmatpush.bf16.msra.mxu2 %v9871_v47 }
 0x912   : > { %v8014_v42 = vmax.f32 %v8004_v41, 0.0  ;;  %v7907_v34 = vpop.permute.xlu2 %7906 }
 0x913   : > { %v7964_v29 = vpop.permute.xlu0 %7963  ;;  %v7933_v33 = vadd.f32 %v7907_v34, %v15186_v22 }
 0x914   : > { %v8023_v36 = vpack.c.bf16 %v8014_v42, %v8013_v21  ;;  %v7905_v1 = vpop.permute.xlu1 %7904 }
 0x915   : > { %v7932_v0 = vadd.f32 %v7905_v1, %v15176_v12 }
 0x916   : > { %9815 = vmatmul.msk.bf16.vlgmr.msrb.gmra.mxu3 %vm3689_vm4, %v8023_v36 }
 0x917   : > { %v7991_v20 = vadd.f32 %v7964_v29, %v7932_v0 }
 0x919   : > { %v8005_v38 = vadd.f32 %v15228_v26, %v7991_v20 }
 0x91a   : > { %v7909_v23 = vpop.permute.xlu2 %7908 }
 0x91b   : > { %v8015_v40 = vmax.f32 %v8005_v38, 0.0  ;;  %v7934_v35 = vadd.f32 %v7909_v23, %v15200_v28  ;;  %v15326_v23 = vld [vmem:[%s15988_s12] ss:$0 sm:$0xff] }
 0x924   : > { %v15235_v11 = vpop.f32.mrf.mxu3 }
 0x925   : > { %v7892_v43 = vrot.slane %v15235_v11, 1  ;;  %v7951_v37 = vrot.slane %v15235_v11, 2 }
 0x927   : > { %v7952_v8 = vsel %vm2565_vm2, %v7949_v51, %v7951_v37  ;;  %v7893_v39 = vsel %vm1605_vm3, %v7890_v48, %v7892_v43 }
 0x928   : > { %7969 = vrot.lane.b32.xlu2 %v7952_v8, %s10491_s20  ;;  %7910 = vrot.lane.b32.xlu0 %v7893_v39, %s10492_s21 }
 0x92a   : > { %v7966_v12 = vpop.permute.xlu1 %7965 }
 0x92b   : > { %v7992_v56 = vadd.f32 %v7966_v12, %v7933_v33 }
 0x92c   : > { %v15245_v60 = vpop.f32.mrf.mxu3 }
 0x92d   : > { %v7894_v27 = vrot.slane %v15245_v60, 1  ;;  %v7953_v2 = vrot.slane %v15245_v60, 2  ;;  %v8006_v44 = vadd.f32 %v15228_v26, %v7992_v56 }
 0x92f   : > { %v7954_v5 = vsel %vm2565_vm2, %v7951_v37, %v7953_v2  ;;  %v7895_v31 = vsel %vm1605_vm3, %v7892_v43, %v7894_v27  ;;  %v8016_v46 = vmax.f32 %v8006_v44, 0.0 }
 0x930   : > { %7971 = vrot.lane.b32.xlu2 %v7954_v5, %s10491_s20  ;;  %7912 = vrot.lane.b32.xlu0 %v7895_v31, %s10492_s21 }
 0x931   : > { %v8024_v22 = vpack.c.bf16 %v8016_v46, %v8015_v40 }
 0x932   : > { %v7968_v58 = vpop.permute.xlu1 %7967 }
 0x933   : > { %9816 = vmatmul.msk.bf16.gmra.mxu3 %vm3689_vm4, %v8024_v22  ;;  %v7993_v24 = vadd.f32 %v7968_v58, %v7934_v35 }
 0x935   : > { %v8007_v16 = vadd.f32 %v15228_v26, %v7993_v24 }
 0x937   : > { %v8017_v49 = vmax.f32 %v8007_v16, 0.0 }
 0x94a   : > { %v15255_v15 = vpop.f32.mrf.mxu3 }
 0x94b   : > { %v7896_v7 = vrot.slane %v15255_v15, 1  ;;  %v7955_v19 = vrot.slane %v15255_v15, 2 }
 0x94d   : > { %v7956_v14 = vsel %vm2565_vm2, %v7953_v2, %v7955_v19  ;;  %v7897_v18 = vsel %vm1605_vm3, %v7894_v27, %v7896_v7 }
 0x94e   : > { %7973 = vrot.lane.b32.xlu0 %v7956_v14, %s10491_s20  ;;  %7914 = vrot.lane.b32.xlu1 %v7897_v18, %s10492_s21 }
 0x952   : > { %v15263_v57 = vpop.f32.mrf.mxu3 }
 0x953   : > { %v7898_v10 = vrot.slane %v15263_v57, 1  ;;  %v7957_v62 = vrot.slane %v15263_v57, 2 }
 0x955   : > { %7918 = vrot.lane.b32.xlu2 %v7898_v10, %s10492_s21  ;;  %v7958_v48 = vsel %vm2565_vm2, %v7955_v19, %v7957_v62  ;;  %v7899_v51 = vsel %vm1605_vm3, %v7896_v7, %v7898_v10 }
 0x956   : > { %7975 = vrot.lane.b32.xlu0 %v7958_v48, %s10491_s20  ;;  %7916 = vrot.lane.b32.xlu1 %v7899_v51, %s10492_s21 }
 0x95e   : > { %7977 = vrot.lane.b32.xlu1 %v7957_v62, %s10491_s20 }
 0x982   : > { %v7970_v52 = vpop.permute.xlu2 %7969 }
 0x98a   : > { %v7972_v0 = vpop.permute.xlu2 %7971 }
 0x999   : > { %v15274_v25 = vpop.f32.mrf.mxu3 }
 0x99a   : > { %v7911_v63 = vpop.permute.xlu0 %7910  ;;  %v8103_v17 = vrot.slane %v15274_v25, 1  ;;  %v8162_v28 = vrot.slane %v15274_v25, 2 }
 0x99b   : > { %v7935_v32 = vadd.f32 %v7911_v63, %v15209_v53 }
 0x99d   : > { %v7994_v54 = vadd.f32 %v7970_v52, %v7935_v32 }
 0x99f   : > { %v8008_v61 = vadd.f32 %v15228_v26, %v7994_v54 }
 0x9a1   : > { %v8018_v13 = vmax.f32 %v8008_v61, 0.0  ;;  %v15280_v59 = vpop.f32.mrf.mxu3 }
 0x9a2   : > { %v8104_v30 = vrot.slane %v15280_v59, 1  ;;  %v8163_v6 = vrot.slane %v15280_v59, 2  ;;  %v7913_v50 = vpop.permute.xlu0 %7912 }
 0x9a3   : > { %v8025_v55 = vpack.c.bf16 %v8018_v13, %v8017_v49  ;;  %v7936_v1 = vadd.f32 %v7913_v50, %v15235_v11 }
 0x9a4   : > { %v8164_v53 = vsel %vm2565_vm2, %v8162_v28, %v8163_v6  ;;  %v8105_v4 = vsel %vm1605_vm3, %v8103_v17, %v8104_v30 }
 0x9a5   : > { %9817 = vmatmul.msk.bf16.gmra.mxu3 %vm3689_vm4, %v8025_v55  ;;  %8181 = vrot.lane.b32.xlu1 %v8164_v53, %s10491_s20  ;;  %v7995_v43 = vadd.f32 %v7972_v0, %v7936_v1 }
 0x9a6   : > { %8122 = vrot.lane.b32.xlu2 %v8105_v4, %s10492_s21 }
 0x9a7   : > { %v8009_v12 = vadd.f32 %v15228_v26, %v7995_v43 }
 0x9a9   : > { %v8019_v27 = vmax.f32 %v8009_v12, 0.0 }
 0x9af   : > { %v7919_v31 = vpop.permute.xlu2 %7918 }
 0x9b0   : > { %v7939_v46 = vadd.f32 %v7919_v31, %v15263_v57  ;;  %v10360_v31 = vld [vmem:[%s15989_s13 + $0xc4] sm:$0xf] }
 0x9b6   : > { %v15296_v45 = vpop.f32.mrf.mxu3 }
 0x9b7   : > { %v8106_v41 = vrot.slane %v15296_v45, 1  ;;  %v8165_v21 = vrot.slane %v15296_v45, 2 }
 0x9b9   : > { %v8166_v42 = vsel %vm2565_vm2, %v8163_v6, %v8165_v21  ;;  %v8107_v36 = vsel %vm1605_vm3, %v8104_v30, %v8106_v41 }
 0x9ba   : > { %8183 = vrot.lane.b32.xlu2 %v8166_v42, %s10491_s20  ;;  %8124 = vrot.lane.b32.xlu0 %v8107_v36, %s10492_s21 }
 0x9be   : > { %v15305_v37 = vpop.f32.mrf.mxu3 }
 0x9bf   : > { %v8108_v34 = vrot.slane %v15305_v37, 1  ;;  %v8167_v29 = vrot.slane %v15305_v37, 2 }
 0x9c0   : > { %v7915_v8 = vpop.permute.xlu1 %7914  ;;  %v7974_v20 = vpop.permute.xlu0 %7973 }
 0x9c1   : > { %v7937_v39 = vadd.f32 %v7915_v8, %v15245_v60  ;;  %v8168_v33 = vsel %vm2565_vm2, %v8165_v21, %v8167_v29  ;;  %v8109_v11 = vsel %vm1605_vm3, %v8106_v41, %v8108_v34 }
 0x9c2   : > { %8185 = vrot.lane.b32.xlu0 %v8168_v33, %s10491_s20  ;;  %8126 = vrot.lane.b32.xlu1 %v8109_v11, %s10492_s21 }
 0x9c3   : > { %v7996_v38 = vadd.f32 %v7974_v20, %v7937_v39 }
 0x9c5   : > { %v8010_v56 = vadd.f32 %v15228_v26, %v7996_v38 }
 0x9c7   : > { %v8020_v2 = vmax.f32 %v8010_v56, 0.0 }
 0x9c8   : > { %v7917_v44 = vpop.permute.xlu1 %7916  ;;  %v7976_v40 = vpop.permute.xlu0 %7975 }
 0x9c9   : > { %v8026_v5 = vpack.c.bf16 %v8020_v2, %v8019_v27  ;;  %v7938_v60 = vadd.f32 %v7917_v44, %v15255_v15 }
 0x9cb   : > { %9818 = vmatmul.msk.bf16.gmra.mxu3 %vm3689_vm4, %v8026_v5  ;;  %v7997_v22 = vadd.f32 %v7976_v40, %v7938_v60  ;;  %v9872_v40 = vld [vmem:[%s15989_s13 + $0xe0] sm:$0xf0] }
 0x9cd   : > { %v8011_v14 = vadd.f32 %v15228_v26, %v7997_v22 }
 0x9cf   : > { %v8021_v62 = vmax.f32 %v8011_v14, 0.0 }
 0x9d0   : > { %v7978_v7 = vpop.permute.xlu1 %7977 }
 0x9d1   : > { %v7998_v19 = vadd.f32 %v7978_v7, %v7939_v46  ;;  %v9875_v46 = vor.u32 %v10360_v31, %v9872_v40  ;;  %v10358_v31 = vld [vmem:[%s15989_s13 + $0xac] sm:$0xf0] }
 0x9d3   : > { %v8012_v18 = vadd.f32 %v15228_v26, %v7998_v19  ;;  %8395 = vmatpush.bf16.msra.mxu3 %v9875_v46 }
 0x9d5   : > { %v8022_v10 = vmax.f32 %v8012_v18, 0.0 }
 0x9d7   : > { %v8027_v48 = vpack.c.bf16 %v8022_v10, %v8021_v62  ;;  %v10352_v62 = vld [vmem:[%s15989_s13 + $0x84] sm:$0xf] }
 0x9db   : > { %9819 = vmatmul.msk.bf16.gmra.mxu3 %vm3689_vm4, %v8027_v48  ;;  %v9840_v48 = vld [vmem:[%s15989_s13 + $0xa0] sm:$0xf0] }
 0xa00   : > { %v8123_v51 = vpop.permute.xlu2 %8122 }
 0xa01   : > { %v8152_v15 = vadd.f32 %v8123_v51, %v15274_v25  ;;  %v9843_v51 = vor.u32 %v10352_v62, %v9840_v48 }
 0xa03   : > { %8396 = vmatpush.bf16.msra.mxu3 %v9843_v51  ;;  %v9894_v51 = vld [vmem:[%s15989_s13 + $0xd8] sm:$0xf] }
 0xa14   : > { %v8184_v61 = vpop.permute.xlu2 %8183 }
 0xa17   : > { %v8182_v57 = vpop.permute.xlu1 %8181 }
 0xa18   : > { %v8211_v58 = vadd.f32 %v8182_v57, %v8152_v15 }
 0xa1a   : > { %v8225_v35 = vadd.f32 %v15326_v23, %v8211_v58 }
 0xa1c   : > { %v8235_v24 = vmax.f32 %v8225_v35, 0.0 }
 0xa1e   : > { %8245 = vst.msk [vmem:[#allocation2] sm:$0xff] %vm3689_vm4, %v8235_v24 }
 0xa28   : > { %v15330_v26 = vpop.f32.mrf.mxu3 }
 0xa29   : > { %v8110_v63 = vrot.slane %v15330_v26, 1  ;;  %v8169_v32 = vrot.slane %v15330_v26, 2 }
 0xa2b   : > { %v8170_v25 = vsel %vm2565_vm2, %v8167_v29, %v8169_v32  ;;  %v8111_v52 = vsel %vm1605_vm3, %v8108_v34, %v8110_v63 }
 0xa2c   : > { %8187 = vrot.lane.b32.xlu1 %v8170_v25, %s10491_s20  ;;  %8128 = vrot.lane.b32.xlu2 %v8111_v52, %s10492_s21  ;;  %v8125_v16 = vpop.permute.xlu0 %8124 }
 0xa2d   : > { %v8153_v54 = vadd.f32 %v8125_v16, %v15280_v59  ;;  %v9838_v59 = vld [vmem:[%s15989_s13 + $0x80] sm:$0xf] }
 0xa2e   : > { %v9839_v3 = vor.u32 %v10356_v9, %v9838_v59  ;;  %v9848_v59 = vld [vmem:[%s15989_s13 + $0xa8] sm:$0xf0] }
 0xa2f   : > { %v8212_v49 = vadd.f32 %v8184_v61, %v8153_v54 }
 0xa30   : > { %8383 = vmatpush.bf16.msra.mxu2 %v9839_v3  ;;  %v8080_v47 = vpop.f32.mrf.mxu3 }
 0xa31   : > { %v8226_v13 = vadd.f32 %v15326_v23, %v8212_v49  ;;  %v8171_v41 = vrot.slane %v8080_v47, 2  ;;  %v9878_v49 = vld [vmem:[%s15989_s13 + $0xc8] sm:$0xf] }
 0xa33   : > { %v8236_v17 = vmax.f32 %v8226_v13, 0.0  ;;  %v8172_v44 = vsel %vm2565_vm2, %v8169_v32, %v8171_v41  ;;  %v10365_v13 = vld [vmem:[%s15989_s13 + $0xe4] sm:$0xf0] }
 0xa34   : > { %v8127_v28 = vpop.permute.xlu1 %8126  ;;  %v8186_v30 = vpop.permute.xlu0 %8185 }
 0xa35   : > { %8246 = vst.msk [vmem:[#allocation2 + $0x8] sm:$0xff] %vm3689_vm4, %v8236_v17  ;;  %v8154_v55 = vadd.f32 %v8127_v28, %v15296_v45  ;;  %v8112_v45 = vrot.slane %v8080_v47, 1  ;;  %v10361_v17 = vld [vmem:[%s15989_s13 + $0xcc] sm:$0xf]  ;;  %v9879_v28 = vor.u32 %v10365_v13, %v9878_v49  ;;  %v9944_v49 = vld [vmem:[%s15989_s13 + $0x60] sm:$0xf0] }
 0xa37   : > { %v8213_v6 = vadd.f32 %v8186_v30, %v8154_v55  ;;  %v8113_v60 = vsel %vm1605_vm3, %v8110_v63, %v8112_v45  ;;  %v9880_v55 = vld [vmem:[%s15989_s13 + $0xe8] sm:$0xf0]  ;;  %v9846_v30 = vld [vmem:[%s15989_s13 + $0x88] sm:$0xf]  ;;  %8408 = vmatpush.bf16.msrb.mxu2 %v9879_v28  ;;  %v9910_v28 = vld [vmem:[%s15989_s13] sm:$0xf] }
 0xa39   : > { %v8227_v53 = vadd.f32 %v15326_v23, %v8213_v6  ;;  %v9883_v6 = vor.u32 %v10361_v17, %v9880_v55  ;;  %v10340_v55 = vld [vmem:[%s15989_s13 + $0x1c] sm:$0xf0] }
 0xa3b   : > { %v8237_v4 = vmax.f32 %v8227_v53, 0.0  ;;  %v10357_v53 = vld [vmem:[%s15989_s13 + $0xa4] sm:$0xf0]  ;;  %8421 = vmatpush.bf16.msrb.mxu3 %v9883_v6  ;;  %v9912_v6 = vld [vmem:[%s15989_s13 + $0x20] sm:$0xf0] }
 0xa3c   : > { %v9847_v3 = vor.u32 %v10357_v53, %v9846_v30  ;;  %v10336_v30 = vld [vmem:[%s15989_s13 + $0x4] sm:$0xf]  ;;  %v9911_v53 = vor.u32 %v10340_v55, %v9910_v28  ;;  %v10369_v28 = vld [vmem:[%s15989_s13 + $0x10c] sm:$0xf] }
 0xa3d   : > { %8247 = vst.msk [vmem:[#allocation2 + $0x10] sm:$0xff] %vm3689_vm4, %v8237_v4  ;;  %v10353_v4 = vld [vmem:[%s15989_s13 + $0x8c] sm:$0xf] }
 0xa3e   : > { %8409 = vmatpush.bf16.msrb.mxu2 %v9847_v3  ;;  %v10345_v3 = vld [vmem:[%s15989_s13 + $0x4c] sm:$0xf] }
 0xa3f   : > { %v10008_v55 = vld [vmem:[%s15989_s13 + $0x128] sm:$0xf0] }
 0xa4e   : > { %v15350_v50 = vpop.f32.mrf.mxu3 }
 0xa4f   : > { %v8114_v21 = vrot.slane %v15350_v50, 1  ;;  %v8173_v42 = vrot.slane %v15350_v50, 2 }
 0xa51   : > { %v8174_v36 = vsel %vm2565_vm2, %v8171_v41, %v8173_v42  ;;  %v8115_v1 = vsel %vm1605_vm3, %v8112_v45, %v8114_v21  ;;  %v9851_v45 = vor.u32 %v10353_v4, %v9848_v59  ;;  %v9915_v4 = vor.u32 %v10336_v30, %v9912_v6  ;;  %v9950_v59 = vld [vmem:[%s15989_s13 + $0x48] sm:$0xf] }
 0xa52   : > { %8191 = vrot.lane.b32.xlu2 %v8174_v36, %s10491_s20  ;;  %8132 = vrot.lane.b32.xlu0 %v8115_v1, %s10492_s21  ;;  %v10011_v6 = vor.u32 %v10369_v28, %v10008_v55  ;;  %v10384_v28 = vld [vmem:[%s15991_s15] sm:$0xff] }
 0xa53   : > { %8422 = vmatpush.bf16.msrb.mxu3 %v9851_v45  ;;  %v10392_v55 = vld [vmem:[%s15991_s15 + $0x40] sm:$0xff] }
 0xa56   : > { %v8085_v0 = vpop.f32.mrf.mxu3 }
 0xa57   : > { %v8116_v43 = vrot.slane %v8085_v0, 1  ;;  %v8175_v8 = vrot.slane %v8085_v0, 2 }
 0xa59   : > { %v8117_v34 = vsel %vm1605_vm3, %v8114_v21, %v8116_v43  ;;  %v8176_v5 = vsel %vm2565_vm2, %v8173_v42, %v8175_v8 }
 0xa5a   : > { %8134 = vrot.lane.b32.xlu1 %v8117_v34, %s10492_s21 }
 0xa5e   : > { %v15360_v29 = vpop.f32.mrf.mxu3 }
 0xa5f   : > { %v8118_v39 = vrot.slane %v15360_v29, 1  ;;  %v8177_v20 = vrot.slane %v15360_v29, 2 }
 0xa61   : > { %v8178_v33 = vsel %vm2565_vm2, %v8175_v8, %v8177_v20  ;;  %v8119_v11 = vsel %vm1605_vm3, %v8116_v43, %v8118_v39 }
 0xa62   : > { %8195 = vrot.lane.b32.xlu1 %v8178_v33, %s10491_s20  ;;  %8136 = vrot.lane.b32.xlu2 %v8119_v11, %s10492_s21  ;;  %v9886_v33 = vld [vmem:[%s15989_s13 + $0xd0] sm:$0xf] }
 0xa66   : > { %v15368_v12 = vpop.f32.mrf.mxu3 }
 0xa67   : > { %v8120_v38 = vrot.slane %v15368_v12, 1  ;;  %v8179_v56 = vrot.slane %v15368_v12, 2 }
 0xa69   : > { %v8180_v27 = vsel %vm2565_vm2, %v8177_v20, %v8179_v56  ;;  %v8121_v2 = vsel %vm1605_vm3, %v8118_v39, %v8120_v38 }
 0xa6a   : > { %8197 = vrot.lane.b32.xlu2 %v8180_v27, %s10491_s20  ;;  %8140 = vrot.lane.b32.xlu1 %v8120_v38, %s10492_s21  ;;  %v10362_v38 = vld [vmem:[%s15989_s13 + $0xd4] sm:$0xf] }
 0xa6b   : > { %8138 = vrot.lane.b32.xlu0 %v8121_v2, %s10492_s21 }
 0xa72   : > { %8189 = vrot.lane.b32.xlu2 %v8172_v44, %s10491_s20 }
 0xa73   : > { %8193 = vrot.lane.b32.xlu0 %v8176_v5, %s10491_s20 }
 0xa7b   : > { %8130 = vrot.lane.b32.xlu0 %v8113_v60, %s10492_s21  ;;  %v9854_v60 = vld [vmem:[%s15989_s13 + $0x90] sm:$0xf] }
 0xa83   : > { %8199 = vrot.lane.b32.xlu0 %v8179_v56, %s10491_s20  ;;  %v9888_v56 = vld [vmem:[%s15989_s13 + $0xf0] sm:$0xf0]  ;;  %s9619_s20 = sshll.u32 %s16231_s25, 3 }
 0xa84   : > { %v9891_v5 = vor.u32 %v10362_v38, %v9888_v56  ;;  %v10342_v56 = vld [vmem:[%s15989_s13 + $0x2c] sm:$0xf0]  ;;  %s548_s28 = scalar_lea.vmem %s15993_s17, %s9619_s20 }
 0xa86   : > { %v8129_v22 = vpop.permute.xlu2 %8128 }
 0xa87   : > { %v8155_v7 = vadd.f32 %v8129_v22, %v15305_v37 }
 0xa9e   : > { %v8188_v19 = vpop.permute.xlu1 %8187 }
 0xa9f   : > { %v8214_v14 = vadd.f32 %v8188_v19, %v8155_v7  ;;  %v10354_v7 = vld [vmem:[%s15989_s13 + $0x94] sm:$0xf] }
 0xaa0   : > { %v9856_v19 = vld [vmem:[%s15989_s13 + $0xb0] sm:$0xf0] }
 0xaa1   : > { %v8228_v18 = vadd.f32 %v15326_v23, %v8214_v14 }
 0xaa3   : > { %v8238_v10 = vmax.f32 %v8228_v18, 0.0 }
 0xaa5   : > { %8248 = vst.msk [vmem:[#allocation2 + $0x18] sm:$0xff] %vm3689_vm4, %v8238_v10  ;;  %v9859_v10 = vor.u32 %v10354_v7, %v9856_v19  ;;  %v9934_v7 = vld [vmem:[%s15989_s13 + $0x18] sm:$0xf] }
 0xaa6   : > { %v10343_v19 = vld [vmem:[%s15989_s13 + $0x34] sm:$0xf0] }
 0xaac   : > { %v8192_v37 = vpop.permute.xlu2 %8191 }
 0xabc   : > { %v8137_v32 = vpop.permute.xlu2 %8136 }
 0xabd   : > { %v8159_v25 = vadd.f32 %v8137_v32, %v8085_v0  ;;  %v9864_v32 = vld [vmem:[%s15989_s13 + $0xb8] sm:$0xf0] }
 0xac4   : > { %v8133_v15 = vpop.permute.xlu0 %8132  ;;  %v8198_v41 = vpop.permute.xlu2 %8197 }
 0xac5   : > { %v8157_v57 = vadd.f32 %v8133_v15, %v8080_v47  ;;  %v10367_v15 = vld [vmem:[%s15989_s13 + $0xf4] sm:$0xf0] }
 0xac7   : > { %v8216_v58 = vadd.f32 %v8192_v37, %v8157_v57  ;;  %v10363_v57 = vld [vmem:[%s15989_s13 + $0xdc] sm:$0xf]  ;;  %v9895_v37 = vor.u32 %v10367_v15, %v9894_v51  ;;  %v10376_v51 = vld [vmem:[%s15989_s13 + $0x144] sm:$0xf] }
 0xac8   : > { %v10032_v15 = vld [vmem:[%s15989_s13 + $0x160] sm:$0xf0] }
 0xac9   : > { %v8230_v35 = vadd.f32 %v15326_v23, %v8216_v58 }
 0xacb   : > { %v8240_v24 = vmax.f32 %v8230_v35, 0.0  ;;  %v9862_v35 = vld [vmem:[%s15989_s13 + $0x98] sm:$0xf] }
 0xacc   : > { %v8135_v63 = vpop.permute.xlu1 %8134  ;;  %v8190_v20 = vpop.permute.xlu2 %8189 }
 0xacd   : > { %8250 = vst.msk [vmem:[#allocation2 + $0x28] sm:$0xff] %vm3689_vm4, %v8240_v24  ;;  %v8158_v36 = vadd.f32 %v8135_v63, %v15350_v50  ;;  %v10366_v50 = vld [vmem:[%s15989_s13 + $0xec] sm:$0xf0]  ;;  %v10359_v24 = vld [vmem:[%s15989_s13 + $0xb4] sm:$0xf0] }
 0xace   : > { %v9887_v44 = vor.u32 %v10366_v50, %v9886_v33  ;;  %v10355_v63 = vld [vmem:[%s15989_s13 + $0x9c] sm:$0xf]  ;;  %v9926_v50 = vld [vmem:[%s15989_s13 + $0x10] sm:$0xf] }
 0xad4   : > { %v8196_v52 = vpop.permute.xlu1 %8195 }
 0xad5   : > { %v8218_v16 = vadd.f32 %v8196_v52, %v8159_v25  ;;  %v9863_v25 = vor.u32 %v10359_v24, %v9862_v35  ;;  %v9867_v52 = vor.u32 %v10355_v63, %v9864_v32  ;;  %v10368_v35 = vld [vmem:[%s15989_s13 + $0x104] sm:$0xf] }
 0xad6   : > { %v10000_v24 = vld [vmem:[%s15989_s13 + $0x120] sm:$0xf0] }
 0xad7   : > { %v8232_v54 = vadd.f32 %v15326_v23, %v8218_v16  ;;  %v9942_v16 = vld [vmem:[%s15989_s13 + $0x40] sm:$0xf]  ;;  %v10003_v32 = vor.u32 %v10368_v35, %v10000_v24 }
 0xad8   : > { %v10388_v35 = vld [vmem:[%s15991_s15 + $0x20] sm:$0xff] }
 0xad9   : > { %v8242_v61 = vmax.f32 %v8232_v54, 0.0  ;;  %v10348_v54 = vld [vmem:[%s15989_s13 + $0x5c] sm:$0xf0] }
 0xada   : > { %v9943_v13 = vor.u32 %v10348_v54, %v9942_v16  ;;  %v10377_v16 = vld [vmem:[%s15989_s13 + $0x14c] sm:$0xf]  ;;  %v10396_v24 = vld [vmem:[%s15991_s15 + $0x60] sm:$0xff] }
 0xadb   : > { %8252 = vst.msk [vmem:[#allocation2 + $0x38] sm:$0xff] %vm3689_vm4, %v8242_v61  ;;  %v10344_v61 = vld [vmem:[%s15989_s13 + $0x44] sm:$0xf]  ;;  %v10040_v54 = vld [vmem:[%s15989_s13 + $0x168] sm:$0xf0] }
 0xadc   : > { %v8141_v27 = vpop.permute.xlu1 %8140  ;;  %v9947_v17 = vor.u32 %v10344_v61, %v9944_v49  ;;  %v10043_v49 = vor.u32 %v10377_v16, %v10040_v54  ;;  %v10386_v16 = vld [vmem:[%s15991_s15 + $0x10] sm:$0xff] }
 0xadd   : > { %v8139_v9 = vpop.permute.xlu0 %8138  ;;  %v8161_v40 = vadd.f32 %v8141_v27, %v15368_v12  ;;  %v9855_v12 = vor.u32 %v10358_v31, %v9854_v60  ;;  %v10338_v27 = vld [vmem:[%s15989_s13 + $0x14] sm:$0xf]  ;;  %v10351_v60 = vld [vmem:[%s15989_s13 + $0x74] sm:$0xf0]  ;;  %v10347_v31 = vld [vmem:[%s15989_s13 + $0x5c] sm:$0xf] }
 0xade   : > { %v8160_v47 = vadd.f32 %v8139_v9, %v15360_v29  ;;  %v10349_v9 = vld [vmem:[%s15989_s13 + $0x64] sm:$0xf0]  ;;  %v10394_v54 = vld [vmem:[%s15991_s15 + $0x50] sm:$0xff] }
 0xadf   : > { %v9951_v45 = vor.u32 %v10349_v9, %v9950_v59  ;;  %v10378_v59 = vld [vmem:[%s15989_s13 + $0x154] sm:$0xf] }
 0xae0   : > { %v8219_v21 = vadd.f32 %v8198_v41, %v8160_v47  ;;  %v9952_v47 = vld [vmem:[%s15989_s13 + $0x68] sm:$0xf0]  ;;  %v10048_v9 = vld [vmem:[%s15989_s13 + $0x170] sm:$0xf0] }
 0xae1   : > { %v9955_v41 = vor.u32 %v10345_v3, %v9952_v47 }
 0xae2   : > { %v8233_v42 = vadd.f32 %v15326_v23, %v8219_v21  ;;  %v9918_v21 = vld [vmem:[%s15989_s13 + $0x8] sm:$0xf] }
 0xae4   : > { %v8243_v1 = vmax.f32 %v8233_v42, 0.0  ;;  %v10341_v42 = vld [vmem:[%s15989_s13 + $0x24] sm:$0xf0] }
 0xae5   : > { %v8194_v0 = vpop.permute.xlu0 %8193 }
 0xae6   : > { %8253 = vst.msk [vmem:[#allocation2 + $0x40] sm:$0xff] %vm3689_vm4, %v8243_v1  ;;  %v8217_v43 = vadd.f32 %v8194_v0, %v8158_v36  ;;  %v10337_v36 = vld [vmem:[%s15989_s13 + $0xc] sm:$0xf]  ;;  %v9919_v0 = vor.u32 %v10341_v42, %v9918_v21  ;;  %v10374_v42 = vld [vmem:[%s15989_s13 + $0x12c] sm:$0xf0] }
 0xae7   : > { %v9920_v1 = vld [vmem:[%s15989_s13 + $0x28] sm:$0xf0] }
 0xae8   : > { %v8231_v34 = vadd.f32 %v15326_v23, %v8217_v43  ;;  %v9923_v43 = vor.u32 %v10337_v36, %v9920_v1  ;;  %v10370_v36 = vld [vmem:[%s15989_s13 + $0x114] sm:$0xf] }
 0xae9   : > { %v10016_v1 = vld [vmem:[%s15989_s13 + $0x130] sm:$0xf0] }
 0xaea   : > { %v8241_v8 = vmax.f32 %v8231_v34, 0.0  ;;  %v9958_v34 = vld [vmem:[%s15989_s13 + $0x50] sm:$0xf] }
 0xaec   : > { %8251 = vst.msk [vmem:[#allocation2 + $0x30] sm:$0xff] %vm3689_vm4, %v8241_v8  ;;  %v10350_v8 = vld [vmem:[%s15989_s13 + $0x6c] sm:$0xf0] }
 0xaed   : > { %v8131_v29 = vpop.permute.xlu0 %8130  ;;  %v9959_v33 = vor.u32 %v10350_v8, %v9958_v34 }
 0xaee   : > { %v8156_v39 = vadd.f32 %v8131_v29, %v15330_v26  ;;  %v10346_v29 = vld [vmem:[%s15989_s13 + $0x54] sm:$0xf] }
 0xaf0   : > { %v8215_v11 = vadd.f32 %v8190_v20, %v8156_v39  ;;  %v9960_v39 = vld [vmem:[%s15989_s13 + $0x70] sm:$0xf0] }
 0xaf2   : > { %v8229_v26 = vadd.f32 %v15326_v23, %v8215_v11  ;;  %v9963_v11 = vor.u32 %v10346_v29, %v9960_v39  ;;  %v10054_v29 = vld [vmem:[%s15989_s13 + $0x158] sm:$0xf] }
 0xaf3   : > { %v8274_v2 = vld [vmem:[#allocation2 + $0x1] ss:$10 sm:$0xff]  ;;  %v8256_v20 = vld [vmem:[#allocation2] ss:$10 sm:$0xff]  ;;  %v10383_v39 = vld [vmem:[%s15989_s13 + $0x174] sm:$0xf0] }
 0xaf4   : > { %v8239_v46 = vmax.f32 %v8229_v26, 0.0  ;;  %v15454_v22 = vpack.c.bf16 %v8274_v2, %v8274_v2  ;;  %v8257_v38 = vpack.c.bf16 %v8256_v20, %v8256_v20  ;;  %v9928_v26 = vld [vmem:[%s15989_s13 + $0x30] sm:$0xf0]  ;;  %v9927_v2 = vor.u32 %v10342_v56, %v9926_v50  ;;  %v10379_v20 = vld [vmem:[%s15989_s13 + $0x15c] sm:$0xf] }
 0xaf5   : > { %v8200_v14 = vpop.permute.xlu0 %8199 }
 0xaf6   : > { %8249 = vst.msk [vmem:[#allocation2 + $0x20] sm:$0xff] %vm3689_vm4, %v8239_v46  ;;  %v8220_v18 = vadd.f32 %v8200_v14, %v8161_v40  ;;  %9900 = vmatmul.msk.bf16.vlgmr.msra.gmra.mxu2 %vm3689_vm4, %v15454_v22  ;;  %9901 = vmatmul.msk.bf16.vlgmr.msra.gmra.mxu3 %vm3689_vm4, %v15454_v22  ;;  %v9968_v40 = vld [vmem:[%s15989_s13 + $0x78] sm:$0xf0] }
 0xaf7   : > { %8434 = vmatpush.bf16.msra.mxu2 %v9887_v44  ;;  %8447 = vmatpush.bf16.msra.mxu3 %v9891_v5  ;;  %v9931_v44 = vor.u32 %v10338_v27, %v9928_v26  ;;  %v9966_v5 = vld [vmem:[%s15989_s13 + $0x58] sm:$0xf]  ;;  %v10339_v14 = vld [vmem:[%s15989_s13 + $0x1c] sm:$0xf] }
 0xaf8   : > { %v8234_v62 = vadd.f32 %v15326_v23, %v8220_v18  ;;  %v9896_v23 = vld [vmem:[%s15989_s13 + $0xf8] sm:$0xf0]  ;;  %v9967_v46 = vor.u32 %v10351_v60, %v9966_v5  ;;  %v10022_v27 = vld [vmem:[%s15989_s13 + $0x118] sm:$0xf] }
 0xaf9   : > { %v9899_v58 = vor.u32 %v10363_v57, %v9896_v23  ;;  %v9936_v18 = vld [vmem:[%s15989_s13 + $0x38] sm:$0xf0]  ;;  %v10035_v23 = vor.u32 %v10376_v51, %v10032_v15  ;;  %v10375_v26 = vld [vmem:[%s15989_s13 + $0x134] sm:$0xf0]  ;;  %v10390_v51 = vld [vmem:[%s15991_s15 + $0x30] sm:$0xff] }
 0xafa   : > { %v8244_v48 = vmax.f32 %v8234_v62, 0.0  ;;  %v10030_v62 = vld [vmem:[%s15989_s13 + $0x140] sm:$0xf]  ;;  %v10023_v5 = vor.u32 %v10375_v26, %v10022_v27  ;;  %v10398_v15 = vld [vmem:[%s15991_s15 + $0x70] sm:$0xff] }
 0xafb   : > { %8435 = vmatpush.bf16.msra.mxu2 %v9855_v12  ;;  %8448 = vmatpush.bf16.msra.mxu3 %v9859_v10  ;;  %v9935_v12 = vor.u32 %v10343_v19, %v9934_v7  ;;  %v9939_v10 = vor.u32 %v10339_v14, %v9936_v18 }
 0xafc   : > { %8255 = vst.msk [vmem:[#allocation2 + $0x48] sm:$0xf] %vm8254_vm6, %v8244_v48  ;;  %v10380_v48 = vld [vmem:[%s15989_s13 + $0x15c] sm:$0xf0] }
 0xafd   : > { %v10031_v57 = vor.u32 %v10380_v48, %v10030_v62 }
 0xb03   : > { %v8667_v3 = vld [vmem:[#allocation2 + $0x2] ss:$10 sm:$0xff] }
 0xb04   : > { %v8668_v21 = vpack.c.bf16 %v8667_v3, %v8667_v3  ;;  %v10405_v3 = vld [vmem:[%s15991_s15 + $0xa8] sm:$0xff] }
 0xb06   : > { %9902 = vmatmul.msk.bf16.vlgmr.msrb.gmra.mxu2 %vm3689_vm4, %v15454_v22  ;;  %9903 = vmatmul.msk.bf16.vlgmr.msrb.gmra.mxu3 %vm3689_vm4, %v15454_v22 }
 0xb07   : > { %8460 = vmatpush.bf16.msrb.mxu2 %v9895_v37  ;;  %8473 = vmatpush.bf16.msrb.mxu3 %v9899_v58  ;;  %v9998_v37 = vld [vmem:[%s15989_s13 + $0x100] sm:$0xf] }
 0xb08   : > { %v10372_v58 = vld [vmem:[%s15989_s13 + $0x11c] sm:$0xf0] }
 0xb09   : > { %v9999_v63 = vor.u32 %v10372_v58, %v9998_v37 }
 0xb0b   : > { %8461 = vmatpush.bf16.msrb.mxu2 %v9863_v25  ;;  %8474 = vmatpush.bf16.msrb.mxu3 %v9867_v52  ;;  %v10038_v25 = vld [vmem:[%s15989_s13 + $0x148] sm:$0xf] }
 0xb0c   : > { %v10381_v52 = vld [vmem:[%s15989_s13 + $0x164] sm:$0xf0] }
 0xb0d   : > { %v10039_v61 = vor.u32 %v10381_v52, %v10038_v25 }
 0xb16   : > { %9904 = vmatmul.msk.bf16.vlgmr.msra.gmra.mxu2 %vm3689_vm4, %v15454_v22  ;;  %9905 = vmatmul.msk.bf16.vlgmr.msra.gmra.mxu3 %vm3689_vm4, %v15454_v22 }
 0xb17   : > { %8569 = vmatpush.bf16.msra.mxu2 %v9943_v13  ;;  %8582 = vmatpush.bf16.msra.mxu3 %v9947_v17  ;;  %v10006_v13 = vld [vmem:[%s15989_s13 + $0x108] sm:$0xf] }
 0xb18   : > { %v10373_v17 = vld [vmem:[%s15989_s13 + $0x124] sm:$0xf0] }
 0xb19   : > { %v10007_v30 = vor.u32 %v10373_v17, %v10006_v13 }
 0xb1b   : > { %8570 = vmatpush.bf16.msra.mxu2 %v9911_v53  ;;  %8583 = vmatpush.bf16.msra.mxu3 %v9915_v4  ;;  %v10046_v53 = vld [vmem:[%s15989_s13 + $0x150] sm:$0xf] }
 0xb1c   : > { %v10382_v4 = vld [vmem:[%s15989_s13 + $0x16c] sm:$0xf0] }
 0xb1d   : > { %v10047_v47 = vor.u32 %v10382_v4, %v10046_v53  ;;  %v10406_v53 = vld [vmem:[%s15991_s15 + $0xb0] sm:$0xff] }
 0xb1e   : > { %v10414_v4 = vld [vmem:[%s15991_s15 + $0xf0] sm:$0xff] }
 0xb26   : > { %9906 = vmatmul.msk.bf16.vlgmr.msrb.gmra.mxu2 %vm3689_vm4, %v15454_v22  ;;  %9907 = vmatmul.msk.bf16.vlgmr.msrb.gmra.mxu3 %vm3689_vm4, %v15454_v22  ;;  %v9971_v22 = vor.u32 %v10347_v31, %v9968_v40 }
 0xb27   : > { %8595 = vmatpush.bf16.msrb.mxu2 %v9951_v45  ;;  %8608 = vmatpush.bf16.msrb.mxu3 %v9955_v41  ;;  %v10051_v45 = vor.u32 %v10378_v59, %v10048_v9  ;;  %v10014_v41 = vld [vmem:[%s15989_s13 + $0x110] sm:$0xf] }
 0xb2b   : > { %8596 = vmatpush.bf16.msrb.mxu2 %v9919_v0  ;;  %8609 = vmatpush.bf16.msrb.mxu3 %v9923_v43  ;;  %v10015_v0 = vor.u32 %v10374_v42, %v10014_v41  ;;  %v10019_v43 = vor.u32 %v10370_v36, %v10016_v1  ;;  %v10412_v41 = vld [vmem:[%s15991_s15 + $0xe0] sm:$0xff]  ;;  %v10403_v36 = vld [vmem:[%s15991_s15 + $0x98] sm:$0xff] }
 0xb2c   : > { %v10411_v1 = vld [vmem:[%s15991_s15 + $0xd8] sm:$0xff] }
 0xb36   : > { %9972 = vmatmul.msk.bf16.vlgmr.msra.gmra.mxu2 %vm3689_vm4, %v8257_v38  ;;  %9973 = vmatmul.msk.bf16.vlgmr.msra.gmra.mxu3 %vm3689_vm4, %v8257_v38 }
 0xb37   : > { %8621 = vmatpush.bf16.msra.mxu2 %v9959_v33  ;;  %8634 = vmatpush.bf16.msra.mxu3 %v9963_v11  ;;  %v10056_v33 = vld [vmem:[%s15989_s13 + $0x178] sm:$0xf0] }
 0xb38   : > { %v10059_v56 = vor.u32 %v10379_v20, %v10056_v33  ;;  %v10401_v20 = vld [vmem:[%s15991_s15 + $0x88] sm:$0xff] }
 0xb39   : > { %v10409_v33 = vld [vmem:[%s15991_s15 + $0xc8] sm:$0xff] }
 0xb3b   : > { %8622 = vmatpush.bf16.msra.mxu2 %v9927_v2  ;;  %8635 = vmatpush.bf16.msra.mxu3 %v9931_v44  ;;  %v10371_v2 = vld [vmem:[%s15989_s13 + $0x11c] sm:$0xf] }
 0xb3c   : > { %v10024_v44 = vld [vmem:[%s15989_s13 + $0x138] sm:$0xf0] }
 0xb3d   : > { %v10027_v60 = vor.u32 %v10371_v2, %v10024_v44 }
 0xb46   : > { %9974 = vmatmul.msk.bf16.vlgmr.msrb.gmra.mxu2 %vm3689_vm4, %v8257_v38  ;;  %9975 = vmatmul.msk.bf16.vlgmr.msrb.gmra.mxu3 %vm3689_vm4, %v8257_v38 }
 0xb47   : > { %8647 = vmatpush.bf16.msrb.mxu2 %v9967_v46  ;;  %8660 = vmatpush.bf16.msrb.mxu3 %v9971_v22 }
 0xb4b   : > { %8648 = vmatpush.bf16.msrb.mxu2 %v9935_v12  ;;  %8661 = vmatpush.bf16.msrb.mxu3 %v9939_v10  ;;  %v10391_v12 = vld [vmem:[%s15991_s15 + $0x38] sm:$0xff] }
 0xb4c   : > { %v10399_v10 = vld [vmem:[%s15991_s15 + $0x78] sm:$0xff] }
 0xb56   : > { %9976 = vmatmul.msk.bf16.vlgmr.msra.gmra.mxu2 %vm3689_vm4, %v8257_v38  ;;  %9977 = vmatmul.msk.bf16.vlgmr.msra.gmra.mxu3 %vm3689_vm4, %v8257_v38 }
 0xb57   : > { %8775 = vmatpush.bf16.msra.mxu2 %v10031_v57  ;;  %8788 = vmatpush.bf16.msra.mxu3 %v10035_v23  ;;  %v10389_v57 = vld [vmem:[%s15991_s15 + $0x28] sm:$0xff] }
 0xb58   : > { %v10397_v23 = vld [vmem:[%s15991_s15 + $0x68] sm:$0xff] }
 0xb5b   : > { %8776 = vmatpush.bf16.msra.mxu2 %v9999_v63  ;;  %8789 = vmatpush.bf16.msra.mxu3 %v10003_v32  ;;  %v10387_v63 = vld [vmem:[%s15991_s15 + $0x18] sm:$0xff] }
 0xb5c   : > { %v10395_v32 = vld [vmem:[%s15991_s15 + $0x58] sm:$0xff] }
 0xb66   : > { %9978 = vmatmul.msk.bf16.vlgmr.msrb.gmra.mxu2 %vm3689_vm4, %v8257_v38  ;;  %9979 = vmatmul.msk.bf16.vlgmr.msrb.gmra.mxu3 %vm3689_vm4, %v8257_v38  ;;  %v10055_v38 = vor.u32 %v10383_v39, %v10054_v29 }
 0xb67   : > { %8801 = vmatpush.bf16.msrb.mxu2 %v10039_v61  ;;  %8814 = vmatpush.bf16.msrb.mxu3 %v10043_v49  ;;  %v10385_v61 = vld [vmem:[%s15991_s15 + $0x8] sm:$0xff] }
 0xb68   : > { %v10393_v49 = vld [vmem:[%s15991_s15 + $0x48] sm:$0xff] }
 0xb6b   : > { %8802 = vmatpush.bf16.msrb.mxu2 %v10007_v30  ;;  %8815 = vmatpush.bf16.msrb.mxu3 %v10011_v6  ;;  %v10407_v30 = vld [vmem:[%s15991_s15 + $0xb8] sm:$0xff] }
 0xb6c   : > { %v10415_v6 = vld [vmem:[%s15991_s15 + $0xf8] sm:$0xff] }
 0xb76   : > { %10060 = vmatmul.msk.bf16.vlgmr.msra.gmra.mxu2 %vm3689_vm4, %v8668_v21  ;;  %10061 = vmatmul.msk.bf16.vlgmr.msra.gmra.mxu3 %vm3689_vm4, %v8668_v21 }
 0xb77   : > { %8827 = vmatpush.bf16.msra.mxu2 %v10047_v47  ;;  %8840 = vmatpush.bf16.msra.mxu3 %v10051_v45  ;;  %v10413_v47 = vld [vmem:[%s15991_s15 + $0xe8] sm:$0xff]  ;;  %v10404_v45 = vld [vmem:[%s15991_s15 + $0xa0] sm:$0xff] }
 0xb79   : > { %v15682_v34 = vpop.f32.mrf.mxu2  ;;  %v15684_v8 = vpop.f32.mrf.mxu3 }
 0xb7b   : > { %8828 = vmatpush.bf16.msra.mxu2 %v10015_v0  ;;  %8841 = vmatpush.bf16.msra.mxu3 %v10019_v43  ;;  %v10402_v0 = vld [vmem:[%s15991_s15 + $0x90] sm:$0xff] }
 0xb7c   : > { %v10410_v43 = vld [vmem:[%s15991_s15 + $0xd0] sm:$0xff] }
 0xb81   : > { %v8387_v11 = vpop.f32.mrf.mxu2  ;;  %v8400_v50 = vpop.f32.mrf.mxu3 }
 0xb82   : > { %v10400_v11 = vld [vmem:[%s15991_s15 + $0x80] sm:$0xff] }
 0xb83   : > { %v10408_v50 = vld [vmem:[%s15991_s15 + $0xc0] sm:$0xff] }
 0xb86   : > { %10062 = vmatmul.msk.bf16.vlgmr.msrb.gmra.mxu2 %vm3689_vm4, %v8668_v21  ;;  %10063 = vmatmul.msk.bf16.vlgmr.msrb.gmra.mxu3 %vm3689_vm4, %v8668_v21 }
 0xb87   : > { %8853 = vmatpush.bf16.msrb.mxu2 %v10055_v38  ;;  %8866 = vmatpush.bf16.msrb.mxu3 %v10059_v56 }
 0xb89   : > { %v15712_v31 = vpop.f32.mrf.mxu2  ;;  %v15714_v40 = vpop.f32.mrf.mxu3 }
 0xb8b   : > { %8854 = vmatpush.bf16.msrb.mxu2 %v10023_v5  ;;  %8867 = vmatpush.bf16.msrb.mxu3 %v10027_v60 }
 0xb91   : > { %v8413_v46 = vpop.f32.mrf.mxu2  ;;  %v8426_v22 = vpop.f32.mrf.mxu3 }
 0xb92   : > { %v15845_v46 = vld [vmem:[%s15990_s14] sm:$0xff] }
 0xb96   : > { %10064 = vmatmul.msk.bf16.vlgmr.msra.gmra.mxu2 %vm3689_vm4, %v8668_v21  ;;  %10065 = vmatmul.msk.bf16.vlgmr.msra.gmra.mxu3 %vm3689_vm4, %v8668_v21 }
 0xb97   : > { %9439 = vmatpush.bf16.msra.mxu2 %v10391_v12  ;;  %9452 = vmatpush.bf16.msra.mxu3 %v10399_v10  ;;  %v8884_v12 = vperm.slane %v15845_v46, 1 }
 0xb99   : > { %v15718_v7 = vpop.f32.mrf.mxu2  ;;  %v15720_v19 = vpop.f32.mrf.mxu3 }
 0xb9b   : > { %9440 = vmatpush.bf16.msra.mxu2 %v10390_v51  ;;  %9453 = vmatpush.bf16.msra.mxu3 %v10398_v15 }
 0xb9f   : > { %9441 = vmatpush.bf16.msra.mxu2 %v10389_v57  ;;  %9454 = vmatpush.bf16.msra.mxu3 %v10397_v23 }
 0xba1   : > { %v8439_v14 = vpop.f32.mrf.mxu2  ;;  %v8452_v18 = vpop.f32.mrf.mxu3 }
 0xba2   : > { %v8883_v18 = vperm.slane %v15845_v46, 0 }
 0xba3   : > { %9442 = vmatpush.bf16.msra.mxu2 %v10388_v35  ;;  %9455 = vmatpush.bf16.msra.mxu3 %v10396_v24 }
 0xba6   : > { %10066 = vmatmul.msk.bf16.vlgmr.msrb.gmra.mxu2 %vm3689_vm4, %v8668_v21  ;;  %10067 = vmatmul.msk.bf16.vlgmr.msrb.gmra.mxu3 %vm3689_vm4, %v8668_v21 }
 0xba7   : > { %9443 = vmatpush.bf16.msra.mxu2 %v10387_v63  ;;  %9456 = vmatpush.bf16.msra.mxu3 %v10395_v32  ;;  %v10422_v32 = vld [vmem:[%s15991_s15 + $0x130] sm:$0xff] }
 0xba9   : > { %v15730_v62 = vpop.f32.mrf.mxu2  ;;  %v15732_v48 = vpop.f32.mrf.mxu3 }
 0xbab   : > { %9444 = vmatpush.bf16.msra.mxu2 %v10386_v16  ;;  %9457 = vmatpush.bf16.msra.mxu3 %v10394_v54  ;;  %v10429_v16 = vld [vmem:[%s15991_s15 + $0x168] sm:$0xff] }
 0xbaf   : > { %9445 = vmatpush.bf16.msra.mxu2 %v10385_v61  ;;  %9458 = vmatpush.bf16.msra.mxu3 %v10393_v49  ;;  %v8885_v49 = vperm.slane %v15845_v46, 2 }
 0xbb1   : > { %v8465_v37 = vpop.f32.mrf.mxu2  ;;  %v8478_v58 = vpop.f32.mrf.mxu3 }
 0xbb2   : > { %v10423_v58 = vld [vmem:[%s15991_s15 + $0x138] sm:$0xff] }
 0xbb3   : > { %9446 = vmatpush.bf16.msra.mxu2 %v10384_v28  ;;  %9459 = vmatpush.bf16.msra.mxu3 %v10392_v55 }
 0xbb7   : > { %9465 = vmatpush.bf16.msrb.mxu2 %v10407_v30  ;;  %9478 = vmatpush.bf16.msrb.mxu3 %v10415_v6  ;;  %v10420_v6 = vld [vmem:[%s15991_s15 + $0x120] sm:$0xff] }
 0xbb9   : > { %v15758_v25 = vpop.f32.mrf.mxu2  ;;  %v15760_v52 = vpop.f32.mrf.mxu3 }
 0xbba   : > { %v8573_v22 = vadd.f32 %v15758_v25, %v15682_v34  ;;  %v8586_v14 = vadd.f32 %v15760_v52, %v15684_v8  ;;  %v10431_v34 = vld [vmem:[%s15991_s15 + $0x178] sm:$0xff]  ;;  %v10430_v25 = vld [vmem:[%s15991_s15 + $0x170] sm:$0xff]  ;;  %v10421_v52 = vld [vmem:[%s15991_s15 + $0x128] sm:$0xff] }
 0xbbb   : > { %9466 = vmatpush.bf16.msrb.mxu2 %v10406_v53  ;;  %9479 = vmatpush.bf16.msrb.mxu3 %v10414_v4 }
 0xbbf   : > { %9467 = vmatpush.bf16.msrb.mxu2 %v10405_v3  ;;  %9480 = vmatpush.bf16.msrb.mxu3 %v10413_v47  ;;  %v10427_v3 = vld [vmem:[%s15991_s15 + $0x158] sm:$0xff] }
 0xbc1   : > { %v8574_v13 = vpop.f32.mrf.mxu2  ;;  %v8587_v17 = vpop.f32.mrf.mxu3 }
 0xbc2   : > { %v8886_v13 = vperm.slane %v15845_v46, 3 }
 0xbc3   : > { %9468 = vmatpush.bf16.msrb.mxu2 %v10404_v45  ;;  %9481 = vmatpush.bf16.msrb.mxu3 %v10412_v41 }
 0xbc7   : > { %9469 = vmatpush.bf16.msrb.mxu2 %v10403_v36  ;;  %9482 = vmatpush.bf16.msrb.mxu3 %v10411_v1  ;;  %v10426_v36 = vld [vmem:[%s15991_s15 + $0x150] sm:$0xff]  ;;  %v10417_v1 = vld [vmem:[%s15991_s15 + $0x108] sm:$0xff] }
 0xbc9   : > { %v15792_v59 = vpop.f32.mrf.mxu2  ;;  %v15794_v9 = vpop.f32.mrf.mxu3 }
 0xbca   : > { %v8599_v54 = vadd.f32 %v15792_v59, %v15712_v31  ;;  %v8612_v61 = vadd.f32 %v15794_v9, %v15714_v40  ;;  %v10428_v31 = vld [vmem:[%s15991_s15 + $0x160] sm:$0xff]  ;;  %v10419_v9 = vld [vmem:[%s15991_s15 + $0x118] sm:$0xff] }
 0xbcb   : > { %9470 = vmatpush.bf16.msrb.mxu2 %v10402_v0  ;;  %9483 = vmatpush.bf16.msrb.mxu3 %v10410_v43  ;;  %v10425_v0 = vld [vmem:[%s15991_s15 + $0x148] sm:$0xff] }
 0xbcf   : > { %9471 = vmatpush.bf16.msrb.mxu2 %v10401_v20  ;;  %9484 = vmatpush.bf16.msrb.mxu3 %v10409_v33  ;;  %v8887_v33 = vperm.slane %v15845_v46, 4 }
 0xbd1   : > { %v8600_v21 = vpop.f32.mrf.mxu2  ;;  %v8613_v42 = vpop.f32.mrf.mxu3 }
 0xbd2   : > { %v10418_v42 = vld [vmem:[%s15991_s15 + $0x110] sm:$0xff] }
 0xbd3   : > { %9472 = vmatpush.bf16.msrb.mxu2 %v10400_v11  ;;  %9485 = vmatpush.bf16.msrb.mxu3 %v10408_v50  ;;  %v8888_v11 = vperm.slane %v15845_v46, 5 }
 0xbd9   : > { %v15820_v29 = vpop.f32.mrf.mxu2  ;;  %v15822_v39 = vpop.f32.mrf.mxu3 }
 0xbda   : > { %v8625_v43 = vadd.f32 %v15820_v29, %v15718_v7  ;;  %v8638_v20 = vadd.f32 %v15822_v39, %v15720_v19  ;;  %v10424_v7 = vld [vmem:[%s15991_s15 + $0x140] sm:$0xff]  ;;  %v10439_v39 = vld [vmem:[%s15991_s15 + $0x1b8] sm:$0xff] }
 0xbe1   : > { %v8626_v38 = vpop.f32.mrf.mxu2  ;;  %v8639_v56 = vpop.f32.mrf.mxu3 }
 0xbe9   : > { %v8650_v27 = vpop.f32.mrf.mxu2  ;;  %v8663_v26 = vpop.f32.mrf.mxu3 }
 0xbea   : > { %v15837_v2 = vadd.f32 %v8650_v27, %v15730_v62  ;;  %v15840_v44 = vadd.f32 %v8663_v26, %v15732_v48  ;;  %v10416_v26 = vld [vmem:[%s15991_s15 + $0x100] sm:$0xff] }
 0xbf1   : > { %v8652_v5 = vpop.f32.mrf.mxu2  ;;  %v8665_v60 = vpop.f32.mrf.mxu3 }
 0xbf2   : > { %v10447_v5 = vld [vmem:[%s15991_s15 + $0x1f8] sm:$0xff] }
 0xbf9   : > { %v8778_v10 = vpop.f32.mrf.mxu2  ;;  %v8791_v62 = vpop.f32.mrf.mxu3 }
 0xbfa   : > { %v8873_v48 = vadd.f32 %v8778_v10, %v8573_v22  ;;  %v8874_v51 = vadd.f32 %v8791_v62, %v8586_v14  ;;  %v10446_v10 = vld [vmem:[%s15991_s15 + $0x1f0] sm:$0xff] }
 0xbfc   : > { %v8899_v15 = vadd.f32 %v8883_v18, %v8873_v48  ;;  %v8900_v57 = vadd.f32 %v8884_v12, %v8874_v51  ;;  %v10438_v12 = vld [vmem:[%s15991_s15 + $0x1b0] sm:$0xff]  ;;  %v10437_v51 = vld [vmem:[%s15991_s15 + $0x1a8] sm:$0xff] }
 0xbfe   : > { %v8907_v23 = vmax.f32 %v8899_v15, 0.0  ;;  %v8908_v37 = vmax.f32 %v8900_v57, 0.0  ;;  %v10445_v15 = vld [vmem:[%s15991_s15 + $0x1e8] sm:$0xff]  ;;  %v10436_v57 = vld [vmem:[%s15991_s15 + $0x1a0] sm:$0xff] }
 0xc00   : > { %v8915_v8 = vpack.c.bf16 %v8907_v23, %v8907_v23  ;;  %v8916_v35 = vpack.c.bf16 %v8908_v37, %v8908_v37  ;;  %v10444_v23 = vld [vmem:[%s15991_s15 + $0x1e0] sm:$0xff] }
 0xc01   : > { %v8780_v24 = vpop.f32.mrf.mxu2  ;;  %v8793_v63 = vpop.f32.mrf.mxu3 }
 0xc02   : > { %9447 = vmatmul.bf16.vlgmr.msra.gmra.mxu2 %v8915_v8  ;;  %9460 = vmatmul.bf16.vlgmr.msra.gmra.mxu3 %v8916_v35  ;;  %v10443_v8 = vld [vmem:[%s15991_s15 + $0x1d8] sm:$0xff]  ;;  %v10434_v35 = vld [vmem:[%s15991_s15 + $0x190] sm:$0xff] }
 0xc03   : > { %9491 = vmatpush.bf16.msra.mxu2 %v10423_v58  ;;  %9504 = vmatpush.bf16.msra.mxu3 %v10431_v34  ;;  %v10435_v34 = vld [vmem:[%s15991_s15 + $0x198] sm:$0xff]  ;;  %v10442_v24 = vld [vmem:[%s15991_s15 + $0x1d0] sm:$0xff] }
 0xc07   : > { %9492 = vmatpush.bf16.msra.mxu2 %v10422_v32  ;;  %9505 = vmatpush.bf16.msra.mxu3 %v10430_v25  ;;  %v8889_v32 = vperm.slane %v15845_v46, 6 }
 0xc09   : > { %v8804_v17 = vpop.f32.mrf.mxu2  ;;  %v8817_v28 = vpop.f32.mrf.mxu3 }
 0xc0a   : > { %v8875_v55 = vadd.f32 %v8804_v17, %v8599_v54  ;;  %v8876_v30 = vadd.f32 %v8817_v28, %v8612_v61  ;;  %v10433_v61 = vld [vmem:[%s15991_s15 + $0x188] sm:$0xff] }
 0xc0b   : > { %9493 = vmatpush.bf16.msra.mxu2 %v10421_v52  ;;  %9506 = vmatpush.bf16.msra.mxu3 %v10429_v16  ;;  %v8890_v52 = vperm.slane %v15845_v46, 7  ;;  %v10440_v46 = vld [vmem:[%s15991_s15 + $0x1c0] sm:$0xff] }
 0xc0c   : > { %v8901_v53 = vadd.f32 %v8885_v49, %v8875_v55  ;;  %v8902_v40 = vadd.f32 %v8886_v13, %v8876_v30  ;;  %v10441_v49 = vld [vmem:[%s15991_s15 + $0x1c8] sm:$0xff] }
 0xc0e   : > { %v8909_v4 = vmax.f32 %v8901_v53, 0.0  ;;  %v8910_v59 = vmax.f32 %v8902_v40, 0.0 }
 0xc0f   : > { %9494 = vmatpush.bf16.msra.mxu2 %v10420_v6  ;;  %9507 = vmatpush.bf16.msra.mxu3 %v10428_v31 }
 0xc10   : > { %v8917_v47 = vpack.c.bf16 %v8909_v4, %v8909_v4  ;;  %v8918_v45 = vpack.c.bf16 %v8910_v59, %v8910_v59 }
 0xc11   : > { %v8806_v41 = vpop.f32.mrf.mxu2  ;;  %v8819_v21 = vpop.f32.mrf.mxu3 }
 0xc12   : > { %9473 = vmatmul.bf16.vlgmr.msrb.gmra.mxu2 %v8917_v47  ;;  %9486 = vmatmul.bf16.vlgmr.msrb.gmra.mxu3 %v8918_v45  ;;  %v10493_v41 = vmov 0   ;;  %v10470_v21 = vld [vmem:[%s15992_s16] ss:$0 sm:$0xff] }
 0xc13   : > { %9495 = vmatpush.bf16.msra.mxu2 %v10419_v9  ;;  %9508 = vmatpush.bf16.msra.mxu3 %v10427_v3 }
 0xc14   : > { %10462 = vset.pattern.permute.xlu2 %v10493_v41  ;;  %10463 = vset.pattern.permute.xlu0 %v10493_v41 }
 0xc17   : > { %9496 = vmatpush.bf16.msra.mxu2 %v10418_v42  ;;  %9509 = vmatpush.bf16.msra.mxu3 %v10426_v36 }
 0xc19   : > { %v8830_v50 = vpop.f32.mrf.mxu2  ;;  %v8843_v38 = vpop.f32.mrf.mxu3 }
 0xc1a   : > { %v8877_v56 = vadd.f32 %v8830_v50, %v8625_v43  ;;  %v8878_v27 = vadd.f32 %v8843_v38, %v8638_v20  ;;  %v9543_v20 = vlaneseq }
 0xc1b   : > { %9497 = vmatpush.bf16.msra.mxu2 %v10417_v1  ;;  %9510 = vmatpush.bf16.msra.mxu3 %v10425_v0 }
 0xc1c   : > { %v8903_v29 = vadd.f32 %v8887_v33, %v8877_v56  ;;  %v8904_v19 = vadd.f32 %v8888_v11, %v8878_v27  ;;  %v9544_v50 = vand.u32 127, %v9543_v20 }
 0xc1e   : > { %v8911_v60 = vmax.f32 %v8903_v29, 0.0  ;;  %v8912_v22 = vmax.f32 %v8904_v19, 0.0  ;;  %vm9545_vm7 = vcmp.ge.s32.totalorder %v9544_v50, 1  ;;  %vm9546_vm8 = vcmp.lt.s32.totalorder %v9544_v50, 4 }
 0xc1f   : > { %9498 = vmatpush.bf16.msra.mxu2 %v10416_v26  ;;  %9511 = vmatpush.bf16.msra.mxu3 %v10424_v7  ;;  %vm9547_vm9 = vmand %vm9545_vm7, %vm9546_vm8 }
 0xc20   : > { %v8919_v14 = vpack.c.bf16 %v8911_v60, %v8911_v60  ;;  %v8920_v18 = vpack.c.bf16 %v8912_v22, %v8912_v22 }
 0xc21   : > { %v8832_v62 = vpop.f32.mrf.mxu2  ;;  %v8845_v48 = vpop.f32.mrf.mxu3 }
 0xc22   : > { %9499 = vmatmul.bf16.vlgmr.msra.gmra.mxu2 %v8919_v14  ;;  %9512 = vmatmul.bf16.vlgmr.msra.gmra.mxu3 %v8920_v18 }
 0xc23   : > { %9517 = vmatpush.bf16.msrb.mxu2 %v10439_v39  ;;  %9530 = vmatpush.bf16.msrb.mxu3 %v10447_v5 }
 0xc27   : > { %9518 = vmatpush.bf16.msrb.mxu2 %v10438_v12  ;;  %9531 = vmatpush.bf16.msrb.mxu3 %v10446_v10 }
 0xc29   : > { %v8856_v37 = vpop.f32.mrf.mxu2  ;;  %v8869_v58 = vpop.f32.mrf.mxu3 }
 0xc2a   : > { %v8879_v63 = vadd.f32 %v8856_v37, %v15837_v2  ;;  %v8880_v25 = vadd.f32 %v8869_v58, %v15840_v44  ;;  %v10432_v44 = vld [vmem:[%s15991_s15 + $0x180] sm:$0xff] }
 0xc2b   : > { %9519 = vmatpush.bf16.msrb.mxu2 %v10437_v51  ;;  %9532 = vmatpush.bf16.msrb.mxu3 %v10445_v15 }
 0xc2c   : > { %v8905_v13 = vadd.f32 %v8889_v32, %v8879_v63  ;;  %v8906_v2 = vadd.f32 %v8890_v52, %v8880_v25 }
 0xc2e   : > { %v8913_v17 = vmax.f32 %v8905_v13, 0.0  ;;  %v8914_v28 = vmax.f32 %v8906_v2, 0.0 }
 0xc2f   : > { %9520 = vmatpush.bf16.msrb.mxu2 %v10436_v57  ;;  %9533 = vmatpush.bf16.msrb.mxu3 %v10444_v23 }
 0xc30   : > { %v8921_v55 = vpack.c.bf16 %v8913_v17, %v8913_v17  ;;  %v8922_v30 = vpack.c.bf16 %v8914_v28, %v8914_v28 }
 0xc31   : > { %v8858_v16 = vpop.f32.mrf.mxu2  ;;  %v8871_v54 = vpop.f32.mrf.mxu3 }
 0xc33   : > { %9521 = vmatpush.bf16.msrb.mxu2 %v10435_v34  ;;  %9534 = vmatpush.bf16.msrb.mxu3 %v10443_v8 }
 0xc37   : > { %9522 = vmatpush.bf16.msrb.mxu2 %v10434_v35  ;;  %9535 = vmatpush.bf16.msrb.mxu3 %v10442_v24 }
 0xc3b   : > { %9523 = vmatpush.bf16.msrb.mxu2 %v10433_v61  ;;  %9536 = vmatpush.bf16.msrb.mxu3 %v10441_v49 }
 0xc3f   : > { %9524 = vmatpush.bf16.msrb.mxu2 %v10432_v44  ;;  %9537 = vmatpush.bf16.msrb.mxu3 %v10440_v46 }
 0xc42   : > { %9525 = vmatmul.bf16.vlgmr.msrb.gmra.mxu2 %v8921_v55  ;;  %9538 = vmatmul.bf16.vlgmr.msrb.gmra.mxu3 %v8922_v30 }
 0xc85   : > { %v9448_v6 = vpop.f32.mrf.mxu2  ;;  %v9461_v31 = vpop.f32.mrf.mxu3 }
 0xc86   : > { %v9449_v1 = vadd.f32 %v10470_v21, %v9448_v6 }
 0xc88   : > { %v9462_v0 = vadd.f32 %v9461_v31, %v9449_v1 }
 0xc8d   : > { %v9450_v53 = vpop.f32.mrf.mxu2  ;;  %v9463_v40 = vpop.f32.mrf.mxu3 }
 0xc95   : > { %v9474_v4 = vpop.f32.mrf.mxu2  ;;  %v9487_v59 = vpop.f32.mrf.mxu3 }
 0xc96   : > { %v9475_v43 = vadd.f32 %v9474_v4, %v9462_v0 }
 0xc98   : > { %v9488_v33 = vadd.f32 %v9487_v59, %v9475_v43 }
 0xc9d   : > { %v9476_v9 = vpop.f32.mrf.mxu2  ;;  %v9489_v3 = vpop.f32.mrf.mxu3 }
 0xca5   : > { %v9500_v47 = vpop.f32.mrf.mxu2  ;;  %v9513_v45 = vpop.f32.mrf.mxu3 }
 0xca6   : > { %v9501_v11 = vadd.f32 %v9500_v47, %v9488_v33 }
 0xca8   : > { %v9514_v38 = vadd.f32 %v9513_v45, %v9501_v11 }
 0xcad   : > { %v9502_v42 = vpop.f32.mrf.mxu2  ;;  %v9515_v36 = vpop.f32.mrf.mxu3 }
 0xcc5   : > { %v9526_v56 = vpop.f32.mrf.mxu2  ;;  %v9539_v27 = vpop.f32.mrf.mxu3 }
 0xcc6   : > { %v9527_v26 = vadd.f32 %v9526_v56, %v9514_v38 }
 0xcc8   : > { %v9540_v7 = vadd.f32 %v9539_v27, %v9527_v26 }
 0xcca   : > { %9554 = vperm.xlu2 %10462, %v9540_v7   ;;  %v9548_v29 = vsel %vm9547_vm9, %v9540_v7, 0.0 }
 0xccb   : > { %9549 = vadd.xlane.f32.xlu1 %v9548_v29 }
 0xccd   : > { %v9528_v19 = vpop.f32.mrf.mxu2  ;;  %v9541_v39 = vpop.f32.mrf.mxu3 }
 0xd24   : > { %v9555_v5 = vpop.permute.xlu2 %9554 }
 0xd25   : > { %v9557_v22 = vadd.f32 %v9555_v5, %v9540_v7 }
 0xd3e   : > { %v9550_v60 = vpop.xlane.xlu1 %9549 }
 0xd3f   : > { %v9551_v14 = vmul.f32 0.33333334, %v9550_v60 }
 0xd41   : > { %v9558_v18 = vsub.f32 %v9557_v22, %v9551_v14 }
 0xd43   : > { %9559 = vst [vmem:[%s548_s28] sm:$0xff] %v9558_v18 }
 0xd44 PF: > { %s27_s24 = sadd.s32 1, %s10489_s24  }
 0xd45   : > { %p24_p5 = scmp.ge.s32.totalorder %s27_s24, 4  }
 0xd47   :  { %26 = sbr.rel (!%p24_p5) target bundleno = 3 (0x3), region = 359 }

</bundles_post_ra>
